<compile_context>
chip_gen: v6e
topology: v6e:2x2x1
jax: 0.10.0
libtpu: 0.0.40
codegen_flags: <defaults>
</compile_context>

<pallas_src>
import functools

import jax
import jax.numpy as jnp
from jax.experimental import pallas as pl
from jax.experimental.pallas import tpu as pltpu

EPS = 1e-5        # torch.nn.LayerNorm default
OUT_PAD = 128     # lane-dense padded width for the merged head output (sliced in wrapper)
NEG_BIG = -1e30   # additive attention bias for cross-sample pairs


# ---------------------------------------------------------------------------
# in-kernel helpers (only ops with guaranteed Mosaic lowerings)
# ---------------------------------------------------------------------------
def _layernorm(x, gamma, beta):
    mean = jnp.mean(x, axis=-1, keepdims=True)
    var = jnp.mean(jnp.square(x - mean), axis=-1, keepdims=True)
    return (x - mean) * jax.lax.rsqrt(var + EPS) * gamma + beta


_ERF_P = 0.3275911
_ERF_A = (0.254829592, -0.284496736, 1.421413741, -1.453152027, 1.061405429)


def _erf_approx(x):
    # Abramowitz & Stegun 7.1.26 rational approximation (|err| <= 1.5e-7); avoids relying
    # on an erf primitive lowering while matching torch's exact-erf GELU to f32 noise.
    sgn = jnp.where(x >= 0.0, 1.0, -1.0)
    a = jnp.abs(x)
    t = 1.0 / (1.0 + _ERF_P * a)
    a1, a2, a3, a4, a5 = _ERF_A
    poly = t * (a1 + t * (a2 + t * (a3 + t * (a4 + t * a5))))
    return sgn * (1.0 - poly * jnp.exp(-a * a))


def _gelu_exact(x):
    # matches torch.nn.GELU default (erf formulation, not tanh approx)
    return 0.5 * x * (1.0 + _erf_approx(x * 0.7071067811865476))


# ---------------------------------------------------------------------------
# fused Pallas kernel: depth transformer blocks + both simple_MLP heads
# ---------------------------------------------------------------------------
def saint_fused_kernel(x_ref, attn_bias_ref, catsel_ref,
                       ln1_g, ln1_b, w_qkv, w_out, b_out,
                       ln2_g, ln2_b, w_ffv, b_ffv, w_ffg, b_ffg, w_ff2, b_ff2,
                       m1_w1, m1_b1, m1_w2, m1_b2,
                       m2_w1, m2_b1, m2_w2, m2_b2,
                       out_ref,
                       *, depth, heads, dim_head):
    f32 = jnp.float32
    bf16 = jnp.bfloat16
    inner = heads * dim_head
    scale = dim_head ** -0.5

    x = x_ref[...]                    # (M, dim) f32, M = TB * n_tokens (batch folded in M)
    attn_bias = attn_bias_ref[...]    # (M, M) f32: 0 within-sample, NEG_BIG across samples
    cat_sel = catsel_ref[...]         # (M, 1) f32: 1.0 on categorical-token rows, else 0.0

    # depth is a small compile-time constant -> static unroll; weights already in VMEM.
    for l in range(depth):
        # ---- PreNorm(Residual(Attention)):  x <- Attn(LN(x)) + LN(x)  (SAINT quirk) ----
        x_ln = _layernorm(x, ln1_g[l], ln1_b[l])
        # fused q/k/v projection: one (M, dim) x (dim, 3*inner) bf16 matmul
        qkv = jnp.dot(x_ln.astype(bf16), w_qkv[l], preferred_element_type=f32)

        attn_out = jnp.zeros_like(x_ln)
        for h in range(heads):
            q = qkv[:, h * dim_head:(h + 1) * dim_head] * scale
            k = qkv[:, inner + h * dim_head: inner + (h + 1) * dim_head]
            v = qkv[:, 2 * inner + h * dim_head: 2 * inner + (h + 1) * dim_head]
            # dense (M, M) scores over the whole block + block-diagonal bias keeps the
            # matmuls full-M without any per-sample reshape/loop.
            s = jnp.einsum('id,jd->ij', q.astype(bf16), k.astype(bf16),
                           preferred_element_type=f32)
            s = s + attn_bias
            s = s - jnp.max(s, axis=-1, keepdims=True)
            p = jnp.exp(s)
            p = p * pl.reciprocal(jnp.sum(p, axis=-1, keepdims=True), approx=True)
            o = jnp.dot(p.astype(bf16), v.astype(bf16), preferred_element_type=f32)
            # accumulate heads directly into the output projection (no lane concat)
            attn_out = attn_out + jnp.dot(o.astype(bf16), w_out[l, h],
                                          preferred_element_type=f32)
        x = attn_out + b_out[l] + x_ln

        # ---- PreNorm(Residual(GEGLU FeedForward)):  x <- FF(LN(x)) + LN(x) ----
        x_ln2 = _layernorm(x, ln2_g[l], ln2_b[l])
        xb = x_ln2.astype(bf16)
        val = jnp.dot(xb, w_ffv[l], preferred_element_type=f32) + b_ffv[l]
        gate = jnp.dot(xb, w_ffg[l], preferred_element_type=f32) + b_ffg[l]
        g = val * _gelu_exact(gate)
        ff = jnp.dot(g.astype(bf16), w_ff2[l], preferred_element_type=f32) + b_ff2[l]
        x = ff + x_ln2

    # ---- model heads: both simple_MLPs on every token row, per-row select.  The two
    # head MLPs are tiny; the redundant rows cost nothing and keep the output store a
    # single dense (M, 128) slab (sublanes multiple of 8, unmasked vst). ----
    xb = x.astype(bf16)
    h1 = jnp.maximum(jnp.dot(xb, m1_w1[...], preferred_element_type=f32) + m1_b1[...], 0.0)
    cat_full = jnp.dot(h1.astype(bf16), m1_w2[...], preferred_element_type=f32) + m1_b2[...]
    h2 = jnp.maximum(jnp.dot(xb, m2_w1[...], preferred_element_type=f32) + m2_b1[...], 0.0)
    con_full = jnp.dot(h2.astype(bf16), m2_w2[...], preferred_element_type=f32) + m2_b2[...]
    out_ref[...] = (cat_sel * cat_full + (1.0 - cat_sel) * con_full).astype(out_ref.dtype)


# ---------------------------------------------------------------------------
# parameter construction (deterministic synthetic init, laid out for the fused kernel)
# ---------------------------------------------------------------------------
def _round_up(v, m):
    return ((v + m - 1) // m) * m


def init_saint_params(key, *, categories, num_continuous, dim, depth, heads, dim_head,
                      num_special_tokens=1):
    n_cat = len(categories)
    total_tokens = sum(categories) + num_special_tokens
    inner = heads * dim_head
    ff_mult = 4                               # official SAINT FeedForward default
    ffh = ff_mult * dim
    hid1 = _round_up(2 * total_tokens, 128)   # simple_MLP hidden dims zero-padded to 128
    hid2 = _round_up(max(num_continuous, 1), 128)

    def nrm(k, shape, scale=0.05):
        return scale * jax.random.normal(k, shape, jnp.float32)

    ks = iter(jax.random.split(key, 16))

    params = dict(
        n_cat=n_cat,
        total_tokens=total_tokens,
        num_continuous=num_continuous,
        # ---- transformer blocks, stacked on a leading depth axis (bf16 matmul weights) --
        ln1_g=jnp.ones((depth, 1, dim), jnp.float32),
        ln1_b=jnp.zeros((depth, 1, dim), jnp.float32),
        w_qkv=nrm(next(ks), (depth, dim, 3 * inner)).astype(jnp.bfloat16),
        w_out=nrm(next(ks), (depth, heads, dim_head, dim)).astype(jnp.bfloat16),
        b_out=nrm(next(ks), (depth, 1, dim), 0.01),
        ln2_g=jnp.ones((depth, 1, dim), jnp.float32),
        ln2_b=jnp.zeros((depth, 1, dim), jnp.float32),
        # GEGLU value / gate projections stored separately (no lane split needed)
        w_ffv=nrm(next(ks), (depth, dim, ffh)).astype(jnp.bfloat16),
        b_ffv=nrm(next(ks), (depth, 1, ffh), 0.01),
        w_ffg=nrm(next(ks), (depth, dim, ffh)).astype(jnp.bfloat16),
        b_ffg=nrm(next(ks), (depth, 1, ffh), 0.01),
        w_ff2=nrm(next(ks), (depth, ffh, dim)).astype(jnp.bfloat16),
        b_ff2=jnp.zeros((depth, 1, dim), jnp.float32),
    )

    # ---- simple_MLP heads; hidden and output dims zero-padded to 128 lanes so all
    # matmuls / stores are lane-dense (padding is exact: ReLU(0)=0, zero rows of W2) ----
    m1_w1 = jnp.zeros((dim, hid1), jnp.float32).at[:, :2 * total_tokens].set(
        nrm(next(ks), (dim, 2 * total_tokens)))
    m1_w2 = jnp.zeros((hid1, OUT_PAD), jnp.float32).at[:2 * total_tokens, :total_tokens].set(
        nrm(next(ks), (2 * total_tokens, total_tokens)))
    m2_w1 = jnp.zeros((dim, hid2), jnp.float32).at[:, :num_continuous].set(
        nrm(next(ks), (dim, num_continuous)))
    m2_w2 = jnp.zeros((hid2, OUT_PAD), jnp.float32).at[:num_continuous, :1].set(
        nrm(next(ks), (num_continuous, 1)))
    params.update(
        m1_w1=m1_w1.astype(jnp.bfloat16), m1_b1=jnp.zeros((1, hid1), jnp.float32),
        m1_w2=m1_w2.astype(jnp.bfloat16), m1_b2=jnp.zeros((1, OUT_PAD), jnp.float32),
        m2_w1=m2_w1.astype(jnp.bfloat16), m2_b1=jnp.zeros((1, hid2), jnp.float32),
        m2_w2=m2_w2.astype(jnp.bfloat16), m2_b2=jnp.zeros((1, OUT_PAD), jnp.float32),
    )
    # Unused-at-forward submodules of SAINT.__init__ (embeds, mask embeddings, self.mlp,
    # mlpfory, pt_mlp, pt_mlp2, per-feature simple_MLPs, self.norm) are omitted: the
    # forward pass never touches them.
    return params


# ---------------------------------------------------------------------------
# SAINT forward: one fused pallas_call for the whole network
# ---------------------------------------------------------------------------
_WEIGHT_ORDER = ("ln1_g", "ln1_b", "w_qkv", "w_out", "b_out",
                 "ln2_g", "ln2_b", "w_ffv", "b_ffv", "w_ffg", "b_ffg", "w_ff2", "b_ff2",
                 "m1_w1", "m1_b1", "m1_w2", "m1_b2",
                 "m2_w1", "m2_b1", "m2_w2", "m2_b2")


def _pick_tb(batch):
    # TB a multiple of 8 keeps every (TB*n)-row block sublane-aligned for any n, and
    # >=2 grid steps lets v7x split the batch across its two TensorCores.
    if batch >= 16:
        return 8
    return max(batch, 1)   # single full-batch step (block == full array -> always legal)


def saint_forward(params, x_categ_emb, x_cont_emb, *, heads, dim_head, tb=None):
    # Transformer('col'): concat already-embedded tokens along the sequence axis.
    x = jnp.concatenate([x_categ_emb, x_cont_emb], axis=1).astype(jnp.float32)  # (B, n, dim)
    B, n, dim = x.shape
    n_cat = params["n_cat"]
    total_tokens = params["total_tokens"]
    depth = params["w_qkv"].shape[0]
    inner = heads * dim_head

    if tb is None:
        tb = _pick_tb(B)
    grid_steps = pl.cdiv(B, tb)
    b_pad = grid_steps * tb
    if b_pad != B:
        x = jnp.concatenate([x, jnp.zeros((b_pad - B, n, dim), x.dtype)], axis=0)

    M = tb * n
    x2d = x.reshape(b_pad * n, dim)       # batch folded into the matmul M (sublane) axis

    # per-block constants (identical for every grid step -> resident in VMEM)
    tok = jnp.arange(M, dtype=jnp.int32)
    same_sample = (tok[:, None] // n) == (tok[None, :] // n)
    attn_bias = jnp.where(same_sample, 0.0, NEG_BIG).astype(jnp.float32)       # (M, M)
    cat_sel = ((tok % n) < n_cat).astype(jnp.float32)[:, None]                 # (M, 1)

    weights = [params[name] for name in _WEIGHT_ORDER]

    def _const_spec(a):
        # whole weight resident in VMEM; constant index map -> never re-fetched per step
        return pl.BlockSpec(a.shape, lambda b, _nd=a.ndim: (0,) * _nd)

    kernel = functools.partial(saint_fused_kernel,
                               depth=depth, heads=heads, dim_head=dim_head)

    # advisory cost estimate for the single fused custom call
    ffh = params["w_ffv"].shape[-1]
    hid1 = params["m1_w1"].shape[-1]
    hid2 = params["m2_w1"].shape[-1]
    flops = int(b_pad * depth * (2 * n * dim * 3 * inner          # fused qkv
                                 + 4 * heads * n * M * dim_head   # block-diag scores + attn@v
                                 + 2 * n * inner * dim            # out projection
                                 + 4 * n * dim * ffh              # GEGLU value + gate
                                 + 2 * n * ffh * dim)             # FF down projection
                + b_pad * n * (2 * dim * hid1 + 2 * hid1 * OUT_PAD
                               + 2 * dim * hid2 + 2 * hid2 * OUT_PAD))
    transcendentals = int(b_pad * depth * (heads * n * M + n * ffh))
    bytes_accessed = int(x2d.size * 4 + attn_bias.size * 4 + cat_sel.size * 4
                         + sum(int(w.size) * w.dtype.itemsize for w in weights)
                         + b_pad * n * OUT_PAD * 4)

    out_pad = pl.pallas_call(
        kernel,
        grid=(grid_steps,),                                       # batch blocks, megacore-parallel
        in_specs=[pl.BlockSpec((M, dim), lambda b: (b, 0)),
                  _const_spec(attn_bias),
                  _const_spec(cat_sel)]
                 + [_const_spec(w) for w in weights],
        out_specs=pl.BlockSpec((M, OUT_PAD), lambda b: (b, 0)),   # lane- and sublane-dense slab
        out_shape=jax.ShapeDtypeStruct((b_pad * n, OUT_PAD), jnp.float32),
        compiler_params=pltpu.CompilerParams(
            dimension_semantics=("parallel",),
            vmem_limit_bytes=48 * 1024 * 1024),
        cost_estimate=pl.CostEstimate(flops=flops,
                                      transcendentals=transcendentals,
                                      bytes_accessed=bytes_accessed),
    )(x2d, attn_bias, cat_sel, *weights)

    # slice the lane-padded merged slab back to the module's output shapes
    out3 = out_pad.reshape(b_pad, n, OUT_PAD)
    cat_outs = out3[:B, :n_cat, :total_tokens]                    # (B, n_cat, total_tokens)
    con_outs = out3[:B, n_cat:, :1]                               # (B, n_cont, 1)
    return cat_outs, con_outs


# ---------------------------------------------------------------------------
if __name__ == "__main__":
    categories = (3, 4, 5)          # -> num_categories = 3, total_tokens = 13
    num_continuous = 4
    dim, depth, heads, dim_head = 32, 2, 4, 16
    B = 16                          # TB=8 -> grid=(2,): both v7x TensorCores busy
    n_cat = len(categories)
    total_tokens = sum(categories) + 1

    root = jax.random.PRNGKey(0)
    kp, kx1, kx2 = jax.random.split(root, 3)

    params = init_saint_params(kp, categories=categories,
                               num_continuous=num_continuous, dim=dim,
                               depth=depth, heads=heads, dim_head=dim_head)

    # forward receives already-embedded tokens (as in the SAINT training loop)
    x_categ = jax.random.normal(kx1, (B, n_cat, dim), jnp.float32)
    x_cont = jax.random.normal(kx2, (B, num_continuous, dim), jnp.float32)

    cat_outs, con_outs = saint_forward(params, x_categ, x_cont,
                                       heads=heads, dim_head=dim_head)
    jax.block_until_ready((cat_outs, con_outs))

    assert cat_outs.shape == (B, n_cat, total_tokens), cat_outs.shape
    assert con_outs.shape == (B, num_continuous, 1), con_outs.shape
    assert bool(jnp.all(jnp.isfinite(cat_outs))) and bool(jnp.all(jnp.isfinite(con_outs)))
    print("KERNEL_OK")
</pallas_src>

<mosaic_0001>
module attributes {stable_mosaic.version = 11 : i64} {
  func.func @saint_fused_kernel(%arg0: i32, %arg1: memref<56x32xf32, #tpu.memory_space<vmem>>, %arg2: memref<56x56xf32, #tpu.memory_space<vmem>>, %arg3: memref<56x1xf32, #tpu.memory_space<vmem>>, %arg4: memref<2x1x32xf32, #tpu.memory_space<vmem>>, %arg5: memref<2x1x32xf32, #tpu.memory_space<vmem>>, %arg6: memref<2x32x192xbf16, #tpu.memory_space<vmem>>, %arg7: memref<2x4x16x32xbf16, #tpu.memory_space<vmem>>, %arg8: memref<2x1x32xf32, #tpu.memory_space<vmem>>, %arg9: memref<2x1x32xf32, #tpu.memory_space<vmem>>, %arg10: memref<2x1x32xf32, #tpu.memory_space<vmem>>, %arg11: memref<2x32x128xbf16, #tpu.memory_space<vmem>>, %arg12: memref<2x1x128xf32, #tpu.memory_space<vmem>>, %arg13: memref<2x32x128xbf16, #tpu.memory_space<vmem>>, %arg14: memref<2x1x128xf32, #tpu.memory_space<vmem>>, %arg15: memref<2x128x32xbf16, #tpu.memory_space<vmem>>, %arg16: memref<2x1x32xf32, #tpu.memory_space<vmem>>, %arg17: memref<32x128xbf16, #tpu.memory_space<vmem>>, %arg18: memref<1x128xf32, #tpu.memory_space<vmem>>, %arg19: memref<128x128xbf16, #tpu.memory_space<vmem>>, %arg20: memref<1x128xf32, #tpu.memory_space<vmem>>, %arg21: memref<32x128xbf16, #tpu.memory_space<vmem>>, %arg22: memref<1x128xf32, #tpu.memory_space<vmem>>, %arg23: memref<128x128xbf16, #tpu.memory_space<vmem>>, %arg24: memref<1x128xf32, #tpu.memory_space<vmem>>, %arg25: memref<56x128xf32, #tpu.memory_space<vmem>>) attributes {dimension_semantics = [#tpu.dimension_semantics<parallel>], iteration_bounds = array<i64: 2>, scalar_prefetch = 0 : i64, scratch_operands = 0 : i64, tpu.core_type = #tpu.core_type<tc>, window_params = [{transform_indices = @transform_0, window_bounds = array<i64: 56, 32>}, {pipeline_mode = #tpu.pipeline_mode<synchronous>, transform_indices = @transform_1, window_bounds = array<i64: 56, 56>}, {pipeline_mode = #tpu.pipeline_mode<synchronous>, transform_indices = @transform_2, window_bounds = array<i64: 56, 1>}, {pipeline_mode = #tpu.pipeline_mode<synchronous>, transform_indices = @transform_3, window_bounds = array<i64: 2, 1, 32>}, {pipeline_mode = #tpu.pipeline_mode<synchronous>, transform_indices = @transform_4, window_bounds = array<i64: 2, 1, 32>}, {pipeline_mode = #tpu.pipeline_mode<synchronous>, transform_indices = @transform_5, window_bounds = array<i64: 2, 32, 192>}, {pipeline_mode = #tpu.pipeline_mode<synchronous>, transform_indices = @transform_6, window_bounds = array<i64: 2, 4, 16, 32>}, {pipeline_mode = #tpu.pipeline_mode<synchronous>, transform_indices = @transform_7, window_bounds = array<i64: 2, 1, 32>}, {pipeline_mode = #tpu.pipeline_mode<synchronous>, transform_indices = @transform_8, window_bounds = array<i64: 2, 1, 32>}, {pipeline_mode = #tpu.pipeline_mode<synchronous>, transform_indices = @transform_9, window_bounds = array<i64: 2, 1, 32>}, {pipeline_mode = #tpu.pipeline_mode<synchronous>, transform_indices = @transform_10, window_bounds = array<i64: 2, 32, 128>}, {pipeline_mode = #tpu.pipeline_mode<synchronous>, transform_indices = @transform_11, window_bounds = array<i64: 2, 1, 128>}, {pipeline_mode = #tpu.pipeline_mode<synchronous>, transform_indices = @transform_12, window_bounds = array<i64: 2, 32, 128>}, {pipeline_mode = #tpu.pipeline_mode<synchronous>, transform_indices = @transform_13, window_bounds = array<i64: 2, 1, 128>}, {pipeline_mode = #tpu.pipeline_mode<synchronous>, transform_indices = @transform_14, window_bounds = array<i64: 2, 128, 32>}, {pipeline_mode = #tpu.pipeline_mode<synchronous>, transform_indices = @transform_15, window_bounds = array<i64: 2, 1, 32>}, {pipeline_mode = #tpu.pipeline_mode<synchronous>, transform_indices = @transform_16, window_bounds = array<i64: 32, 128>}, {pipeline_mode = #tpu.pipeline_mode<synchronous>, transform_indices = @transform_17, window_bounds = array<i64: 1, 128>}, {pipeline_mode = #tpu.pipeline_mode<synchronous>, transform_indices = @transform_18, window_bounds = array<i64: 128, 128>}, {pipeline_mode = #tpu.pipeline_mode<synchronous>, transform_indices = @transform_19, window_bounds = array<i64: 1, 128>}, {pipeline_mode = #tpu.pipeline_mode<synchronous>, transform_indices = @transform_20, window_bounds = array<i64: 32, 128>}, {pipeline_mode = #tpu.pipeline_mode<synchronous>, transform_indices = @transform_21, window_bounds = array<i64: 1, 128>}, {pipeline_mode = #tpu.pipeline_mode<synchronous>, transform_indices = @transform_22, window_bounds = array<i64: 128, 128>}, {pipeline_mode = #tpu.pipeline_mode<synchronous>, transform_indices = @transform_23, window_bounds = array<i64: 1, 128>}, {transform_indices = @transform_24, window_bounds = array<i64: 56, 128>}]} {
    %c0 = arith.constant 0 : index
    %c0_0 = arith.constant 0 : index
    %0 = vector.load %arg1[%c0, %c0_0] : memref<56x32xf32, #tpu.memory_space<vmem>>, vector<56x32xf32>
    %c0_1 = arith.constant 0 : index
    %c0_2 = arith.constant 0 : index
    %1 = vector.load %arg2[%c0_1, %c0_2] : memref<56x56xf32, #tpu.memory_space<vmem>>, vector<56x56xf32>
    %c0_3 = arith.constant 0 : index
    %c0_4 = arith.constant 0 : index
    %2 = vector.load %arg3[%c0_3, %c0_4] : memref<56x1xf32, #tpu.memory_space<vmem>>, vector<56x1xf32>
    %c0_5 = arith.constant 0 : index
    %c0_6 = arith.constant 0 : index
    %c0_7 = arith.constant 0 : index
    %3 = vector.load %arg4[%c0_5, %c0_6, %c0_7] : memref<2x1x32xf32, #tpu.memory_space<vmem>>, vector<1x1x32xf32>
    %4 = vector.shape_cast %3 : vector<1x1x32xf32> to vector<1x32xf32>
    %c0_8 = arith.constant 0 : index
    %c0_9 = arith.constant 0 : index
    %c0_10 = arith.constant 0 : index
    %5 = vector.load %arg5[%c0_8, %c0_9, %c0_10] : memref<2x1x32xf32, #tpu.memory_space<vmem>>, vector<1x1x32xf32>
    %6 = vector.shape_cast %5 : vector<1x1x32xf32> to vector<1x32xf32>
    %cst = arith.constant dense<0.000000e+00> : vector<56xf32>
    %7 = vector.multi_reduction <add>, %0, %cst [1] : vector<56x32xf32> to vector<56xf32>
    %8 = vector.shape_cast %7 : vector<56xf32> to vector<56x1xf32>
    %cst_11 = arith.constant 3.200000e+01 : f32
    %9 = vector.broadcast %cst_11 : f32 to vector<56x1xf32>
    %10 = arith.divf %8, %9 : vector<56x1xf32>
    %11 = vector.broadcast %10 : vector<56x1xf32> to vector<56x32xf32>
    %12 = arith.subf %0, %11 : vector<56x32xf32>
    %13 = arith.mulf %12, %12 : vector<56x32xf32>
    %cst_12 = arith.constant dense<0.000000e+00> : vector<56xf32>
    %14 = vector.multi_reduction <add>, %13, %cst_12 [1] : vector<56x32xf32> to vector<56xf32>
    %15 = vector.shape_cast %14 : vector<56xf32> to vector<56x1xf32>
    %cst_13 = arith.constant 3.200000e+01 : f32
    %16 = vector.broadcast %cst_13 : f32 to vector<56x1xf32>
    %17 = arith.divf %15, %16 : vector<56x1xf32>
    %18 = vector.broadcast %10 : vector<56x1xf32> to vector<56x32xf32>
    %19 = arith.subf %0, %18 : vector<56x32xf32>
    %cst_14 = arith.constant 9.99999974E-6 : f32
    %20 = vector.broadcast %cst_14 : f32 to vector<56x1xf32>
    %21 = arith.addf %17, %20 : vector<56x1xf32>
    %22 = math.rsqrt %21 : vector<56x1xf32>
    %23 = vector.broadcast %22 : vector<56x1xf32> to vector<56x32xf32>
    %24 = arith.mulf %19, %23 : vector<56x32xf32>
    %25 = vector.broadcast %4 : vector<1x32xf32> to vector<56x32xf32>
    %26 = arith.mulf %24, %25 : vector<56x32xf32>
    %27 = vector.broadcast %6 : vector<1x32xf32> to vector<56x32xf32>
    %28 = arith.addf %26, %27 : vector<56x32xf32>
    %29 = arith.truncf %28 : vector<56x32xf32> to vector<56x32xbf16>
    %c0_15 = arith.constant 0 : index
    %c0_16 = arith.constant 0 : index
    %c0_17 = arith.constant 0 : index
    %30 = vector.load %arg6[%c0_15, %c0_16, %c0_17] : memref<2x32x192xbf16, #tpu.memory_space<vmem>>, vector<1x32x192xbf16>
    %31 = vector.shape_cast %30 : vector<1x32x192xbf16> to vector<32x192xbf16>
    %cst_18 = arith.constant dense<0.000000e+00> : vector<56x192xf32>
    %32 = tpu.matmul %29, %31, %cst_18 {dimension_numbers = #tpu.dot_dimension_numbers<[1], [0], [0], [1], [0, 0, 1, 1], [], []>} : vector<56x32xbf16>, vector<32x192xbf16>, vector<56x192xf32> -> vector<56x192xf32>
    %cst_19 = arith.constant 0.000000e+00 : f32
    %33 = vector.broadcast %cst_19 : f32 to vector<56x32xf32>
    %34 = vector.extract_strided_slice %32 {offsets = [0, 0], sizes = [56, 16], strides = [1, 1]} : vector<56x192xf32> to vector<56x16xf32>
    %cst_20 = arith.constant 2.500000e-01 : f32
    %35 = vector.broadcast %cst_20 : f32 to vector<56x16xf32>
    %36 = arith.mulf %34, %35 : vector<56x16xf32>
    %37 = vector.extract_strided_slice %32 {offsets = [0, 64], sizes = [56, 16], strides = [1, 1]} : vector<56x192xf32> to vector<56x16xf32>
    %38 = vector.extract_strided_slice %32 {offsets = [0, 128], sizes = [56, 16], strides = [1, 1]} : vector<56x192xf32> to vector<56x16xf32>
    %39 = arith.truncf %36 : vector<56x16xf32> to vector<56x16xbf16>
    %40 = arith.truncf %37 : vector<56x16xf32> to vector<56x16xbf16>
    "tpu.trace_start"() <{level = 10 : i32, message = "id,jd->ij"}> : () -> ()
    %cst_21 = arith.constant dense<0.000000e+00> : vector<56x56xf32>
    %41 = tpu.matmul %39, %40, %cst_21 {dimension_numbers = #tpu.dot_dimension_numbers<[1], [1], [0], [0], [0, 0, 1, 0], [], []>} : vector<56x16xbf16>, vector<56x16xbf16>, vector<56x56xf32> -> vector<56x56xf32>
    "tpu.trace_stop"() : () -> ()
    %42 = arith.addf %41, %1 : vector<56x56xf32>
    %cst_22 = arith.constant dense<0xFF800000> : vector<56xf32>
    %43 = vector.multi_reduction <maximumf>, %42, %cst_22 [1] : vector<56x56xf32> to vector<56xf32>
    %44 = vector.shape_cast %43 : vector<56xf32> to vector<56x1xf32>
    %45 = vector.broadcast %44 : vector<56x1xf32> to vector<56x56xf32>
    %46 = arith.subf %42, %45 : vector<56x56xf32>
    %47 = math.exp %46 : vector<56x56xf32>
    %cst_23 = arith.constant dense<0.000000e+00> : vector<56xf32>
    %48 = vector.multi_reduction <add>, %47, %cst_23 [1] : vector<56x56xf32> to vector<56xf32>
    %49 = vector.shape_cast %48 : vector<56xf32> to vector<56x1xf32>
    %50 = tpu.reciprocal %49 {approx = true} : vector<56x1xf32> -> vector<56x1xf32>
    %51 = vector.broadcast %50 : vector<56x1xf32> to vector<56x56xf32>
    %52 = arith.mulf %47, %51 : vector<56x56xf32>
    %53 = arith.truncf %52 : vector<56x56xf32> to vector<56x56xbf16>
    %54 = arith.truncf %38 : vector<56x16xf32> to vector<56x16xbf16>
    %cst_24 = arith.constant dense<0.000000e+00> : vector<56x16xf32>
    %55 = tpu.matmul %53, %54, %cst_24 {dimension_numbers = #tpu.dot_dimension_numbers<[1], [0], [0], [1], [0, 0, 1, 1], [], []>} : vector<56x56xbf16>, vector<56x16xbf16>, vector<56x16xf32> -> vector<56x16xf32>
    %56 = arith.truncf %55 : vector<56x16xf32> to vector<56x16xbf16>
    %c0_25 = arith.constant 0 : index
    %c0_26 = arith.constant 0 : index
    %c0_27 = arith.constant 0 : index
    %c0_28 = arith.constant 0 : index
    %57 = vector.load %arg7[%c0_25, %c0_26, %c0_27, %c0_28] : memref<2x4x16x32xbf16, #tpu.memory_space<vmem>>, vector<1x1x16x32xbf16>
    %58 = vector.shape_cast %57 : vector<1x1x16x32xbf16> to vector<16x32xbf16>
    %cst_29 = arith.constant dense<0.000000e+00> : vector<56x32xf32>
    %59 = tpu.matmul %56, %58, %cst_29 {dimension_numbers = #tpu.dot_dimension_numbers<[1], [0], [0], [1], [0, 0, 1, 1], [], []>} : vector<56x16xbf16>, vector<16x32xbf16>, vector<56x32xf32> -> vector<56x32xf32>
    %60 = arith.addf %33, %59 : vector<56x32xf32>
    %61 = vector.extract_strided_slice %32 {offsets = [0, 16], sizes = [56, 16], strides = [1, 1]} : vector<56x192xf32> to vector<56x16xf32>
    %cst_30 = arith.constant 2.500000e-01 : f32
    %62 = vector.broadcast %cst_30 : f32 to vector<56x16xf32>
    %63 = arith.mulf %61, %62 : vector<56x16xf32>
    %64 = vector.extract_strided_slice %32 {offsets = [0, 80], sizes = [56, 16], strides = [1, 1]} : vector<56x192xf32> to vector<56x16xf32>
    %65 = vector.extract_strided_slice %32 {offsets = [0, 144], sizes = [56, 16], strides = [1, 1]} : vector<56x192xf32> to vector<56x16xf32>
    %66 = arith.truncf %63 : vector<56x16xf32> to vector<56x16xbf16>
    %67 = arith.truncf %64 : vector<56x16xf32> to vector<56x16xbf16>
    "tpu.trace_start"() <{level = 10 : i32, message = "id,jd->ij"}> : () -> ()
    %cst_31 = arith.constant dense<0.000000e+00> : vector<56x56xf32>
    %68 = tpu.matmul %66, %67, %cst_31 {dimension_numbers = #tpu.dot_dimension_numbers<[1], [1], [0], [0], [0, 0, 1, 0], [], []>} : vector<56x16xbf16>, vector<56x16xbf16>, vector<56x56xf32> -> vector<56x56xf32>
    "tpu.trace_stop"() : () -> ()
    %69 = arith.addf %68, %1 : vector<56x56xf32>
    %cst_32 = arith.constant dense<0xFF800000> : vector<56xf32>
    %70 = vector.multi_reduction <maximumf>, %69, %cst_32 [1] : vector<56x56xf32> to vector<56xf32>
    %71 = vector.shape_cast %70 : vector<56xf32> to vector<56x1xf32>
    %72 = vector.broadcast %71 : vector<56x1xf32> to vector<56x56xf32>
    %73 = arith.subf %69, %72 : vector<56x56xf32>
    %74 = math.exp %73 : vector<56x56xf32>
    %cst_33 = arith.constant dense<0.000000e+00> : vector<56xf32>
    %75 = vector.multi_reduction <add>, %74, %cst_33 [1] : vector<56x56xf32> to vector<56xf32>
    %76 = vector.shape_cast %75 : vector<56xf32> to vector<56x1xf32>
    %77 = tpu.reciprocal %76 {approx = true} : vector<56x1xf32> -> vector<56x1xf32>
    %78 = vector.broadcast %77 : vector<56x1xf32> to vector<56x56xf32>
    %79 = arith.mulf %74, %78 : vector<56x56xf32>
    %80 = arith.truncf %79 : vector<56x56xf32> to vector<56x56xbf16>
    %81 = arith.truncf %65 : vector<56x16xf32> to vector<56x16xbf16>
    %cst_34 = arith.constant dense<0.000000e+00> : vector<56x16xf32>
    %82 = tpu.matmul %80, %81, %cst_34 {dimension_numbers = #tpu.dot_dimension_numbers<[1], [0], [0], [1], [0, 0, 1, 1], [], []>} : vector<56x56xbf16>, vector<56x16xbf16>, vector<56x16xf32> -> vector<56x16xf32>
    %83 = arith.truncf %82 : vector<56x16xf32> to vector<56x16xbf16>
    %c0_35 = arith.constant 0 : index
    %c1 = arith.constant 1 : index
    %c0_36 = arith.constant 0 : index
    %c0_37 = arith.constant 0 : index
    %84 = vector.load %arg7[%c0_35, %c1, %c0_36, %c0_37] : memref<2x4x16x32xbf16, #tpu.memory_space<vmem>>, vector<1x1x16x32xbf16>
    %85 = vector.shape_cast %84 : vector<1x1x16x32xbf16> to vector<16x32xbf16>
    %cst_38 = arith.constant dense<0.000000e+00> : vector<56x32xf32>
    %86 = tpu.matmul %83, %85, %cst_38 {dimension_numbers = #tpu.dot_dimension_numbers<[1], [0], [0], [1], [0, 0, 1, 1], [], []>} : vector<56x16xbf16>, vector<16x32xbf16>, vector<56x32xf32> -> vector<56x32xf32>
    %87 = arith.addf %60, %86 : vector<56x32xf32>
    %88 = vector.extract_strided_slice %32 {offsets = [0, 32], sizes = [56, 16], strides = [1, 1]} : vector<56x192xf32> to vector<56x16xf32>
    %cst_39 = arith.constant 2.500000e-01 : f32
    %89 = vector.broadcast %cst_39 : f32 to vector<56x16xf32>
    %90 = arith.mulf %88, %89 : vector<56x16xf32>
    %91 = vector.extract_strided_slice %32 {offsets = [0, 96], sizes = [56, 16], strides = [1, 1]} : vector<56x192xf32> to vector<56x16xf32>
    %92 = vector.extract_strided_slice %32 {offsets = [0, 160], sizes = [56, 16], strides = [1, 1]} : vector<56x192xf32> to vector<56x16xf32>
    %93 = arith.truncf %90 : vector<56x16xf32> to vector<56x16xbf16>
    %94 = arith.truncf %91 : vector<56x16xf32> to vector<56x16xbf16>
    "tpu.trace_start"() <{level = 10 : i32, message = "id,jd->ij"}> : () -> ()
    %cst_40 = arith.constant dense<0.000000e+00> : vector<56x56xf32>
    %95 = tpu.matmul %93, %94, %cst_40 {dimension_numbers = #tpu.dot_dimension_numbers<[1], [1], [0], [0], [0, 0, 1, 0], [], []>} : vector<56x16xbf16>, vector<56x16xbf16>, vector<56x56xf32> -> vector<56x56xf32>
    "tpu.trace_stop"() : () -> ()
    %96 = arith.addf %95, %1 : vector<56x56xf32>
    %cst_41 = arith.constant dense<0xFF800000> : vector<56xf32>
    %97 = vector.multi_reduction <maximumf>, %96, %cst_41 [1] : vector<56x56xf32> to vector<56xf32>
    %98 = vector.shape_cast %97 : vector<56xf32> to vector<56x1xf32>
    %99 = vector.broadcast %98 : vector<56x1xf32> to vector<56x56xf32>
    %100 = arith.subf %96, %99 : vector<56x56xf32>
    %101 = math.exp %100 : vector<56x56xf32>
    %cst_42 = arith.constant dense<0.000000e+00> : vector<56xf32>
    %102 = vector.multi_reduction <add>, %101, %cst_42 [1] : vector<56x56xf32> to vector<56xf32>
    %103 = vector.shape_cast %102 : vector<56xf32> to vector<56x1xf32>
    %104 = tpu.reciprocal %103 {approx = true} : vector<56x1xf32> -> vector<56x1xf32>
    %105 = vector.broadcast %104 : vector<56x1xf32> to vector<56x56xf32>
    %106 = arith.mulf %101, %105 : vector<56x56xf32>
    %107 = arith.truncf %106 : vector<56x56xf32> to vector<56x56xbf16>
    %108 = arith.truncf %92 : vector<56x16xf32> to vector<56x16xbf16>
    %cst_43 = arith.constant dense<0.000000e+00> : vector<56x16xf32>
    %109 = tpu.matmul %107, %108, %cst_43 {dimension_numbers = #tpu.dot_dimension_numbers<[1], [0], [0], [1], [0, 0, 1, 1], [], []>} : vector<56x56xbf16>, vector<56x16xbf16>, vector<56x16xf32> -> vector<56x16xf32>
    %110 = arith.truncf %109 : vector<56x16xf32> to vector<56x16xbf16>
    %c0_44 = arith.constant 0 : index
    %c2 = arith.constant 2 : index
    %c0_45 = arith.constant 0 : index
    %c0_46 = arith.constant 0 : index
    %111 = vector.load %arg7[%c0_44, %c2, %c0_45, %c0_46] : memref<2x4x16x32xbf16, #tpu.memory_space<vmem>>, vector<1x1x16x32xbf16>
    %112 = vector.shape_cast %111 : vector<1x1x16x32xbf16> to vector<16x32xbf16>
    %cst_47 = arith.constant dense<0.000000e+00> : vector<56x32xf32>
    %113 = tpu.matmul %110, %112, %cst_47 {dimension_numbers = #tpu.dot_dimension_numbers<[1], [0], [0], [1], [0, 0, 1, 1], [], []>} : vector<56x16xbf16>, vector<16x32xbf16>, vector<56x32xf32> -> vector<56x32xf32>
    %114 = arith.addf %87, %113 : vector<56x32xf32>
    %115 = vector.extract_strided_slice %32 {offsets = [0, 48], sizes = [56, 16], strides = [1, 1]} : vector<56x192xf32> to vector<56x16xf32>
    %cst_48 = arith.constant 2.500000e-01 : f32
    %116 = vector.broadcast %cst_48 : f32 to vector<56x16xf32>
    %117 = arith.mulf %115, %116 : vector<56x16xf32>
    %118 = vector.extract_strided_slice %32 {offsets = [0, 112], sizes = [56, 16], strides = [1, 1]} : vector<56x192xf32> to vector<56x16xf32>
    %119 = vector.extract_strided_slice %32 {offsets = [0, 176], sizes = [56, 16], strides = [1, 1]} : vector<56x192xf32> to vector<56x16xf32>
    %120 = arith.truncf %117 : vector<56x16xf32> to vector<56x16xbf16>
    %121 = arith.truncf %118 : vector<56x16xf32> to vector<56x16xbf16>
    "tpu.trace_start"() <{level = 10 : i32, message = "id,jd->ij"}> : () -> ()
    %cst_49 = arith.constant dense<0.000000e+00> : vector<56x56xf32>
    %122 = tpu.matmul %120, %121, %cst_49 {dimension_numbers = #tpu.dot_dimension_numbers<[1], [1], [0], [0], [0, 0, 1, 0], [], []>} : vector<56x16xbf16>, vector<56x16xbf16>, vector<56x56xf32> -> vector<56x56xf32>
    "tpu.trace_stop"() : () -> ()
    %123 = arith.addf %122, %1 : vector<56x56xf32>
    %cst_50 = arith.constant dense<0xFF800000> : vector<56xf32>
    %124 = vector.multi_reduction <maximumf>, %123, %cst_50 [1] : vector<56x56xf32> to vector<56xf32>
    %125 = vector.shape_cast %124 : vector<56xf32> to vector<56x1xf32>
    %126 = vector.broadcast %125 : vector<56x1xf32> to vector<56x56xf32>
    %127 = arith.subf %123, %126 : vector<56x56xf32>
    %128 = math.exp %127 : vector<56x56xf32>
    %cst_51 = arith.constant dense<0.000000e+00> : vector<56xf32>
    %129 = vector.multi_reduction <add>, %128, %cst_51 [1] : vector<56x56xf32> to vector<56xf32>
    %130 = vector.shape_cast %129 : vector<56xf32> to vector<56x1xf32>
    %131 = tpu.reciprocal %130 {approx = true} : vector<56x1xf32> -> vector<56x1xf32>
    %132 = vector.broadcast %131 : vector<56x1xf32> to vector<56x56xf32>
    %133 = arith.mulf %128, %132 : vector<56x56xf32>
    %134 = arith.truncf %133 : vector<56x56xf32> to vector<56x56xbf16>
    %135 = arith.truncf %119 : vector<56x16xf32> to vector<56x16xbf16>
    %cst_52 = arith.constant dense<0.000000e+00> : vector<56x16xf32>
    %136 = tpu.matmul %134, %135, %cst_52 {dimension_numbers = #tpu.dot_dimension_numbers<[1], [0], [0], [1], [0, 0, 1, 1], [], []>} : vector<56x56xbf16>, vector<56x16xbf16>, vector<56x16xf32> -> vector<56x16xf32>
    %137 = arith.truncf %136 : vector<56x16xf32> to vector<56x16xbf16>
    %c0_53 = arith.constant 0 : index
    %c3 = arith.constant 3 : index
    %c0_54 = arith.constant 0 : index
    %c0_55 = arith.constant 0 : index
    %138 = vector.load %arg7[%c0_53, %c3, %c0_54, %c0_55] : memref<2x4x16x32xbf16, #tpu.memory_space<vmem>>, vector<1x1x16x32xbf16>
    %139 = vector.shape_cast %138 : vector<1x1x16x32xbf16> to vector<16x32xbf16>
    %cst_56 = arith.constant dense<0.000000e+00> : vector<56x32xf32>
    %140 = tpu.matmul %137, %139, %cst_56 {dimension_numbers = #tpu.dot_dimension_numbers<[1], [0], [0], [1], [0, 0, 1, 1], [], []>} : vector<56x16xbf16>, vector<16x32xbf16>, vector<56x32xf32> -> vector<56x32xf32>
    %141 = arith.addf %114, %140 : vector<56x32xf32>
    %c0_57 = arith.constant 0 : index
    %c0_58 = arith.constant 0 : index
    %c0_59 = arith.constant 0 : index
    %142 = vector.load %arg8[%c0_57, %c0_58, %c0_59] : memref<2x1x32xf32, #tpu.memory_space<vmem>>, vector<1x1x32xf32>
    %143 = vector.shape_cast %142 : vector<1x1x32xf32> to vector<1x32xf32>
    %144 = vector.broadcast %143 : vector<1x32xf32> to vector<56x32xf32>
    %145 = arith.addf %141, %144 : vector<56x32xf32>
    %146 = arith.addf %145, %28 : vector<56x32xf32>
    %c0_60 = arith.constant 0 : index
    %c0_61 = arith.constant 0 : index
    %c0_62 = arith.constant 0 : index
    %147 = vector.load %arg9[%c0_60, %c0_61, %c0_62] : memref<2x1x32xf32, #tpu.memory_space<vmem>>, vector<1x1x32xf32>
    %148 = vector.shape_cast %147 : vector<1x1x32xf32> to vector<1x32xf32>
    %c0_63 = arith.constant 0 : index
    %c0_64 = arith.constant 0 : index
    %c0_65 = arith.constant 0 : index
    %149 = vector.load %arg10[%c0_63, %c0_64, %c0_65] : memref<2x1x32xf32, #tpu.memory_space<vmem>>, vector<1x1x32xf32>
    %150 = vector.shape_cast %149 : vector<1x1x32xf32> to vector<1x32xf32>
    %cst_66 = arith.constant dense<0.000000e+00> : vector<56xf32>
    %151 = vector.multi_reduction <add>, %146, %cst_66 [1] : vector<56x32xf32> to vector<56xf32>
    %152 = vector.shape_cast %151 : vector<56xf32> to vector<56x1xf32>
    %cst_67 = arith.constant 3.200000e+01 : f32
    %153 = vector.broadcast %cst_67 : f32 to vector<56x1xf32>
    %154 = arith.divf %152, %153 : vector<56x1xf32>
    %155 = vector.broadcast %154 : vector<56x1xf32> to vector<56x32xf32>
    %156 = arith.subf %146, %155 : vector<56x32xf32>
    %157 = arith.mulf %156, %156 : vector<56x32xf32>
    %cst_68 = arith.constant dense<0.000000e+00> : vector<56xf32>
    %158 = vector.multi_reduction <add>, %157, %cst_68 [1] : vector<56x32xf32> to vector<56xf32>
    %159 = vector.shape_cast %158 : vector<56xf32> to vector<56x1xf32>
    %cst_69 = arith.constant 3.200000e+01 : f32
    %160 = vector.broadcast %cst_69 : f32 to vector<56x1xf32>
    %161 = arith.divf %159, %160 : vector<56x1xf32>
    %162 = vector.broadcast %154 : vector<56x1xf32> to vector<56x32xf32>
    %163 = arith.subf %146, %162 : vector<56x32xf32>
    %cst_70 = arith.constant 9.99999974E-6 : f32
    %164 = vector.broadcast %cst_70 : f32 to vector<56x1xf32>
    %165 = arith.addf %161, %164 : vector<56x1xf32>
    %166 = math.rsqrt %165 : vector<56x1xf32>
    %167 = vector.broadcast %166 : vector<56x1xf32> to vector<56x32xf32>
    %168 = arith.mulf %163, %167 : vector<56x32xf32>
    %169 = vector.broadcast %148 : vector<1x32xf32> to vector<56x32xf32>
    %170 = arith.mulf %168, %169 : vector<56x32xf32>
    %171 = vector.broadcast %150 : vector<1x32xf32> to vector<56x32xf32>
    %172 = arith.addf %170, %171 : vector<56x32xf32>
    %173 = arith.truncf %172 : vector<56x32xf32> to vector<56x32xbf16>
    %c0_71 = arith.constant 0 : index
    %c0_72 = arith.constant 0 : index
    %c0_73 = arith.constant 0 : index
    %174 = vector.load %arg11[%c0_71, %c0_72, %c0_73] : memref<2x32x128xbf16, #tpu.memory_space<vmem>>, vector<1x32x128xbf16>
    %175 = vector.shape_cast %174 : vector<1x32x128xbf16> to vector<32x128xbf16>
    %cst_74 = arith.constant dense<0.000000e+00> : vector<56x128xf32>
    %176 = tpu.matmul %173, %175, %cst_74 {dimension_numbers = #tpu.dot_dimension_numbers<[1], [0], [0], [1], [0, 0, 1, 1], [], []>} : vector<56x32xbf16>, vector<32x128xbf16>, vector<56x128xf32> -> vector<56x128xf32>
    %c0_75 = arith.constant 0 : index
    %c0_76 = arith.constant 0 : index
    %c0_77 = arith.constant 0 : index
    %177 = vector.load %arg12[%c0_75, %c0_76, %c0_77] : memref<2x1x128xf32, #tpu.memory_space<vmem>>, vector<1x1x128xf32>
    %178 = vector.shape_cast %177 : vector<1x1x128xf32> to vector<1x128xf32>
    %179 = vector.broadcast %178 : vector<1x128xf32> to vector<56x128xf32>
    %180 = arith.addf %176, %179 : vector<56x128xf32>
    %c0_78 = arith.constant 0 : index
    %c0_79 = arith.constant 0 : index
    %c0_80 = arith.constant 0 : index
    %181 = vector.load %arg13[%c0_78, %c0_79, %c0_80] : memref<2x32x128xbf16, #tpu.memory_space<vmem>>, vector<1x32x128xbf16>
    %182 = vector.shape_cast %181 : vector<1x32x128xbf16> to vector<32x128xbf16>
    %cst_81 = arith.constant dense<0.000000e+00> : vector<56x128xf32>
    %183 = tpu.matmul %173, %182, %cst_81 {dimension_numbers = #tpu.dot_dimension_numbers<[1], [0], [0], [1], [0, 0, 1, 1], [], []>} : vector<56x32xbf16>, vector<32x128xbf16>, vector<56x128xf32> -> vector<56x128xf32>
    %c0_82 = arith.constant 0 : index
    %c0_83 = arith.constant 0 : index
    %c0_84 = arith.constant 0 : index
    %184 = vector.load %arg14[%c0_82, %c0_83, %c0_84] : memref<2x1x128xf32, #tpu.memory_space<vmem>>, vector<1x1x128xf32>
    %185 = vector.shape_cast %184 : vector<1x1x128xf32> to vector<1x128xf32>
    %186 = vector.broadcast %185 : vector<1x128xf32> to vector<56x128xf32>
    %187 = arith.addf %183, %186 : vector<56x128xf32>
    %cst_85 = arith.constant 5.000000e-01 : f32
    %188 = vector.broadcast %cst_85 : f32 to vector<56x128xf32>
    %189 = arith.mulf %188, %187 : vector<56x128xf32>
    %cst_86 = arith.constant 0.707106769 : f32
    %190 = vector.broadcast %cst_86 : f32 to vector<56x128xf32>
    %191 = arith.mulf %187, %190 : vector<56x128xf32>
    %cst_87 = arith.constant 0.000000e+00 : f32
    %192 = vector.broadcast %cst_87 : f32 to vector<56x128xf32>
    %193 = arith.cmpf oge, %191, %192 : vector<56x128xf32>
    %cst_88 = arith.constant 1.000000e+00 : f32
    %cst_89 = arith.constant -1.000000e+00 : f32
    %194 = vector.broadcast %cst_88 : f32 to vector<56x128xf32>
    %195 = vector.broadcast %cst_89 : f32 to vector<56x128xf32>
    %196 = arith.select %193, %194, %195 : vector<56x128xi1>, vector<56x128xf32>
    %197 = math.absf %191 : vector<56x128xf32>
    %cst_90 = arith.constant 0.327591091 : f32
    %198 = vector.broadcast %cst_90 : f32 to vector<56x128xf32>
    %199 = arith.mulf %198, %197 : vector<56x128xf32>
    %cst_91 = arith.constant 1.000000e+00 : f32
    %200 = vector.broadcast %cst_91 : f32 to vector<56x128xf32>
    %201 = arith.addf %200, %199 : vector<56x128xf32>
    %cst_92 = arith.constant 1.000000e+00 : f32
    %202 = vector.broadcast %cst_92 : f32 to vector<56x128xf32>
    %203 = arith.divf %202, %201 : vector<56x128xf32>
    %cst_93 = arith.constant 1.06140542 : f32
    %204 = vector.broadcast %cst_93 : f32 to vector<56x128xf32>
    %205 = arith.mulf %203, %204 : vector<56x128xf32>
    %cst_94 = arith.constant -1.45315206 : f32
    %206 = vector.broadcast %cst_94 : f32 to vector<56x128xf32>
    %207 = arith.addf %206, %205 : vector<56x128xf32>
    %208 = arith.mulf %203, %207 : vector<56x128xf32>
    %cst_95 = arith.constant 1.42141378 : f32
    %209 = vector.broadcast %cst_95 : f32 to vector<56x128xf32>
    %210 = arith.addf %209, %208 : vector<56x128xf32>
    %211 = arith.mulf %203, %210 : vector<56x128xf32>
    %cst_96 = arith.constant -0.284496725 : f32
    %212 = vector.broadcast %cst_96 : f32 to vector<56x128xf32>
    %213 = arith.addf %212, %211 : vector<56x128xf32>
    %214 = arith.mulf %203, %213 : vector<56x128xf32>
    %cst_97 = arith.constant 0.254829586 : f32
    %215 = vector.broadcast %cst_97 : f32 to vector<56x128xf32>
    %216 = arith.addf %215, %214 : vector<56x128xf32>
    %217 = arith.mulf %203, %216 : vector<56x128xf32>
    %cst_98 = arith.constant 0.000000e+00 : f32
    %218 = vector.broadcast %cst_98 : f32 to vector<56x128xf32>
    %219 = arith.subf %218, %197 : vector<56x128xf32>
    %220 = arith.mulf %219, %197 : vector<56x128xf32>
    %221 = math.exp %220 : vector<56x128xf32>
    %222 = arith.mulf %217, %221 : vector<56x128xf32>
    %cst_99 = arith.constant 1.000000e+00 : f32
    %223 = vector.broadcast %cst_99 : f32 to vector<56x128xf32>
    %224 = arith.subf %223, %222 : vector<56x128xf32>
    %225 = arith.mulf %196, %224 : vector<56x128xf32>
    %cst_100 = arith.constant 1.000000e+00 : f32
    %226 = vector.broadcast %cst_100 : f32 to vector<56x128xf32>
    %227 = arith.addf %226, %225 : vector<56x128xf32>
    %228 = arith.mulf %189, %227 : vector<56x128xf32>
    %229 = arith.mulf %180, %228 : vector<56x128xf32>
    %230 = arith.truncf %229 : vector<56x128xf32> to vector<56x128xbf16>
    %c0_101 = arith.constant 0 : index
    %c0_102 = arith.constant 0 : index
    %c0_103 = arith.constant 0 : index
    %231 = vector.load %arg15[%c0_101, %c0_102, %c0_103] : memref<2x128x32xbf16, #tpu.memory_space<vmem>>, vector<1x128x32xbf16>
    %232 = vector.shape_cast %231 : vector<1x128x32xbf16> to vector<128x32xbf16>
    %cst_104 = arith.constant dense<0.000000e+00> : vector<56x32xf32>
    %233 = tpu.matmul %230, %232, %cst_104 {dimension_numbers = #tpu.dot_dimension_numbers<[1], [0], [0], [1], [0, 0, 1, 1], [], []>} : vector<56x128xbf16>, vector<128x32xbf16>, vector<56x32xf32> -> vector<56x32xf32>
    %c0_105 = arith.constant 0 : index
    %c0_106 = arith.constant 0 : index
    %c0_107 = arith.constant 0 : index
    %234 = vector.load %arg16[%c0_105, %c0_106, %c0_107] : memref<2x1x32xf32, #tpu.memory_space<vmem>>, vector<1x1x32xf32>
    %235 = vector.shape_cast %234 : vector<1x1x32xf32> to vector<1x32xf32>
    %236 = vector.broadcast %235 : vector<1x32xf32> to vector<56x32xf32>
    %237 = arith.addf %233, %236 : vector<56x32xf32>
    %238 = arith.addf %237, %172 : vector<56x32xf32>
    %c1_108 = arith.constant 1 : index
    %c0_109 = arith.constant 0 : index
    %c0_110 = arith.constant 0 : index
    %239 = vector.load %arg4[%c1_108, %c0_109, %c0_110] : memref<2x1x32xf32, #tpu.memory_space<vmem>>, vector<1x1x32xf32>
    %240 = vector.shape_cast %239 : vector<1x1x32xf32> to vector<1x32xf32>
    %c1_111 = arith.constant 1 : index
    %c0_112 = arith.constant 0 : index
    %c0_113 = arith.constant 0 : index
    %241 = vector.load %arg5[%c1_111, %c0_112, %c0_113] : memref<2x1x32xf32, #tpu.memory_space<vmem>>, vector<1x1x32xf32>
    %242 = vector.shape_cast %241 : vector<1x1x32xf32> to vector<1x32xf32>
    %cst_114 = arith.constant dense<0.000000e+00> : vector<56xf32>
    %243 = vector.multi_reduction <add>, %238, %cst_114 [1] : vector<56x32xf32> to vector<56xf32>
    %244 = vector.shape_cast %243 : vector<56xf32> to vector<56x1xf32>
    %cst_115 = arith.constant 3.200000e+01 : f32
    %245 = vector.broadcast %cst_115 : f32 to vector<56x1xf32>
    %246 = arith.divf %244, %245 : vector<56x1xf32>
    %247 = vector.broadcast %246 : vector<56x1xf32> to vector<56x32xf32>
    %248 = arith.subf %238, %247 : vector<56x32xf32>
    %249 = arith.mulf %248, %248 : vector<56x32xf32>
    %cst_116 = arith.constant dense<0.000000e+00> : vector<56xf32>
    %250 = vector.multi_reduction <add>, %249, %cst_116 [1] : vector<56x32xf32> to vector<56xf32>
    %251 = vector.shape_cast %250 : vector<56xf32> to vector<56x1xf32>
    %cst_117 = arith.constant 3.200000e+01 : f32
    %252 = vector.broadcast %cst_117 : f32 to vector<56x1xf32>
    %253 = arith.divf %251, %252 : vector<56x1xf32>
    %254 = vector.broadcast %246 : vector<56x1xf32> to vector<56x32xf32>
    %255 = arith.subf %238, %254 : vector<56x32xf32>
    %cst_118 = arith.constant 9.99999974E-6 : f32
    %256 = vector.broadcast %cst_118 : f32 to vector<56x1xf32>
    %257 = arith.addf %253, %256 : vector<56x1xf32>
    %258 = math.rsqrt %257 : vector<56x1xf32>
    %259 = vector.broadcast %258 : vector<56x1xf32> to vector<56x32xf32>
    %260 = arith.mulf %255, %259 : vector<56x32xf32>
    %261 = vector.broadcast %240 : vector<1x32xf32> to vector<56x32xf32>
    %262 = arith.mulf %260, %261 : vector<56x32xf32>
    %263 = vector.broadcast %242 : vector<1x32xf32> to vector<56x32xf32>
    %264 = arith.addf %262, %263 : vector<56x32xf32>
    %265 = arith.truncf %264 : vector<56x32xf32> to vector<56x32xbf16>
    %c1_119 = arith.constant 1 : index
    %c0_120 = arith.constant 0 : index
    %c0_121 = arith.constant 0 : index
    %266 = vector.load %arg6[%c1_119, %c0_120, %c0_121] : memref<2x32x192xbf16, #tpu.memory_space<vmem>>, vector<1x32x192xbf16>
    %267 = vector.shape_cast %266 : vector<1x32x192xbf16> to vector<32x192xbf16>
    %cst_122 = arith.constant dense<0.000000e+00> : vector<56x192xf32>
    %268 = tpu.matmul %265, %267, %cst_122 {dimension_numbers = #tpu.dot_dimension_numbers<[1], [0], [0], [1], [0, 0, 1, 1], [], []>} : vector<56x32xbf16>, vector<32x192xbf16>, vector<56x192xf32> -> vector<56x192xf32>
    %cst_123 = arith.constant 0.000000e+00 : f32
    %269 = vector.broadcast %cst_123 : f32 to vector<56x32xf32>
    %270 = vector.extract_strided_slice %268 {offsets = [0, 0], sizes = [56, 16], strides = [1, 1]} : vector<56x192xf32> to vector<56x16xf32>
    %cst_124 = arith.constant 2.500000e-01 : f32
    %271 = vector.broadcast %cst_124 : f32 to vector<56x16xf32>
    %272 = arith.mulf %270, %271 : vector<56x16xf32>
    %273 = vector.extract_strided_slice %268 {offsets = [0, 64], sizes = [56, 16], strides = [1, 1]} : vector<56x192xf32> to vector<56x16xf32>
    %274 = vector.extract_strided_slice %268 {offsets = [0, 128], sizes = [56, 16], strides = [1, 1]} : vector<56x192xf32> to vector<56x16xf32>
    %275 = arith.truncf %272 : vector<56x16xf32> to vector<56x16xbf16>
    %276 = arith.truncf %273 : vector<56x16xf32> to vector<56x16xbf16>
    "tpu.trace_start"() <{level = 10 : i32, message = "id,jd->ij"}> : () -> ()
    %cst_125 = arith.constant dense<0.000000e+00> : vector<56x56xf32>
    %277 = tpu.matmul %275, %276, %cst_125 {dimension_numbers = #tpu.dot_dimension_numbers<[1], [1], [0], [0], [0, 0, 1, 0], [], []>} : vector<56x16xbf16>, vector<56x16xbf16>, vector<56x56xf32> -> vector<56x56xf32>
    "tpu.trace_stop"() : () -> ()
    %278 = arith.addf %277, %1 : vector<56x56xf32>
    %cst_126 = arith.constant dense<0xFF800000> : vector<56xf32>
    %279 = vector.multi_reduction <maximumf>, %278, %cst_126 [1] : vector<56x56xf32> to vector<56xf32>
    %280 = vector.shape_cast %279 : vector<56xf32> to vector<56x1xf32>
    %281 = vector.broadcast %280 : vector<56x1xf32> to vector<56x56xf32>
    %282 = arith.subf %278, %281 : vector<56x56xf32>
    %283 = math.exp %282 : vector<56x56xf32>
    %cst_127 = arith.constant dense<0.000000e+00> : vector<56xf32>
    %284 = vector.multi_reduction <add>, %283, %cst_127 [1] : vector<56x56xf32> to vector<56xf32>
    %285 = vector.shape_cast %284 : vector<56xf32> to vector<56x1xf32>
    %286 = tpu.reciprocal %285 {approx = true} : vector<56x1xf32> -> vector<56x1xf32>
    %287 = vector.broadcast %286 : vector<56x1xf32> to vector<56x56xf32>
    %288 = arith.mulf %283, %287 : vector<56x56xf32>
    %289 = arith.truncf %288 : vector<56x56xf32> to vector<56x56xbf16>
    %290 = arith.truncf %274 : vector<56x16xf32> to vector<56x16xbf16>
    %cst_128 = arith.constant dense<0.000000e+00> : vector<56x16xf32>
    %291 = tpu.matmul %289, %290, %cst_128 {dimension_numbers = #tpu.dot_dimension_numbers<[1], [0], [0], [1], [0, 0, 1, 1], [], []>} : vector<56x56xbf16>, vector<56x16xbf16>, vector<56x16xf32> -> vector<56x16xf32>
    %292 = arith.truncf %291 : vector<56x16xf32> to vector<56x16xbf16>
    %c1_129 = arith.constant 1 : index
    %c0_130 = arith.constant 0 : index
    %c0_131 = arith.constant 0 : index
    %c0_132 = arith.constant 0 : index
    %293 = vector.load %arg7[%c1_129, %c0_130, %c0_131, %c0_132] : memref<2x4x16x32xbf16, #tpu.memory_space<vmem>>, vector<1x1x16x32xbf16>
    %294 = vector.shape_cast %293 : vector<1x1x16x32xbf16> to vector<16x32xbf16>
    %cst_133 = arith.constant dense<0.000000e+00> : vector<56x32xf32>
    %295 = tpu.matmul %292, %294, %cst_133 {dimension_numbers = #tpu.dot_dimension_numbers<[1], [0], [0], [1], [0, 0, 1, 1], [], []>} : vector<56x16xbf16>, vector<16x32xbf16>, vector<56x32xf32> -> vector<56x32xf32>
    %296 = arith.addf %269, %295 : vector<56x32xf32>
    %297 = vector.extract_strided_slice %268 {offsets = [0, 16], sizes = [56, 16], strides = [1, 1]} : vector<56x192xf32> to vector<56x16xf32>
    %cst_134 = arith.constant 2.500000e-01 : f32
    %298 = vector.broadcast %cst_134 : f32 to vector<56x16xf32>
    %299 = arith.mulf %297, %298 : vector<56x16xf32>
    %300 = vector.extract_strided_slice %268 {offsets = [0, 80], sizes = [56, 16], strides = [1, 1]} : vector<56x192xf32> to vector<56x16xf32>
    %301 = vector.extract_strided_slice %268 {offsets = [0, 144], sizes = [56, 16], strides = [1, 1]} : vector<56x192xf32> to vector<56x16xf32>
    %302 = arith.truncf %299 : vector<56x16xf32> to vector<56x16xbf16>
    %303 = arith.truncf %300 : vector<56x16xf32> to vector<56x16xbf16>
    "tpu.trace_start"() <{level = 10 : i32, message = "id,jd->ij"}> : () -> ()
    %cst_135 = arith.constant dense<0.000000e+00> : vector<56x56xf32>
    %304 = tpu.matmul %302, %303, %cst_135 {dimension_numbers = #tpu.dot_dimension_numbers<[1], [1], [0], [0], [0, 0, 1, 0], [], []>} : vector<56x16xbf16>, vector<56x16xbf16>, vector<56x56xf32> -> vector<56x56xf32>
    "tpu.trace_stop"() : () -> ()
    %305 = arith.addf %304, %1 : vector<56x56xf32>
    %cst_136 = arith.constant dense<0xFF800000> : vector<56xf32>
    %306 = vector.multi_reduction <maximumf>, %305, %cst_136 [1] : vector<56x56xf32> to vector<56xf32>
    %307 = vector.shape_cast %306 : vector<56xf32> to vector<56x1xf32>
    %308 = vector.broadcast %307 : vector<56x1xf32> to vector<56x56xf32>
    %309 = arith.subf %305, %308 : vector<56x56xf32>
    %310 = math.exp %309 : vector<56x56xf32>
    %cst_137 = arith.constant dense<0.000000e+00> : vector<56xf32>
    %311 = vector.multi_reduction <add>, %310, %cst_137 [1] : vector<56x56xf32> to vector<56xf32>
    %312 = vector.shape_cast %311 : vector<56xf32> to vector<56x1xf32>
    %313 = tpu.reciprocal %312 {approx = true} : vector<56x1xf32> -> vector<56x1xf32>
    %314 = vector.broadcast %313 : vector<56x1xf32> to vector<56x56xf32>
    %315 = arith.mulf %310, %314 : vector<56x56xf32>
    %316 = arith.truncf %315 : vector<56x56xf32> to vector<56x56xbf16>
    %317 = arith.truncf %301 : vector<56x16xf32> to vector<56x16xbf16>
    %cst_138 = arith.constant dense<0.000000e+00> : vector<56x16xf32>
    %318 = tpu.matmul %316, %317, %cst_138 {dimension_numbers = #tpu.dot_dimension_numbers<[1], [0], [0], [1], [0, 0, 1, 1], [], []>} : vector<56x56xbf16>, vector<56x16xbf16>, vector<56x16xf32> -> vector<56x16xf32>
    %319 = arith.truncf %318 : vector<56x16xf32> to vector<56x16xbf16>
    %c1_139 = arith.constant 1 : index
    %c1_140 = arith.constant 1 : index
    %c0_141 = arith.constant 0 : index
    %c0_142 = arith.constant 0 : index
    %320 = vector.load %arg7[%c1_139, %c1_140, %c0_141, %c0_142] : memref<2x4x16x32xbf16, #tpu.memory_space<vmem>>, vector<1x1x16x32xbf16>
    %321 = vector.shape_cast %320 : vector<1x1x16x32xbf16> to vector<16x32xbf16>
    %cst_143 = arith.constant dense<0.000000e+00> : vector<56x32xf32>
    %322 = tpu.matmul %319, %321, %cst_143 {dimension_numbers = #tpu.dot_dimension_numbers<[1], [0], [0], [1], [0, 0, 1, 1], [], []>} : vector<56x16xbf16>, vector<16x32xbf16>, vector<56x32xf32> -> vector<56x32xf32>
    %323 = arith.addf %296, %322 : vector<56x32xf32>
    %324 = vector.extract_strided_slice %268 {offsets = [0, 32], sizes = [56, 16], strides = [1, 1]} : vector<56x192xf32> to vector<56x16xf32>
    %cst_144 = arith.constant 2.500000e-01 : f32
    %325 = vector.broadcast %cst_144 : f32 to vector<56x16xf32>
    %326 = arith.mulf %324, %325 : vector<56x16xf32>
    %327 = vector.extract_strided_slice %268 {offsets = [0, 96], sizes = [56, 16], strides = [1, 1]} : vector<56x192xf32> to vector<56x16xf32>
    %328 = vector.extract_strided_slice %268 {offsets = [0, 160], sizes = [56, 16], strides = [1, 1]} : vector<56x192xf32> to vector<56x16xf32>
    %329 = arith.truncf %326 : vector<56x16xf32> to vector<56x16xbf16>
    %330 = arith.truncf %327 : vector<56x16xf32> to vector<56x16xbf16>
    "tpu.trace_start"() <{level = 10 : i32, message = "id,jd->ij"}> : () -> ()
    %cst_145 = arith.constant dense<0.000000e+00> : vector<56x56xf32>
    %331 = tpu.matmul %329, %330, %cst_145 {dimension_numbers = #tpu.dot_dimension_numbers<[1], [1], [0], [0], [0, 0, 1, 0], [], []>} : vector<56x16xbf16>, vector<56x16xbf16>, vector<56x56xf32> -> vector<56x56xf32>
    "tpu.trace_stop"() : () -> ()
    %332 = arith.addf %331, %1 : vector<56x56xf32>
    %cst_146 = arith.constant dense<0xFF800000> : vector<56xf32>
    %333 = vector.multi_reduction <maximumf>, %332, %cst_146 [1] : vector<56x56xf32> to vector<56xf32>
    %334 = vector.shape_cast %333 : vector<56xf32> to vector<56x1xf32>
    %335 = vector.broadcast %334 : vector<56x1xf32> to vector<56x56xf32>
    %336 = arith.subf %332, %335 : vector<56x56xf32>
    %337 = math.exp %336 : vector<56x56xf32>
    %cst_147 = arith.constant dense<0.000000e+00> : vector<56xf32>
    %338 = vector.multi_reduction <add>, %337, %cst_147 [1] : vector<56x56xf32> to vector<56xf32>
    %339 = vector.shape_cast %338 : vector<56xf32> to vector<56x1xf32>
    %340 = tpu.reciprocal %339 {approx = true} : vector<56x1xf32> -> vector<56x1xf32>
    %341 = vector.broadcast %340 : vector<56x1xf32> to vector<56x56xf32>
    %342 = arith.mulf %337, %341 : vector<56x56xf32>
    %343 = arith.truncf %342 : vector<56x56xf32> to vector<56x56xbf16>
    %344 = arith.truncf %328 : vector<56x16xf32> to vector<56x16xbf16>
    %cst_148 = arith.constant dense<0.000000e+00> : vector<56x16xf32>
    %345 = tpu.matmul %343, %344, %cst_148 {dimension_numbers = #tpu.dot_dimension_numbers<[1], [0], [0], [1], [0, 0, 1, 1], [], []>} : vector<56x56xbf16>, vector<56x16xbf16>, vector<56x16xf32> -> vector<56x16xf32>
    %346 = arith.truncf %345 : vector<56x16xf32> to vector<56x16xbf16>
    %c1_149 = arith.constant 1 : index
    %c2_150 = arith.constant 2 : index
    %c0_151 = arith.constant 0 : index
    %c0_152 = arith.constant 0 : index
    %347 = vector.load %arg7[%c1_149, %c2_150, %c0_151, %c0_152] : memref<2x4x16x32xbf16, #tpu.memory_space<vmem>>, vector<1x1x16x32xbf16>
    %348 = vector.shape_cast %347 : vector<1x1x16x32xbf16> to vector<16x32xbf16>
    %cst_153 = arith.constant dense<0.000000e+00> : vector<56x32xf32>
    %349 = tpu.matmul %346, %348, %cst_153 {dimension_numbers = #tpu.dot_dimension_numbers<[1], [0], [0], [1], [0, 0, 1, 1], [], []>} : vector<56x16xbf16>, vector<16x32xbf16>, vector<56x32xf32> -> vector<56x32xf32>
    %350 = arith.addf %323, %349 : vector<56x32xf32>
    %351 = vector.extract_strided_slice %268 {offsets = [0, 48], sizes = [56, 16], strides = [1, 1]} : vector<56x192xf32> to vector<56x16xf32>
    %cst_154 = arith.constant 2.500000e-01 : f32
    %352 = vector.broadcast %cst_154 : f32 to vector<56x16xf32>
    %353 = arith.mulf %351, %352 : vector<56x16xf32>
    %354 = vector.extract_strided_slice %268 {offsets = [0, 112], sizes = [56, 16], strides = [1, 1]} : vector<56x192xf32> to vector<56x16xf32>
    %355 = vector.extract_strided_slice %268 {offsets = [0, 176], sizes = [56, 16], strides = [1, 1]} : vector<56x192xf32> to vector<56x16xf32>
    %356 = arith.truncf %353 : vector<56x16xf32> to vector<56x16xbf16>
    %357 = arith.truncf %354 : vector<56x16xf32> to vector<56x16xbf16>
    "tpu.trace_start"() <{level = 10 : i32, message = "id,jd->ij"}> : () -> ()
    %cst_155 = arith.constant dense<0.000000e+00> : vector<56x56xf32>
    %358 = tpu.matmul %356, %357, %cst_155 {dimension_numbers = #tpu.dot_dimension_numbers<[1], [1], [0], [0], [0, 0, 1, 0], [], []>} : vector<56x16xbf16>, vector<56x16xbf16>, vector<56x56xf32> -> vector<56x56xf32>
    "tpu.trace_stop"() : () -> ()
    %359 = arith.addf %358, %1 : vector<56x56xf32>
    %cst_156 = arith.constant dense<0xFF800000> : vector<56xf32>
    %360 = vector.multi_reduction <maximumf>, %359, %cst_156 [1] : vector<56x56xf32> to vector<56xf32>
    %361 = vector.shape_cast %360 : vector<56xf32> to vector<56x1xf32>
    %362 = vector.broadcast %361 : vector<56x1xf32> to vector<56x56xf32>
    %363 = arith.subf %359, %362 : vector<56x56xf32>
    %364 = math.exp %363 : vector<56x56xf32>
    %cst_157 = arith.constant dense<0.000000e+00> : vector<56xf32>
    %365 = vector.multi_reduction <add>, %364, %cst_157 [1] : vector<56x56xf32> to vector<56xf32>
    %366 = vector.shape_cast %365 : vector<56xf32> to vector<56x1xf32>
    %367 = tpu.reciprocal %366 {approx = true} : vector<56x1xf32> -> vector<56x1xf32>
    %368 = vector.broadcast %367 : vector<56x1xf32> to vector<56x56xf32>
    %369 = arith.mulf %364, %368 : vector<56x56xf32>
    %370 = arith.truncf %369 : vector<56x56xf32> to vector<56x56xbf16>
    %371 = arith.truncf %355 : vector<56x16xf32> to vector<56x16xbf16>
    %cst_158 = arith.constant dense<0.000000e+00> : vector<56x16xf32>
    %372 = tpu.matmul %370, %371, %cst_158 {dimension_numbers = #tpu.dot_dimension_numbers<[1], [0], [0], [1], [0, 0, 1, 1], [], []>} : vector<56x56xbf16>, vector<56x16xbf16>, vector<56x16xf32> -> vector<56x16xf32>
    %373 = arith.truncf %372 : vector<56x16xf32> to vector<56x16xbf16>
    %c1_159 = arith.constant 1 : index
    %c3_160 = arith.constant 3 : index
    %c0_161 = arith.constant 0 : index
    %c0_162 = arith.constant 0 : index
    %374 = vector.load %arg7[%c1_159, %c3_160, %c0_161, %c0_162] : memref<2x4x16x32xbf16, #tpu.memory_space<vmem>>, vector<1x1x16x32xbf16>
    %375 = vector.shape_cast %374 : vector<1x1x16x32xbf16> to vector<16x32xbf16>
    %cst_163 = arith.constant dense<0.000000e+00> : vector<56x32xf32>
    %376 = tpu.matmul %373, %375, %cst_163 {dimension_numbers = #tpu.dot_dimension_numbers<[1], [0], [0], [1], [0, 0, 1, 1], [], []>} : vector<56x16xbf16>, vector<16x32xbf16>, vector<56x32xf32> -> vector<56x32xf32>
    %377 = arith.addf %350, %376 : vector<56x32xf32>
    %c1_164 = arith.constant 1 : index
    %c0_165 = arith.constant 0 : index
    %c0_166 = arith.constant 0 : index
    %378 = vector.load %arg8[%c1_164, %c0_165, %c0_166] : memref<2x1x32xf32, #tpu.memory_space<vmem>>, vector<1x1x32xf32>
    %379 = vector.shape_cast %378 : vector<1x1x32xf32> to vector<1x32xf32>
    %380 = vector.broadcast %379 : vector<1x32xf32> to vector<56x32xf32>
    %381 = arith.addf %377, %380 : vector<56x32xf32>
    %382 = arith.addf %381, %264 : vector<56x32xf32>
    %c1_167 = arith.constant 1 : index
    %c0_168 = arith.constant 0 : index
    %c0_169 = arith.constant 0 : index
    %383 = vector.load %arg9[%c1_167, %c0_168, %c0_169] : memref<2x1x32xf32, #tpu.memory_space<vmem>>, vector<1x1x32xf32>
    %384 = vector.shape_cast %383 : vector<1x1x32xf32> to vector<1x32xf32>
    %c1_170 = arith.constant 1 : index
    %c0_171 = arith.constant 0 : index
    %c0_172 = arith.constant 0 : index
    %385 = vector.load %arg10[%c1_170, %c0_171, %c0_172] : memref<2x1x32xf32, #tpu.memory_space<vmem>>, vector<1x1x32xf32>
    %386 = vector.shape_cast %385 : vector<1x1x32xf32> to vector<1x32xf32>
    %cst_173 = arith.constant dense<0.000000e+00> : vector<56xf32>
    %387 = vector.multi_reduction <add>, %382, %cst_173 [1] : vector<56x32xf32> to vector<56xf32>
    %388 = vector.shape_cast %387 : vector<56xf32> to vector<56x1xf32>
    %cst_174 = arith.constant 3.200000e+01 : f32
    %389 = vector.broadcast %cst_174 : f32 to vector<56x1xf32>
    %390 = arith.divf %388, %389 : vector<56x1xf32>
    %391 = vector.broadcast %390 : vector<56x1xf32> to vector<56x32xf32>
    %392 = arith.subf %382, %391 : vector<56x32xf32>
    %393 = arith.mulf %392, %392 : vector<56x32xf32>
    %cst_175 = arith.constant dense<0.000000e+00> : vector<56xf32>
    %394 = vector.multi_reduction <add>, %393, %cst_175 [1] : vector<56x32xf32> to vector<56xf32>
    %395 = vector.shape_cast %394 : vector<56xf32> to vector<56x1xf32>
    %cst_176 = arith.constant 3.200000e+01 : f32
    %396 = vector.broadcast %cst_176 : f32 to vector<56x1xf32>
    %397 = arith.divf %395, %396 : vector<56x1xf32>
    %398 = vector.broadcast %390 : vector<56x1xf32> to vector<56x32xf32>
    %399 = arith.subf %382, %398 : vector<56x32xf32>
    %cst_177 = arith.constant 9.99999974E-6 : f32
    %400 = vector.broadcast %cst_177 : f32 to vector<56x1xf32>
    %401 = arith.addf %397, %400 : vector<56x1xf32>
    %402 = math.rsqrt %401 : vector<56x1xf32>
    %403 = vector.broadcast %402 : vector<56x1xf32> to vector<56x32xf32>
    %404 = arith.mulf %399, %403 : vector<56x32xf32>
    %405 = vector.broadcast %384 : vector<1x32xf32> to vector<56x32xf32>
    %406 = arith.mulf %404, %405 : vector<56x32xf32>
    %407 = vector.broadcast %386 : vector<1x32xf32> to vector<56x32xf32>
    %408 = arith.addf %406, %407 : vector<56x32xf32>
    %409 = arith.truncf %408 : vector<56x32xf32> to vector<56x32xbf16>
    %c1_178 = arith.constant 1 : index
    %c0_179 = arith.constant 0 : index
    %c0_180 = arith.constant 0 : index
    %410 = vector.load %arg11[%c1_178, %c0_179, %c0_180] : memref<2x32x128xbf16, #tpu.memory_space<vmem>>, vector<1x32x128xbf16>
    %411 = vector.shape_cast %410 : vector<1x32x128xbf16> to vector<32x128xbf16>
    %cst_181 = arith.constant dense<0.000000e+00> : vector<56x128xf32>
    %412 = tpu.matmul %409, %411, %cst_181 {dimension_numbers = #tpu.dot_dimension_numbers<[1], [0], [0], [1], [0, 0, 1, 1], [], []>} : vector<56x32xbf16>, vector<32x128xbf16>, vector<56x128xf32> -> vector<56x128xf32>
    %c1_182 = arith.constant 1 : index
    %c0_183 = arith.constant 0 : index
    %c0_184 = arith.constant 0 : index
    %413 = vector.load %arg12[%c1_182, %c0_183, %c0_184] : memref<2x1x128xf32, #tpu.memory_space<vmem>>, vector<1x1x128xf32>
    %414 = vector.shape_cast %413 : vector<1x1x128xf32> to vector<1x128xf32>
    %415 = vector.broadcast %414 : vector<1x128xf32> to vector<56x128xf32>
    %416 = arith.addf %412, %415 : vector<56x128xf32>
    %c1_185 = arith.constant 1 : index
    %c0_186 = arith.constant 0 : index
    %c0_187 = arith.constant 0 : index
    %417 = vector.load %arg13[%c1_185, %c0_186, %c0_187] : memref<2x32x128xbf16, #tpu.memory_space<vmem>>, vector<1x32x128xbf16>
    %418 = vector.shape_cast %417 : vector<1x32x128xbf16> to vector<32x128xbf16>
    %cst_188 = arith.constant dense<0.000000e+00> : vector<56x128xf32>
    %419 = tpu.matmul %409, %418, %cst_188 {dimension_numbers = #tpu.dot_dimension_numbers<[1], [0], [0], [1], [0, 0, 1, 1], [], []>} : vector<56x32xbf16>, vector<32x128xbf16>, vector<56x128xf32> -> vector<56x128xf32>
    %c1_189 = arith.constant 1 : index
    %c0_190 = arith.constant 0 : index
    %c0_191 = arith.constant 0 : index
    %420 = vector.load %arg14[%c1_189, %c0_190, %c0_191] : memref<2x1x128xf32, #tpu.memory_space<vmem>>, vector<1x1x128xf32>
    %421 = vector.shape_cast %420 : vector<1x1x128xf32> to vector<1x128xf32>
    %422 = vector.broadcast %421 : vector<1x128xf32> to vector<56x128xf32>
    %423 = arith.addf %419, %422 : vector<56x128xf32>
    %cst_192 = arith.constant 5.000000e-01 : f32
    %424 = vector.broadcast %cst_192 : f32 to vector<56x128xf32>
    %425 = arith.mulf %424, %423 : vector<56x128xf32>
    %cst_193 = arith.constant 0.707106769 : f32
    %426 = vector.broadcast %cst_193 : f32 to vector<56x128xf32>
    %427 = arith.mulf %423, %426 : vector<56x128xf32>
    %cst_194 = arith.constant 0.000000e+00 : f32
    %428 = vector.broadcast %cst_194 : f32 to vector<56x128xf32>
    %429 = arith.cmpf oge, %427, %428 : vector<56x128xf32>
    %cst_195 = arith.constant 1.000000e+00 : f32
    %cst_196 = arith.constant -1.000000e+00 : f32
    %430 = vector.broadcast %cst_195 : f32 to vector<56x128xf32>
    %431 = vector.broadcast %cst_196 : f32 to vector<56x128xf32>
    %432 = arith.select %429, %430, %431 : vector<56x128xi1>, vector<56x128xf32>
    %433 = math.absf %427 : vector<56x128xf32>
    %cst_197 = arith.constant 0.327591091 : f32
    %434 = vector.broadcast %cst_197 : f32 to vector<56x128xf32>
    %435 = arith.mulf %434, %433 : vector<56x128xf32>
    %cst_198 = arith.constant 1.000000e+00 : f32
    %436 = vector.broadcast %cst_198 : f32 to vector<56x128xf32>
    %437 = arith.addf %436, %435 : vector<56x128xf32>
    %cst_199 = arith.constant 1.000000e+00 : f32
    %438 = vector.broadcast %cst_199 : f32 to vector<56x128xf32>
    %439 = arith.divf %438, %437 : vector<56x128xf32>
    %cst_200 = arith.constant 1.06140542 : f32
    %440 = vector.broadcast %cst_200 : f32 to vector<56x128xf32>
    %441 = arith.mulf %439, %440 : vector<56x128xf32>
    %cst_201 = arith.constant -1.45315206 : f32
    %442 = vector.broadcast %cst_201 : f32 to vector<56x128xf32>
    %443 = arith.addf %442, %441 : vector<56x128xf32>
    %444 = arith.mulf %439, %443 : vector<56x128xf32>
    %cst_202 = arith.constant 1.42141378 : f32
    %445 = vector.broadcast %cst_202 : f32 to vector<56x128xf32>
    %446 = arith.addf %445, %444 : vector<56x128xf32>
    %447 = arith.mulf %439, %446 : vector<56x128xf32>
    %cst_203 = arith.constant -0.284496725 : f32
    %448 = vector.broadcast %cst_203 : f32 to vector<56x128xf32>
    %449 = arith.addf %448, %447 : vector<56x128xf32>
    %450 = arith.mulf %439, %449 : vector<56x128xf32>
    %cst_204 = arith.constant 0.254829586 : f32
    %451 = vector.broadcast %cst_204 : f32 to vector<56x128xf32>
    %452 = arith.addf %451, %450 : vector<56x128xf32>
    %453 = arith.mulf %439, %452 : vector<56x128xf32>
    %cst_205 = arith.constant 0.000000e+00 : f32
    %454 = vector.broadcast %cst_205 : f32 to vector<56x128xf32>
    %455 = arith.subf %454, %433 : vector<56x128xf32>
    %456 = arith.mulf %455, %433 : vector<56x128xf32>
    %457 = math.exp %456 : vector<56x128xf32>
    %458 = arith.mulf %453, %457 : vector<56x128xf32>
    %cst_206 = arith.constant 1.000000e+00 : f32
    %459 = vector.broadcast %cst_206 : f32 to vector<56x128xf32>
    %460 = arith.subf %459, %458 : vector<56x128xf32>
    %461 = arith.mulf %432, %460 : vector<56x128xf32>
    %cst_207 = arith.constant 1.000000e+00 : f32
    %462 = vector.broadcast %cst_207 : f32 to vector<56x128xf32>
    %463 = arith.addf %462, %461 : vector<56x128xf32>
    %464 = arith.mulf %425, %463 : vector<56x128xf32>
    %465 = arith.mulf %416, %464 : vector<56x128xf32>
    %466 = arith.truncf %465 : vector<56x128xf32> to vector<56x128xbf16>
    %c1_208 = arith.constant 1 : index
    %c0_209 = arith.constant 0 : index
    %c0_210 = arith.constant 0 : index
    %467 = vector.load %arg15[%c1_208, %c0_209, %c0_210] : memref<2x128x32xbf16, #tpu.memory_space<vmem>>, vector<1x128x32xbf16>
    %468 = vector.shape_cast %467 : vector<1x128x32xbf16> to vector<128x32xbf16>
    %cst_211 = arith.constant dense<0.000000e+00> : vector<56x32xf32>
    %469 = tpu.matmul %466, %468, %cst_211 {dimension_numbers = #tpu.dot_dimension_numbers<[1], [0], [0], [1], [0, 0, 1, 1], [], []>} : vector<56x128xbf16>, vector<128x32xbf16>, vector<56x32xf32> -> vector<56x32xf32>
    %c1_212 = arith.constant 1 : index
    %c0_213 = arith.constant 0 : index
    %c0_214 = arith.constant 0 : index
    %470 = vector.load %arg16[%c1_212, %c0_213, %c0_214] : memref<2x1x32xf32, #tpu.memory_space<vmem>>, vector<1x1x32xf32>
    %471 = vector.shape_cast %470 : vector<1x1x32xf32> to vector<1x32xf32>
    %472 = vector.broadcast %471 : vector<1x32xf32> to vector<56x32xf32>
    %473 = arith.addf %469, %472 : vector<56x32xf32>
    %474 = arith.addf %473, %408 : vector<56x32xf32>
    %475 = arith.truncf %474 : vector<56x32xf32> to vector<56x32xbf16>
    %c0_215 = arith.constant 0 : index
    %c0_216 = arith.constant 0 : index
    %476 = vector.load %arg17[%c0_215, %c0_216] : memref<32x128xbf16, #tpu.memory_space<vmem>>, vector<32x128xbf16>
    %cst_217 = arith.constant dense<0.000000e+00> : vector<56x128xf32>
    %477 = tpu.matmul %475, %476, %cst_217 {dimension_numbers = #tpu.dot_dimension_numbers<[1], [0], [0], [1], [0, 0, 1, 1], [], []>} : vector<56x32xbf16>, vector<32x128xbf16>, vector<56x128xf32> -> vector<56x128xf32>
    %c0_218 = arith.constant 0 : index
    %c0_219 = arith.constant 0 : index
    %478 = vector.load %arg18[%c0_218, %c0_219] : memref<1x128xf32, #tpu.memory_space<vmem>>, vector<1x128xf32>
    %479 = vector.broadcast %478 : vector<1x128xf32> to vector<56x128xf32>
    %480 = arith.addf %477, %479 : vector<56x128xf32>
    %cst_220 = arith.constant 0.000000e+00 : f32
    %481 = vector.broadcast %cst_220 : f32 to vector<56x128xf32>
    %482 = arith.maximumf %480, %481 : vector<56x128xf32>
    %483 = arith.truncf %482 : vector<56x128xf32> to vector<56x128xbf16>
    %c0_221 = arith.constant 0 : index
    %c0_222 = arith.constant 0 : index
    %484 = vector.load %arg19[%c0_221, %c0_222] : memref<128x128xbf16, #tpu.memory_space<vmem>>, vector<128x128xbf16>
    %cst_223 = arith.constant dense<0.000000e+00> : vector<56x128xf32>
    %485 = tpu.matmul %483, %484, %cst_223 {dimension_numbers = #tpu.dot_dimension_numbers<[1], [0], [0], [1], [0, 0, 1, 1], [], []>} : vector<56x128xbf16>, vector<128x128xbf16>, vector<56x128xf32> -> vector<56x128xf32>
    %c0_224 = arith.constant 0 : index
    %c0_225 = arith.constant 0 : index
    %486 = vector.load %arg20[%c0_224, %c0_225] : memref<1x128xf32, #tpu.memory_space<vmem>>, vector<1x128xf32>
    %487 = vector.broadcast %486 : vector<1x128xf32> to vector<56x128xf32>
    %488 = arith.addf %485, %487 : vector<56x128xf32>
    %c0_226 = arith.constant 0 : index
    %c0_227 = arith.constant 0 : index
    %489 = vector.load %arg21[%c0_226, %c0_227] : memref<32x128xbf16, #tpu.memory_space<vmem>>, vector<32x128xbf16>
    %cst_228 = arith.constant dense<0.000000e+00> : vector<56x128xf32>
    %490 = tpu.matmul %475, %489, %cst_228 {dimension_numbers = #tpu.dot_dimension_numbers<[1], [0], [0], [1], [0, 0, 1, 1], [], []>} : vector<56x32xbf16>, vector<32x128xbf16>, vector<56x128xf32> -> vector<56x128xf32>
    %c0_229 = arith.constant 0 : index
    %c0_230 = arith.constant 0 : index
    %491 = vector.load %arg22[%c0_229, %c0_230] : memref<1x128xf32, #tpu.memory_space<vmem>>, vector<1x128xf32>
    %492 = vector.broadcast %491 : vector<1x128xf32> to vector<56x128xf32>
    %493 = arith.addf %490, %492 : vector<56x128xf32>
    %cst_231 = arith.constant 0.000000e+00 : f32
    %494 = vector.broadcast %cst_231 : f32 to vector<56x128xf32>
    %495 = arith.maximumf %493, %494 : vector<56x128xf32>
    %496 = arith.truncf %495 : vector<56x128xf32> to vector<56x128xbf16>
    %c0_232 = arith.constant 0 : index
    %c0_233 = arith.constant 0 : index
    %497 = vector.load %arg23[%c0_232, %c0_233] : memref<128x128xbf16, #tpu.memory_space<vmem>>, vector<128x128xbf16>
    %cst_234 = arith.constant dense<0.000000e+00> : vector<56x128xf32>
    %498 = tpu.matmul %496, %497, %cst_234 {dimension_numbers = #tpu.dot_dimension_numbers<[1], [0], [0], [1], [0, 0, 1, 1], [], []>} : vector<56x128xbf16>, vector<128x128xbf16>, vector<56x128xf32> -> vector<56x128xf32>
    %c0_235 = arith.constant 0 : index
    %c0_236 = arith.constant 0 : index
    %499 = vector.load %arg24[%c0_235, %c0_236] : memref<1x128xf32, #tpu.memory_space<vmem>>, vector<1x128xf32>
    %500 = vector.broadcast %499 : vector<1x128xf32> to vector<56x128xf32>
    %501 = arith.addf %498, %500 : vector<56x128xf32>
    %502 = vector.broadcast %2 : vector<56x1xf32> to vector<56x128xf32>
    %503 = arith.mulf %502, %488 : vector<56x128xf32>
    %cst_237 = arith.constant 1.000000e+00 : f32
    %504 = vector.broadcast %cst_237 : f32 to vector<56x1xf32>
    %505 = arith.subf %504, %2 : vector<56x1xf32>
    %506 = vector.broadcast %505 : vector<56x1xf32> to vector<56x128xf32>
    %507 = arith.mulf %506, %501 : vector<56x128xf32>
    %508 = arith.addf %503, %507 : vector<56x128xf32>
    %c0_238 = arith.constant 0 : index
    %c0_239 = arith.constant 0 : index
    %509 = vector.load %arg25[%c0_238, %c0_239] : memref<56x128xf32, #tpu.memory_space<vmem>>, vector<56x128xf32>
    tpu.vector_store %arg25[%c0_238, %c0_239], %508 {strides = array<i32>} : memref<56x128xf32, #tpu.memory_space<vmem>>, vector<56x128xf32>,
    return
  }
  func.func @transform_0(%arg0: i32) -> (i32, i32) {
    %c0_i32 = arith.constant 0 : i32
    %c0_i32_0 = arith.constant 0 : i32
    return %arg0, %c0_i32 : i32, i32
  }
  func.func @transform_1(%arg0: i32) -> (i32, i32) {
    %c0_i32 = arith.constant 0 : i32
    %c0_i32_0 = arith.constant 0 : i32
    %c0_i32_1 = arith.constant 0 : i32
    return %c0_i32, %c0_i32_0 : i32, i32
  }
  func.func @transform_2(%arg0: i32) -> (i32, i32) {
    %c0_i32 = arith.constant 0 : i32
    %c0_i32_0 = arith.constant 0 : i32
    %c0_i32_1 = arith.constant 0 : i32
    return %c0_i32, %c0_i32_0 : i32, i32
  }
  func.func @transform_3(%arg0: i32) -> (i32, i32, i32) {
    %c0_i32 = arith.constant 0 : i32
    %c0_i32_0 = arith.constant 0 : i32
    %c0_i32_1 = arith.constant 0 : i32
    %c0_i32_2 = arith.constant 0 : i32
    return %c0_i32, %c0_i32_0, %c0_i32_1 : i32, i32, i32
  }
  func.func @transform_4(%arg0: i32) -> (i32, i32, i32) {
    %c0_i32 = arith.constant 0 : i32
    %c0_i32_0 = arith.constant 0 : i32
    %c0_i32_1 = arith.constant 0 : i32
    %c0_i32_2 = arith.constant 0 : i32
    return %c0_i32, %c0_i32_0, %c0_i32_1 : i32, i32, i32
  }
  func.func @transform_5(%arg0: i32) -> (i32, i32, i32) {
    %c0_i32 = arith.constant 0 : i32
    %c0_i32_0 = arith.constant 0 : i32
    %c0_i32_1 = arith.constant 0 : i32
    %c0_i32_2 = arith.constant 0 : i32
    return %c0_i32, %c0_i32_0, %c0_i32_1 : i32, i32, i32
  }
  func.func @transform_6(%arg0: i32) -> (i32, i32, i32, i32) {
    %c0_i32 = arith.constant 0 : i32
    %c0_i32_0 = arith.constant 0 : i32
    %c0_i32_1 = arith.constant 0 : i32
    %c0_i32_2 = arith.constant 0 : i32
    %c0_i32_3 = arith.constant 0 : i32
    return %c0_i32, %c0_i32_0, %c0_i32_1, %c0_i32_2 : i32, i32, i32, i32
  }
  func.func @transform_7(%arg0: i32) -> (i32, i32, i32) {
    %c0_i32 = arith.constant 0 : i32
    %c0_i32_0 = arith.constant 0 : i32
    %c0_i32_1 = arith.constant 0 : i32
    %c0_i32_2 = arith.constant 0 : i32
    return %c0_i32, %c0_i32_0, %c0_i32_1 : i32, i32, i32
  }
  func.func @transform_8(%arg0: i32) -> (i32, i32, i32) {
    %c0_i32 = arith.constant 0 : i32
    %c0_i32_0 = arith.constant 0 : i32
    %c0_i32_1 = arith.constant 0 : i32
    %c0_i32_2 = arith.constant 0 : i32
    return %c0_i32, %c0_i32_0, %c0_i32_1 : i32, i32, i32
  }
  func.func @transform_9(%arg0: i32) -> (i32, i32, i32) {
    %c0_i32 = arith.constant 0 : i32
    %c0_i32_0 = arith.constant 0 : i32
    %c0_i32_1 = arith.constant 0 : i32
    %c0_i32_2 = arith.constant 0 : i32
    return %c0_i32, %c0_i32_0, %c0_i32_1 : i32, i32, i32
  }
  func.func @transform_10(%arg0: i32) -> (i32, i32, i32) {
    %c0_i32 = arith.constant 0 : i32
    %c0_i32_0 = arith.constant 0 : i32
    %c0_i32_1 = arith.constant 0 : i32
    %c0_i32_2 = arith.constant 0 : i32
    return %c0_i32, %c0_i32_0, %c0_i32_1 : i32, i32, i32
  }
  func.func @transform_11(%arg0: i32) -> (i32, i32, i32) {
    %c0_i32 = arith.constant 0 : i32
    %c0_i32_0 = arith.constant 0 : i32
    %c0_i32_1 = arith.constant 0 : i32
    %c0_i32_2 = arith.constant 0 : i32
    return %c0_i32, %c0_i32_0, %c0_i32_1 : i32, i32, i32
  }
  func.func @transform_12(%arg0: i32) -> (i32, i32, i32) {
    %c0_i32 = arith.constant 0 : i32
    %c0_i32_0 = arith.constant 0 : i32
    %c0_i32_1 = arith.constant 0 : i32
    %c0_i32_2 = arith.constant 0 : i32
    return %c0_i32, %c0_i32_0, %c0_i32_1 : i32, i32, i32
  }
  func.func @transform_13(%arg0: i32) -> (i32, i32, i32) {
    %c0_i32 = arith.constant 0 : i32
    %c0_i32_0 = arith.constant 0 : i32
    %c0_i32_1 = arith.constant 0 : i32
    %c0_i32_2 = arith.constant 0 : i32
    return %c0_i32, %c0_i32_0, %c0_i32_1 : i32, i32, i32
  }
  func.func @transform_14(%arg0: i32) -> (i32, i32, i32) {
    %c0_i32 = arith.constant 0 : i32
    %c0_i32_0 = arith.constant 0 : i32
    %c0_i32_1 = arith.constant 0 : i32
    %c0_i32_2 = arith.constant 0 : i32
    return %c0_i32, %c0_i32_0, %c0_i32_1 : i32, i32, i32
  }
  func.func @transform_15(%arg0: i32) -> (i32, i32, i32) {
    %c0_i32 = arith.constant 0 : i32
    %c0_i32_0 = arith.constant 0 : i32
    %c0_i32_1 = arith.constant 0 : i32
    %c0_i32_2 = arith.constant 0 : i32
    return %c0_i32, %c0_i32_0, %c0_i32_1 : i32, i32, i32
  }
  func.func @transform_16(%arg0: i32) -> (i32, i32) {
    %c0_i32 = arith.constant 0 : i32
    %c0_i32_0 = arith.constant 0 : i32
    %c0_i32_1 = arith.constant 0 : i32
    return %c0_i32, %c0_i32_0 : i32, i32
  }
  func.func @transform_17(%arg0: i32) -> (i32, i32) {
    %c0_i32 = arith.constant 0 : i32
    %c0_i32_0 = arith.constant 0 : i32
    %c0_i32_1 = arith.constant 0 : i32
    return %c0_i32, %c0_i32_0 : i32, i32
  }
  func.func @transform_18(%arg0: i32) -> (i32, i32) {
    %c0_i32 = arith.constant 0 : i32
    %c0_i32_0 = arith.constant 0 : i32
    %c0_i32_1 = arith.constant 0 : i32
    return %c0_i32, %c0_i32_0 : i32, i32
  }
  func.func @transform_19(%arg0: i32) -> (i32, i32) {
    %c0_i32 = arith.constant 0 : i32
    %c0_i32_0 = arith.constant 0 : i32
    %c0_i32_1 = arith.constant 0 : i32
    return %c0_i32, %c0_i32_0 : i32, i32
  }
  func.func @transform_20(%arg0: i32) -> (i32, i32) {
    %c0_i32 = arith.constant 0 : i32
    %c0_i32_0 = arith.constant 0 : i32
    %c0_i32_1 = arith.constant 0 : i32
    return %c0_i32, %c0_i32_0 : i32, i32
  }
  func.func @transform_21(%arg0: i32) -> (i32, i32) {
    %c0_i32 = arith.constant 0 : i32
    %c0_i32_0 = arith.constant 0 : i32
    %c0_i32_1 = arith.constant 0 : i32
    return %c0_i32, %c0_i32_0 : i32, i32
  }
  func.func @transform_22(%arg0: i32) -> (i32, i32) {
    %c0_i32 = arith.constant 0 : i32
    %c0_i32_0 = arith.constant 0 : i32
    %c0_i32_1 = arith.constant 0 : i32
    return %c0_i32, %c0_i32_0 : i32, i32
  }
  func.func @transform_23(%arg0: i32) -> (i32, i32) {
    %c0_i32 = arith.constant 0 : i32
    %c0_i32_0 = arith.constant 0 : i32
    %c0_i32_1 = arith.constant 0 : i32
    return %c0_i32, %c0_i32_0 : i32, i32
  }
  func.func @transform_24(%arg0: i32) -> (i32, i32) {
    %c0_i32 = arith.constant 0 : i32
    %c0_i32_0 = arith.constant 0 : i32
    return %arg0, %c0_i32 : i32, i32
  }
}

</mosaic_0001>

<bundles_post_ra>
// kernel: tpu_custom_call.1
= control target key start
LH: loop header
LB: loop body
LE: loop exit
PB: predicated region body
PF: predicated region fallthrough
CT: control target
= control target key end

     0   :  { %s10784_s0 = inlined_call_operand.vmem [shape: f32[112,32], index: 0, kind: input, shape index: {}]   ;;  %s10785_s1 = inlined_call_operand.vmem [shape: f32[56,56], index: 1, kind: input, shape index: {}]   ;;  %s10786_s2 = inlined_call_operand.vmem [shape: f32[56,1], index: 2, kind: input, shape index: {}]   ;;  %s10787_s3 = inlined_call_operand.hbm [shape: f32[2,1,32], index: 3, kind: input, shape index: {}]   ;;  %s10788_s4 = inlined_call_operand.hbm [shape: f32[2,1,32], index: 4, kind: input, shape index: {}]   ;;  %s10789_s5 = inlined_call_operand.vmem [shape: bf16[2,32,192], index: 5, kind: input, shape index: {}]   ;;  %s10790_s6 = inlined_call_operand.vmem [shape: bf16[2,4,16,32], index: 6, kind: input, shape index: {}]   ;;  %s10791_s7 = inlined_call_operand.hbm [shape: f32[2,1,32], index: 7, kind: input, shape index: {}]   ;;  %s10792_s8 = inlined_call_operand.hbm [shape: f32[2,1,32], index: 8, kind: input, shape index: {}]   ;;  %s10793_s9 = inlined_call_operand.hbm [shape: f32[2,1,32], index: 9, kind: input, shape index: {}]   ;;  %s10794_s10 = inlined_call_operand.vmem [shape: bf16[2,32,128], index: 10, kind: input, shape index: {}]   ;;  %s10795_s11 = inlined_call_operand.hbm [shape: f32[2,1,128], index: 11, kind: input, shape index: {}]   ;;  %s10796_s12 = inlined_call_operand.hbm [shape: bf16[2,32,128], index: 12, kind: input, shape index: {}]   ;;  %s10797_s13 = inlined_call_operand.hbm [shape: f32[2,1,128], index: 13, kind: input, shape index: {}]   ;;  %s10798_s14 = inlined_call_operand.vmem [shape: bf16[2,128,32], index: 14, kind: input, shape index: {}]   ;;  %s10799_s15 = inlined_call_operand.hbm [shape: f32[2,1,32], index: 15, kind: input, shape index: {}]   ;;  %s10800_s16 = inlined_call_operand.hbm [shape: bf16[32,128], index: 16, kind: input, shape index: {}]   ;;  %s10801_s17 = inlined_call_operand.vmem [shape: f32[1,128], index: 17, kind: input, shape index: {}]   ;;  %s10802_s18 = inlined_call_operand.vmem [shape: bf16[128,128], index: 18, kind: input, shape index: {}]   ;;  %s10803_s19 = inlined_call_operand.hbm [shape: f32[1,128], index: 19, kind: input, shape index: {}]   ;;  %s10804_s20 = inlined_call_operand.vmem [shape: bf16[32,128], index: 20, kind: input, shape index: {}]   ;;  %s10805_s21 = inlined_call_operand.vmem [shape: f32[1,128], index: 21, kind: input, shape index: {}]   ;;  %s10806_s22 = inlined_call_operand.vmem [shape: bf16[128,128], index: 22, kind: input, shape index: {}]   ;;  %s10807_s23 = inlined_call_operand.vmem [shape: f32[1,128], index: 23, kind: input, shape index: {}]   ;;  %s10808_s24 = inlined_call_operand.hbm [shape: f32[112,128], index: 24, kind: output, shape index: {}]  }
   0x1   :  { %10833 = sst [smem:[#allocation35_spill]] %s10784_s0 }
   0x2   :  { %10834 = sst [smem:[#allocation36_spill]] %s10785_s1 }
   0x3   :  { %10835 = sst [smem:[#allocation37_spill]] %s10786_s2 }
   0x4   :  { %10836 = sst [smem:[#allocation38_spill]] %s10787_s3 }
   0x5   :  { %10837 = sst [smem:[#allocation39_spill]] %s10788_s4 }
   0x6   :  { %10838 = sst [smem:[#allocation40_spill]] %s10789_s5 }
   0x7   :  { %10839 = sst [smem:[#allocation41_spill]] %s10790_s6 }
   0x8   :  { %10840 = sst [smem:[#allocation42_spill]] %s10791_s7 }
   0x9   :  { %10841 = sst [smem:[#allocation43_spill]] %s10792_s8 }
   0xa   :  { %10842 = sst [smem:[#allocation44_spill]] %s10807_s23 }
   0xb   :  { %10843 = sst [smem:[#allocation45_spill]] %s10808_s24 }
   0xc   :  { %29 = vsyncpa [#allocation3], 0 }
   0xd   :  { %30 = vsyncpa [#allocation6], 0 }
   0xe   :  { %31 = vsyncpa [#allocation9], 0 }
   0xf   :  { %32 = vsyncpa [#allocation12], 0 }
  0x10   :  { %33 = vsyncpa [#allocation15], 0 }
  0x11   :  { %34 = vsyncpa [#allocation18], 0 }
  0x12   :  { %35 = vsyncpa [#allocation4], 0 }
  0x13   :  { %37 = vsyncpa [#allocation4 + $0x1], 0  ;;  %s8645_s5 = smov 0   ;;  %s8647_s26 = smov 0  }
  0x14   :  { %s8649_s27 = smov 0   ;;  %s8651_s28 = smov 0  }
  0x15 LB: > { %10844 = sst [smem:[#allocation28_spill]] %s8479_s5  ;;  %s8666_s6 = sadd.s32 4294967295, %s8491_s28   ;;  %s8491_s28 = sphi %s8651_s28, %s10888_s28   ;;  %s8487_s27 = sphi %s8649_s27, %s10890_s27   ;;  %s8483_s26 = sphi %s8647_s26, %s10892_s26   ;;  %s8479_s5 = sphi %s8645_s5, %s10891_s5  }
  0x16   : > { %10845 = sst [smem:[#allocation29_spill]] %s8487_s27  ;;  %s6473_s2 = sadd.s32 4294967294, %s8491_s28  }
  0x17   : > { %10846 = sst [smem:[#allocation30_spill]] %s8491_s28  ;;  %s8670_s29 = sadd.s32 1, %s8491_s28  }
  0x18   : > { %10847 = sst [smem:[#allocation31_spill]] %s8670_s29  ;;  %s559_s0 = sadd.s32 1, %s8487_s27 }
  0x19   : > { %s556_s7 = ssub.s32 %s8491_s28, %s8670_s29  ;;  %p569_p0 = scmp.ne.s32.totalorder %s8487_s27, %s8483_s26 }
  0x1a   : > { %p557_p1 = scmp.eq.s32.totalorder %s556_s7, 0  ;;  %p570_p2 = scmp.eq.s32.totalorder %s8666_s6, 1 }
  0x1b   : > { %p575_p3 = scmp.ne.s32.totalorder %s8483_s26, %s8479_s5  ;;  %p576_p4 = scmp.eq.s32.totalorder %s6473_s2, 1 }
  0x1c   : > { %s8681_s30 = scalar_select %p557_p1, %s8487_s27, %s559_s0  }
  0x1d   : > { %p8683_p5 = por %p570_p2, %p569_p0  ;;  %p8687_p6 = por %p576_p4, %p575_p3 }
  0x1e   : > { %10848 = sst [smem:[#allocation32_spill]] %s8681_s30  ;;  %p6474_p7 = scmp.ge.s32.totalorder %s8491_s28, 1 }
  0x1f   : > { %s10849_s3 = scalar_select %p8683_p5, 1, 0 }
  0x20   : > { %s10851_s25 = scalar_select %p8687_p6, 1, 0 }
  0x21   : > { %10850 = sst [smem:[#allocation33_spill]] %s10849_s3  ;;  %p583_p8 = scmp.lt.s32.totalorder %s8491_s28, 3 }
  0x22   : > { %10852 = sst [smem:[#allocation34_spill]] %s10851_s25  ;;  %p10822_p9 = scmp.eq.s32.totalorder %s8666_s6, 0 }
  0x23   : > { %p8694_p10 = pnand %p6474_p7, %p583_p8  ;;  %s8493_s4 = smov [#allocation5]  }
  0x24   : > { %s614_s1 = sshll.u32 %s8493_s4, 4  ;;  %s8494_s0 = smov [#allocation8]   ;;  %s615_s1 = int_to_ptr.vmem [resolvable:$true] %s614_s1 }
  0x25   : > { %p7593_p11 = pneg %p8694_p10  ;;  %s646_s7 = sshll.u32 %s8494_s0, 4  ;;  %s647_s7 = int_to_ptr.vmem [resolvable:$true] %s646_s7 }
  0x26   : > { %s8495_s30 = smov [#allocation11]   ;;  %s8132_s25 = scalar_lea.vmem %s615_s1, 32 }
  0x27   : > { %p8702_p12 = pnand %p10822_p9, %p7593_p11  ;;  %s675_s27 = sshll.u32 %s8495_s30, 4  ;;  %s676_s27 = int_to_ptr.vmem [resolvable:$true] %s675_s27 }
  0x28   : > { %p8133_p0 = scmp.ne.s32.totalorder %s615_s1, %s8132_s25  ;;  %p8140_p3 = scmp.lt.s32.totalorder %s615_s1, %s615_s1 }
  0x29   : > { %p8708_p13 = pneg %p8702_p12  ;;  %p8141_p4 = scmp.lt.s32.totalorder %s8132_s25, %s8132_s25 }
  0x2b   : > { %p8135_p1 = pnand %p8133_p0, %p8708_p13  ;;  %p8142_p7 = por %p8141_p4, %p8140_p3 }
  0x2d   : > { %p8136_p2 = pneg %p8135_p1 }
  0x2f   : > { %p8143_p8 = pnand %p8142_p7, %p8136_p2 }
  0x31   : > { %8146 = shalt.err (!%p8143_p8)
}
  0x32   : > { %s8496_s4 = smov 16   ;;  %s8497_s30 = smov 1  }
  0x33   : > { %s10856_s28 = sld [smem:[#allocation39_spill]]  ;;  %s8158_s24 = scalar_lea.vmem %s647_s7, 32 }
  0x34   : > { %p8159_p11 = scmp.ne.s32.totalorder %s647_s7, %s8158_s24  ;;  %p8166_p3 = scmp.lt.s32.totalorder %s647_s7, %s647_s7 }
  0x35   : > { %p8167_p2 = scmp.lt.s32.totalorder %s8158_s24, %s8158_s24 }
  0x36   : > { %p8161_p0 = pnand %p8159_p11, %p8708_p13 }
  0x37   : > { %p8168_p4 = por %p8167_p2, %p8166_p3 }
  0x38   : > { %p8162_p1 = pneg %p8161_p0 }
  0x39   : > { %7599 = dma.hbm_to_vmem [thread:$0]  (!%p8702_p12), %s10856_s28, 32, %s615_s1, [#allocation6], %s8496_s4, %s8496_s4, %s8497_s30  }
  0x3a   : > { %p8169_p7 = pnand %p8168_p4, %p8162_p1 }
  0x3c   : > { %8172 = shalt.err (!%p8169_p7)
}
  0x3d   : > { %s10857_s23 = sld [smem:[#allocation43_spill]]  ;;  %s8184_s5 = scalar_lea.vmem %s676_s27, 32 }
  0x3e   : > { %p8185_p8 = scmp.ne.s32.totalorder %s676_s27, %s8184_s5  ;;  %p8192_p9 = scmp.lt.s32.totalorder %s676_s27, %s676_s27 }
  0x3f   : > { %p8193_p3 = scmp.lt.s32.totalorder %s8184_s5, %s8184_s5 }
  0x40   : > { %p8187_p11 = pnand %p8185_p8, %p8708_p13 }
  0x41   : > { %p8194_p1 = por %p8193_p3, %p8192_p9 }
  0x42   : > { %p8188_p0 = pneg %p8187_p11 }
  0x43   : > { %7605 = dma.hbm_to_vmem [thread:$0]  (!%p8702_p12), %s10857_s23, 32, %s647_s7, [#allocation9], %s8496_s4, %s8496_s4, %s8497_s30  }
  0x44   : > { %p8195_p2 = pnand %p8194_p1, %p8188_p0 }
  0x46   : > { %8198 = shalt.err (!%p8195_p2)
}
  0x47   : > { %7611 = dma.hbm_to_vmem [thread:$0]  (!%p8702_p12), %s10795_s11, 32, %s676_s27, [#allocation12], %s8496_s4, %s8496_s4, %s8497_s30  }
  0x48   : > { %s8498_s23 = smov [#allocation14]  }
  0x49   : > { %s701_s3 = sshll.u32 %s8498_s23, 4  ;;  %s702_s3 = int_to_ptr.vmem [resolvable:$true] %s701_s3 }
  0x4a   : > { %s8210_s1 = scalar_lea.vmem %s702_s3, 32  ;;  %p8218_p8 = scmp.lt.s32.totalorder %s702_s3, %s702_s3 }
  0x4b   : > { %p8211_p4 = scmp.ne.s32.totalorder %s702_s3, %s8210_s1  ;;  %p8219_p11 = scmp.lt.s32.totalorder %s8210_s1, %s8210_s1 }
  0x4d   : > { %p8213_p7 = pnand %p8211_p4, %p8708_p13  ;;  %p8220_p0 = por %p8219_p11, %p8218_p8 }
  0x4f   : > { %p8214_p9 = pneg %p8213_p7 }
  0x51   : > { %p8221_p3 = pnand %p8220_p0, %p8214_p9 }
  0x53   : > { %8224 = shalt.err (!%p8221_p3)
}
  0x54   : > { %7617 = dma.hbm_to_vmem [thread:$0]  (!%p8702_p12), %s10797_s13, 32, %s702_s3, [#allocation15], %s8496_s4, %s8496_s4, %s8497_s30  }
  0x55   : > { %s8499_s0 = smov [#allocation17]   ;;  %s8500_s5 = smov [#allocation2]  }
  0x56   : > { %s730_s25 = sshll.u32 %s8499_s0, 4  ;;  %s601_s24 = sshll.u32 %s8500_s5, 4  ;;  %s731_s25 = int_to_ptr.vmem [resolvable:$true] %s730_s25  ;;  %s602_s24 = int_to_ptr.vmem [resolvable:$true] %s601_s24 }
  0x57   : > { %s8236_s28 = scalar_lea.vmem %s731_s25, 256  ;;  %p8244_p7 = scmp.lt.s32.totalorder %s731_s25, %s731_s25 }
  0x58   : > { %p8237_p1 = scmp.ne.s32.totalorder %s731_s25, %s8236_s28  ;;  %p8245_p9 = scmp.lt.s32.totalorder %s8236_s28, %s8236_s28 }
  0x5a   : > { %p8239_p2 = pnand %p8237_p1, %p8708_p13  ;;  %p8246_p8 = por %p8245_p9, %p8244_p7 }
  0x5c   : > { %p8240_p4 = pneg %p8239_p2 }
  0x5e   : > { %p8247_p11 = pnand %p8246_p8, %p8240_p4 }
  0x60   : > { %8250 = shalt.err (!%p8247_p11)
}
  0x61   : > { %s10823_s23 = smov 64   ;;  %s8502_s3 = smov 4  }
  0x62   : > { %7623 = dma.hbm_to_vmem [thread:$0]  (!%p8702_p12), %s10800_s16, 256, %s731_s25, [#allocation18], %s10823_s23, %s10823_s23, %s8502_s3  }
  0x63   : > { %s8262_s27 = scalar_lea.vmem %s602_s24, 32  ;;  %p8270_p2 = scmp.lt.s32.totalorder %s602_s24, %s602_s24 }
  0x64   : > { %p8263_p0 = scmp.ne.s32.totalorder %s602_s24, %s8262_s27  ;;  %p8271_p4 = scmp.lt.s32.totalorder %s8262_s27, %s8262_s27 }
  0x66   : > { %p8265_p3 = pnand %p8263_p0, %p8708_p13  ;;  %p8272_p7 = por %p8271_p4, %p8270_p2 }
  0x68   : > { %p8266_p1 = pneg %p8265_p3 }
  0x6a   : > { %p8273_p9 = pnand %p8272_p7, %p8266_p1 }
  0x6c   : > { %8276 = shalt.err (!%p8273_p9)
}
  0x6d   : > { %s10858_s28 = sld [smem:[#allocation38_spill]]  ;;  %s8503_s25 = smov [#allocation7]  }
  0x6e   : > { %s633_s1 = sshll.u32 %s8503_s25, 4  ;;  %s8504_s7 = smov [#allocation10]   ;;  %s634_s1 = int_to_ptr.vmem [resolvable:$true] %s633_s1 }
  0x6f   : > { %s659_s23 = sshll.u32 %s8504_s7, 4  ;;  %s8288_s27 = scalar_lea.vmem %s634_s1, 32  ;;  %s660_s23 = int_to_ptr.vmem [resolvable:$true] %s659_s23 }
  0x70   : > { %p8289_p8 = scmp.ne.s32.totalorder %s634_s1, %s8288_s27  ;;  %p8296_p3 = scmp.lt.s32.totalorder %s634_s1, %s634_s1 }
  0x71   : > { %p8297_p1 = scmp.lt.s32.totalorder %s8288_s27, %s8288_s27 }
  0x72   : > { %p8291_p11 = pnand %p8289_p8, %p8708_p13 }
  0x73   : > { %7596 = dma.hbm_to_vmem [thread:$0]  (!%p8702_p12), %s10858_s28, 32, %s602_s24, [#allocation3], %s8496_s4, %s8496_s4, %s8497_s30  }
  0x74   : > { %p8292_p0 = pneg %p8291_p11  ;;  %p8298_p2 = por %p8297_p1, %p8296_p3 }
  0x76   : > { %p8299_p4 = pnand %p8298_p2, %p8292_p0 }
  0x78   : > { %8302 = shalt.err (!%p8299_p4)
}
  0x79   : > { %s10859_s5 = sld [smem:[#allocation42_spill]]  ;;  %s8314_s28 = scalar_lea.vmem %s660_s23, 32 }
  0x7a   : > { %p8315_p7 = scmp.ne.s32.totalorder %s660_s23, %s8314_s28  ;;  %p8322_p11 = scmp.lt.s32.totalorder %s660_s23, %s660_s23 }
  0x7b   : > { %p8323_p6 = scmp.lt.s32.totalorder %s8314_s28, %s8314_s28 }
  0x7c   : > { %p8317_p9 = pnand %p8315_p7, %p8708_p13 }
  0x7d   : > { %p8324_p3 = por %p8323_p6, %p8322_p11 }
  0x7e   : > { %p8318_p8 = pneg %p8317_p9 }
  0x7f   : > { %7602 = dma.hbm_to_vmem [thread:$0]  (!%p8702_p12), %s10859_s5, 32, %s634_s1, [#allocation6], %s8496_s4, %s8496_s4, %s8497_s30  }
  0x80   : > { %p8325_p0 = pnand %p8324_p3, %p8318_p8 }
  0x82   : > { %8328 = shalt.err (!%p8325_p0)
}
  0x83   : > { %7608 = dma.hbm_to_vmem [thread:$0]  (!%p8702_p12), %s10793_s9, 32, %s660_s23, [#allocation9], %s8496_s4, %s8496_s4, %s8497_s30  }
  0x84   : > { %s8505_s1 = smov [#allocation13]   ;;  %s8506_s24 = smov [#allocation16]  }
  0x85   : > { %s688_s27 = sshll.u32 %s8505_s1, 4  ;;  %s717_s0 = sshll.u32 %s8506_s24, 4  ;;  %s689_s27 = int_to_ptr.vmem [resolvable:$true] %s688_s27  ;;  %s718_s0 = int_to_ptr.vmem [resolvable:$true] %s717_s0 }
  0x86   : > { %s8340_s5 = scalar_lea.vmem %s689_s27, 512  ;;  %p8348_p4 = scmp.lt.s32.totalorder %s689_s27, %s689_s27 }
  0x87   : > { %p8341_p6 = scmp.ne.s32.totalorder %s689_s27, %s8340_s5  ;;  %p8349_p7 = scmp.lt.s32.totalorder %s8340_s5, %s8340_s5 }
  0x89   : > { %p8343_p1 = pnand %p8341_p6, %p8708_p13  ;;  %p8350_p9 = por %p8349_p7, %p8348_p4 }
  0x8b   : > { %p8344_p2 = pneg %p8343_p1 }
  0x8d   : > { %p8351_p8 = pnand %p8350_p9, %p8344_p2 }
  0x8f   : > { %8354 = shalt.err (!%p8351_p8)
}
  0x90   : > { %s10860_s23 = smov 64   ;;  %s8366_s7 = scalar_lea.vmem %s718_s0, 32 }
  0x91   : > { %7614 = dma.hbm_to_vmem [thread:$0]  (!%p8702_p12), %s10796_s12, 512, %s689_s27, [#allocation12], %s10860_s23, %s10860_s23, %s8502_s3  }
  0x92   : > { %p8367_p11 = scmp.ne.s32.totalorder %s718_s0, %s8366_s7  ;;  %p8374_p6 = scmp.lt.s32.totalorder %s718_s0, %s718_s0 }
  0x93   : > { %p8375_p1 = scmp.lt.s32.totalorder %s8366_s7, %s8366_s7 }
  0x94   : > { %p8369_p3 = pnand %p8367_p11, %p8708_p13 }
  0x95   : > { %p8376_p4 = por %p8375_p1, %p8374_p6 }
  0x96   : > { %p8370_p0 = pneg %p8369_p3 }
  0x98   : > { %p8377_p2 = pnand %p8376_p4, %p8370_p0 }
  0x9a   : > { %8380 = shalt.err (!%p8377_p2)
}
  0x9b   : > { %7620 = dma.hbm_to_vmem [thread:$0]  (!%p8702_p12), %s10799_s15, 32, %s718_s0, [#allocation15], %s8496_s4, %s8496_s4, %s8497_s30  }
  0x9c   : > { %s8507_s3 = smov [#allocation19]  }
  0x9d   : > { %s750_s27 = sshll.u32 %s8507_s3, 4  ;;  %s751_s27 = int_to_ptr.vmem [resolvable:$true] %s750_s27 }
  0x9e   : > { %s8392_s5 = scalar_lea.vmem %s751_s27, 16  ;;  %s8399_s23 = scalar_lea.vmem %s751_s27, 32 }
  0x9f   : > { %p8393_p7 = scmp.ne.s32.totalorder %s751_s27, %s8392_s5  ;;  %p8400_p11 = scmp.lt.s32.totalorder %s751_s27, %s751_s27 }
  0xa0   : > { %p8401_p3 = scmp.lt.s32.totalorder %s8399_s23, %s8392_s5 }
  0xa1   : > { %p8395_p9 = pnand %p8393_p7, %p8708_p13 }
  0xa2   : > { %p8402_p0 = por %p8401_p3, %p8400_p11 }
  0xa3   : > { %p8396_p8 = pneg %p8395_p9 }
  0xa5   : > { %p8403_p6 = pnand %p8402_p0, %p8396_p8 }
  0xa7   : > { %8406 = shalt.err (!%p8403_p6)
}
  0xa8   : > { %7626 = dma.hbm_to_vmem [thread:$0]  (!%p8702_p12), %s10803_s19, 16, %s751_s27, [#allocation18]  }
  0xa9   : > { %784 = sbr.rel (%p8694_p10) target bundleno = 7971 (0x1f23), region = 116  ;;  %p10861_p1 = scmp.eq.s32.totalorder (!%p8694_p10), %s8666_s6, 0 }
  0xae   : > { %8450 = dma.done.wait (%p10861_p1), [#allocation3], 32   ;;  %p10862_p13 = pmov %p10861_p1 }
  0xaf   : > { %p10863_p4 = pmov %p10861_p1 }
  0xb0   : > { %8452 = vsyncadd (%p10862_p13), [#allocation3], 4294967264 }
  0xb1   : > { %8454 = dma.done.wait (%p10863_p4), [#allocation6], 64   ;;  %p10864_p2 = pmov %p10861_p1 }
  0xb2   : > { %p10865_p7 = pmov %p10861_p1 }
  0xb3   : > { %8456 = vsyncadd (%p10864_p2), [#allocation6], 4294967232 }
  0xb4   : > { %8458 = dma.done.wait (%p10865_p7), [#allocation9], 64   ;;  %p10866_p12 = pmov %p10861_p1 }
  0xb5   : > { %p10867_p10 = pmov %p10861_p1 }
  0xb6   : > { %8460 = vsyncadd (%p10866_p12), [#allocation9], 4294967232 }
  0xb7   : > { %8462 = dma.done.wait (%p10867_p10), [#allocation12], 544   ;;  %p10868_p9 = pmov %p10861_p1 }
  0xb8   : > { %p10869_p8 = pmov %p10861_p1 }
  0xb9   : > { %8464 = vsyncadd (%p10868_p9), [#allocation12], 4294966752 }
  0xba   : > { %8466 = dma.done.wait (%p10869_p8), [#allocation15], 64   ;;  %p10870_p11 = pmov %p10861_p1 }
  0xbb   : > { %p10871_p3 = pmov %p10861_p1 }
  0xbc   : > { %8468 = vsyncadd (%p10870_p11), [#allocation15], 4294967232 }
  0xbd   : > { %8470 = dma.done.wait (%p10871_p3), [#allocation18], 272   ;;  %p10872_p0 = pmov %p10861_p1 }
  0xbe   : > { %s890_s29 = smul.u32 7, %s8666_s6  ;;  %vm921_vm0 = vcmask 261120   ;;  %s10873_s30 = sld [smem:[#allocation35_spill]]  ;;  %v8508_v52 = vmov 0   ;;  %vm1178_vm1 = vcmask 130048   ;;  %vm1365_vm2 = vcmask 1043456  }
  0xbf   : > { %8472 = vsyncadd (%p10872_p0), [#allocation18], 4294967024  ;;  %s10874_s24 = sld [smem:[#allocation40_spill]]  ;;  %1112 = vmatprep.mubr.bf16.mxu1 %v8508_v52  ;;  %7713 = vset.pattern.permute.xlu1 %v8508_v52  ;;  %s8511_s2 = smov 112   ;;  %vm1267_vm3 = vcmask 457728  }
  0xc0   : > { %p891_p6 = scmp.lt.s32.totalorder %s890_s29, 13  ;;  %7712 = vset.pattern.permute.xlu0 %v8508_v52  ;;  %s8512_s3 = smov 32  }
  0xc1   : > { %s10828_s27 = smov 96   ;;  %s10826_s5 = smov 16  }
  0xc2   : > { %s10894_s29 = smov (!%p891_p6, %s890_s29), 13  ;;  %s10824_s23 = smov 80  }
  0xc3   : > { %s6499_s8 = sshll.u32 %s10894_s29, 3  ;;  %s8509_s29 = smov 64  }
  0xc4   : > { %s894_s0 = scalar_lea.vmem %s10873_s30, %s6499_s8  ;;  %s8510_s8 = smov 48  }
  0xc5   : > { %v898_v0 = vld [vmem:[%s894_s0] sm:$0xff]  ;;  %v900_v1 = vld [vmem:[%s894_s0 + $0x10] sm:$0xff]  ;;  %v899_v2 = vld [vmem:[%s894_s0 + $0x8] sm:$0xff]  ;;  %s10876_s4 = sld [smem:[#allocation41_spill]]  ;;  %s10877_s25 = smov 96  }
  0xc6   : > { %v922_v3 = vsel %vm921_vm0, %v898_v0, 0.0  ;;  %v928_v4 = vsel %vm921_vm0, %v900_v1, 0.0  ;;  %v925_v5 = vsel %vm921_vm0, %v899_v2, 0.0  ;;  %v901_v6 = vld [vmem:[%s894_s0 + $0x18] sm:$0xff]  ;;  %v902_v7 = vld [vmem:[%s894_s0 + $0x20] sm:$0xff]  ;;  %v903_v8 = vld [vmem:[%s894_s0 + $0x28] sm:$0xff] }
  0xc7   : > { %923 = vadd.xlane.f32.xlu0 %v922_v3  ;;  %929 = vadd.xlane.f32.xlu1 %v928_v4  ;;  %v931_v9 = vsel %vm921_vm0, %v901_v6, 0.0  ;;  %v934_v10 = vsel %vm921_vm0, %v902_v7, 0.0  ;;  %v937_v11 = vsel %vm921_vm0, %v903_v8, 0.0  ;;  %v904_v12 = vld [vmem:[%s894_s0 + $0x30] sm:$0xff]  ;;  %v7717_v51 = vld [vmem:[%s10874_s24 + $0x4] ss:$8 sps:$4 sm:$0xff]  }
  0xc8   : > { %v940_v13 = vsel %vm921_vm0, %v904_v12, 0.0  ;;  %v7714_v49 = vld [vmem:[%s10874_s24 + $0x14] ss:$8 sps:$4 sm:$0xff]   ;;  %v7716_v50 = vld [vmem:[%s10874_s24 + $0x10] ss:$8 sps:$4 sm:$0xff]   ;;  %s10875_s0 = sld [smem:[#allocation36_spill]] }
  0xc9   : > { %1092 = vmatprep.subr.bf16.mxu1 %v7714_v49  ;;  %v7719_v53 = vld [vmem:[%s10874_s24] ss:$8 sps:$4 sm:$0xff]   ;;  %s10880_s7 = sld [smem:[#allocation37_spill]] }
  0xca   : > { %1093 = vmatpush1.bf16.msra.mxu1 %v7716_v50 }
  0xcb   : > { %926 = vadd.xlane.f32.xlu0 %v925_v5  ;;  %932 = vadd.xlane.f32.xlu1 %v931_v9 }
  0xcc   : > { %1094 = vmatprep.subr.bf16.mxu1 %v7717_v51 }
  0xce   : > { %1095 = vmatpush1.bf16.msra.mxu1 %v7719_v53 }
  0xcf   : > { %935 = vadd.xlane.f32.xlu0 %v934_v10  ;;  %938 = vadd.xlane.f32.xlu1 %v937_v11 }
  0xd3   : > { %941 = vadd.xlane.f32.xlu0 %v940_v13 }
 0x150   : > { %v924_v14 = vpop.xlane.xlu0 %923  ;;  %v930_v15 = vpop.xlane.xlu1 %929 }
 0x151   : > { %v944_v16 = vmul.f32 0.03125, %v924_v14  ;;  %v946_v17 = vmul.f32 0.03125, %v930_v15 }
 0x153   : > { %v8856_v18 = vsub.f32 %v898_v0, %v944_v16  ;;  %v8858_v19 = vsub.f32 %v900_v1, %v946_v17 }
 0x154   : > { %v927_v20 = vpop.xlane.xlu0 %926  ;;  %v933_v21 = vpop.xlane.xlu1 %932 }
 0x155   : > { %v945_v22 = vmul.f32 0.03125, %v927_v20  ;;  %v947_v23 = vmul.f32 0.03125, %v933_v21  ;;  %v958_v24 = vmul.f32 %v8856_v18, %v8856_v18  ;;  %v960_v25 = vmul.f32 %v8858_v19, %v8858_v19  ;;  %v6501_v20 = vld [vmem:[#allocation5] ss:$0 sm:$0xff] }
 0x157   : > { %v8864_v26 = vsub.f32 %v899_v2, %v945_v22  ;;  %v8866_v27 = vsub.f32 %v901_v6, %v947_v23  ;;  %v965_v28 = vsel %vm921_vm0, %v958_v24, 0.0  ;;  %v971_v31 = vsel %vm921_vm0, %v960_v25, 0.0 }
 0x158   : > { %966 = vadd.xlane.f32.xlu1 %v965_v28  ;;  %v936_v29 = vpop.xlane.xlu0 %935  ;;  %v939_v30 = vpop.xlane.xlu1 %938 }
 0x159   : > { %v948_v32 = vmul.f32 0.03125, %v936_v29  ;;  %v949_v33 = vmul.f32 0.03125, %v939_v30  ;;  %v959_v34 = vmul.f32 %v8864_v26, %v8864_v26  ;;  %v961_v35 = vmul.f32 %v8866_v27, %v8866_v27 }
 0x15b   : > { %v8874_v36 = vsub.f32 %v902_v7, %v948_v32  ;;  %v8876_v37 = vsub.f32 %v903_v8, %v949_v33  ;;  %v968_v38 = vsel %vm921_vm0, %v959_v34, 0.0  ;;  %v974_v41 = vsel %vm921_vm0, %v961_v35, 0.0 }
 0x15c   : > { %972 = vadd.xlane.f32.xlu1 %v971_v31  ;;  %969 = vadd.xlane.f32.xlu0 %v968_v38  ;;  %v942_v39 = vpop.xlane.xlu0 %941 }
 0x15d   : > { %v950_v40 = vmul.f32 0.03125, %v942_v39  ;;  %v962_v42 = vmul.f32 %v8874_v36, %v8874_v36  ;;  %v963_v43 = vmul.f32 %v8876_v37, %v8876_v37 }
 0x15f   : > { %v8884_v44 = vsub.f32 %v904_v12, %v950_v40  ;;  %v977_v45 = vsel %vm921_vm0, %v962_v42, 0.0  ;;  %v980_v46 = vsel %vm921_vm0, %v963_v43, 0.0  ;;  %v6500_v12 = vld [vmem:[#allocation2] ss:$0 sm:$0xff] }
 0x160   : > { %975 = vadd.xlane.f32.xlu0 %v974_v41  ;;  %978 = vadd.xlane.f32.xlu1 %v977_v45 }
 0x161   : > { %v964_v47 = vmul.f32 %v8884_v44, %v8884_v44 }
 0x163   : > { %v983_v48 = vsel %vm921_vm0, %v964_v47, 0.0 }
 0x164   : > { %981 = vadd.xlane.f32.xlu0 %v980_v46  ;;  %984 = vadd.xlane.f32.xlu1 %v983_v48 }
 0x1e1   : > { %v967_v54 = vpop.xlane.xlu1 %966 }
 0x1e2   : > { %v986_v55 = vmul.f32 0.03125, %v967_v54 }
 0x1e4   : > { %v993_v56 = vadd.f32 1e-05, %v986_v55 }
 0x1e5   : > { %v973_v57 = vpop.xlane.xlu1 %972  ;;  %v970_v58 = vpop.xlane.xlu0 %969 }
 0x1e6   : > { %7778 = vrsqrt.f32 %v993_v56  ;;  %v988_v59 = vmul.f32 0.03125, %v973_v57  ;;  %v987_v60 = vmul.f32 0.03125, %v970_v58 }
 0x1e8   : > { %v994_v61 = vadd.f32 1e-05, %v987_v60  ;;  %v995_v62 = vadd.f32 1e-05, %v988_v59 }
 0x1e9   : > { %v976_v63 = vpop.xlane.xlu0 %975  ;;  %v979_v0 = vpop.xlane.xlu1 %978 }
 0x1ea   : > { %v989_v1 = vmul.f32 0.03125, %v976_v63  ;;  %7780 = vrsqrt.f32 %v994_v61  ;;  %v990_v3 = vmul.f32 0.03125, %v979_v0 }
 0x1eb   : > { %7782 = vrsqrt.f32 %v995_v62 }
 0x1ec   : > { %v996_v2 = vadd.f32 1e-05, %v989_v1  ;;  %v997_v8 = vadd.f32 1e-05, %v990_v3 }
 0x1ed   : > { %v982_v4 = vpop.xlane.xlu0 %981  ;;  %v985_v6 = vpop.xlane.xlu1 %984 }
 0x1ee   : > { %v991_v5 = vmul.f32 0.03125, %v982_v4  ;;  %7784 = vrsqrt.f32 %v996_v2  ;;  %v992_v10 = vmul.f32 0.03125, %v985_v6 }
 0x1f0   : > { %v998_v7 = vadd.f32 1e-05, %v991_v5  ;;  %v999_v13 = vadd.f32 1e-05, %v992_v10 }
 0x1f2   : > { %7786 = vrsqrt.f32 %v998_v7 }
 0x1f3   : > { %v7779_v9 = vpop.eup %7778  ;;  %7788 = vrsqrt.f32 %v997_v8 }
 0x1f4   : > { %v1007_v11 = vmul.f32 %v7779_v9, %v8856_v18  ;;  %7790 = vrsqrt.f32 %v999_v13 }
 0x1f6   : > { %v1020_v16 = vmul.f32 %v6500_v12, %v1007_v11 }
 0x1f7   : > { %v7781_v14 = vpop.eup %7780 }
 0x1f8   : > { %v1008_v15 = vmul.f32 %v7781_v14, %v8864_v26  ;;  %v7783_v17 = vpop.eup %7782  ;;  %v8908_v23 = vadd.f32 %v6501_v20, %v1020_v16 }
 0x1f9   : > { %v1009_v25 = vmul.f32 %v7783_v17, %v8858_v19 }
 0x1fa   : > { %v1021_v21 = vmul.f32 %v6500_v12, %v1008_v15 }
 0x1fb   : > { %v7785_v22 = vpop.eup %7784  ;;  %v1022_v26 = vmul.f32 %v6500_v12, %v1009_v25 }
 0x1fc   : > { %v8910_v24 = vadd.f32 %v6501_v20, %v1021_v21  ;;  %v1010_v28 = vmul.f32 %v7785_v22, %v8866_v27 }
 0x1fd   : > { %v8921_v34 = vadd.f32 %v6501_v20, %v1022_v26 }
 0x1fe   : > { %v1040_v18 = vpack.c.bf16 %v8910_v24, %v8908_v23  ;;  %v1023_v29 = vmul.f32 %v6500_v12, %v1010_v28 }
 0x1ff   : > { %v7787_v30 = vpop.eup %7786 }
 0x200   : > { %6506 = vmatmul.mubr.msk.bf16.vlgmr.msra.gmra.mxu1 %vm921_vm0, %v1040_v18  ;;  %v7789_v31 = vpop.eup %7788  ;;  %v8918_v32 = vadd.f32 %v6501_v20, %v1023_v29  ;;  %v1012_v33 = vmul.f32 %v7787_v30, %v8876_v37 }
 0x201   : > { %1122 = vmatprep.mubr.bf16.mxu1 %v8508_v52  ;;  %v1011_v19 = vmul.f32 %v7789_v31, %v8874_v36  ;;  %v7791_v38 = vpop.eup %7790 }
 0x202   : > { %v1041_v27 = vpack.c.bf16 %v8918_v32, %v8921_v34  ;;  %v1025_v35 = vmul.f32 %v6500_v12, %v1012_v33  ;;  %v1013_v41 = vmul.f32 %v7791_v38, %v8884_v44 }
 0x203   : > { %v1024_v39 = vmul.f32 %v6500_v12, %v1011_v19 }
 0x204   : > { %v8928_v40 = vadd.f32 %v6501_v20, %v1025_v35  ;;  %v1026_v36 = vmul.f32 %v6500_v12, %v1013_v41 }
 0x205   : > { %v8931_v42 = vadd.f32 %v6501_v20, %v1024_v39 }
 0x206   : > { %v8937_v43 = vadd.f32 %v6501_v20, %v1026_v36 }
 0x207   : > { %v1042_v37 = vpack.c.bf16 %v8928_v40, %v8931_v42 }
 0x208   : > { %6507 = vmatmul.mubr.msk.bf16.gmra.mxu1 %vm921_vm0, %v1041_v27  ;;  %v1043_v45 = vpack.c.bf16 %v8937_v43, %v8937_v43 }
 0x209   : > { %1132 = vmatprep.mubr.bf16.mxu1 %v8508_v52 }
 0x210   : > { %6508 = vmatmul.mubr.msk.bf16.gmra.mxu1 %vm921_vm0, %v1042_v37 }
 0x211   : > { %1142 = vmatprep.mubr.bf16.mxu1 %v8508_v52 }
 0x218   : > { %6509 = vmatmul.mubr.msk.bf16.gmra.mxu1 %vm921_vm0, %v1043_v45 }
 0x2c0   : > { %v1114_v46 = vpop.f32.mrf.mxu1 }
 0x2c1   : > { %v1151_v48 = vmul.f32 0.25, %v1114_v46 }
 0x2c2   : > { %v8942_v47 = vpop.f32.mrf.mxu1 }
 0x2c4   : > { %v1118_v44 = vpop.f32.mrf.mxu1 }
 0x2c5   : > { %v1152_v49 = vmul.f32 0.25, %v1118_v44  ;;  %v8970_v3 = vpack.c.bf16 %v1118_v44, %v1114_v46  ;;  %v9049_v46 = vld [vmem:[%s10875_s0 + $0x10] sm:$0xff] }
 0x2c6   : > { %v8944_v50 = vpop.f32.mrf.mxu1 }
 0x2c7   : > { %v8946_v51 = vpack.c.bf16 %v1152_v49, %v1151_v48  ;;  %v9038_v36 = vpack.c.bf16 %v8944_v50, %v8942_v47  ;;  %v9054_v47 = vld [vmem:[%s10875_s0] sm:$0xff] }
 0x2c8   : > { %v1124_v53 = vpop.f32.mrf.mxu1 }
 0x2c9   : > { %7010 = vmatprep.mubr.msk.bf16.mxu0 %vm1178_vm1, %v8946_v51  ;;  %v1153_v7 = vmul.f32 0.25, %v1124_v53 }
 0x2ca   : > { %v8950_v54 = vpop.f32.mrf.mxu1 }
 0x2cc   : > { %v1128_v55 = vpop.f32.mrf.mxu1 }
 0x2cd   : > { %v8962_v63 = vpack.c.bf16 %v1128_v55, %v1124_v53  ;;  %v1154_v5 = vmul.f32 0.25, %v1128_v55 }
 0x2ce   : > { %v8952_v56 = vpop.f32.mrf.mxu1 }
 0x2cf   : > { %v8984_v9 = vpack.c.bf16 %v1154_v5, %v1153_v7  ;;  %v9030_v41 = vpack.c.bf16 %v8952_v56, %v8950_v54  ;;  %v9067_v54 = vld [vmem:[%s10875_s0 + $0x18] sm:$0xff] }
 0x2d0   : > { %v1134_v57 = vpop.f32.mrf.mxu1 }
 0x2d1   : > { %v1155_v8 = vmul.f32 0.25, %v1134_v57 }
 0x2d2   : > { %v8954_v58 = vpop.f32.mrf.mxu1 }
 0x2d4   : > { %v1138_v59 = vpop.f32.mrf.mxu1 }
 0x2d5   : > { %v8956_v60 = vpack.c.bf16 %v1138_v59, %v1134_v57  ;;  %v1156_v6 = vmul.f32 0.25, %v1138_v59  ;;  %v9072_v57 = vld [vmem:[%s10875_s0 + $0x8] sm:$0xff] }
 0x2d6   : > { %v8958_v61 = vpop.f32.mrf.mxu1 }
 0x2d7   : > { %1174 = vrot.lane.b32.xlu1 %v8956_v60, %s8509_s29  ;;  %v8986_v10 = vpack.c.bf16 %v1156_v6, %v1155_v8  ;;  %v9019_v35 = vpack.c.bf16 %v8958_v61, %v8954_v58 }
 0x2d8   : > { %v1144_v62 = vpop.f32.mrf.mxu1 }
 0x2d9   : > { %v8964_v0 = vpack.c.bf16 %v1144_v62, %v1144_v62  ;;  %v1157_v11 = vmul.f32 0.25, %v1144_v62 }
 0x2da   : > { %v1146_v1 = vpop.f32.mrf.mxu1 }
 0x2db   : > { %1172 = vrot.lane.b32.xlu1 %v8962_v63, %s8509_s29  ;;  %1176 = vrot.lane.b32.xlu0 %v8964_v0, %s8509_s29  ;;  %v8992_v12 = vpack.c.bf16 %v1157_v11, %v1157_v11  ;;  %v9011_v33 = vpack.c.bf16 %v1146_v1, %v1146_v1 }
 0x2dc   : > { %v1148_v2 = vpop.f32.mrf.mxu1 }
 0x2dd   : > { %v1367_v38 = vsel %vm1365_vm2, %v9011_v33, 0  ;;  %v9085_v2 = vld [vmem:[%s10875_s0 + $0x30] sm:$0xff] }
 0x2de   : > { %v1149_v4 = vpop.f32.mrf.mxu1 }
 0x2df   : > { %1457 = vrot.lane.b32.xlu1 %v8964_v0, %s8510_s8  ;;  %1170 = vrot.lane.b32.xlu0 %v8970_v3, %s8509_s29 }
 0x2e3   : > { %1455 = vrot.lane.b32.xlu1 %v8956_v60, %s8510_s8  ;;  %1453 = vrot.lane.b32.xlu0 %v8962_v63, %s8510_s8 }
 0x2e7   : > { %1451 = vrot.lane.b32.xlu1 %v8970_v3, %s8510_s8  ;;  %1443 = vrot.lane.b32.xlu0 %v8946_v51, %s8511_s2 }
 0x2eb   : > { %1445 = vrot.lane.b32.xlu1 %v8984_v9, %s8511_s2  ;;  %1447 = vrot.lane.b32.xlu0 %v8986_v10, %s8511_s2 }
 0x2ef   : > { %1449 = vrot.lane.b32.xlu1 %v8992_v12, %s8511_s2 }
 0x349   : > { %v1175_v13 = vpop.permute.xlu1 %1174 }
 0x34a   : > { %v1198_v28 = vsel %vm1178_vm1, %v1175_v13, 0 }
 0x34d   : > { %v1173_v14 = vpop.permute.xlu1 %1172  ;;  %v1177_v15 = vpop.permute.xlu0 %1176 }
 0x34e   : > { %7506 = vmatprep.subr.msk.bf16.mxu0 %vm1178_vm1, %v1177_v15  ;;  %v1201_v16 = vsel %vm1178_vm1, %v1177_v15, 0  ;;  %v1195_v30 = vsel %vm1178_vm1, %v1173_v14, 0  ;;  %v9100_v15 = vld [vmem:[%s10875_s0 + $0x20] sm:$0xff] }
 0x34f   : > { %7003 = vmatpush3.bf16.xpose.msra.mxu0 %v1201_v16 }
 0x350   : > { %7507 = vmatprep.subr.msk.bf16.mxu0 %vm1178_vm1, %v1175_v13 }
 0x351   : > { %v1458_v17 = vpop.permute.xlu1 %1457  ;;  %v1171_v20 = vpop.permute.xlu0 %1170 }
 0x352   : > { %7511 = vmatprep.subr.msk.bf16.mxu1 %vm1178_vm1, %v1458_v17  ;;  %v1481_v21 = vsel %vm1178_vm1, %v1458_v17, 0  ;;  %v1192_v19 = vsel %vm1178_vm1, %v1171_v20, 0 }
 0x353   : > { %7035 = vmatpush3.bf16.xpose.msra.mxu1 %v1481_v21 }
 0x355   : > { %v1456_v22 = vpop.permute.xlu1 %1455  ;;  %v1454_v25 = vpop.permute.xlu0 %1453 }
 0x356   : > { %7512 = vmatprep.subr.msk.bf16.mxu1 %vm1178_vm1, %v1456_v22  ;;  %v1478_v29 = vsel %vm1178_vm1, %v1456_v22, 0  ;;  %v1475_v26 = vsel %vm1178_vm1, %v1454_v25, 0 }
 0x357   : > { %7005 = vmatpush3.bf16.xpose.msra.mxu0 %v1198_v28 }
 0x358   : > { %7508 = vmatprep.subr.msk.bf16.mxu0 %vm1178_vm1, %v1173_v14 }
 0x359   : > { %v1444_v18 = vpop.permute.xlu0 %1443  ;;  %v1452_v31 = vpop.permute.xlu1 %1451 }
 0x35a   : > { %7042 = vmatprep.mubr.msk.bf16.mxu1 %vm1178_vm1, %v1444_v18  ;;  %v1472_v27 = vsel %vm1178_vm1, %v1452_v31, 0 }
 0x35b   : > { %7037 = vmatpush3.bf16.xpose.msra.mxu1 %v1478_v29 }
 0x35c   : > { %7513 = vmatprep.subr.msk.bf16.mxu1 %vm1178_vm1, %v1454_v25 }
 0x35d   : > { %v1446_v39 = vpop.permute.xlu1 %1445  ;;  %v1448_v37 = vpop.permute.xlu0 %1447 }
 0x35f   : > { %7007 = vmatpush3.bf16.xpose.msra.mxu0 %v1195_v30 }
 0x360   : > { %7509 = vmatprep.subr.msk.bf16.mxu0 %vm1178_vm1, %v1171_v20  ;;  %v9105_v20 = vld [vmem:[%s10875_s0 + $0x28] sm:$0xff] }
 0x361   : > { %v1450_v45 = vpop.permute.xlu1 %1449 }
 0x363   : > { %7039 = vmatpush3.bf16.xpose.msra.mxu1 %v1475_v26 }
 0x364   : > { %7514 = vmatprep.subr.msk.bf16.mxu1 %vm1178_vm1, %v1452_v31 }
 0x367   : > { %7009 = vmatpush3.bf16.xpose.msra.mxu0 %v1192_v19 }
 0x368   : > { %7510 = vmatprep.subr.msk.bf16.mxu0 %vm1365_vm2, %v9011_v33 }
 0x36b   : > { %7041 = vmatpush3.bf16.xpose.msra.mxu1 %v1472_v27 }
 0x36e   : > { %7011 = vmatmul.mubr.msk.bf16.vlgmr.msra.gmra.mxu0 %vm1178_vm1, %v8984_v9 }
 0x36f   : > { %7014 = vmatprep.mubr.msk.bf16.mxu0 %vm1178_vm1, %v8986_v10  ;;  %7019 = vmatpush3.bf16.msra.mxu0 %v1367_v38 }
 0x370   : > { %7020 = vmatprep.subr.bf16.mxu0 %v9019_v35 }
 0x372   : > { %7043 = vmatmul.mubr.msk.bf16.vlgmr.msra.gmra.mxu1 %vm1178_vm1, %v1446_v39 }
 0x373   : > { %7021 = vmatpush3.bf16.msra.mxu0 %v9019_v35  ;;  %7046 = vmatprep.mubr.msk.bf16.mxu1 %vm1178_vm1, %v1448_v37 }
 0x374   : > { %7022 = vmatprep.subr.bf16.mxu0 %v9030_v41 }
 0x376   : > { %7015 = vmatmul.mubr.msk.bf16.gmra.mxu0 %vm1178_vm1, %v8992_v12 }
 0x377   : > { %7023 = vmatpush3.bf16.msra.mxu0 %v9030_v41 }
 0x378   : > { %7024 = vmatprep.subr.bf16.mxu0 %v9038_v36 }
 0x37a   : > { %7047 = vmatmul.mubr.msk.bf16.gmra.mxu1 %vm1178_vm1, %v1450_v45 }
 0x37b   : > { %7025 = vmatpush3.bf16.msra.mxu0 %v9038_v36 }
 0x42e   : > { %v7012_v44 = vpop.f32.mrf.mxu0 }
 0x42f   : > { %v9057_v48 = vadd.f32 %v7012_v44, %v9049_v46 }
 0x430   : > { %v1237_v49 = vpop.f32.mrf.mxu0 }
 0x431   : > { %v9060_v50 = vadd.f32 %v1237_v49, %v9054_v47  ;;  %v1274_v53 = vsel %vm1267_vm3, %v9057_v48, -inf }
 0x432   : > { %1275 = vmax.xlane.f32.xlu0 %v1274_v53  ;;  %v7013_v55 = vpop.f32.mrf.mxu0  ;;  %v7044_v56 = vpop.f32.mrf.mxu1 }
 0x433   : > { %v9075_v61 = vadd.f32 %v7013_v55, %v9067_v54  ;;  %v1268_v1 = vsel %vm1267_vm3, %v9060_v50, -inf  ;;  %v1526_v26 = vadd.f32 %v7044_v56, %v9049_v46 }
 0x434   : > { %v1240_v58 = vpop.f32.mrf.mxu0  ;;  %v1517_v59 = vpop.f32.mrf.mxu1 }
 0x435   : > { %v9078_v62 = vadd.f32 %v1240_v58, %v9072_v57  ;;  %v9088_v6 = vadd.f32 %v1517_v59, %v9054_v47  ;;  %v1277_v14 = vsel %vm1267_vm3, %v9075_v61, -inf  ;;  %v1553_v39 = vsel %vm1267_vm3, %v1526_v26, -inf }
 0x436   : > { %1269 = vmax.xlane.f32.xlu0 %v1268_v1  ;;  %v7016_v4 = vpop.f32.mrf.mxu0  ;;  %v7045_v5 = vpop.f32.mrf.mxu1 }
 0x437   : > { %v1271_v7 = vsel %vm1267_vm3, %v9078_v62, -inf  ;;  %v9093_v13 = vadd.f32 %v7016_v4, %v9085_v2  ;;  %v1547_v21 = vsel %vm1267_vm3, %v9088_v6, -inf  ;;  %v1529_v37 = vadd.f32 %v7045_v5, %v9067_v54 }
 0x438   : > { %1272 = vmax.xlane.f32.xlu1 %v1271_v7  ;;  %v1253_v8 = vpop.f32.mrf.mxu0  ;;  %v1520_v11 = vpop.f32.mrf.mxu1 }
 0x439   : > { %v9110_v28 = vadd.f32 %v1253_v8, %v9100_v15  ;;  %v1286_v29 = vsel %vm1267_vm3, %v9093_v13, -inf  ;;  %v1521_v19 = vadd.f32 %v1520_v11, %v9072_v57  ;;  %v1556_v56 = vsel %vm1267_vm3, %v1529_v37, -inf }
 0x43a   : > { %1278 = vmax.xlane.f32.xlu0 %v1277_v14  ;;  %v7017_v16 = vpop.f32.mrf.mxu0  ;;  %v7048_v17 = vpop.f32.mrf.mxu1 }
 0x43b   : > { %v1280_v27 = vsel %vm1267_vm3, %v9110_v28, -inf  ;;  %v1550_v45 = vsel %vm1267_vm3, %v1521_v19, -inf  ;;  %v9130_v49 = vadd.f32 %v7048_v17, %v9085_v2 }
 0x43c   : > { %v1256_v22 = vpop.f32.mrf.mxu0  ;;  %v1533_v25 = vpop.f32.mrf.mxu1  ;;  %1548 = vmax.xlane.f32.xlu1 %v1547_v21 }
 0x43d   : > { %v9113_v18 = vadd.f32 %v1256_v22, %v9105_v20  ;;  %v9124_v38 = vadd.f32 %v1533_v25, %v9100_v15  ;;  %v1565_v58 = vsel %vm1267_vm3, %v9130_v49, -inf }
 0x43e   : > { %1287 = vmax.xlane.f32.xlu0 %v1286_v29  ;;  %v7049_v30 = vpop.f32.mrf.mxu1 }
 0x43f   : > { %v1283_v31 = vsel %vm1267_vm3, %v9113_v18, -inf  ;;  %v1559_v53 = vsel %vm1267_vm3, %v9124_v38, -inf }
 0x440   : > { %1284 = vmax.xlane.f32.xlu1 %v1283_v31  ;;  %v1536_v44 = vpop.f32.mrf.mxu1 }
 0x441   : > { %v9135_v55 = vadd.f32 %v1536_v44, %v9105_v20 }
 0x442   : > { %1281 = vmax.xlane.f32.xlu0 %v1280_v27 }
 0x443   : > { %v1562_v59 = vsel %vm1267_vm3, %v9135_v55, -inf }
 0x444   : > { %1554 = vmax.xlane.f32.xlu1 %v1553_v39 }
 0x446   : > { %1551 = vmax.xlane.f32.xlu0 %v1550_v45 }
 0x448   : > { %1560 = vmax.xlane.f32.xlu1 %v1559_v53 }
 0x44a   : > { %1557 = vmax.xlane.f32.xlu0 %v1556_v56 }
 0x44c   : > { %1566 = vmax.xlane.f32.xlu1 %v1565_v58 }
 0x44e   : > { %1563 = vmax.xlane.f32.xlu0 %v1562_v59 }
 0x45d   : > { %1638 = vrot.lane.b32.xlu1 %v9011_v33, %s8511_s2 }
 0x464   : > { %1636 = vrot.lane.b32.xlu0 %v9019_v35, %s8511_s2 }
 0x4bb   : > { %v1276_v1 = vpop.xlane.xlu0 %1275 }
 0x4bc   : > { %v1291_v4 = vsub.f32 %v9057_v48, %v1276_v1 }
 0x4be   : > { %v1300_v5 = vmul.f32 1.442695, %v1291_v4 }
 0x4bf   : > { %v1270_v7 = vpop.xlane.xlu0 %1269 }
 0x4c0   : > { %7792 = vpow2.f32 %v1300_v5  ;;  %v1289_v8 = vsub.f32 %v9060_v50, %v1270_v7 }
 0x4c1   : > { %v1273_v11 = vpop.xlane.xlu1 %1272 }
 0x4c2   : > { %v1296_v14 = vmul.f32 1.442695, %v1289_v8  ;;  %v1290_v1 = vsub.f32 %v9078_v62, %v1273_v11 }
 0x4c3   : > { %v1279_v16 = vpop.xlane.xlu0 %1278 }
 0x4c4   : > { %7794 = vpow2.f32 %v1296_v14  ;;  %v1292_v39 = vsub.f32 %v9075_v61, %v1279_v16  ;;  %v1298_v14 = vmul.f32 1.442695, %v1290_v1 }
 0x4c5   : > { %v1549_v17 = vpop.xlane.xlu1 %1548 }
 0x4c6   : > { %v1568_v29 = vsub.f32 %v9088_v6, %v1549_v17  ;;  %v1302_v59 = vmul.f32 1.442695, %v1292_v39 }
 0x4c7   : > { %v1288_v21 = vpop.xlane.xlu0 %1287 }
 0x4c8   : > { %v1575_v45 = vmul.f32 1.442695, %v1568_v29  ;;  %v1295_v5 = vsub.f32 %v9093_v13, %v1288_v21 }
 0x4c9   : > { %v1285_v22 = vpop.xlane.xlu1 %1284 }
 0x4ca   : > { %v1308_v17 = vmul.f32 1.442695, %v1295_v5  ;;  %v1294_v62 = vsub.f32 %v9113_v18, %v1285_v22 }
 0x4cb   : > { %v1282_v25 = vpop.xlane.xlu0 %1281 }
 0x4cc   : > { %v1293_v29 = vsub.f32 %v9110_v28, %v1282_v25 }
 0x4cd   : > { %v9149_v30 = vpop.eup %7792  ;;  %v1555_v31 = vpop.xlane.xlu1 %1554 }
 0x4ce   : > { %v1570_v27 = vsub.f32 %v1526_v26, %v1555_v31  ;;  %v1316_v48 = vsel %vm1267_vm3, %v9149_v30, 0.0  ;;  %v1306_v31 = vmul.f32 1.442695, %v1294_v62 }
 0x4cf   : > { %1317 = vadd.xlane.f32.xlu0 %v1316_v48  ;;  %v1552_v50 = vpop.xlane.xlu0 %1551 }
 0x4d0   : > { %v1579_v44 = vmul.f32 1.442695, %v1570_v27  ;;  %v1569_v58 = vsub.f32 %v1521_v19, %v1552_v50 }
 0x4d1   : > { %v9154_v53 = vpop.eup %7794  ;;  %v1561_v56 = vpop.xlane.xlu1 %1560 }
 0x4d2   : > { %7796 = vpow2.f32 %v1579_v44  ;;  %v1310_v6 = vsel %vm1267_vm3, %v9154_v53, 0.0  ;;  %v1577_v7 = vmul.f32 1.442695, %v1569_v58  ;;  %v1572_v16 = vsub.f32 %v9124_v38, %v1561_v56 }
 0x4d3   : > { %1311 = vadd.xlane.f32.xlu0 %v1310_v6  ;;  %v1558_v26 = vpop.xlane.xlu0 %1557  ;;  %7798 = vpow2.f32 %v1575_v45 }
 0x4d4   : > { %v1571_v4 = vsub.f32 %v1529_v37, %v1558_v26  ;;  %7800 = vpow2.f32 %v1302_v59  ;;  %v1583_v13 = vmul.f32 1.442695, %v1572_v16  ;;  %v1304_v37 = vmul.f32 1.442695, %v1293_v29 }
 0x4d5   : > { %v1567_v61 = vpop.xlane.xlu1 %1566 }
 0x4d6   : > { %v1581_v8 = vmul.f32 1.442695, %v1571_v4  ;;  %v1574_v11 = vsub.f32 %v9130_v49, %v1567_v61 }
 0x4d7   : > { %v1564_v38 = vpop.xlane.xlu0 %1563 }
 0x4d8   : > { %7802 = vpow2.f32 %v1581_v8  ;;  %v1587_v27 = vmul.f32 1.442695, %v1574_v11  ;;  %v1573_v18 = vsub.f32 %v9135_v55, %v1564_v38 }
 0x4d9   : > { %v9161_v19 = vpop.permute.xlu1 %1638  ;;  %7804 = vpow2.f32 %v1577_v7 }
 0x4da   : > { %7515 = vmatprep.subr.msk.bf16.mxu0 %vm1365_vm2, %v9161_v19  ;;  %7806 = vpow2.f32 %v1298_v14  ;;  %v1585_v39 = vmul.f32 1.442695, %v1573_v18 }
 0x4db   : > { %7808 = vpow2.f32 %v1308_v17 }
 0x4dc   : > { %7810 = vpow2.f32 %v1583_v13 }
 0x4dd   : > { %7812 = vpow2.f32 %v1304_v37 }
 0x4de   : > { %7814 = vpow2.f32 %v1306_v31 }
 0x4df   : > { %v9168_v21 = vpop.eup %7796  ;;  %7816 = vpow2.f32 %v1587_v27 }
 0x4e0   : > { %v1595_v28 = vsel %vm1267_vm3, %v9168_v21, 0.0  ;;  %v9172_v25 = vpop.eup %7798  ;;  %7818 = vpow2.f32 %v1585_v39 }
 0x4e1   : > { %1596 = vadd.xlane.f32.xlu1 %v1595_v28  ;;  %v9175_v22 = vpop.eup %7800  ;;  %v1589_v49 = vsel %vm1267_vm3, %v9172_v25, 0.0 }
 0x4e2   : > { %v1319_v55 = vsel %vm1267_vm3, %v9175_v22, 0.0 }
 0x4e5   : > { %v9179_v48 = vpop.eup %7802  ;;  %1590 = vadd.xlane.f32.xlu1 %v1589_v49 }
 0x4e6   : > { %v1598_v50 = vsel %vm1267_vm3, %v9179_v48, 0.0  ;;  %v9183_v45 = vpop.eup %7804 }
 0x4e7   : > { %1599 = vadd.xlane.f32.xlu0 %v1598_v50  ;;  %v9187_v44 = vpop.eup %7806  ;;  %v1592_v56 = vsel %vm1267_vm3, %v9183_v45, 0.0 }
 0x4e8   : > { %v9191_v58 = vpop.eup %7808  ;;  %v1313_v6 = vsel %vm1267_vm3, %v9187_v44, 0.0 }
 0x4e9   : > { %1320 = vadd.xlane.f32.xlu1 %v1319_v55  ;;  %v9195_v59 = vpop.eup %7810  ;;  %v1328_v26 = vsel %vm1267_vm3, %v9191_v58, 0.0 }
 0x4ea   : > { %v9199_v1 = vpop.eup %7812  ;;  %v1601_v4 = vsel %vm1267_vm3, %v9195_v59, 0.0 }
 0x4eb   : > { %1593 = vadd.xlane.f32.xlu0 %v1592_v56  ;;  %v9203_v61 = vpop.eup %7814  ;;  %v1322_v5 = vsel %vm1267_vm3, %v9199_v1, 0.0 }
 0x4ec   : > { %v9207_v7 = vpop.eup %7816  ;;  %v1325_v8 = vsel %vm1267_vm3, %v9203_v61, 0.0 }
 0x4ed   : > { %1314 = vadd.xlane.f32.xlu1 %v1313_v6  ;;  %v1607_v14 = vsel %vm1267_vm3, %v9207_v7, 0.0  ;;  %v9213_v16 = vpop.eup %7818 }
 0x4ee   : > { %v1604_v17 = vsel %vm1267_vm3, %v9213_v16, 0.0 }
 0x4ef   : > { %1329 = vadd.xlane.f32.xlu0 %v1328_v26 }
 0x4f1   : > { %1602 = vadd.xlane.f32.xlu1 %v1601_v4 }
 0x4f3   : > { %1323 = vadd.xlane.f32.xlu0 %v1322_v5 }
 0x4f5   : > { %1326 = vadd.xlane.f32.xlu1 %v1325_v8 }
 0x4f7   : > { %1608 = vadd.xlane.f32.xlu0 %v1607_v14 }
 0x4fb   : > { %1605 = vadd.xlane.f32.xlu0 %v1604_v17 }
 0x506   : > { %1634 = vrot.lane.b32.xlu1 %v9030_v41, %s8511_s2 }
 0x50a   : > { %1907 = vrot.lane.b32.xlu1 %v8964_v0, %s8512_s3 }
 0x50e   : > { %1905 = vrot.lane.b32.xlu1 %v8956_v60, %s8512_s3 }
 0x511   : > { %1632 = vrot.lane.b32.xlu0 %v9038_v36, %s8511_s2 }
 0x512   : > { %1903 = vrot.lane.b32.xlu1 %v8962_v63, %s8512_s3 }
 0x515   : > { %1893 = vrot.lane.b32.xlu0 %v8946_v51, %s10828_s27 }
 0x516   : > { %1901 = vrot.lane.b32.xlu1 %v8970_v3, %s8512_s3 }
 0x519   : > { %1897 = vrot.lane.b32.xlu0 %v8986_v10, %s10828_s27 }
 0x51a   : > { %1895 = vrot.lane.b32.xlu1 %v8984_v9, %s10828_s27 }
 0x51d   : > { %2278 = vrot.lane.b32.xlu0 %v8964_v0, %s10826_s5 }
 0x51e   : > { %1899 = vrot.lane.b32.xlu1 %v8992_v12, %s10828_s27 }
 0x521   : > { %2274 = vrot.lane.b32.xlu0 %v8962_v63, %s10826_s5  ;;  %v1637_v63 = vpop.permute.xlu0 %1636 }
 0x522   : > { %2276 = vrot.lane.b32.xlu1 %v8956_v60, %s10826_s5 }
 0x525   : > { %2264 = vrot.lane.b32.xlu0 %v8946_v51, %s10824_s23 }
 0x526   : > { %2272 = vrot.lane.b32.xlu1 %v8970_v3, %s10826_s5  ;;  %s10881_s5 = sld [smem:[#allocation44_spill]] }
 0x529   : > { %2268 = vrot.lane.b32.xlu0 %v8986_v10, %s10824_s23 }
 0x52a   : > { %2266 = vrot.lane.b32.xlu1 %v8984_v9, %s10824_s23 }
 0x52e   : > { %2270 = vrot.lane.b32.xlu1 %v8992_v12, %s10824_s23 }
 0x558   : > { %v1318_v0 = vpop.xlane.xlu0 %1317 }
 0x55c   : > { %v1312_v60 = vpop.xlane.xlu0 %1311 }
 0x56a   : > { %v1597_v29 = vpop.xlane.xlu1 %1596 }
 0x56e   : > { %v1591_v62 = vpop.xlane.xlu1 %1590 }
 0x570   : > { %v1600_v13 = vpop.xlane.xlu0 %1599 }
 0x572   : > { %v1321_v37 = vpop.xlane.xlu1 %1320 }
 0x573   : > { %7820 = vrcp.f32 %v1321_v37 }
 0x574   : > { %v1594_v51 = vpop.xlane.xlu0 %1593  ;;  %7822 = vrcp.f32 %v1312_v60 }
 0x575   : > { %7824 = vrcp.f32 %v1318_v0 }
 0x576   : > { %v1315_v3 = vpop.xlane.xlu1 %1314 }
 0x577   : > { %7826 = vrcp.f32 %v1315_v3 }
 0x578   : > { %v1330_v10 = vpop.xlane.xlu0 %1329  ;;  %7828 = vrcp.f32 %v1594_v51 }
 0x579   : > { %7830 = vrcp.f32 %v1330_v10 }
 0x57a   : > { %v1603_v11 = vpop.xlane.xlu1 %1602 }
 0x57c   : > { %v1324_v9 = vpop.xlane.xlu0 %1323 }
 0x57d   : > { %7832 = vrcp.f32 %v1324_v9 }
 0x57e   : > { %7834 = vrcp.f32 %v1591_v62  ;;  %v1327_v12 = vpop.xlane.xlu1 %1326 }
 0x57f   : > { %7836 = vrcp.f32 %v1327_v12 }
 0x580   : > { %v1609_v38 = vpop.xlane.xlu0 %1608  ;;  %v7821_v31 = vpop.eup %7820  ;;  %7838 = vrcp.f32 %v1600_v13 }
 0x581   : > { %v7823_v28 = vpop.eup %7822  ;;  %v1341_v49 = vmul.f32 %v7821_v31, %v9175_v22  ;;  %v1656_v22 = vsel %vm1365_vm2, %v9161_v19, 0 }
 0x582   : > { %v7825_v27 = vpop.eup %7824  ;;  %v1338_v50 = vmul.f32 %v7823_v28, %v9154_v53 }
 0x583   : > { %v1340_v56 = vmul.f32 %v7825_v27, %v9149_v30 }
 0x584   : > { %v7827_v18 = vpop.eup %7826  ;;  %v1606_v39 = vpop.xlane.xlu0 %1605 }
 0x585   : > { %7840 = vrcp.f32 %v1606_v39  ;;  %v1339_v55 = vmul.f32 %v7827_v18, %v9187_v44  ;;  %v7829_v26 = vpop.eup %7828  ;;  %v1346_v4 = vpack.c.bf16 %v1341_v49, %v1340_v56 }
 0x586   : > { %7842 = vrcp.f32 %v1597_v29  ;;  %v7831_v5 = vpop.eup %7830  ;;  %v1618_v0 = vmul.f32 %v7829_v26, %v9183_v45  ;;  %v1635_v29 = vpop.permute.xlu1 %1634 }
 0x587   : > { %7844 = vrcp.f32 %v1603_v11  ;;  %v1345_v6 = vpack.c.bf16 %v1339_v55, %v1338_v50  ;;  %v1344_v30 = vmul.f32 %v7831_v5, %v9191_v58 }
 0x588   : > { %7846 = vrcp.f32 %v1609_v38 }
 0x589   : > { %7026 = vmatprep.mubr.msk.bf16.mxu0 %vm1267_vm3, %v1345_v6  ;;  %v1348_v19 = vpack.c.bf16 %v1344_v30, %v1344_v30 }
 0x58a   : > { %v7833_v8 = vpop.eup %7832  ;;  %7027 = vmatmul.mubr.msk.bf16.vlgmr.msra.gmra.mxu0 %vm1267_vm3, %v1346_v4  ;;  %v1908_v38 = vpop.permute.xlu1 %1907 }
 0x58b   : > { %v7835_v14 = vpop.eup %7834  ;;  %7051 = vmatpush3.bf16.msra.mxu0 %v1656_v22  ;;  %v1342_v44 = vmul.f32 %v7833_v8, %v9199_v1  ;;  %v1633_v1 = vpop.permute.xlu0 %1632 }
 0x58c   : > { %v7837_v53 = vpop.eup %7836  ;;  %7052 = vmatprep.subr.bf16.mxu0 %v1637_v63  ;;  %v1617_v62 = vmul.f32 %v7835_v14, %v9172_v25  ;;  %v7720_v25 = vld [vmem:[%s10876_s4 + $0x8] sm:$0xff]  }
 0x58d   : > { %v1343_v17 = vmul.f32 %v7837_v53, %v9203_v61  ;;  %v7839_v13 = vpop.eup %7838 }
 0x58e   : > { %v1624_v37 = vpack.c.bf16 %v1618_v0, %v1617_v62  ;;  %v1620_v61 = vmul.f32 %v7839_v13, %v9179_v48 }
 0x58f   : > { %7053 = vmatpush3.bf16.msra.mxu0 %v1637_v63  ;;  %v1347_v60 = vpack.c.bf16 %v1343_v17, %v1342_v44  ;;  %v1931_v44 = vsel %vm1178_vm1, %v1908_v38, 0  ;;  %v1906_v17 = vpop.permute.xlu1 %1905 }
 0x590   : > { %7054 = vmatprep.subr.bf16.mxu0 %v1635_v29  ;;  %v1928_v13 = vsel %vm1178_vm1, %v1906_v17, 0 }
 0x591   : > { %7030 = vmatprep.mubr.msk.bf16.mxu0 %vm1267_vm3, %v1347_v60 }
 0x592   : > { %v7841_v51 = vpop.eup %7840  ;;  %7031 = vmatmul.mubr.msk.bf16.gmra.mxu0 %vm1267_vm3, %v1348_v19  ;;  %v1894_v19 = vpop.permute.xlu0 %1893 }
 0x593   : > { %v7843_v58 = vpop.eup %7842  ;;  %7055 = vmatpush3.bf16.msra.mxu0 %v1635_v29  ;;  %7058 = vmatprep.mubr.msk.bf16.mxu0 %vm1267_vm3, %v1624_v37  ;;  %v1622_v63 = vmul.f32 %v7841_v51, %v9213_v16  ;;  %v1904_v37 = vpop.permute.xlu1 %1903 }
 0x594   : > { %v7845_v45 = vpop.eup %7844  ;;  %7056 = vmatprep.subr.bf16.mxu0 %v1633_v1  ;;  %v1619_v3 = vmul.f32 %v7843_v58, %v9168_v21  ;;  %v7721_v21 = vld [vmem:[%s10876_s4] sm:$0xff]   ;;  %v1925_v58 = vsel %vm1178_vm1, %v1904_v37, 0 }
 0x595   : > { %v1621_v10 = vmul.f32 %v7845_v45, %v9195_v59  ;;  %v7847_v9 = vpop.eup %7846  ;;  %7076 = vmatprep.subr.bf16.mxu1 %v7721_v21 }
 0x596   : > { %v1625_v11 = vpack.c.bf16 %v1620_v61, %v1619_v3  ;;  %v1623_v48 = vmul.f32 %v7847_v9, %v9207_v7  ;;  %7077 = vmatpush3.bf16.msra.mxu1 %v7721_v21 }
 0x597   : > { %7057 = vmatpush3.bf16.msra.mxu0 %v1633_v1  ;;  %v1626_v12 = vpack.c.bf16 %v1622_v63, %v1621_v10  ;;  %v1902_v51 = vpop.permute.xlu1 %1901  ;;  %v1898_v1 = vpop.permute.xlu0 %1897 }
 0x598   : > { %7066 = vmatprep.subr.bf16.mxu0 %v7720_v25  ;;  %v1627_v16 = vpack.c.bf16 %v1623_v48, %v1623_v48  ;;  %v1922_v61 = vsel %vm1178_vm1, %v1902_v51, 0 }
 0x59a   : > { %7059 = vmatmul.mubr.msk.bf16.vlgmr.msra.gmra.mxu0 %vm1267_vm3, %v1625_v11 }
 0x59b   : > { %7067 = vmatpush3.bf16.msra.mxu0 %v7720_v25  ;;  %7062 = vmatprep.mubr.msk.bf16.mxu0 %vm1267_vm3, %v1626_v12  ;;  %v1896_v45 = vpop.permute.xlu1 %1895  ;;  %v2279_v25 = vpop.permute.xlu0 %2278 }
 0x59c   : > { %7516 = vmatprep.subr.msk.bf16.mxu0 %vm1178_vm1, %v1908_v38  ;;  %v2302_v3 = vsel %vm1178_vm1, %v2279_v25, 0 }
 0x59f   : > { %v1900_v63 = vpop.permute.xlu1 %1899  ;;  %v2275_v11 = vpop.permute.xlu0 %2274 }
 0x5a0   : > { %v2296_v38 = vsel %vm1178_vm1, %v2275_v11, 0 }
 0x5a2   : > { %7063 = vmatmul.mubr.msk.bf16.gmra.mxu0 %vm1267_vm3, %v1627_v16 }
 0x5a3   : > { %v2277_v10 = vpop.permute.xlu1 %2276  ;;  %v2265_v9 = vpop.permute.xlu0 %2264 }
 0x5a4   : > { %v2299_v12 = vsel %vm1178_vm1, %v2277_v10, 0 }
 0x5a7   : > { %v2273_v48 = vpop.permute.xlu1 %2272 }
 0x5a8   : > { %v2293_v16 = vsel %vm1178_vm1, %v2273_v48, 0 }
 0x5ab   : > { %v2267_v21 = vpop.permute.xlu1 %2266 }
 0x64a   : > { %v7028_v59 = vpop.f32.mrf.mxu0 }
 0x64c   : > { %v1403_v31 = vpop.f32.mrf.mxu0 }
 0x64e   : > { %v7029_v28 = vpop.f32.mrf.mxu0 }
 0x64f   : > { %v1434_v49 = vpack.c.bf16 %v7029_v28, %v7028_v59  ;;  %v2269_v59 = vpop.permute.xlu0 %2268 }
 0x650   : > { %v1406_v27 = vpop.f32.mrf.mxu0 }
 0x651   : > { %v1433_v18 = vpack.c.bf16 %v1406_v27, %v1403_v31  ;;  %v2271_v31 = vpop.permute.xlu1 %2270 }
 0x652   : > { %v7032_v39 = vpop.f32.mrf.mxu0 }
 0x653   : > { %7078 = vmatprep.mubr.msk.bf16.mxu1 %vm1178_vm1, %v1433_v18  ;;  %v1436_v6 = vpack.c.bf16 %v7032_v39, %v7032_v39 }
 0x654   : > { %v1419_v50 = vpop.f32.mrf.mxu0  ;;  %7079 = vmatmul.mubr.msk.bf16.vlgmr.msra.gmra.mxu1 %vm1178_vm1, %v1434_v49 }
 0x656   : > { %v7033_v7 = vpop.f32.mrf.mxu0 }
 0x658   : > { %v1422_v55 = vpop.f32.mrf.mxu0 }
 0x659   : > { %v1435_v56 = vpack.c.bf16 %v1422_v55, %v1419_v50 }
 0x65a   : > { %v7060_v26 = vpop.f32.mrf.mxu0 }
 0x65b   : > { %7082 = vmatprep.mubr.msk.bf16.mxu1 %vm1178_vm1, %v1435_v56 }
 0x65c   : > { %v1692_v4 = vpop.f32.mrf.mxu0  ;;  %7083 = vmatmul.mubr.msk.bf16.gmra.mxu1 %vm1178_vm1, %v1436_v6 }
 0x65e   : > { %v7061_v5 = vpop.f32.mrf.mxu0 }
 0x65f   : > { %v1723_v14 = vpack.c.bf16 %v7061_v5, %v7060_v26 }
 0x660   : > { %v1695_v8 = vpop.f32.mrf.mxu0 }
 0x661   : > { %v1722_v22 = vpack.c.bf16 %v1695_v8, %v1692_v4 }
 0x662   : > { %v7064_v53 = vpop.f32.mrf.mxu0 }
 0x663   : > { %7068 = vmatprep.mubr.msk.bf16.mxu0 %vm1178_vm1, %v1722_v22  ;;  %v1725_v62 = vpack.c.bf16 %v7064_v53, %v7064_v53 }
 0x664   : > { %v1708_v30 = vpop.f32.mrf.mxu0  ;;  %7069 = vmatmul.mubr.msk.bf16.vlgmr.msra.gmra.mxu0 %vm1178_vm1, %v1723_v14 }
 0x665   : > { %7087 = vmatpush3.bf16.xpose.msra.mxu0 %v1931_v44 }
 0x666   : > { %7517 = vmatprep.subr.msk.bf16.mxu0 %vm1178_vm1, %v1906_v17  ;;  %v7065_v0 = vpop.f32.mrf.mxu0 }
 0x668   : > { %v1711_v29 = vpop.f32.mrf.mxu0 }
 0x669   : > { %v1724_v60 = vpack.c.bf16 %v1711_v29, %v1708_v30 }
 0x66b   : > { %7072 = vmatprep.mubr.msk.bf16.mxu0 %vm1178_vm1, %v1724_v60 }
 0x66c   : > { %7073 = vmatmul.mubr.msk.bf16.gmra.mxu0 %vm1178_vm1, %v1725_v62 }
 0x66d   : > { %7089 = vmatpush3.bf16.xpose.msra.mxu0 %v1928_v13  ;;  %7094 = vmatprep.mubr.msk.bf16.mxu0 %vm1178_vm1, %v1894_v19 }
 0x66e   : > { %7518 = vmatprep.subr.msk.bf16.mxu0 %vm1178_vm1, %v1904_v37 }
 0x675   : > { %7091 = vmatpush3.bf16.xpose.msra.mxu0 %v1925_v58 }
 0x676   : > { %7519 = vmatprep.subr.msk.bf16.mxu0 %vm1178_vm1, %v1902_v51 }
 0x67d   : > { %7093 = vmatpush3.bf16.xpose.msra.mxu0 %v1922_v61 }
 0x67e   : > { %7521 = vmatprep.subr.msk.bf16.mxu0 %vm1178_vm1, %v2279_v25 }
 0x684   : > { %7095 = vmatmul.mubr.msk.bf16.vlgmr.msra.gmra.mxu0 %vm1178_vm1, %v1896_v45 }
 0x685   : > { %7098 = vmatprep.mubr.msk.bf16.mxu0 %vm1178_vm1, %v1898_v1  ;;  %7129 = vmatpush3.bf16.xpose.msra.mxu0 %v2302_v3 }
 0x686   : > { %7522 = vmatprep.subr.msk.bf16.mxu0 %vm1178_vm1, %v2277_v10 }
 0x68c   : > { %7099 = vmatmul.mubr.msk.bf16.gmra.mxu0 %vm1178_vm1, %v1900_v63 }
 0x68d   : > { %7131 = vmatpush3.bf16.xpose.msra.mxu0 %v2299_v12  ;;  %7136 = vmatprep.mubr.msk.bf16.mxu0 %vm1178_vm1, %v2265_v9 }
 0x68e   : > { %7523 = vmatprep.subr.msk.bf16.mxu0 %vm1178_vm1, %v2275_v11 }
 0x695   : > { %7133 = vmatpush3.bf16.xpose.msra.mxu0 %v2296_v38 }
 0x696   : > { %7524 = vmatprep.subr.msk.bf16.mxu0 %vm1178_vm1, %v2273_v48 }
 0x69d   : > { %7135 = vmatpush3.bf16.xpose.msra.mxu0 %v2293_v16 }
 0x6a4   : > { %7137 = vmatmul.mubr.msk.bf16.vlgmr.msra.gmra.mxu0 %vm1178_vm1, %v2267_v21 }
 0x6a5   : > { %7140 = vmatprep.mubr.msk.bf16.mxu0 %vm1178_vm1, %v2269_v59 }
 0x6ac   : > { %7141 = vmatmul.mubr.msk.bf16.gmra.mxu0 %vm1178_vm1, %v2271_v31 }
 0x714   : > { %v7080_v28 = vpop.f32.mrf.mxu1 }
 0x716   : > { %v1863_v27 = vpop.f32.mrf.mxu1 }
 0x718   : > { %v7081_v18 = vpop.f32.mrf.mxu1 }
 0x71a   : > { %v9315_v49 = vpop.f32.mrf.mxu1 }
 0x71c   : > { %v7084_v39 = vpop.f32.mrf.mxu1 }
 0x71e   : > { %v1879_v50 = vpop.f32.mrf.mxu1 }
 0x720   : > { %v7085_v7 = vpop.f32.mrf.mxu1 }
 0x724   : > { %v7070_v55 = vpop.f32.mrf.mxu0 }
 0x725   : > { %v9317_v56 = vadd.f32 %v7080_v28, %v7070_v55 }
 0x726   : > { %v1781_v6 = vpop.f32.mrf.mxu0 }
 0x727   : > { %v9319_v26 = vadd.f32 %v1863_v27, %v1781_v6 }
 0x728   : > { %v7071_v4 = vpop.f32.mrf.mxu0 }
 0x729   : > { %v9321_v5 = vadd.f32 %v7081_v18, %v7071_v4 }
 0x72a   : > { %v9323_v8 = vpop.f32.mrf.mxu0 }
 0x72c   : > { %v7074_v22 = vpop.f32.mrf.mxu0 }
 0x72d   : > { %v9325_v14 = vadd.f32 %v7084_v39, %v7074_v22 }
 0x72e   : > { %v1797_v53 = vpop.f32.mrf.mxu0 }
 0x72f   : > { %v9327_v30 = vadd.f32 %v1879_v50, %v1797_v53 }
 0x730   : > { %v7075_v44 = vpop.f32.mrf.mxu0 }
 0x732   : > { %v9329_v17 = vpop.f32.mrf.mxu0 }
 0x744   : > { %v7096_v0 = vpop.f32.mrf.mxu0 }
 0x745   : > { %v1976_v19 = vadd.f32 %v7096_v0, %v9049_v46 }
 0x746   : > { %v1967_v29 = vpop.f32.mrf.mxu0 }
 0x747   : > { %v1968_v60 = vadd.f32 %v1967_v29, %v9054_v47  ;;  %v2003_v61 = vsel %vm1267_vm3, %v1976_v19, -inf }
 0x748   : > { %v7097_v62 = vpop.f32.mrf.mxu0 }
 0x749   : > { %v1997_v13 = vsel %vm1267_vm3, %v1968_v60, -inf  ;;  %v1979_v1 = vadd.f32 %v7097_v62, %v9067_v54 }
 0x74a   : > { %v1970_v37 = vpop.f32.mrf.mxu0  ;;  %1998 = vmax.xlane.f32.xlu0 %v1997_v13 }
 0x74b   : > { %v1971_v51 = vadd.f32 %v1970_v37, %v9072_v57  ;;  %v2006_v10 = vsel %vm1267_vm3, %v1979_v1, -inf }
 0x74c   : > { %v7100_v58 = vpop.f32.mrf.mxu0 }
 0x74d   : > { %v2000_v45 = vsel %vm1267_vm3, %v1971_v51, -inf  ;;  %v1992_v12 = vadd.f32 %v7100_v58, %v9085_v2 }
 0x74e   : > { %2001 = vmax.xlane.f32.xlu1 %v2000_v45  ;;  %2004 = vmax.xlane.f32.xlu0 %v2003_v61  ;;  %v1983_v25 = vpop.f32.mrf.mxu0 }
 0x74f   : > { %v1984_v3 = vadd.f32 %v1983_v25, %v9100_v15  ;;  %v2015_v16 = vsel %vm1267_vm3, %v1992_v12, -inf }
 0x750   : > { %v7101_v63 = vpop.f32.mrf.mxu0 }
 0x751   : > { %v2009_v48 = vsel %vm1267_vm3, %v1984_v3, -inf }
 0x752   : > { %2007 = vmax.xlane.f32.xlu0 %v2006_v10  ;;  %v1986_v11 = vpop.f32.mrf.mxu0 }
 0x753   : > { %v1987_v9 = vadd.f32 %v1986_v11, %v9105_v20 }
 0x755   : > { %v2012_v38 = vsel %vm1267_vm3, %v1987_v9, -inf }
 0x756   : > { %2013 = vmax.xlane.f32.xlu1 %v2012_v38  ;;  %2010 = vmax.xlane.f32.xlu0 %v2009_v48 }
 0x75a   : > { %2016 = vmax.xlane.f32.xlu0 %v2015_v16 }
 0x764   : > { %v7138_v21 = vpop.f32.mrf.mxu0 }
 0x766   : > { %v2338_v59 = vpop.f32.mrf.mxu0 }
 0x768   : > { %v7139_v31 = vpop.f32.mrf.mxu0 }
 0x76a   : > { %v9345_v28 = vpop.f32.mrf.mxu0 }
 0x76c   : > { %v9347_v27 = vpop.f32.mrf.mxu0 }
 0x76e   : > { %v9349_v18 = vpop.f32.mrf.mxu0 }
 0x770   : > { %v7143_v39 = vpop.f32.mrf.mxu0 }
 0x7d3   : > { %v1999_v50 = vpop.xlane.xlu0 %1998 }
 0x7d4   : > { %v2018_v7 = vsub.f32 %v1968_v60, %v1999_v50 }
 0x7d6   : > { %v2025_v22 = vmul.f32 1.442695, %v2018_v7 }
 0x7d7   : > { %v2005_v55 = vpop.xlane.xlu0 %2004  ;;  %v2002_v6 = vpop.xlane.xlu1 %2001 }
 0x7d8   : > { %v2020_v4 = vsub.f32 %v1976_v19, %v2005_v55  ;;  %v2019_v44 = vsub.f32 %v1971_v51, %v2002_v6 }
 0x7da   : > { %v2029_v53 = vmul.f32 1.442695, %v2020_v4  ;;  %v2027_v62 = vmul.f32 1.442695, %v2019_v44  ;;  %v9388_v4 = vadd.f32 %v2338_v59, %v9054_v47  ;;  %v9396_v44 = vadd.f32 %v7139_v31, %v9067_v54 }
 0x7db   : > { %v2008_v0 = vpop.xlane.xlu0 %2007  ;;  %v9406_v47 = vadd.f32 %v9349_v18, %v9100_v15  ;;  %v9412_v54 = vadd.f32 %v9347_v27, %v9085_v2 }
 0x7dc   : > { %7848 = vpow2.f32 %v2029_v53  ;;  %v2021_v29 = vsub.f32 %v1979_v1, %v2008_v0  ;;  %v2368_v53 = vsel %vm1267_vm3, %v9388_v4, -inf }
 0x7dd   : > { %7850 = vpow2.f32 %v2025_v22  ;;  %v9391_v22 = vadd.f32 %v7138_v21, %v9049_v46  ;;  %v2377_v46 = vsel %vm1267_vm3, %v9396_v44, -inf  ;;  %v2357_v21 = vpop.f32.mrf.mxu0  ;;  %v2380_v31 = vsel %vm1267_vm3, %v9406_v47, -inf }
 0x7de   : > { %v2031_v13 = vmul.f32 1.442695, %v2021_v29  ;;  %v9402_v29 = vadd.f32 %v9345_v28, %v9072_v57  ;;  %v9415_v59 = vadd.f32 %v2357_v21, %v9105_v20  ;;  %v2386_v28 = vsel %vm1267_vm3, %v9412_v54, -inf }
 0x7df   : > { %v2011_v37 = vpop.xlane.xlu0 %2010  ;;  %v2014_v58 = vpop.xlane.xlu1 %2013  ;;  %v2374_v0 = vsel %vm1267_vm3, %v9391_v22, -inf }
 0x7e0   : > { %7852 = vpow2.f32 %v2031_v13  ;;  %v2023_v45 = vsub.f32 %v1987_v9, %v2014_v58  ;;  %v2022_v61 = vsub.f32 %v1984_v3, %v2011_v37  ;;  %v2371_v57 = vsel %vm1267_vm3, %v9402_v29, -inf }
 0x7e1   : > { %7854 = vpow2.f32 %v2027_v62  ;;  %v2383_v15 = vsel %vm1267_vm3, %v9415_v59, -inf }
 0x7e2   : > { %v2035_v25 = vmul.f32 1.442695, %v2023_v45  ;;  %v2033_v10 = vmul.f32 1.442695, %v2022_v61 }
 0x7e3   : > { %v2017_v60 = vpop.xlane.xlu0 %2016 }
 0x7e4   : > { %v2024_v63 = vsub.f32 %v1992_v12, %v2017_v60  ;;  %7856 = vpow2.f32 %v2035_v25 }
 0x7e6   : > { %v2037_v19 = vmul.f32 1.442695, %v2024_v63 }
 0x7e8   : > { %7858 = vpow2.f32 %v2037_v19 }
 0x7e9   : > { %v9351_v51 = vpop.eup %7848  ;;  %7860 = vpow2.f32 %v2033_v10 }
 0x7ea   : > { %v2045_v1 = vsel %vm1267_vm3, %v9351_v51, 0.0  ;;  %v9355_v11 = vpop.eup %7850 }
 0x7eb   : > { %2046 = vadd.xlane.f32.xlu1 %v2045_v1  ;;  %v2039_v3 = vsel %vm1267_vm3, %v9355_v11, 0.0 }
 0x7ed   : > { %v9357_v38 = vpop.eup %7852 }
 0x7ee   : > { %v2048_v9 = vsel %vm1267_vm3, %v9357_v38, 0.0  ;;  %v9363_v12 = vpop.eup %7854 }
 0x7ef   : > { %2040 = vadd.xlane.f32.xlu1 %v2039_v3  ;;  %2049 = vadd.xlane.f32.xlu0 %v2048_v9  ;;  %v2042_v48 = vsel %vm1267_vm3, %v9363_v12, 0.0 }
 0x7f1   : > { %v9367_v16 = vpop.eup %7856 }
 0x7f2   : > { %v2054_v7 = vsel %vm1267_vm3, %v9367_v16, 0.0 }
 0x7f3   : > { %2043 = vadd.xlane.f32.xlu0 %v2042_v48  ;;  %v7722_v48 = vld [vmem:[%s10876_s4 + $0x10] sm:$0xff]  }
 0x7f5   : > { %v9369_v39 = vpop.eup %7858 }
 0x7f6   : > { %v2057_v50 = vsel %vm1267_vm3, %v9369_v39, 0.0  ;;  %v9375_v55 = vpop.eup %7860 }
 0x7f7   : > { %2058 = vadd.xlane.f32.xlu1 %v2057_v50  ;;  %2055 = vadd.xlane.f32.xlu0 %v2054_v7  ;;  %v2051_v6 = vsel %vm1267_vm3, %v9375_v55, 0.0 }
 0x7fb   : > { %2052 = vadd.xlane.f32.xlu1 %v2051_v6 }
 0x80c   : > { %2082 = vrot.lane.b32.xlu1 %v9019_v35, %s10828_s27 }
 0x80d   : > { %2084 = vrot.lane.b32.xlu0 %v9011_v33, %s10828_s27 }
 0x810   : > { %2080 = vrot.lane.b32.xlu1 %v9030_v41, %s10828_s27 }
 0x814   : > { %2078 = vrot.lane.b32.xlu1 %v9038_v36, %s10828_s27  ;;  %s10878_s27 = smov 16  }
 0x82c   : > { %2369 = vmax.xlane.f32.xlu0 %v2368_v53 }
 0x830   : > { %2375 = vmax.xlane.f32.xlu0 %v2374_v0 }
 0x834   : > { %2378 = vmax.xlane.f32.xlu0 %v2377_v46 }
 0x838   : > { %2372 = vmax.xlane.f32.xlu1 %v2371_v57  ;;  %2381 = vmax.xlane.f32.xlu0 %v2380_v31 }
 0x83c   : > { %2384 = vmax.xlane.f32.xlu1 %v2383_v15  ;;  %2387 = vmax.xlane.f32.xlu0 %v2386_v28 }
 0x84d   : > { %2455 = vrot.lane.b32.xlu1 %v9011_v33, %s10824_s23 }
 0x874   : > { %v2047_v2 = vpop.xlane.xlu1 %2046 }
 0x878   : > { %v2050_v20 = vpop.xlane.xlu0 %2049  ;;  %v2041_v27 = vpop.xlane.xlu1 %2040 }
 0x879   : > { %7862 = vrcp.f32 %v2041_v27 }
 0x87c   : > { %v2044_v18 = vpop.xlane.xlu0 %2043 }
 0x87d   : > { %7864 = vrcp.f32 %v2044_v18 }
 0x87e   : > { %7866 = vrcp.f32 %v2050_v20 }
 0x87f   : > { %7868 = vrcp.f32 %v2047_v2 }
 0x880   : > { %v2056_v62 = vpop.xlane.xlu0 %2055  ;;  %v2059_v13 = vpop.xlane.xlu1 %2058 }
 0x881   : > { %7870 = vrcp.f32 %v2056_v62 }
 0x884   : > { %v2085_v37 = vpop.permute.xlu0 %2084  ;;  %v2053_v58 = vpop.xlane.xlu1 %2052 }
 0x885   : > { %7872 = vrcp.f32 %v2053_v58  ;;  %7520 = vmatprep.subr.msk.bf16.mxu1 %vm1365_vm2, %v2085_v37  ;;  %v2102_v45 = vsel %vm1365_vm2, %v2085_v37, 0 }
 0x886   : > { %7103 = vmatpush3.bf16.msra.mxu1 %v2102_v45  ;;  %7874 = vrcp.f32 %v2059_v13  ;;  %v7863_v33 = vpop.eup %7862 }
 0x887   : > { %v2067_v60 = vmul.f32 %v7863_v33, %v9355_v11 }
 0x888   : > { %v2083_v61 = vpop.permute.xlu1 %2082 }
 0x889   : > { %7104 = vmatprep.subr.bf16.mxu1 %v2083_v61 }
 0x88a   : > { %v7865_v25 = vpop.eup %7864  ;;  %7105 = vmatpush3.bf16.msra.mxu1 %v2083_v61 }
 0x88b   : > { %v2068_v63 = vmul.f32 %v7865_v25, %v9363_v12  ;;  %v7867_v10 = vpop.eup %7866 }
 0x88c   : > { %v2081_v19 = vpop.permute.xlu1 %2080  ;;  %v7869_v3 = vpop.eup %7868  ;;  %v2070_v9 = vmul.f32 %v7867_v10, %v9357_v38 }
 0x88d   : > { %7106 = vmatprep.subr.bf16.mxu1 %v2081_v19  ;;  %v2074_v1 = vpack.c.bf16 %v2068_v63, %v2067_v60  ;;  %v2069_v11 = vmul.f32 %v7869_v3, %v9351_v51 }
 0x88e   : > { %7107 = vmatpush3.bf16.msra.mxu1 %v2081_v19  ;;  %v7871_v50 = vpop.eup %7870 }
 0x88f   : > { %7110 = vmatprep.mubr.msk.bf16.mxu1 %vm1267_vm3, %v2074_v1  ;;  %v2075_v6 = vpack.c.bf16 %v2070_v9, %v2069_v11  ;;  %v2072_v0 = vmul.f32 %v7871_v50, %v9367_v16  ;;  %v9479_v11 = vpop.f32.mrf.mxu1 }
 0x890   : > { %v2079_v7 = vpop.permute.xlu1 %2078 }
 0x891   : > { %7108 = vmatprep.subr.bf16.mxu1 %v2079_v7 }
 0x892   : > { %v7873_v12 = vpop.eup %7872  ;;  %7109 = vmatpush3.bf16.msra.mxu1 %v2079_v7 }
 0x893   : > { %v2071_v53 = vmul.f32 %v7873_v12, %v9375_v55  ;;  %7118 = vmatprep.subr.bf16.mxu1 %v7722_v48  ;;  %v7875_v38 = vpop.eup %7874 }
 0x894   : > { %v2073_v21 = vmul.f32 %v7875_v38, %v9369_v39 }
 0x895   : > { %7111 = vmatmul.mubr.msk.bf16.vlgmr.msra.gmra.mxu1 %vm1267_vm3, %v2075_v6  ;;  %v2076_v46 = vpack.c.bf16 %v2072_v0, %v2071_v53 }
 0x896   : > { %7119 = vmatpush3.bf16.msra.mxu1 %v7722_v48  ;;  %v2077_v57 = vpack.c.bf16 %v2073_v21, %v2073_v21 }
 0x897   : > { %7114 = vmatprep.mubr.msk.bf16.mxu1 %vm1267_vm3, %v2076_v46 }
 0x89d   : > { %7115 = vmatmul.mubr.msk.bf16.gmra.mxu1 %vm1267_vm3, %v2077_v57 }
 0x8b5   : > { %v2370_v51 = vpop.xlane.xlu0 %2369 }
 0x8b6   : > { %v2389_v31 = vsub.f32 %v9388_v4, %v2370_v51 }
 0x8b8   : > { %v2396_v16 = vmul.f32 1.442695, %v2389_v31 }
 0x8b9   : > { %v2376_v15 = vpop.xlane.xlu0 %2375 }
 0x8ba   : > { %v2391_v55 = vsub.f32 %v9391_v22, %v2376_v15 }
 0x8bc   : > { %v2400_v28 = vmul.f32 1.442695, %v2391_v55 }
 0x8bd   : > { %v2379_v2 = vpop.xlane.xlu0 %2378 }
 0x8be   : > { %7876 = vpow2.f32 %v2400_v28  ;;  %v2392_v20 = vsub.f32 %v9396_v44, %v2379_v2 }
 0x8bf   : > { %7878 = vpow2.f32 %v2396_v16 }
 0x8c0   : > { %v2402_v27 = vmul.f32 1.442695, %v2392_v20 }
 0x8c1   : > { %v2382_v18 = vpop.xlane.xlu0 %2381  ;;  %v2373_v62 = vpop.xlane.xlu1 %2372 }
 0x8c2   : > { %7880 = vpow2.f32 %v2402_v27  ;;  %v2390_v39 = vsub.f32 %v9402_v29, %v2373_v62  ;;  %v2393_v37 = vsub.f32 %v9406_v47, %v2382_v18 }
 0x8c4   : > { %v2398_v13 = vmul.f32 1.442695, %v2390_v39  ;;  %v2404_v33 = vmul.f32 1.442695, %v2393_v37 }
 0x8c5   : > { %v2388_v4 = vpop.xlane.xlu0 %2387  ;;  %v2385_v58 = vpop.xlane.xlu1 %2384 }
 0x8c6   : > { %v2395_v22 = vsub.f32 %v9412_v54, %v2388_v4  ;;  %7882 = vpow2.f32 %v2398_v13  ;;  %v2394_v61 = vsub.f32 %v9415_v59, %v2385_v58 }
 0x8c8   : > { %v2408_v45 = vmul.f32 1.442695, %v2395_v22  ;;  %v2406_v47 = vmul.f32 1.442695, %v2394_v61 }
 0x8c9   : > { %v2456_v44 = vpop.permute.xlu1 %2455 }
 0x8ca   : > { %7884 = vpow2.f32 %v2408_v45  ;;  %7525 = vmatprep.subr.msk.bf16.mxu1 %vm1365_vm2, %v2456_v44 }
 0x8cb   : > { %v9451_v25 = vpop.eup %7876  ;;  %7886 = vpow2.f32 %v2404_v33 }
 0x8cc   : > { %v2416_v29 = vsel %vm1267_vm3, %v9451_v25, 0.0  ;;  %v7879_v60 = vpop.eup %7878  ;;  %7888 = vpow2.f32 %v2406_v47 }
 0x8cd   : > { %2417 = vadd.xlane.f32.xlu1 %v2416_v29  ;;  %v2410_v54 = vsel %vm1267_vm3, %v7879_v60, 0.0 }
 0x8cf   : > { %v9455_v63 = vpop.eup %7880 }
 0x8d0   : > { %v2419_v59 = vsel %vm1267_vm3, %v9455_v63, 0.0 }
 0x8d1   : > { %2411 = vadd.xlane.f32.xlu1 %v2410_v54  ;;  %2420 = vadd.xlane.f32.xlu0 %v2419_v59 }
 0x8d3   : > { %v7883_v10 = vpop.eup %7882 }
 0x8d4   : > { %v2413_v19 = vsel %vm1267_vm3, %v7883_v10, 0.0 }
 0x8d5   : > { %2414 = vadd.xlane.f32.xlu0 %v2413_v19 }
 0x8d7   : > { %v9461_v1 = vpop.eup %7884 }
 0x8d8   : > { %v2428_v3 = vsel %vm1267_vm3, %v9461_v1, 0.0  ;;  %v9465_v9 = vpop.eup %7886 }
 0x8d9   : > { %2429 = vadd.xlane.f32.xlu0 %v2428_v3  ;;  %v2422_v48 = vsel %vm1267_vm3, %v9465_v9, 0.0  ;;  %v9469_v50 = vpop.eup %7888 }
 0x8da   : > { %v2425_v7 = vsel %vm1267_vm3, %v9469_v50, 0.0 }
 0x8dd   : > { %2423 = vadd.xlane.f32.xlu0 %v2422_v48 }
 0x8e1   : > { %2426 = vadd.xlane.f32.xlu0 %v2425_v7 }
 0x8e2   : > { %2451 = vrot.lane.b32.xlu1 %v9030_v41, %s10824_s23 }
 0x8e6   : > { %2449 = vrot.lane.b32.xlu1 %v9038_v36, %s10824_s23 }
 0x8f7   : > { %2453 = vrot.lane.b32.xlu0 %v9019_v35, %s10824_s23  ;;  %v2473_v35 = vsel %vm1365_vm2, %v2456_v44, 0 }
 0x955   : > { %v7112_v12 = vpop.f32.mrf.mxu1 }
 0x956   : > { %v2418_v6 = vpop.xlane.xlu1 %2417 }
 0x957   : > { %v2138_v53 = vpop.f32.mrf.mxu1 }
 0x959   : > { %v7113_v0 = vpop.f32.mrf.mxu1 }
 0x95a   : > { %v2421_v38 = vpop.xlane.xlu0 %2420  ;;  %v2412_v46 = vpop.xlane.xlu1 %2411  ;;  %v2169_v51 = vpack.c.bf16 %v7113_v0, %v7112_v12 }
 0x95b   : > { %v2141_v21 = vpop.f32.mrf.mxu1  ;;  %7890 = vrcp.f32 %v2412_v46 }
 0x95c   : > { %v2168_v57 = vpack.c.bf16 %v2141_v21, %v2138_v53 }
 0x95d   : > { %v7116_v31 = vpop.f32.mrf.mxu1 }
 0x95e   : > { %7120 = vmatprep.mubr.msk.bf16.mxu1 %vm1178_vm1, %v2168_v57  ;;  %v2415_v41 = vpop.xlane.xlu0 %2414  ;;  %v2171_v2 = vpack.c.bf16 %v7116_v31, %v7116_v31  ;;  %v2452_v37 = vpop.permute.xlu1 %2451 }
 0x95f   : > { %v2154_v36 = vpop.f32.mrf.mxu1  ;;  %7121 = vmatmul.mubr.msk.bf16.vlgmr.msra.gmra.mxu1 %vm1178_vm1, %v2169_v51  ;;  %7892 = vrcp.f32 %v2415_v41 }
 0x960   : > { %7145 = vmatpush3.bf16.msra.mxu1 %v2473_v35  ;;  %7894 = vrcp.f32 %v2421_v38 }
 0x961   : > { %v7117_v15 = vpop.f32.mrf.mxu1  ;;  %7896 = vrcp.f32 %v2418_v6 }
 0x962   : > { %v2430_v55 = vpop.xlane.xlu0 %2429  ;;  %v2450_v33 = vpop.permute.xlu1 %2449 }
 0x963   : > { %v2157_v16 = vpop.f32.mrf.mxu1 }
 0x964   : > { %v2170_v28 = vpack.c.bf16 %v2157_v16, %v2154_v36 }
 0x966   : > { %7124 = vmatprep.mubr.msk.bf16.mxu1 %vm1178_vm1, %v2170_v28  ;;  %v2424_v20 = vpop.xlane.xlu0 %2423 }
 0x967   : > { %7125 = vmatmul.mubr.msk.bf16.gmra.mxu1 %vm1178_vm1, %v2171_v2  ;;  %7898 = vrcp.f32 %v2424_v20  ;;  %v6568_v2 = vld [vmem:[#allocation7] ss:$0 sm:$0xff] }
 0x968   : > { %v7891_v27 = vpop.eup %7890 }
 0x969   : > { %v2438_v39 = vmul.f32 %v7891_v27, %v7879_v60  ;;  %v1867_v27 = vadd.f32 %v9315_v49, %v9323_v8  ;;  %v1883_v49 = vadd.f32 %v9479_v11, %v9329_v17 }
 0x96a   : > { %v2427_v18 = vpop.xlane.xlu0 %2426 }
 0x96b   : > { %7900 = vrcp.f32 %v2427_v18 }
 0x96c   : > { %v7893_v62 = vpop.eup %7892  ;;  %7902 = vrcp.f32 %v2430_v55 }
 0x96d   : > { %v2439_v13 = vmul.f32 %v7893_v62, %v7883_v10  ;;  %v7895_v22 = vpop.eup %7894 }
 0x96e   : > { %v2454_v4 = vpop.permute.xlu0 %2453  ;;  %v7897_v45 = vpop.eup %7896  ;;  %v2441_v61 = vmul.f32 %v7895_v22, %v9455_v63 }
 0x96f   : > { %7146 = vmatprep.subr.bf16.mxu1 %v2454_v4  ;;  %v2445_v58 = vpack.c.bf16 %v2439_v13, %v2438_v39  ;;  %v2440_v29 = vmul.f32 %v7897_v45, %v9451_v25  ;;  %v7723_v25 = vld [vmem:[%s10876_s4 + $0x18] sm:$0xff]  }
 0x970   : > { %7147 = vmatpush3.bf16.msra.mxu1 %v2454_v4 }
 0x971   : > { %7148 = vmatprep.subr.bf16.mxu1 %v2452_v37  ;;  %7152 = vmatprep.mubr.msk.bf16.mxu1 %vm1267_vm3, %v2445_v58  ;;  %v2446_v47 = vpack.c.bf16 %v2441_v61, %v2440_v29 }
 0x974   : > { %7149 = vmatpush3.bf16.msra.mxu1 %v2452_v37  ;;  %v7899_v44 = vpop.eup %7898 }
 0x975   : > { %7150 = vmatprep.subr.bf16.mxu1 %v2450_v33  ;;  %v2442_v54 = vmul.f32 %v7899_v44, %v9465_v9 }
 0x978   : > { %v7901_v60 = vpop.eup %7900  ;;  %7151 = vmatpush3.bf16.msra.mxu1 %v2450_v33 }
 0x979   : > { %v2443_v59 = vmul.f32 %v7901_v60, %v9469_v50  ;;  %v7903_v10 = vpop.eup %7902  ;;  %7160 = vmatprep.subr.bf16.mxu1 %v7723_v25 }
 0x97a   : > { %v2444_v3 = vmul.f32 %v7903_v10, %v9461_v1 }
 0x97b   : > { %7153 = vmatmul.mubr.msk.bf16.vlgmr.msra.gmra.mxu1 %vm1267_vm3, %v2446_v47  ;;  %v2447_v19 = vpack.c.bf16 %v2443_v59, %v2442_v54 }
 0x97c   : > { %v2448_v63 = vpack.c.bf16 %v2444_v3, %v2444_v3  ;;  %7161 = vmatpush3.bf16.msra.mxu1 %v7723_v25 }
 0x97d   : > { %7156 = vmatprep.mubr.msk.bf16.mxu1 %vm1267_vm3, %v2447_v19 }
 0x983   : > { %7157 = vmatmul.mubr.msk.bf16.gmra.mxu1 %vm1267_vm3, %v2448_v63 }
 0xa1f   : > { %v7122_v9 = vpop.f32.mrf.mxu1 }
 0xa20   : > { %v2259_v48 = vadd.f32 %v7122_v9, %v9317_v56 }
 0xa21   : > { %v2227_v50 = vpop.f32.mrf.mxu1 }
 0xa22   : > { %v2257_v7 = vadd.f32 %v2227_v50, %v9319_v26 }
 0xa23   : > { %v7123_v12 = vpop.f32.mrf.mxu1 }
 0xa24   : > { %v2260_v6 = vadd.f32 %v7123_v12, %v9321_v5 }
 0xa25   : > { %v2230_v53 = vpop.f32.mrf.mxu1 }
 0xa26   : > { %v2258_v13 = vadd.f32 %v2230_v53, %v1867_v27 }
 0xa27   : > { %v7126_v1 = vpop.f32.mrf.mxu1 }
 0xa28   : > { %v2263_v0 = vadd.f32 %v7126_v1, %v9325_v14 }
 0xa29   : > { %v2243_v38 = vpop.f32.mrf.mxu1 }
 0xa2a   : > { %v2261_v46 = vadd.f32 %v2243_v38, %v9327_v30 }
 0xa2b   : > { %v7127_v21 = vpop.f32.mrf.mxu1 }
 0xa2d   : > { %v2246_v57 = vpop.f32.mrf.mxu1 }
 0xa2e   : > { %v2262_v10 = vadd.f32 %v2246_v57, %v1883_v49 }
 0xa3b   : > { %v7154_v51 = vpop.f32.mrf.mxu1 }
 0xa3d   : > { %v2509_v31 = vpop.f32.mrf.mxu1 }
 0xa3f   : > { %v7155_v41 = vpop.f32.mrf.mxu1 }
 0xa40   : > { %v2540_v35 = vpack.c.bf16 %v7155_v41, %v7154_v51 }
 0xa41   : > { %v2512_v36 = vpop.f32.mrf.mxu1 }
 0xa42   : > { %v2539_v56 = vpack.c.bf16 %v2512_v36, %v2509_v31 }
 0xa43   : > { %v7158_v15 = vpop.f32.mrf.mxu1 }
 0xa44   : > { %7162 = vmatprep.mubr.msk.bf16.mxu1 %vm1178_vm1, %v2539_v56  ;;  %v2542_v16 = vpack.c.bf16 %v7158_v15, %v7158_v15 }
 0xa45   : > { %v2525_v26 = vpop.f32.mrf.mxu1  ;;  %7163 = vmatmul.mubr.msk.bf16.vlgmr.msra.gmra.mxu1 %vm1178_vm1, %v2540_v35 }
 0xa47   : > { %v7159_v5 = vpop.f32.mrf.mxu1 }
 0xa49   : > { %v2528_v55 = vpop.f32.mrf.mxu1 }
 0xa4a   : > { %v2541_v14 = vpack.c.bf16 %v2528_v55, %v2525_v26 }
 0xa4c   : > { %7166 = vmatprep.mubr.msk.bf16.mxu1 %vm1178_vm1, %v2541_v14 }
 0xa4d   : > { %7167 = vmatmul.mubr.msk.bf16.gmra.mxu1 %vm1178_vm1, %v2542_v16 }
 0xb05   : > { %v7164_v30 = vpop.f32.mrf.mxu1 }
 0xb06   : > { %v2630_v28 = vadd.f32 %v7164_v30, %v2259_v48 }
 0xb07   : > { %v2598_v20 = vpop.f32.mrf.mxu1 }
 0xb08   : > { %v2628_v18 = vadd.f32 %v2598_v20, %v2257_v7  ;;  %v2644_v62 = vadd.f32 %v6568_v2, %v2630_v28 }
 0xb09   : > { %v7165_v39 = vpop.f32.mrf.mxu1 }
 0xb0a   : > { %v2642_v37 = vadd.f32 %v6568_v2, %v2628_v18  ;;  %v2631_v4 = vadd.f32 %v7165_v39, %v2260_v6  ;;  %v2651_v61 = vadd.f32 %v2644_v62, %v8921_v34 }
 0xb0b   : > { %v2601_v58 = vpop.f32.mrf.mxu1 }
 0xb0c   : > { %v2629_v22 = vadd.f32 %v2601_v58, %v2258_v13  ;;  %v2649_v45 = vadd.f32 %v2642_v37, %v8908_v23  ;;  %v2645_v44 = vadd.f32 %v6568_v2, %v2631_v4  ;;  %v2664_v23 = vsel %vm921_vm0, %v2651_v61, 0.0 }
 0xb0d   : > { %v7168_v33 = vpop.f32.mrf.mxu1 }
 0xb0e   : > { %v2643_v29 = vadd.f32 %v6568_v2, %v2629_v22  ;;  %v2634_v60 = vadd.f32 %v7168_v33, %v2263_v0  ;;  %v2658_v47 = vsel %vm921_vm0, %v2649_v45, 0.0  ;;  %v2652_v25 = vadd.f32 %v2645_v44, %v8918_v32  ;;  %v7725_v33 = vld [vmem:[%s10794_s10 + $0x8] sm:$0xff]   ;;  %v7727_v44 = vld [vmem:[%s10794_s10] sm:$0xff]  }
 0xb0f   : > { %2659 = vadd.xlane.f32.xlu1 %v2658_v47  ;;  %v2614_v8 = vpop.f32.mrf.mxu1  ;;  %7170 = vmatprep.subr.bf16.mxu0 %v7725_v33 }
 0xb10   : > { %v2632_v54 = vadd.f32 %v2614_v8, %v2261_v46  ;;  %v2650_v59 = vadd.f32 %v2643_v29, %v8910_v24  ;;  %v2648_v3 = vadd.f32 %v6568_v2, %v2634_v60  ;;  %v2667_v50 = vsel %vm921_vm0, %v2652_v25, 0.0  ;;  %7171 = vmatpush3.bf16.msra.mxu0 %v7725_v33  ;;  %v7733_v33 = vld [vmem:[%s10798_s14 + $0x10] sm:$0xff]  }
 0xb11   : > { %v7169_v19 = vpop.f32.mrf.mxu1  ;;  %7172 = vmatprep.subr.bf16.mxu0 %v7727_v44 }
 0xb12   : > { %v2646_v63 = vadd.f32 %v6568_v2, %v2632_v54  ;;  %v2661_v34 = vsel %vm921_vm0, %v2650_v59, 0.0  ;;  %v2655_v7 = vadd.f32 %v2648_v3, %v8937_v43 }
 0xb13   : > { %2665 = vadd.xlane.f32.xlu1 %v2664_v23  ;;  %2662 = vadd.xlane.f32.xlu0 %v2661_v34  ;;  %v2617_v9 = vpop.f32.mrf.mxu1 }
 0xb14   : > { %v2633_v48 = vadd.f32 %v2617_v9, %v2262_v10  ;;  %v2653_v17 = vadd.f32 %v2646_v63, %v8931_v42  ;;  %v2676_v6 = vsel %vm921_vm0, %v2655_v7, 0.0  ;;  %7173 = vmatpush3.bf16.msra.mxu0 %v7727_v44  ;;  %v7735_v44 = vld [vmem:[%s10798_s14] sm:$0xff]  }
 0xb16   : > { %v2647_v11 = vadd.f32 %v6568_v2, %v2633_v48  ;;  %v2670_v24 = vsel %vm921_vm0, %v2653_v17, 0.0 }
 0xb17   : > { %2668 = vadd.xlane.f32.xlu1 %v2667_v50  ;;  %2671 = vadd.xlane.f32.xlu0 %v2670_v24 }
 0xb18   : > { %v2654_v12 = vadd.f32 %v2647_v11, %v8928_v40 }
 0xb1a   : > { %v2673_v32 = vsel %vm921_vm0, %v2654_v12, 0.0 }
 0xb1b   : > { %2677 = vadd.xlane.f32.xlu0 %v2676_v6  ;;  %2674 = vadd.xlane.f32.xlu1 %v2673_v32  ;;  %v6569_v32 = vld [vmem:[#allocation8] ss:$0 sm:$0xff] }
 0xb98   : > { %v2660_v53 = vpop.xlane.xlu1 %2659 }
 0xb99   : > { %v2679_v1 = vmul.f32 0.03125, %v2660_v53 }
 0xb9b   : > { %v9525_v42 = vsub.f32 %v2649_v45, %v2679_v1  ;;  %v7724_v45 = vld [vmem:[#allocation13 + $0x8] sm:$0xff]  }
 0xb9c   : > { %v2666_v0 = vpop.xlane.xlu1 %2665  ;;  %v2663_v38 = vpop.xlane.xlu0 %2662  ;;  %7182 = vmatprep.subr.bf16.mxu1 %v7724_v45 }
 0xb9d   : > { %v2681_v46 = vmul.f32 0.03125, %v2666_v0  ;;  %v2680_v21 = vmul.f32 0.03125, %v2663_v38  ;;  %v2693_v43 = vmul.f32 %v9525_v42, %v9525_v42  ;;  %7183 = vmatpush3.bf16.msra.mxu1 %v7724_v45  ;;  %v7732_v45 = vld [vmem:[%s10798_s14 + $0x18] sm:$0xff]  }
 0xb9f   : > { %v9529_v57 = vsub.f32 %v2651_v61, %v2681_v46  ;;  %v9531_v40 = vsub.f32 %v2650_v59, %v2680_v21  ;;  %v2700_v51 = vsel %vm921_vm0, %v2693_v43, 0.0  ;;  %v7726_v61 = vld [vmem:[#allocation13] sm:$0xff]   ;;  %v6570_v21 = vld [vmem:[#allocation10] ss:$0 sm:$0xff] }
 0xba0   : > { %v2669_v31 = vpop.xlane.xlu1 %2668  ;;  %v2672_v41 = vpop.xlane.xlu0 %2671  ;;  %2701 = vadd.xlane.f32.xlu1 %v2700_v51  ;;  %7184 = vmatprep.subr.bf16.mxu1 %v7726_v61 }
 0xba1   : > { %v2682_v36 = vmul.f32 0.03125, %v2669_v31  ;;  %v2683_v56 = vmul.f32 0.03125, %v2672_v41  ;;  %v2694_v35 = vmul.f32 %v9531_v40, %v9531_v40  ;;  %v2695_v15 = vmul.f32 %v9529_v57, %v9529_v57  ;;  %7185 = vmatpush3.bf16.msra.mxu1 %v7726_v61  ;;  %v7734_v61 = vld [vmem:[%s10798_s14 + $0x8] sm:$0xff]  }
 0xba3   : > { %v9538_v26 = vsub.f32 %v2652_v25, %v2682_v36  ;;  %v9540_v5 = vsub.f32 %v2653_v17, %v2683_v56  ;;  %v2703_v55 = vsel %vm921_vm0, %v2694_v35, 0.0  ;;  %v2706_v14 = vsel %vm921_vm0, %v2695_v15, 0.0 }
 0xba4   : > { %2704 = vadd.xlane.f32.xlu0 %v2703_v55  ;;  %v2678_v16 = vpop.xlane.xlu0 %2677  ;;  %2707 = vadd.xlane.f32.xlu1 %v2706_v14  ;;  %v2675_v30 = vpop.xlane.xlu1 %2674 }
 0xba5   : > { %v2685_v28 = vmul.f32 0.03125, %v2678_v16  ;;  %v2684_v2 = vmul.f32 0.03125, %v2675_v30  ;;  %v2696_v20 = vmul.f32 %v9538_v26, %v9538_v26  ;;  %v2697_v27 = vmul.f32 %v9540_v5, %v9540_v5 }
 0xba7   : > { %v9548_v18 = vsub.f32 %v2655_v7, %v2685_v28  ;;  %v9550_v62 = vsub.f32 %v2654_v12, %v2684_v2  ;;  %v2709_v39 = vsel %vm921_vm0, %v2696_v20, 0.0  ;;  %v2712_v13 = vsel %vm921_vm0, %v2697_v27, 0.0 }
 0xba8   : > { %2710 = vadd.xlane.f32.xlu0 %v2709_v39  ;;  %2713 = vadd.xlane.f32.xlu1 %v2712_v13 }
 0xba9   : > { %v2699_v37 = vmul.f32 %v9548_v18, %v9548_v18  ;;  %v2698_v4 = vmul.f32 %v9550_v62, %v9550_v62 }
 0xbab   : > { %v2718_v58 = vsel %vm921_vm0, %v2699_v37, 0.0  ;;  %v2715_v22 = vsel %vm921_vm0, %v2698_v4, 0.0  ;;  %v7728_v37 = vld [vmem:[%s10798_s14 + $0x38] sm:$0xff]   ;;  %v7729_v4 = vld [vmem:[%s10798_s14 + $0x30] sm:$0xff]  }
 0xbac   : > { %2719 = vadd.xlane.f32.xlu1 %v2718_v58  ;;  %2716 = vadd.xlane.f32.xlu0 %v2715_v22  ;;  %v7730_v58 = vld [vmem:[%s10798_s14 + $0x28] sm:$0xff]   ;;  %v7731_v22 = vld [vmem:[%s10798_s14 + $0x20] sm:$0xff]  }
 0xbad   : > { %7194 = vmatprep.subr.bf16.mxu0 %v7728_v37 }
 0xc29   : > { %v2702_v29 = vpop.xlane.xlu1 %2701 }
 0xc2a   : > { %v2721_v60 = vmul.f32 0.03125, %v2702_v29  ;;  %v6578_v29 = vld [vmem:[#allocation14] ss:$0 sm:$0xff] }
 0xc2c   : > { %v2728_v47 = vadd.f32 1e-05, %v2721_v60 }
 0xc2d   : > { %v2705_v49 = vpop.xlane.xlu0 %2704  ;;  %v2708_v8 = vpop.xlane.xlu1 %2707 }
 0xc2e   : > { %7904 = vrsqrt.f32 %v2728_v47  ;;  %v2722_v54 = vmul.f32 0.03125, %v2705_v49  ;;  %v2723_v59 = vmul.f32 0.03125, %v2708_v8 }
 0xc30   : > { %v2729_v10 = vadd.f32 1e-05, %v2722_v54  ;;  %v2730_v19 = vadd.f32 1e-05, %v2723_v59 }
 0xc31   : > { %v2711_v23 = vpop.xlane.xlu0 %2710  ;;  %v2714_v3 = vpop.xlane.xlu1 %2713 }
 0xc32   : > { %7906 = vrsqrt.f32 %v2729_v10  ;;  %v2724_v63 = vmul.f32 0.03125, %v2711_v23  ;;  %v2725_v34 = vmul.f32 0.03125, %v2714_v3 }
 0xc33   : > { %7908 = vrsqrt.f32 %v2730_v19 }
 0xc34   : > { %v2731_v25 = vadd.f32 1e-05, %v2724_v63  ;;  %v2732_v9 = vadd.f32 1e-05, %v2725_v34 }
 0xc35   : > { %v2717_v48 = vpop.xlane.xlu0 %2716  ;;  %v2720_v17 = vpop.xlane.xlu1 %2719 }
 0xc36   : > { %7910 = vrsqrt.f32 %v2731_v25  ;;  %v2726_v11 = vmul.f32 0.03125, %v2717_v48  ;;  %v2727_v50 = vmul.f32 0.03125, %v2720_v17 }
 0xc37   : > { %7912 = vrsqrt.f32 %v2732_v9 }
 0xc38   : > { %v2733_v24 = vadd.f32 1e-05, %v2726_v11  ;;  %v2734_v7 = vadd.f32 1e-05, %v2727_v50 }
 0xc3a   : > { %7914 = vrsqrt.f32 %v2733_v24 }
 0xc3b   : > { %v7905_v12 = vpop.eup %7904  ;;  %7916 = vrsqrt.f32 %v2734_v7 }
 0xc3c   : > { %v2742_v6 = vmul.f32 %v7905_v12, %v9525_v42 }
 0xc3e   : > { %v2755_v38 = vmul.f32 %v6569_v32, %v2742_v6 }
 0xc3f   : > { %v7907_v53 = vpop.eup %7906 }
 0xc40   : > { %v7909_v1 = vpop.eup %7908  ;;  %v2743_v0 = vmul.f32 %v7907_v53, %v9531_v40  ;;  %v9570_v56 = vadd.f32 %v6570_v21, %v2755_v38 }
 0xc41   : > { %v2744_v46 = vmul.f32 %v7909_v1, %v9529_v57 }
 0xc42   : > { %v2756_v43 = vmul.f32 %v6569_v32, %v2743_v0 }
 0xc43   : > { %v7911_v51 = vpop.eup %7910  ;;  %v2757_v31 = vmul.f32 %v6569_v32, %v2744_v46 }
 0xc44   : > { %v7913_v41 = vpop.eup %7912  ;;  %v2745_v36 = vmul.f32 %v7911_v51, %v9538_v26  ;;  %v9572_v35 = vadd.f32 %v6570_v21, %v2756_v43 }
 0xc45   : > { %v2746_v42 = vmul.f32 %v7913_v41, %v9540_v5  ;;  %v9577_v14 = vadd.f32 %v6570_v21, %v2757_v31 }
 0xc46   : > { %v2758_v15 = vmul.f32 %v6569_v32, %v2745_v36  ;;  %v2775_v40 = vpack.c.bf16 %v9572_v35, %v9570_v56 }
 0xc47   : > { %v7915_v55 = vpop.eup %7914  ;;  %v2759_v30 = vmul.f32 %v6569_v32, %v2746_v42 }
 0xc48   : > { %v7917_v57 = vpop.eup %7916  ;;  %7174 = vmatprep.mubr.msk.bf16.mxu0 %vm921_vm0, %v2775_v40  ;;  %7186 = vmatprep.mubr.msk.bf16.mxu1 %vm921_vm0, %v2775_v40  ;;  %v9581_v16 = vadd.f32 %v6570_v21, %v2758_v15  ;;  %v2747_v26 = vmul.f32 %v7915_v55, %v9550_v62 }
 0xc49   : > { %v2748_v28 = vmul.f32 %v7917_v57, %v9548_v18  ;;  %v9589_v27 = vadd.f32 %v6570_v21, %v2759_v30 }
 0xc4a   : > { %v2776_v5 = vpack.c.bf16 %v9581_v16, %v9577_v14  ;;  %v2760_v2 = vmul.f32 %v6569_v32, %v2747_v26 }
 0xc4b   : > { %v2761_v20 = vmul.f32 %v6569_v32, %v2748_v28 }
 0xc4c   : > { %7175 = vmatmul.mubr.msk.bf16.vlgmr.msra.gmra.mxu0 %vm921_vm0, %v2776_v5  ;;  %7187 = vmatmul.mubr.msk.bf16.vlgmr.msra.gmra.mxu1 %vm921_vm0, %v2776_v5  ;;  %v9591_v39 = vadd.f32 %v6570_v21, %v2760_v2 }
 0xc4d   : > { %v9595_v62 = vadd.f32 %v6570_v21, %v2761_v20  ;;  %7195 = vmatpush3.bf16.msra.mxu0 %v7728_v37 }
 0xc4e   : > { %v2777_v13 = vpack.c.bf16 %v9591_v39, %v9589_v27  ;;  %7196 = vmatprep.subr.bf16.mxu0 %v7729_v4 }
 0xc4f   : > { %v2778_v18 = vpack.c.bf16 %v9595_v62, %v9595_v62 }
 0xc50   : > { %7178 = vmatprep.mubr.msk.bf16.mxu0 %vm921_vm0, %v2777_v13  ;;  %7190 = vmatprep.mubr.msk.bf16.mxu1 %vm921_vm0, %v2777_v13 }
 0xc51   : > { %7197 = vmatpush3.bf16.msra.mxu0 %v7729_v4 }
 0xc52   : > { %7198 = vmatprep.subr.bf16.mxu0 %v7730_v58 }
 0xc54   : > { %7179 = vmatmul.mubr.msk.bf16.gmra.mxu0 %vm921_vm0, %v2778_v18  ;;  %7191 = vmatmul.mubr.msk.bf16.gmra.mxu1 %vm921_vm0, %v2778_v18 }
 0xc55   : > { %3501 = vmatprep.mubr.bf16.mxu1 %v8508_v52  ;;  %7199 = vmatpush3.bf16.msra.mxu0 %v7730_v58 }
 0xc56   : > { %7200 = vmatprep.subr.bf16.mxu0 %v7731_v22 }
 0xc59   : > { %7201 = vmatpush3.bf16.msra.mxu0 %v7731_v22 }
 0xc5a   : > { %7202 = vmatprep.subr.bf16.mxu0 %v7732_v45 }
 0xc5d   : > { %7203 = vmatpush3.bf16.msra.mxu0 %v7732_v45 }
 0xc5e   : > { %7204 = vmatprep.subr.bf16.mxu0 %v7733_v33 }
 0xc61   : > { %7205 = vmatpush3.bf16.msra.mxu0 %v7733_v33 }
 0xc62   : > { %7206 = vmatprep.subr.bf16.mxu0 %v7734_v61 }
 0xc65   : > { %7207 = vmatpush3.bf16.msra.mxu0 %v7734_v61 }
 0xc66   : > { %7208 = vmatprep.subr.bf16.mxu0 %v7735_v44 }
 0xc69   : > { %7209 = vmatpush3.bf16.msra.mxu0 %v7735_v44 }
 0xd0c   : > { %v9628_v60 = vpop.f32.mrf.mxu0  ;;  %v7188_v47 = vpop.f32.mrf.mxu1 }
 0xd0d   : > { %v9630_v49 = vadd.f32 %v7188_v47, %v6578_v29 }
 0xd0e   : > { %v9632_v8 = vpop.f32.mrf.mxu0  ;;  %v2935_v54 = vpop.f32.mrf.mxu1 }
 0xd0f   : > { %v9635_v59 = vmul.f32 0.70710677, %v9630_v49  ;;  %v9637_v10 = vadd.f32 %v6578_v29, %v2935_v54 }
 0xd10   : > { %v9639_v19 = vpop.f32.mrf.mxu0  ;;  %v7189_v23 = vpop.f32.mrf.mxu1 }
 0xd11   : > { %v2995_v3 = vand.u32 2147483647, %v9635_v59  ;;  %v9643_v63 = vmul.f32 0.70710677, %v9637_v10  ;;  %v9645_v34 = vadd.f32 %v7189_v23, %v6578_v29  ;;  %vm2981_vm4 = vcmp.ge.f32.partialorder %v9635_v59, 0.0 }
 0xd12   : > { %v9647_v25 = vpop.f32.mrf.mxu0  ;;  %v2938_v9 = vpop.f32.mrf.mxu1 }
 0xd13   : > { %v3002_v48 = vmul.f32 0.3275911, %v2995_v3  ;;  %v2993_v17 = vand.u32 2147483647, %v9643_v63  ;;  %v9651_v11 = vmul.f32 0.70710677, %v9645_v34  ;;  %v9656_v32 = vadd.f32 %v6578_v29, %v2938_v9 }
 0xd14   : > { %v9653_v50 = vpop.f32.mrf.mxu0  ;;  %v7192_v24 = vpop.f32.mrf.mxu1  ;;  %v3093_v41 = vsub.f32 0.0, %v2995_v3  ;;  %vm2979_vm5 = vcmp.ge.f32.partialorder %v9643_v63, 0.0 }
 0xd15   : > { %v3009_v7 = vadd.f32 1.0, %v3002_v48  ;;  %v3000_v12 = vmul.f32 0.3275911, %v2993_v17  ;;  %v2996_v6 = vand.u32 2147483647, %v9651_v11  ;;  %v9663_v51 = vadd.f32 %v7192_v24, %v6578_v29 }
 0xd16   : > { %v9658_v53 = vpop.f32.mrf.mxu0  ;;  %v2951_v1 = vpop.f32.mrf.mxu1  ;;  %v9661_v43 = vmul.f32 0.70710677, %v9656_v32  ;;  %v3100_v30 = vmul.f32 %v3093_v41, %v2995_v3  ;;  %v3091_v5 = vsub.f32 0.0, %v2993_v17  ;;  %vm2982_vm6 = vcmp.ge.f32.partialorder %v9651_v11, 0.0 }
 0xd17   : > { %7918 = vrcp.f32 %v3009_v7  ;;  %v3007_v0 = vadd.f32 1.0, %v3000_v12  ;;  %v3003_v38 = vmul.f32 0.3275911, %v2996_v6  ;;  %v9667_v15 = vmul.f32 0.70710677, %v9663_v51 }
 0xd18   : > { %v7181_v46 = vpop.f32.mrf.mxu0  ;;  %v7193_v21 = vpop.f32.mrf.mxu1  ;;  %v2994_v36 = vand.u32 2147483647, %v9661_v43  ;;  %v9669_v55 = vadd.f32 %v6578_v29, %v2951_v1  ;;  %v3094_v18 = vsub.f32 0.0, %v2996_v6  ;;  %v3109_v58 = vmul.f32 1.442695, %v3100_v30 }
 0xd19   : > { %7920 = vrcp.f32 %v3007_v0  ;;  %v3010_v31 = vadd.f32 1.0, %v3003_v38  ;;  %v2999_v57 = vand.u32 2147483647, %v9667_v15  ;;  %v3098_v33 = vmul.f32 %v3091_v5, %v2993_v17 }
 0xd1a   : > { %v2954_v42 = vpop.f32.mrf.mxu1  ;;  %v3001_v40 = vmul.f32 0.3275911, %v2994_v36  ;;  %v9675_v20 = vmul.f32 0.70710677, %v9669_v55  ;;  %v3101_v47 = vmul.f32 %v3094_v18, %v2996_v6  ;;  %v3092_v54 = vsub.f32 0.0, %v2994_v36 }
 0xd1b   : > { %7922 = vrcp.f32 %v3010_v31  ;;  %v9672_v26 = vadd.f32 %v6578_v29, %v2954_v42  ;;  %v3006_v2 = vmul.f32 0.3275911, %v2999_v57  ;;  %v3105_v7 = vmul.f32 1.442695, %v3098_v33 }
 0xd1c   : > { %v3008_v28 = vadd.f32 1.0, %v3001_v40  ;;  %v2997_v4 = vand.u32 2147483647, %v9675_v20  ;;  %v3097_v17 = vsub.f32 0.0, %v2999_v57  ;;  %v3111_v6 = vmul.f32 1.442695, %v3101_v47 }
 0xd1d   : > { %v9678_v13 = vmul.f32 0.70710677, %v9672_v26  ;;  %v3013_v37 = vadd.f32 1.0, %v3006_v2  ;;  %v3099_v46 = vmul.f32 %v3092_v54, %v2994_v36  ;;  %vm2980_vm7 = vcmp.ge.f32.partialorder %v9661_v43, 0.0 }
 0xd1e   : > { %7924 = vrcp.f32 %v3008_v28  ;;  %v3004_v61 = vmul.f32 0.3275911, %v2997_v4  ;;  %v3104_v40 = vmul.f32 %v3097_v17, %v2999_v57  ;;  %v3095_v30 = vsub.f32 0.0, %v2997_v4 }
 0xd1f   : > { %v2998_v22 = vand.u32 2147483647, %v9678_v13  ;;  %7926 = vrcp.f32 %v3013_v37  ;;  %v3107_v18 = vmul.f32 1.442695, %v3099_v46  ;;  %vm2985_vm8 = vcmp.ge.f32.partialorder %v9667_v15, 0.0 }
 0xd20   : > { %v3011_v23 = vadd.f32 1.0, %v3004_v61  ;;  %7928 = vpow2.f32 %v3109_v58  ;;  %v3117_v57 = vmul.f32 1.442695, %v3104_v40  ;;  %v3102_v54 = vmul.f32 %v3095_v30, %v2997_v4 }
 0xd21   : > { %v3005_v29 = vmul.f32 0.3275911, %v2998_v22  ;;  %v3096_v33 = vsub.f32 0.0, %v2998_v22  ;;  %v2966_v43 = vmul.f32 0.5, %v9656_v32  ;;  %vm2983_vm9 = vcmp.ge.f32.partialorder %v9675_v20, 0.0 }
 0xd22   : > { %7930 = vrcp.f32 %v3011_v23  ;;  %vm2984_vm10 = vcmp.ge.f32.partialorder %v9678_v13, 0.0 }
 0xd23   : > { %v3012_v48 = vadd.f32 1.0, %v3005_v29 }
 0xd24   : > { %v7919_v45 = vpop.eup %7918 }
 0xd25   : > { %v3030_v44 = vmul.f32 1.0614054, %v7919_v45  ;;  %7932 = vrcp.f32 %v3012_v48 }
 0xd26   : > { %v9682_v3 = vpop.eup %7920  ;;  %7934 = vpow2.f32 %v3105_v7 }
 0xd27   : > { %v3037_v9 = vadd.f32 -1.4531521, %v3030_v44  ;;  %v3028_v24 = vmul.f32 1.0614054, %v9682_v3  ;;  %7936 = vpow2.f32 %v3111_v6 }
 0xd28   : > { %v9685_v12 = vpop.eup %7922  ;;  %7938 = vpow2.f32 %v3107_v18 }
 0xd29   : > { %v3044_v1 = vmul.f32 %v7919_v45, %v3037_v9  ;;  %v3035_v0 = vadd.f32 -1.4531521, %v3028_v24  ;;  %v3031_v38 = vmul.f32 1.0614054, %v9685_v12  ;;  %7940 = vpow2.f32 %v3117_v57 }
 0xd2b   : > { %v3051_v21 = vadd.f32 1.4214138, %v3044_v1  ;;  %v3042_v31 = vmul.f32 %v9682_v3, %v3035_v0  ;;  %v3038_v41 = vadd.f32 -1.4531521, %v3031_v38  ;;  %v9689_v28 = vpop.eup %7924  ;;  %v3103_v1 = vmul.f32 %v3096_v33, %v2998_v22 }
 0xd2c   : > { %v3029_v58 = vmul.f32 1.0614054, %v9689_v28  ;;  %v9694_v44 = vpop.eup %7926 }
 0xd2d   : > { %v3058_v42 = vmul.f32 %v7919_v45, %v3051_v21  ;;  %v3049_v5 = vadd.f32 1.4214138, %v3042_v31  ;;  %v3045_v2 = vmul.f32 %v9685_v12, %v3038_v41  ;;  %v3034_v48 = vmul.f32 1.0614054, %v9694_v44  ;;  %v7929_v17 = vpop.eup %7928 }
 0xd2e   : > { %v3036_v47 = vadd.f32 -1.4531521, %v3029_v58  ;;  %v3113_v31 = vmul.f32 1.442695, %v3102_v54 }
 0xd2f   : > { %v3065_v37 = vadd.f32 -0.28449672, %v3058_v42  ;;  %v3056_v36 = vmul.f32 %v9682_v3, %v3049_v5  ;;  %v3052_v61 = vadd.f32 1.4214138, %v3045_v2  ;;  %v3041_v6 = vadd.f32 -1.4531521, %v3034_v48  ;;  %v9702_v4 = vpop.eup %7930 }
 0xd30   : > { %v3043_v7 = vmul.f32 %v9689_v28, %v3036_v47  ;;  %v3032_v30 = vmul.f32 1.0614054, %v9702_v4  ;;  %7942 = vpow2.f32 %v3113_v31 }
 0xd31   : > { %v3072_v29 = vmul.f32 %v7919_v45, %v3065_v37  ;;  %v3063_v23 = vadd.f32 -0.28449672, %v3056_v36  ;;  %v3059_v9 = vmul.f32 %v9685_v12, %v3052_v61  ;;  %v3048_v22 = vmul.f32 %v9694_v44, %v3041_v6 }
 0xd32   : > { %v3050_v21 = vadd.f32 1.4214138, %v3043_v7  ;;  %v9704_v41 = vpop.eup %7932  ;;  %v3115_v37 = vmul.f32 1.442695, %v3103_v1  ;;  %v3039_v36 = vadd.f32 -1.4531521, %v3032_v30 }
 0xd33   : > { %v3079_v24 = vadd.f32 0.2548296, %v3072_v29  ;;  %v3070_v0 = vmul.f32 %v9682_v3, %v3063_v23  ;;  %v3066_v38 = vadd.f32 -0.28449672, %v3059_v9  ;;  %v3033_v18 = vmul.f32 1.0614054, %v9704_v41  ;;  %v7935_v61 = vpop.eup %7934 }
 0xd34   : > { %v3057_v2 = vmul.f32 %v9689_v28, %v3050_v21  ;;  %v3055_v33 = vadd.f32 1.4214138, %v3048_v22  ;;  %v3046_v9 = vmul.f32 %v9702_v4, %v3039_v36  ;;  %v7937_v48 = vpop.eup %7936  ;;  %7944 = vpow2.f32 %v3115_v37 }
 0xd35   : > { %v3086_v46 = vmul.f32 %v7919_v45, %v3079_v24  ;;  %v3077_v42 = vadd.f32 0.2548296, %v3070_v0  ;;  %v3073_v40 = vmul.f32 %v9685_v12, %v3066_v38  ;;  %v3040_v47 = vadd.f32 -1.4531521, %v3033_v18  ;;  %v7939_v63 = vpop.eup %7938  ;;  %v9732_v18 = vld [vmem:[#allocation11] ss:$0 sm:$0xff] }
 0xd36   : > { %v3064_v29 = vadd.f32 -0.28449672, %v3057_v2  ;;  %v3062_v23 = vmul.f32 %v9694_v44, %v3055_v33  ;;  %v3053_v38 = vadd.f32 1.4214138, %v3046_v9  ;;  %v8516_v6 = vmov -1.0  }
 0xd37   : > { %v3121_v5 = vmul.f32 %v7929_v17, %v3086_v46  ;;  %v3084_v45 = vmul.f32 %v9682_v3, %v3077_v42  ;;  %v3080_v58 = vadd.f32 0.2548296, %v3073_v40  ;;  %v3047_v7 = vmul.f32 %v9704_v41, %v3040_v47  ;;  %v7941_v47 = vpop.eup %7940 }
 0xd38   : > { %v3071_v3 = vmul.f32 %v9689_v28, %v3064_v29  ;;  %v3069_v0 = vadd.f32 -0.28449672, %v3062_v23  ;;  %v2986_v46 = vsel %vm2979_vm5, 1.0, %v8516_v6  ;;  %v2989_v42 = vsel %vm2982_vm6, 1.0, %v8516_v6 }
 0xd39   : > { %v3119_v57 = vmul.f32 %v7935_v61, %v3084_v45  ;;  %v3087_v54 = vmul.f32 %v9685_v12, %v3080_v58  ;;  %v3128_v24 = vsub.f32 1.0, %v3121_v5  ;;  %v2988_v12 = vsel %vm2981_vm4, 1.0, %v8516_v6 }
 0xd3a   : > { %v3078_v21 = vadd.f32 0.2548296, %v3071_v3  ;;  %v3054_v31 = vadd.f32 1.4214138, %v3047_v7  ;;  %v3076_v22 = vmul.f32 %v9694_v44, %v3069_v0  ;;  %v3060_v30 = vmul.f32 %v9702_v4, %v3053_v38 }
 0xd3b   : > { %v3126_v1 = vsub.f32 1.0, %v3119_v57  ;;  %v3122_v17 = vmul.f32 %v7937_v48, %v3087_v54  ;;  %v3135_v37 = vmul.f32 %v3128_v24, %v2988_v12  ;;  %v2967_v33 = vmul.f32 0.5, %v9630_v49 }
 0xd3c   : > { %v3085_v59 = vmul.f32 %v9689_v28, %v3078_v21  ;;  %v3061_v2 = vmul.f32 %v9704_v41, %v3054_v31  ;;  %v3083_v58 = vadd.f32 0.2548296, %v3076_v22  ;;  %v3067_v11 = vadd.f32 -0.28449672, %v3060_v30 }
 0xd3d   : > { %v3129_v40 = vsub.f32 1.0, %v3122_v17  ;;  %v3133_v5 = vmul.f32 %v3126_v1, %v2986_v46  ;;  %v2849_v36 = vadd.f32 %v9732_v18, %v9632_v8  ;;  %v2968_v57 = vmul.f32 0.5, %v9645_v34  ;;  %v7943_v0 = vpop.eup %7942 }
 0xd3e   : > { %v3120_v61 = vmul.f32 %v7939_v63, %v3085_v59  ;;  %v3068_v29 = vadd.f32 -0.28449672, %v3061_v2  ;;  %v3090_v54 = vmul.f32 %v9694_v44, %v3083_v58  ;;  %v3074_v23 = vmul.f32 %v9702_v4, %v3067_v11 }
 0xd3f   : > { %v3136_v45 = vmul.f32 %v3129_v40, %v2989_v42  ;;  %v3140_v9 = vadd.f32 1.0, %v3133_v5  ;;  %v2987_v48 = vsel %vm2980_vm7, 1.0, %v8516_v6  ;;  %v3142_v3 = vadd.f32 1.0, %v3135_v37 }
 0xd40   : > { %v3127_v24 = vsub.f32 1.0, %v3120_v61  ;;  %v3075_v49 = vmul.f32 %v9704_v41, %v3068_v29  ;;  %v3125_v8 = vmul.f32 %v7941_v47, %v3090_v54  ;;  %v3081_v7 = vadd.f32 0.2548296, %v3074_v23 }
 0xd41   : > { %v3143_v28 = vadd.f32 1.0, %v3136_v45  ;;  %v2965_v34 = vmul.f32 0.5, %v9637_v10  ;;  %v2860_v44 = vadd.f32 %v9639_v19, %v9732_v18  ;;  %v2992_v15 = vsel %vm2985_vm8, 1.0, %v8516_v6  ;;  %v7945_v40 = vpop.eup %7944 }
 0xd42   : > { %v3134_v1 = vmul.f32 %v3127_v24, %v2987_v48  ;;  %v3082_v17 = vadd.f32 0.2548296, %v3075_v49  ;;  %v3132_v12 = vsub.f32 1.0, %v3125_v8  ;;  %v3088_v46 = vmul.f32 %v9702_v4, %v3081_v7 }
 0xd43   : > { %v3150_v38 = vmul.f32 %v3143_v28, %v2968_v57  ;;  %v3147_v21 = vmul.f32 %v3140_v9, %v2965_v34  ;;  %v3149_v10 = vmul.f32 %v3142_v3, %v2967_v33  ;;  %v2852_v30 = vadd.f32 %v9732_v18, %v9647_v25  ;;  %v2867_v28 = vpop.f32.mrf.mxu0 }
 0xd44   : > { %v3141_v31 = vadd.f32 1.0, %v3134_v1  ;;  %v3089_v42 = vmul.f32 %v9704_v41, %v3082_v17  ;;  %v3139_v22 = vmul.f32 %v3132_v12, %v2992_v15  ;;  %v3123_v19 = vmul.f32 %v7943_v0, %v3088_v46 }
 0xd45   : > { %v2857_v4 = vadd.f32 %v9628_v60, %v9732_v18  ;;  %v3157_v59 = vmul.f32 %v3150_v38, %v2860_v44  ;;  %v2990_v41 = vsel %vm2983_vm9, 1.0, %v8516_v6  ;;  %v3154_v45 = vmul.f32 %v3147_v21, %v2849_v36 }
 0xd46   : > { %v3148_v5 = vmul.f32 %v3141_v31, %v2966_v43  ;;  %v3124_v32 = vmul.f32 %v7945_v40, %v3089_v42  ;;  %v3146_v2 = vadd.f32 1.0, %v3139_v22  ;;  %v3130_v63 = vsub.f32 1.0, %v3123_v19 }
 0xd47   : > { %v3156_v20 = vmul.f32 %v3149_v10, %v2857_v4  ;;  %v2971_v11 = vmul.f32 0.5, %v9663_v51  ;;  %v2991_v25 = vsel %vm2984_vm10, 1.0, %v8516_v6  ;;  %v2969_v60 = vmul.f32 0.5, %v9669_v55 }
 0xd48   : > { %v3131_v37 = vsub.f32 1.0, %v3124_v32  ;;  %v3155_v58 = vmul.f32 %v3148_v5, %v2852_v30  ;;  %v3137_v33 = vmul.f32 %v3130_v63, %v2990_v41  ;;  %v2970_v54 = vmul.f32 0.5, %v9672_v26  ;;  %v6585_v26 = vld [vmem:[#allocation16] ss:$0 sm:$0xff] }
 0xd49   : > { %v3162_v29 = vpack.c.bf16 %v3157_v59, %v3156_v20  ;;  %v3153_v47 = vmul.f32 %v3146_v2, %v2971_v11  ;;  %v2873_v36 = vadd.f32 %v9653_v50, %v9732_v18  ;;  %v2865_v51 = vadd.f32 %v9732_v18, %v9658_v53 }
 0xd4a   : > { %v3138_v61 = vmul.f32 %v3131_v37, %v2991_v25  ;;  %v3161_v13 = vpack.c.bf16 %v3155_v58, %v3154_v45  ;;  %v3144_v57 = vadd.f32 1.0, %v3137_v33  ;;  %v2868_v48 = vadd.f32 %v9732_v18, %v2867_v28 }
 0xd4b   : > { %v3160_v49 = vmul.f32 %v3153_v47, %v2873_v36 }
 0xd4c   : > { %v3145_v23 = vadd.f32 1.0, %v3138_v61  ;;  %7210 = vmatprep.mubr.bf16.mxu0 %v3161_v13  ;;  %v3151_v9 = vmul.f32 %v3144_v57, %v2969_v60 }
 0xd4d   : > { %7211 = vmatmul.mubr.bf16.vlgmr.msra.gmra.mxu0 %v3162_v29  ;;  %v3164_v7 = vpack.c.bf16 %v3160_v49, %v3160_v49 }
 0xd4e   : > { %v3152_v24 = vmul.f32 %v3145_v23, %v2970_v54  ;;  %v3158_v3 = vmul.f32 %v3151_v9, %v2865_v51 }
 0xd50   : > { %v3159_v55 = vmul.f32 %v3152_v24, %v2868_v48 }
 0xd52   : > { %v3163_v8 = vpack.c.bf16 %v3159_v55, %v3158_v3 }
 0xd54   : > { %7214 = vmatprep.mubr.bf16.mxu0 %v3163_v8 }
 0xd55   : > { %7215 = vmatmul.mubr.bf16.gmra.mxu0 %v3164_v7 }
 0xe0d   : > { %v7212_v34 = vpop.f32.mrf.mxu0 }
 0xe0e   : > { %v3279_v44 = vadd.f32 %v7212_v34, %v6585_v26 }
 0xe0f   : > { %v3270_v1 = vpop.f32.mrf.mxu0 }
 0xe10   : > { %v3271_v50 = vadd.f32 %v6585_v26, %v3270_v1  ;;  %v3302_v53 = vadd.f32 %v3279_v44, %v9577_v14  ;;  %v7738_v1 = vld [vmem:[%s10874_s24 + $0x34] ss:$8 sps:$4 sm:$0xff]  }
 0xe11   : > { %v7213_v17 = vpop.f32.mrf.mxu0  ;;  %3481 = vmatprep.subr.bf16.mxu1 %v7738_v1 }
 0xe12   : > { %v3300_v0 = vadd.f32 %v3271_v50, %v9570_v56  ;;  %v3282_v18 = vadd.f32 %v7213_v17, %v6585_v26  ;;  %v3317_v15 = vsel %vm921_vm0, %v3302_v53, 0.0  ;;  %v7736_v50 = vld [vmem:[%s10874_s24 + $0x30] ss:$8 sps:$4 sm:$0xff]   ;;  %v7741_v17 = vld [vmem:[%s10874_s24 + $0x24] ss:$8 sps:$4 sm:$0xff]  }
 0xe13   : > { %v3273_v38 = vpop.f32.mrf.mxu0  ;;  %3482 = vmatpush1.bf16.msra.mxu1 %v7736_v50 }
 0xe14   : > { %v3274_v43 = vadd.f32 %v6585_v26, %v3273_v38  ;;  %v3311_v12 = vsel %vm921_vm0, %v3300_v0, 0.0  ;;  %v3303_v42 = vadd.f32 %v3282_v18, %v9581_v16  ;;  %3483 = vmatprep.subr.bf16.mxu1 %v7741_v17 }
 0xe15   : > { %3312 = vadd.xlane.f32.xlu0 %v3311_v12  ;;  %v7216_v46 = vpop.f32.mrf.mxu0 }
 0xe16   : > { %v3301_v21 = vadd.f32 %v3274_v43, %v9572_v35  ;;  %v3295_v40 = vadd.f32 %v7216_v46, %v6585_v26  ;;  %v3320_v35 = vsel %vm921_vm0, %v3303_v42, 0.0 }
 0xe17   : > { %v3286_v31 = vpop.f32.mrf.mxu0 }
 0xe18   : > { %v3287_v10 = vadd.f32 %v6585_v26, %v3286_v31  ;;  %v3314_v56 = vsel %vm921_vm0, %v3301_v21, 0.0  ;;  %v3306_v30 = vadd.f32 %v3295_v40, %v9595_v62 }
 0xe19   : > { %3315 = vadd.xlane.f32.xlu1 %v3314_v56  ;;  %3318 = vadd.xlane.f32.xlu0 %v3317_v15  ;;  %v7217_v14 = vpop.f32.mrf.mxu0 }
 0xe1a   : > { %v3304_v22 = vadd.f32 %v3287_v10, %v9589_v27  ;;  %v3329_v59 = vsel %vm921_vm0, %v3306_v30, 0.0 }
 0xe1b   : > { %v3289_v19 = vpop.f32.mrf.mxu0 }
 0xe1c   : > { %v3290_v5 = vadd.f32 %v6585_v26, %v3289_v19  ;;  %v3323_v32 = vsel %vm921_vm0, %v3304_v22, 0.0 }
 0xe1d   : > { %3321 = vadd.xlane.f32.xlu1 %v3320_v35  ;;  %3324 = vadd.xlane.f32.xlu0 %v3323_v32 }
 0xe1e   : > { %v3305_v16 = vadd.f32 %v3290_v5, %v9591_v39 }
 0xe20   : > { %v3326_v4 = vsel %vm921_vm0, %v3305_v16, 0.0 }
 0xe21   : > { %3327 = vadd.xlane.f32.xlu1 %v3326_v4  ;;  %3330 = vadd.xlane.f32.xlu0 %v3329_v59  ;;  %v6594_v59 = vld [vmem:[#allocation2 + $0x1] ss:$0 sm:$0xff] }
 0xe9e   : > { %v3313_v2 = vpop.xlane.xlu0 %3312 }
 0xe9f   : > { %v3332_v27 = vmul.f32 0.03125, %v3313_v2 }
 0xea1   : > { %v9782_v63 = vsub.f32 %v3300_v0, %v3332_v27  ;;  %v7739_v0 = vld [vmem:[%s10874_s24 + $0x20] ss:$8 sps:$4 sm:$0xff]  }
 0xea2   : > { %v3316_v62 = vpop.xlane.xlu1 %3315  ;;  %v3319_v41 = vpop.xlane.xlu0 %3318  ;;  %3484 = vmatpush1.bf16.msra.mxu1 %v7739_v0 }
 0xea3   : > { %v3333_v37 = vmul.f32 0.03125, %v3316_v62  ;;  %v3334_v45 = vmul.f32 0.03125, %v3319_v41  ;;  %v3346_v58 = vmul.f32 %v9782_v63, %v9782_v63 }
 0xea5   : > { %v9786_v20 = vsub.f32 %v3301_v21, %v3333_v37  ;;  %v9788_v39 = vsub.f32 %v3302_v53, %v3334_v45  ;;  %v3353_v11 = vsel %vm921_vm0, %v3346_v58, 0.0  ;;  %v6595_v45 = vld [vmem:[#allocation5 + $0x1] ss:$0 sm:$0xff] }
 0xea6   : > { %v3322_v33 = vpop.xlane.xlu1 %3321  ;;  %3354 = vadd.xlane.f32.xlu1 %v3353_v11  ;;  %v3325_v25 = vpop.xlane.xlu0 %3324 }
 0xea7   : > { %v3335_v61 = vmul.f32 0.03125, %v3322_v33  ;;  %v3336_v13 = vmul.f32 0.03125, %v3325_v25  ;;  %v3348_v29 = vmul.f32 %v9788_v39, %v9788_v39  ;;  %v3347_v47 = vmul.f32 %v9786_v20, %v9786_v20 }
 0xea9   : > { %v9795_v60 = vsub.f32 %v3303_v42, %v3335_v61  ;;  %v9797_v57 = vsub.f32 %v3304_v22, %v3336_v13  ;;  %v3359_v28 = vsel %vm921_vm0, %v3348_v29, 0.0  ;;  %v3356_v54 = vsel %vm921_vm0, %v3347_v47, 0.0 }
 0xeaa   : > { %3360 = vadd.xlane.f32.xlu1 %v3359_v28  ;;  %v3328_v23 = vpop.xlane.xlu1 %3327  ;;  %3357 = vadd.xlane.f32.xlu0 %v3356_v54  ;;  %v3331_v36 = vpop.xlane.xlu0 %3330 }
 0xeab   : > { %v3337_v9 = vmul.f32 0.03125, %v3328_v23  ;;  %v3338_v51 = vmul.f32 0.03125, %v3331_v36  ;;  %v3349_v48 = vmul.f32 %v9795_v60, %v9795_v60  ;;  %v3350_v24 = vmul.f32 %v9797_v57, %v9797_v57 }
 0xead   : > { %v9805_v49 = vsub.f32 %v3305_v16, %v3337_v9  ;;  %v9807_v3 = vsub.f32 %v3306_v30, %v3338_v51  ;;  %v3362_v55 = vsel %vm921_vm0, %v3349_v48, 0.0  ;;  %v3365_v8 = vsel %vm921_vm0, %v3350_v24, 0.0 }
 0xeae   : > { %3363 = vadd.xlane.f32.xlu0 %v3362_v55  ;;  %3366 = vadd.xlane.f32.xlu1 %v3365_v8 }
 0xeaf   : > { %v3351_v7 = vmul.f32 %v9805_v49, %v9805_v49  ;;  %v3352_v26 = vmul.f32 %v9807_v3, %v9807_v3 }
 0xeb1   : > { %v3368_v34 = vsel %vm921_vm0, %v3351_v7, 0.0  ;;  %v3371_v44 = vsel %vm921_vm0, %v3352_v26, 0.0 }
 0xeb2   : > { %3369 = vadd.xlane.f32.xlu0 %v3368_v34  ;;  %3372 = vadd.xlane.f32.xlu1 %v3371_v44 }
 0xf2f   : > { %v3355_v53 = vpop.xlane.xlu1 %3354 }
 0xf30   : > { %v3374_v38 = vmul.f32 0.03125, %v3355_v53 }
 0xf32   : > { %v3381_v18 = vadd.f32 1e-05, %v3374_v38 }
 0xf33   : > { %v3361_v43 = vpop.xlane.xlu1 %3360  ;;  %v3358_v12 = vpop.xlane.xlu0 %3357 }
 0xf34   : > { %7946 = vrsqrt.f32 %v3381_v18  ;;  %v3376_v46 = vmul.f32 0.03125, %v3361_v43  ;;  %v3375_v21 = vmul.f32 0.03125, %v3358_v12 }
 0xf36   : > { %v3382_v31 = vadd.f32 1e-05, %v3375_v21  ;;  %v3383_v15 = vadd.f32 1e-05, %v3376_v46 }
 0xf37   : > { %v3364_v42 = vpop.xlane.xlu0 %3363  ;;  %v3367_v40 = vpop.xlane.xlu1 %3366 }
 0xf38   : > { %v3377_v10 = vmul.f32 0.03125, %v3364_v42  ;;  %7948 = vrsqrt.f32 %v3382_v31  ;;  %v3378_v14 = vmul.f32 0.03125, %v3367_v40 }
 0xf39   : > { %7950 = vrsqrt.f32 %v3383_v15 }
 0xf3a   : > { %v3384_v56 = vadd.f32 1e-05, %v3377_v10  ;;  %v3385_v35 = vadd.f32 1e-05, %v3378_v14 }
 0xf3b   : > { %v3370_v22 = vpop.xlane.xlu0 %3369  ;;  %v3373_v30 = vpop.xlane.xlu1 %3372 }
 0xf3c   : > { %v3379_v19 = vmul.f32 0.03125, %v3370_v22  ;;  %7952 = vrsqrt.f32 %v3384_v56  ;;  %v3380_v16 = vmul.f32 0.03125, %v3373_v30 }
 0xf3e   : > { %v3386_v5 = vadd.f32 1e-05, %v3379_v19  ;;  %v3387_v2 = vadd.f32 1e-05, %v3380_v16 }
 0xf40   : > { %7954 = vrsqrt.f32 %v3386_v5 }
 0xf41   : > { %v7947_v32 = vpop.eup %7946  ;;  %7956 = vrsqrt.f32 %v3385_v35 }
 0xf42   : > { %v3395_v4 = vmul.f32 %v7947_v32, %v9782_v63  ;;  %7958 = vrsqrt.f32 %v3387_v2 }
 0xf44   : > { %v3408_v62 = vmul.f32 %v6594_v59, %v3395_v4 }
 0xf45   : > { %v7949_v27 = vpop.eup %7948 }
 0xf46   : > { %v3396_v41 = vmul.f32 %v7949_v27, %v9786_v20  ;;  %v7951_v37 = vpop.eup %7950  ;;  %v9831_v33 = vadd.f32 %v6595_v45, %v3408_v62 }
 0xf47   : > { %v3397_v61 = vmul.f32 %v7951_v37, %v9788_v39 }
 0xf48   : > { %v3409_v58 = vmul.f32 %v6594_v59, %v3396_v41 }
 0xf49   : > { %v7953_v11 = vpop.eup %7952  ;;  %v3410_v20 = vmul.f32 %v6594_v59, %v3397_v61 }
 0xf4a   : > { %v9833_v25 = vadd.f32 %v6595_v45, %v3409_v58  ;;  %v3398_v63 = vmul.f32 %v7953_v11, %v9795_v60 }
 0xf4b   : > { %v9844_v36 = vadd.f32 %v6595_v45, %v3410_v20 }
 0xf4c   : > { %v3428_v13 = vpack.c.bf16 %v9833_v25, %v9831_v33  ;;  %v3411_v29 = vmul.f32 %v6594_v59, %v3398_v63 }
 0xf4d   : > { %v7955_v47 = vpop.eup %7954 }
 0xf4e   : > { %6604 = vmatmul.mubr.msk.bf16.vlgmr.msra.gmra.mxu1 %vm921_vm0, %v3428_v13  ;;  %v7957_v28 = vpop.eup %7956  ;;  %v9841_v54 = vadd.f32 %v6595_v45, %v3411_v29  ;;  %v3400_v23 = vmul.f32 %v7955_v47, %v9805_v49 }
 0xf4f   : > { %3511 = vmatprep.mubr.bf16.mxu1 %v8508_v52  ;;  %v3399_v39 = vmul.f32 %v7957_v28, %v9797_v57  ;;  %v7959_v51 = vpop.eup %7958 }
 0xf50   : > { %v3429_v60 = vpack.c.bf16 %v9841_v54, %v9844_v36  ;;  %v3413_v9 = vmul.f32 %v6594_v59, %v3400_v23  ;;  %v3401_v55 = vmul.f32 %v7959_v51, %v9807_v3  ;;  %v9926_v23 = vld [vmem:[%s10875_s0] sm:$0xff] }
 0xf51   : > { %v3412_v48 = vmul.f32 %v6594_v59, %v3399_v39 }
 0xf52   : > { %v9851_v24 = vadd.f32 %v6595_v45, %v3413_v9  ;;  %v3414_v57 = vmul.f32 %v6594_v59, %v3401_v55  ;;  %v9932_v9 = vld [vmem:[%s10875_s0 + $0x10] sm:$0xff] }
 0xf53   : > { %v9854_v8 = vadd.f32 %v6595_v45, %v3412_v48 }
 0xf54   : > { %v9860_v7 = vadd.f32 %v6595_v45, %v3414_v57 }
 0xf55   : > { %v3430_v49 = vpack.c.bf16 %v9851_v24, %v9854_v8 }
 0xf56   : > { %6605 = vmatmul.mubr.msk.bf16.gmra.mxu1 %vm921_vm0, %v3429_v60  ;;  %v3431_v26 = vpack.c.bf16 %v9860_v7, %v9860_v7 }
 0xf57   : > { %3521 = vmatprep.mubr.bf16.mxu1 %v8508_v52 }
 0xf5e   : > { %6606 = vmatmul.mubr.msk.bf16.gmra.mxu1 %vm921_vm0, %v3430_v49  ;;  %v9939_v49 = vld [vmem:[%s10875_s0 + $0x8] sm:$0xff] }
 0xf5f   : > { %3531 = vmatprep.mubr.bf16.mxu1 %v8508_v52 }
 0xf66   : > { %6607 = vmatmul.mubr.msk.bf16.gmra.mxu1 %vm921_vm0, %v3431_v26 }
0x100e   : > { %v3503_v34 = vpop.f32.mrf.mxu1 }
0x100f   : > { %v3540_v1 = vmul.f32 0.25, %v3503_v34 }
0x1010   : > { %v3505_v44 = vpop.f32.mrf.mxu1 }
0x1012   : > { %v3507_v3 = vpop.f32.mrf.mxu1 }
0x1013   : > { %v3541_v50 = vmul.f32 0.25, %v3507_v3  ;;  %v9887_v16 = vpack.c.bf16 %v3507_v3, %v3503_v34  ;;  %v9945_v34 = vld [vmem:[%s10875_s0 + $0x18] sm:$0xff] }
0x1014   : > { %v3509_v17 = vpop.f32.mrf.mxu1 }
0x1015   : > { %v9865_v0 = vpack.c.bf16 %v3541_v50, %v3540_v1  ;;  %v9902_v62 = vpack.c.bf16 %v3509_v17, %v3505_v44 }
0x1016   : > { %v3513_v53 = vpop.f32.mrf.mxu1 }
0x1017   : > { %7226 = vmatprep.mubr.msk.bf16.mxu1 %vm1178_vm1, %v9865_v0  ;;  %v3542_v18 = vmul.f32 0.25, %v3513_v53 }
0x1018   : > { %v3515_v52 = vpop.f32.mrf.mxu1 }
0x101a   : > { %v3517_v38 = vpop.f32.mrf.mxu1 }
0x101b   : > { %v3543_v43 = vmul.f32 0.25, %v3517_v38  ;;  %v9877_v19 = vpack.c.bf16 %v3517_v38, %v3513_v53  ;;  %v9953_v53 = vld [vmem:[%s10875_s0 + $0x20] sm:$0xff] }
0x101c   : > { %v3519_v12 = vpop.f32.mrf.mxu1 }
0x101d   : > { %v9869_v46 = vpack.c.bf16 %v3543_v43, %v3542_v18  ;;  %v9898_v27 = vpack.c.bf16 %v3519_v12, %v3515_v52  ;;  %v9960_v43 = vld [vmem:[%s10875_s0 + $0x28] sm:$0xff] }
0x101e   : > { %v3523_v21 = vpop.f32.mrf.mxu1 }
0x101f   : > { %v3544_v42 = vmul.f32 0.25, %v3523_v21 }
0x1020   : > { %v3525_v31 = vpop.f32.mrf.mxu1 }
0x1022   : > { %v3527_v15 = vpop.f32.mrf.mxu1 }
0x1023   : > { %v3545_v40 = vmul.f32 0.25, %v3527_v15  ;;  %v9871_v10 = vpack.c.bf16 %v3527_v15, %v3523_v21  ;;  %v9966_v21 = vld [vmem:[%s10875_s0 + $0x30] sm:$0xff] }
0x1024   : > { %v3529_v56 = vpop.f32.mrf.mxu1 }
0x1025   : > { %v9873_v14 = vpack.c.bf16 %v3545_v40, %v3544_v42  ;;  %3563 = vrot.lane.b32.xlu1 %v9871_v10, %s8509_s29  ;;  %v9889_v4 = vpack.c.bf16 %v3529_v56, %v3525_v31 }
0x1026   : > { %v3533_v22 = vpop.f32.mrf.mxu1 }
0x1027   : > { %v9879_v30 = vpack.c.bf16 %v3533_v22, %v3533_v22  ;;  %v3546_v29 = vmul.f32 0.25, %v3533_v22 }
0x1028   : > { %v3535_v5 = vpop.f32.mrf.mxu1 }
0x1029   : > { %v9881_v35 = vpack.c.bf16 %v3535_v5, %v3535_v5  ;;  %3561 = vrot.lane.b32.xlu1 %v9877_v19, %s8509_s29  ;;  %3565 = vrot.lane.b32.xlu0 %v9879_v30, %s8509_s29  ;;  %v9919_v47 = vpack.c.bf16 %v3546_v29, %v3546_v29 }
0x102a   : > { %v3537_v32 = vpop.f32.mrf.mxu1 }
0x102b   : > { %7530 = vmatprep.subr.msk.bf16.mxu0 %vm1365_vm2, %v9881_v35  ;;  %v3753_v59 = vsel %vm1365_vm2, %v9881_v35, 0 }
0x102c   : > { %v3538_v2 = vpop.f32.mrf.mxu1  ;;  %7235 = vmatpush3.bf16.msra.mxu0 %v3753_v59 }
0x102d   : > { %3559 = vrot.lane.b32.xlu1 %v9887_v16, %s8509_s29  ;;  %7236 = vmatprep.subr.bf16.mxu0 %v9889_v4 }
0x1030   : > { %7237 = vmatpush3.bf16.msra.mxu0 %v9889_v4 }
0x1031   : > { %7238 = vmatprep.subr.bf16.mxu0 %v9898_v27 }
0x1034   : > { %7239 = vmatpush3.bf16.msra.mxu0 %v9898_v27 }
0x1035   : > { %7240 = vmatprep.subr.bf16.mxu0 %v9902_v62 }
0x1038   : > { %7241 = vmatpush3.bf16.msra.mxu0 %v9902_v62 }
0x1097   : > { %v3564_v45 = vpop.permute.xlu1 %3563 }
0x1098   : > { %v3586_v58 = vsel %vm1178_vm1, %v3564_v45, 0 }
0x109b   : > { %v3566_v41 = vpop.permute.xlu0 %3565  ;;  %v3562_v11 = vpop.permute.xlu1 %3561 }
0x109c   : > { %7526 = vmatprep.subr.msk.bf16.mxu1 %vm1178_vm1, %v3566_v41  ;;  %v3589_v37 = vsel %vm1178_vm1, %v3566_v41, 0  ;;  %v3583_v61 = vsel %vm1178_vm1, %v3562_v11, 0 }
0x109d   : > { %7219 = vmatpush3.bf16.xpose.msra.mxu1 %v3589_v37 }
0x109e   : > { %7527 = vmatprep.subr.msk.bf16.mxu1 %vm1178_vm1, %v3564_v45 }
0x109f   : > { %v3560_v63 = vpop.permute.xlu1 %3559 }
0x10a0   : > { %v3580_v13 = vsel %vm1178_vm1, %v3560_v63, 0 }
0x10a5   : > { %7221 = vmatpush3.bf16.xpose.msra.mxu1 %v3586_v58 }
0x10a6   : > { %7528 = vmatprep.subr.msk.bf16.mxu1 %vm1178_vm1, %v3562_v11 }
0x10ad   : > { %7223 = vmatpush3.bf16.xpose.msra.mxu1 %v3583_v61 }
0x10ae   : > { %7529 = vmatprep.subr.msk.bf16.mxu1 %vm1178_vm1, %v3560_v63 }
0x10b5   : > { %7225 = vmatpush3.bf16.xpose.msra.mxu1 %v3580_v13 }
0x10bc   : > { %7227 = vmatmul.mubr.msk.bf16.vlgmr.msra.gmra.mxu1 %vm1178_vm1, %v9869_v46 }
0x10bd   : > { %7230 = vmatprep.mubr.msk.bf16.mxu1 %vm1178_vm1, %v9873_v14 }
0x10c4   : > { %7231 = vmatmul.mubr.msk.bf16.gmra.mxu1 %vm1178_vm1, %v9919_v47 }
0x117c   : > { %v7228_v20 = vpop.f32.mrf.mxu1 }
0x117d   : > { %v3634_v51 = vadd.f32 %v9932_v9, %v7228_v20 }
0x117e   : > { %v3625_v28 = vpop.f32.mrf.mxu1 }
0x117f   : > { %v3626_v39 = vadd.f32 %v9926_v23, %v3625_v28  ;;  %v3661_v1 = vsel %vm1267_vm3, %v3634_v51, -inf }
0x1180   : > { %v7229_v60 = vpop.f32.mrf.mxu1 }
0x1181   : > { %v3655_v48 = vsel %vm1267_vm3, %v3626_v39, -inf  ;;  %v3637_v44 = vadd.f32 %v9945_v34, %v7229_v60 }
0x1182   : > { %v3628_v55 = vpop.f32.mrf.mxu1  ;;  %3656 = vmax.xlane.f32.xlu0 %v3655_v48 }
0x1183   : > { %v3629_v57 = vadd.f32 %v9939_v49, %v3628_v55  ;;  %v3664_v38 = vsel %vm1267_vm3, %v3637_v44, -inf }
0x1184   : > { %v7232_v26 = vpop.f32.mrf.mxu1 }
0x1185   : > { %v3658_v3 = vsel %vm1267_vm3, %v3629_v57, -inf  ;;  %v3650_v31 = vadd.f32 %v9966_v21, %v7232_v26 }
0x1186   : > { %v3641_v50 = vpop.f32.mrf.mxu1  ;;  %3659 = vmax.xlane.f32.xlu1 %v3658_v3  ;;  %3662 = vmax.xlane.f32.xlu0 %v3661_v1 }
0x1187   : > { %v3642_v52 = vadd.f32 %v9953_v53, %v3641_v50  ;;  %v3673_v40 = vsel %vm1267_vm3, %v3650_v31, -inf }
0x1188   : > { %v7233_v17 = vpop.f32.mrf.mxu1 }
0x1189   : > { %v3667_v42 = vsel %vm1267_vm3, %v3642_v52, -inf }
0x118a   : > { %v3644_v18 = vpop.f32.mrf.mxu1  ;;  %3665 = vmax.xlane.f32.xlu0 %v3664_v38 }
0x118b   : > { %v3645_v12 = vadd.f32 %v9960_v43, %v3644_v18 }
0x118d   : > { %v3670_v15 = vsel %vm1267_vm3, %v3645_v12, -inf }
0x118e   : > { %3671 = vmax.xlane.f32.xlu1 %v3670_v15  ;;  %3668 = vmax.xlane.f32.xlu0 %v3667_v42 }
0x1192   : > { %3674 = vmax.xlane.f32.xlu0 %v3673_v40 }
0x120b   : > { %v3657_v56 = vpop.xlane.xlu0 %3656 }
0x120c   : > { %v3676_v22 = vsub.f32 %v3626_v39, %v3657_v56 }
0x120e   : > { %v3683_v37 = vmul.f32 1.442695, %v3676_v22 }
0x120f   : > { %v3660_v5 = vpop.xlane.xlu1 %3659  ;;  %v3663_v32 = vpop.xlane.xlu0 %3662 }
0x1210   : > { %v3678_v59 = vsub.f32 %v3634_v51, %v3663_v32  ;;  %v3677_v2 = vsub.f32 %v3629_v57, %v3660_v5 }
0x1212   : > { %v3687_v41 = vmul.f32 1.442695, %v3678_v59  ;;  %v3685_v11 = vmul.f32 1.442695, %v3677_v2 }
0x1213   : > { %v3666_v45 = vpop.xlane.xlu0 %3665 }
0x1214   : > { %v3679_v58 = vsub.f32 %v3637_v44, %v3666_v45  ;;  %7960 = vpow2.f32 %v3687_v41 }
0x1215   : > { %7962 = vpow2.f32 %v3683_v37 }
0x1216   : > { %v3689_v61 = vmul.f32 1.442695, %v3679_v58 }
0x1217   : > { %v3672_v63 = vpop.xlane.xlu1 %3671  ;;  %v3669_v13 = vpop.xlane.xlu0 %3668 }
0x1218   : > { %7964 = vpow2.f32 %v3689_v61  ;;  %v3681_v29 = vsub.f32 %v3645_v12, %v3672_v63  ;;  %v3680_v28 = vsub.f32 %v3642_v52, %v3669_v13 }
0x1219   : > { %7966 = vpow2.f32 %v3685_v11 }
0x121a   : > { %v3693_v20 = vmul.f32 1.442695, %v3681_v29  ;;  %v3691_v51 = vmul.f32 1.442695, %v3680_v28 }
0x121b   : > { %v3675_v39 = vpop.xlane.xlu0 %3674 }
0x121c   : > { %v3682_v60 = vsub.f32 %v3650_v31, %v3675_v39  ;;  %7968 = vpow2.f32 %v3693_v20 }
0x121e   : > { %v3695_v48 = vmul.f32 1.442695, %v3682_v60 }
0x1220   : > { %7970 = vpow2.f32 %v3695_v48 }
0x1221   : > { %v7961_v55 = vpop.eup %7960  ;;  %7972 = vpow2.f32 %v3691_v51 }
0x1222   : > { %v3703_v57 = vsel %vm1267_vm3, %v7961_v55, 0.0  ;;  %v7963_v26 = vpop.eup %7962 }
0x1223   : > { %3704 = vadd.xlane.f32.xlu1 %v3703_v57  ;;  %v3697_v50 = vsel %vm1267_vm3, %v7963_v26, 0.0 }
0x1225   : > { %v7965_v44 = vpop.eup %7964 }
0x1226   : > { %v3706_v3 = vsel %vm1267_vm3, %v7965_v44, 0.0  ;;  %v7967_v1 = vpop.eup %7966 }
0x1227   : > { %3707 = vadd.xlane.f32.xlu0 %v3706_v3  ;;  %3698 = vadd.xlane.f32.xlu1 %v3697_v50  ;;  %v3700_v17 = vsel %vm1267_vm3, %v7967_v1, 0.0 }
0x1229   : > { %v7969_v52 = vpop.eup %7968 }
0x122a   : > { %v3712_v18 = vsel %vm1267_vm3, %v7969_v52, 0.0 }
0x122b   : > { %3701 = vadd.xlane.f32.xlu0 %v3700_v17 }
0x122d   : > { %v7971_v38 = vpop.eup %7970 }
0x122e   : > { %v3715_v12 = vsel %vm1267_vm3, %v7971_v38, 0.0  ;;  %v7973_v31 = vpop.eup %7972 }
0x122f   : > { %3713 = vadd.xlane.f32.xlu0 %v3712_v18  ;;  %3716 = vadd.xlane.f32.xlu1 %v3715_v12  ;;  %v3709_v15 = vsel %vm1267_vm3, %v7973_v31, 0.0 }
0x1233   : > { %3710 = vadd.xlane.f32.xlu1 %v3709_v15 }
0x1244   : > { %3842 = vrot.lane.b32.xlu1 %v9871_v10, %s8510_s8 }
0x1245   : > { %3844 = vrot.lane.b32.xlu0 %v9879_v30, %s8510_s8 }
0x1248   : > { %3840 = vrot.lane.b32.xlu1 %v9877_v19, %s8510_s8 }
0x1249   : > { %3830 = vrot.lane.b32.xlu0 %v9865_v0, %s8511_s2 }
0x124c   : > { %3838 = vrot.lane.b32.xlu1 %v9887_v16, %s8510_s8  ;;  %s6749_s8 = smul.u32 896, %s8666_s6 }
0x124d   : > { %3834 = vrot.lane.b32.xlu0 %v9873_v14, %s8511_s2 }
0x1250   : > { %3832 = vrot.lane.b32.xlu1 %v9869_v46, %s8511_s2 }
0x1254   : > { %3836 = vrot.lane.b32.xlu1 %v9919_v47, %s8511_s2 }
0x12ac   : > { %v3705_v42 = vpop.xlane.xlu1 %3704 }
0x12b0   : > { %v3708_v40 = vpop.xlane.xlu0 %3707  ;;  %v3699_v56 = vpop.xlane.xlu1 %3698 }
0x12b1   : > { %7974 = vrcp.f32 %v3708_v40 }
0x12b2   : > { %7976 = vrcp.f32 %v3699_v56 }
0x12b3   : > { %7978 = vrcp.f32 %v3705_v42  ;;  %v7742_v42 = vld [vmem:[%s10876_s4 + $0x20] sm:$0xff]  }
0x12b4   : > { %v3702_v22 = vpop.xlane.xlu0 %3701 }
0x12b5   : > { %7980 = vrcp.f32 %v3702_v22 }
0x12b8   : > { %v3717_v5 = vpop.xlane.xlu1 %3716  ;;  %v3714_v32 = vpop.xlane.xlu0 %3713 }
0x12b9   : > { %7982 = vrcp.f32 %v3717_v5 }
0x12ba   : > { %7984 = vrcp.f32 %v3714_v32 }
0x12bc   : > { %v3711_v59 = vpop.xlane.xlu1 %3710  ;;  %v3845_v2 = vpop.permute.xlu0 %3844 }
0x12bd   : > { %7986 = vrcp.f32 %v3711_v59  ;;  %7531 = vmatprep.subr.msk.bf16.mxu0 %vm1178_vm1, %v3845_v2  ;;  %v3868_v60 = vsel %vm1178_vm1, %v3845_v2, 0 }
0x12be   : > { %v7975_v41 = vpop.eup %7974 }
0x12bf   : > { %v7977_v37 = vpop.eup %7976  ;;  %v3728_v11 = vmul.f32 %v7975_v41, %v7965_v44 }
0x12c0   : > { %v7979_v45 = vpop.eup %7978  ;;  %v3725_v61 = vmul.f32 %v7977_v37, %v7963_v26  ;;  %v3843_v51 = vpop.permute.xlu1 %3842 }
0x12c1   : > { %v3727_v13 = vmul.f32 %v7979_v45, %v7961_v55  ;;  %v3865_v50 = vsel %vm1178_vm1, %v3843_v51, 0 }
0x12c2   : > { %v7981_v58 = vpop.eup %7980 }
0x12c3   : > { %v3726_v63 = vmul.f32 %v7981_v58, %v7967_v1  ;;  %v3733_v20 = vpack.c.bf16 %v3728_v11, %v3727_v13  ;;  %v3831_v1 = vpop.permute.xlu0 %3830 }
0x12c4   : > { %v3841_v17 = vpop.permute.xlu1 %3840 }
0x12c5   : > { %v3732_v29 = vpack.c.bf16 %v3726_v63, %v3725_v61  ;;  %v3862_v18 = vsel %vm1178_vm1, %v3841_v17, 0 }
0x12c6   : > { %v7983_v28 = vpop.eup %7982 }
0x12c7   : > { %7242 = vmatprep.mubr.msk.bf16.mxu0 %vm1267_vm3, %v3732_v29  ;;  %v7985_v39 = vpop.eup %7984  ;;  %v3731_v57 = vmul.f32 %v7983_v28, %v7971_v38 }
0x12c8   : > { %7243 = vmatmul.mubr.msk.bf16.vlgmr.msra.gmra.mxu0 %vm1267_vm3, %v3733_v20  ;;  %v3730_v26 = vmul.f32 %v7985_v39, %v7969_v52  ;;  %v3839_v38 = vpop.permute.xlu1 %3838 }
0x12c9   : > { %7251 = vmatpush3.bf16.xpose.msra.mxu0 %v3868_v60  ;;  %v3735_v55 = vpack.c.bf16 %v3731_v57, %v3731_v57  ;;  %v3859_v52 = vsel %vm1178_vm1, %v3839_v38, 0 }
0x12ca   : > { %v7987_v48 = vpop.eup %7986  ;;  %7532 = vmatprep.subr.msk.bf16.mxu0 %vm1178_vm1, %v3843_v51 }
0x12cb   : > { %v3729_v44 = vmul.f32 %v7987_v48, %v7973_v31  ;;  %v3835_v31 = vpop.permute.xlu0 %3834 }
0x12cc   : > { %v3833_v12 = vpop.permute.xlu1 %3832 }
0x12cd   : > { %v3734_v3 = vpack.c.bf16 %v3730_v26, %v3729_v44 }
0x12cf   : > { %7246 = vmatprep.mubr.msk.bf16.mxu0 %vm1267_vm3, %v3734_v3 }
0x12d0   : > { %7247 = vmatmul.mubr.msk.bf16.gmra.mxu0 %vm1267_vm3, %v3735_v55  ;;  %v3837_v15 = vpop.permute.xlu1 %3836 }
0x12d1   : > { %7253 = vmatpush3.bf16.xpose.msra.mxu0 %v3865_v50  ;;  %7258 = vmatprep.mubr.msk.bf16.mxu0 %vm1178_vm1, %v3831_v1 }
0x12d2   : > { %7533 = vmatprep.subr.msk.bf16.mxu0 %vm1178_vm1, %v3841_v17 }
0x12d9   : > { %7255 = vmatpush3.bf16.xpose.msra.mxu0 %v3862_v18 }
0x12da   : > { %7534 = vmatprep.subr.msk.bf16.mxu0 %vm1178_vm1, %v3839_v38 }
0x12e1   : > { %7257 = vmatpush3.bf16.xpose.msra.mxu0 %v3859_v52 }
0x12e2   : > { %7292 = vmatprep.subr.bf16.mxu0 %v7742_v42 }
0x12e8   : > { %7259 = vmatmul.mubr.msk.bf16.vlgmr.msra.gmra.mxu0 %vm1178_vm1, %v3833_v12 }
0x12e9   : > { %7262 = vmatprep.mubr.msk.bf16.mxu0 %vm1178_vm1, %v3835_v31  ;;  %7293 = vmatpush3.bf16.msra.mxu0 %v7742_v42 }
0x12f0   : > { %7263 = vmatmul.mubr.msk.bf16.gmra.mxu0 %vm1178_vm1, %v3837_v15 }
0x1388   : > { %v7244_v40 = vpop.f32.mrf.mxu0 }
0x138a   : > { %v3789_v56 = vpop.f32.mrf.mxu0 }
0x138c   : > { %v7245_v22 = vpop.f32.mrf.mxu0 }
0x138d   : > { %v3820_v59 = vpack.c.bf16 %v7245_v22, %v7244_v40 }
0x138e   : > { %v3792_v5 = vpop.f32.mrf.mxu0 }
0x138f   : > { %v3819_v32 = vpack.c.bf16 %v3792_v5, %v3789_v56 }
0x1390   : > { %v7248_v2 = vpop.f32.mrf.mxu0 }
0x1391   : > { %7294 = vmatprep.mubr.msk.bf16.mxu0 %vm1178_vm1, %v3819_v32  ;;  %v3822_v11 = vpack.c.bf16 %v7248_v2, %v7248_v2 }
0x1392   : > { %v3805_v41 = vpop.f32.mrf.mxu0  ;;  %7295 = vmatmul.mubr.msk.bf16.vlgmr.msra.gmra.mxu0 %vm1178_vm1, %v3820_v59 }
0x1394   : > { %v7249_v37 = vpop.f32.mrf.mxu0 }
0x1396   : > { %v3808_v45 = vpop.f32.mrf.mxu0 }
0x1397   : > { %v3821_v58 = vpack.c.bf16 %v3808_v45, %v3805_v41 }
0x1399   : > { %7298 = vmatprep.mubr.msk.bf16.mxu0 %vm1178_vm1, %v3821_v58 }
0x139a   : > { %7299 = vmatmul.mubr.msk.bf16.gmra.mxu0 %vm1178_vm1, %v3822_v11 }
0x13a8   : > { %v7260_v61 = vpop.f32.mrf.mxu0 }
0x13a9   : > { %v3913_v20 = vadd.f32 %v9932_v9, %v7260_v61 }
0x13aa   : > { %v3904_v63 = vpop.f32.mrf.mxu0 }
0x13ab   : > { %v3905_v13 = vadd.f32 %v9926_v23, %v3904_v63  ;;  %v3940_v44 = vsel %vm1267_vm3, %v3913_v20, -inf }
0x13ac   : > { %v7261_v29 = vpop.f32.mrf.mxu0 }
0x13ad   : > { %v3934_v28 = vsel %vm1267_vm3, %v3905_v13, -inf  ;;  %v3916_v48 = vadd.f32 %v9945_v34, %v7261_v29 }
0x13ae   : > { %v3907_v39 = vpop.f32.mrf.mxu0  ;;  %3935 = vmax.xlane.f32.xlu0 %v3934_v28 }
0x13af   : > { %v3908_v60 = vadd.f32 %v9939_v49, %v3907_v39  ;;  %v3943_v1 = vsel %vm1267_vm3, %v3916_v48, -inf }
0x13b0   : > { %v7264_v51 = vpop.f32.mrf.mxu0 }
0x13b1   : > { %v3937_v57 = vsel %vm1267_vm3, %v3908_v60, -inf  ;;  %v3929_v55 = vadd.f32 %v9966_v21, %v7264_v51 }
0x13b2   : > { %3938 = vmax.xlane.f32.xlu1 %v3937_v57  ;;  %3941 = vmax.xlane.f32.xlu0 %v3940_v44  ;;  %v3920_v26 = vpop.f32.mrf.mxu0 }
0x13b3   : > { %v3921_v18 = vadd.f32 %v9953_v53, %v3920_v26  ;;  %v3952_v38 = vsel %vm1267_vm3, %v3929_v55, -inf }
0x13b4   : > { %v7265_v3 = vpop.f32.mrf.mxu0 }
0x13b5   : > { %v3946_v12 = vsel %vm1267_vm3, %v3921_v18, -inf }
0x13b6   : > { %3944 = vmax.xlane.f32.xlu0 %v3943_v1  ;;  %v3923_v50 = vpop.f32.mrf.mxu0 }
0x13b7   : > { %v3924_v17 = vadd.f32 %v9960_v43, %v3923_v50 }
0x13b9   : > { %v3949_v52 = vsel %vm1267_vm3, %v3924_v17, -inf }
0x13ba   : > { %3953 = vmax.xlane.f32.xlu0 %v3952_v38  ;;  %3950 = vmax.xlane.f32.xlu1 %v3949_v52 }
0x13be   : > { %3947 = vmax.xlane.f32.xlu0 %v3946_v12 }
0x13cb   : > { %4025 = vrot.lane.b32.xlu1 %v9881_v35, %s8511_s2 }
0x13d4   : > { %4023 = vrot.lane.b32.xlu0 %v9889_v4, %s8511_s2 }
0x1437   : > { %v3936_v31 = vpop.xlane.xlu0 %3935 }
0x1438   : > { %v3955_v15 = vsub.f32 %v3905_v13, %v3936_v31 }
0x143a   : > { %v3962_v32 = vmul.f32 1.442695, %v3955_v15 }
0x143b   : > { %v3939_v42 = vpop.xlane.xlu1 %3938  ;;  %v3942_v40 = vpop.xlane.xlu0 %3941 }
0x143c   : > { %v3957_v56 = vsub.f32 %v3913_v20, %v3942_v40  ;;  %v3956_v22 = vsub.f32 %v3908_v60, %v3939_v42 }
0x143e   : > { %v3966_v5 = vmul.f32 1.442695, %v3957_v56  ;;  %v3964_v41 = vmul.f32 1.442695, %v3956_v22 }
0x143f   : > { %v3945_v59 = vpop.xlane.xlu0 %3944 }
0x1440   : > { %v3958_v2 = vsub.f32 %v3916_v48, %v3945_v59  ;;  %7988 = vpow2.f32 %v3966_v5 }
0x1441   : > { %7990 = vpow2.f32 %v3962_v32 }
0x1442   : > { %v3968_v37 = vmul.f32 1.442695, %v3958_v2 }
0x1443   : > { %v3951_v45 = vpop.xlane.xlu1 %3950  ;;  %v3954_v58 = vpop.xlane.xlu0 %3953 }
0x1444   : > { %7992 = vpow2.f32 %v3968_v37  ;;  %v3961_v11 = vsub.f32 %v3929_v55, %v3954_v58  ;;  %v3960_v61 = vsub.f32 %v3924_v17, %v3951_v45 }
0x1445   : > { %7994 = vpow2.f32 %v3964_v41 }
0x1446   : > { %v3974_v63 = vmul.f32 1.442695, %v3961_v11  ;;  %v3972_v39 = vmul.f32 1.442695, %v3960_v61 }
0x1447   : > { %v4026_v13 = vpop.permute.xlu1 %4025  ;;  %v3948_v29 = vpop.xlane.xlu0 %3947 }
0x1448   : > { %v4043_v20 = vsel %vm1365_vm2, %v4026_v13, 0  ;;  %v3959_v28 = vsub.f32 %v3921_v18, %v3948_v29  ;;  %7535 = vmatprep.subr.msk.bf16.mxu1 %vm1365_vm2, %v4026_v13  ;;  %7996 = vpow2.f32 %v3974_v63 }
0x1449   : > { %7267 = vmatpush3.bf16.msra.mxu1 %v4043_v20 }
0x144a   : > { %v3970_v60 = vmul.f32 1.442695, %v3959_v28 }
0x144b   : > { %v4024_v51 = vpop.permute.xlu0 %4023 }
0x144c   : > { %7998 = vpow2.f32 %v3970_v60  ;;  %7268 = vmatprep.subr.bf16.mxu1 %v4024_v51 }
0x144d   : > { %7269 = vmatpush3.bf16.msra.mxu1 %v4024_v51  ;;  %v10038_v48 = vpop.eup %7988  ;;  %8000 = vpow2.f32 %v3972_v39 }
0x144e   : > { %v3982_v57 = vsel %vm1267_vm3, %v10038_v48, 0.0  ;;  %v10042_v44 = vpop.eup %7990 }
0x144f   : > { %3983 = vadd.xlane.f32.xlu1 %v3982_v57  ;;  %v3976_v50 = vsel %vm1267_vm3, %v10042_v44, 0.0 }
0x1451   : > { %v10044_v26 = vpop.eup %7992 }
0x1452   : > { %v10046_v3 = vpop.f32.mrf.mxu0  ;;  %v3985_v55 = vsel %vm1267_vm3, %v10044_v26, 0.0  ;;  %v10050_v1 = vpop.eup %7994 }
0x1453   : > { %3986 = vadd.xlane.f32.xlu0 %v3985_v55  ;;  %3977 = vadd.xlane.f32.xlu1 %v3976_v50  ;;  %v3979_v38 = vsel %vm1267_vm3, %v10050_v1, 0.0 }
0x1454   : > { %v10054_v17 = vpop.f32.mrf.mxu0 }
0x1455   : > { %v10060_v52 = vpop.eup %7996 }
0x1456   : > { %v10056_v18 = vpop.f32.mrf.mxu0  ;;  %v3994_v42 = vsel %vm1267_vm3, %v10060_v52, 0.0 }
0x1457   : > { %3980 = vadd.xlane.f32.xlu0 %v3979_v38 }
0x1458   : > { %v10062_v12 = vpop.f32.mrf.mxu0 }
0x1459   : > { %v10064_v31 = vpop.eup %7998 }
0x145a   : > { %v10066_v15 = vpop.f32.mrf.mxu0  ;;  %v3988_v40 = vsel %vm1267_vm3, %v10064_v31, 0.0  ;;  %v10072_v56 = vpop.eup %8000 }
0x145b   : > { %3995 = vadd.xlane.f32.xlu0 %v3994_v42  ;;  %3989 = vadd.xlane.f32.xlu1 %v3988_v40  ;;  %v3991_v32 = vsel %vm1267_vm3, %v10072_v56, 0.0 }
0x145c   : > { %v10074_v22 = vpop.f32.mrf.mxu0 }
0x145e   : > { %v7301_v5 = vpop.f32.mrf.mxu0 }
0x145f   : > { %3992 = vadd.xlane.f32.xlu0 %v3991_v32 }
0x146c   : > { %4021 = vrot.lane.b32.xlu1 %v9898_v27, %s8511_s2 }
0x1470   : > { %4294 = vrot.lane.b32.xlu1 %v9879_v30, %s8512_s3 }
0x1474   : > { %4292 = vrot.lane.b32.xlu1 %v9871_v10, %s8512_s3 }
0x1475   : > { %4019 = vrot.lane.b32.xlu0 %v9902_v62, %s8511_s2  ;;  %s10879_s2 = smov 80  }
0x1478   : > { %4290 = vrot.lane.b32.xlu1 %v9877_v19, %s8512_s3 }
0x1479   : > { %4280 = vrot.lane.b32.xlu0 %v9865_v0, %s10877_s25 }
0x147c   : > { %4288 = vrot.lane.b32.xlu1 %v9887_v16, %s8512_s3 }
0x147d   : > { %4284 = vrot.lane.b32.xlu0 %v9873_v14, %s10877_s25 }
0x1480   : > { %4282 = vrot.lane.b32.xlu1 %v9869_v46, %s10877_s25 }
0x1481   : > { %4665 = vrot.lane.b32.xlu0 %v9879_v30, %s10878_s27 }
0x1484   : > { %4286 = vrot.lane.b32.xlu1 %v9919_v47, %s10877_s25 }
0x1485   : > { %4661 = vrot.lane.b32.xlu0 %v9877_v19, %s10878_s27 }
0x1488   : > { %4663 = vrot.lane.b32.xlu1 %v9871_v10, %s10878_s27 }
0x1489   : > { %4651 = vrot.lane.b32.xlu0 %v9865_v0, %s10879_s2 }
0x148c   : > { %4659 = vrot.lane.b32.xlu1 %v9887_v16, %s10878_s27  ;;  %s887_s27 = sand.u32 1, %s8483_s26  }
0x148d   : > { %4655 = vrot.lane.b32.xlu0 %v9873_v14, %s10879_s2  ;;  %s7546_s29 = smul.u32 56, %s887_s27  ;;  %s10744_s6 = scalar_lea.sflag [#allocation4], %s887_s27 }
0x148f   : > { %s10723_s30 = scalar_lea.vmem [#allocation20], %s7546_s29  ;;  %s8517_s29 = smov [#allocation20]  }
0x1490   : > { %4653 = vrot.lane.b32.xlu1 %v9869_v46, %s10879_s2  ;;  %s6304_s1 = sshll.u32 %s10723_s30, 4  ;;  %s8411_s0 = sshll.u32 %s8517_s29, 4  ;;  %s10733_s1 = int_to_ptr.vmem [resolvable:$true] %s6304_s1  ;;  %s8412_s0 = int_to_ptr.vmem [resolvable:$false] %s8411_s0 }
0x1491   : > { %p8414_p2 = scmp.lt.s32.totalorder %s10733_s1, %s8412_s0 }
0x1494   : > { %4657 = vrot.lane.b32.xlu1 %v9919_v47, %s10879_s2  ;;  %v7743_v47 = vld [vmem:[%s10876_s4 + $0x28] sm:$0xff]  }
0x14d8   : > { %v3984_v30 = vpop.xlane.xlu1 %3983 }
0x14dc   : > { %v3987_v19 = vpop.xlane.xlu0 %3986  ;;  %v3978_v59 = vpop.xlane.xlu1 %3977 }
0x14dd   : > { %8002 = vrcp.f32 %v3987_v19 }
0x14de   : > { %8004 = vrcp.f32 %v3978_v59 }
0x14df   : > { %8006 = vrcp.f32 %v3984_v30 }
0x14e0   : > { %v3981_v10 = vpop.xlane.xlu0 %3980 }
0x14e1   : > { %8008 = vrcp.f32 %v3981_v10 }
0x14e4   : > { %v3990_v0 = vpop.xlane.xlu1 %3989  ;;  %v3996_v2 = vpop.xlane.xlu0 %3995 }
0x14e5   : > { %8010 = vrcp.f32 %v3996_v2 }
0x14e6   : > { %8012 = vrcp.f32 %v3990_v0 }
0x14e8   : > { %v4022_v16 = vpop.permute.xlu1 %4021  ;;  %v3993_v14 = vpop.xlane.xlu0 %3992 }
0x14e9   : > { %8014 = vrcp.f32 %v3993_v14  ;;  %7270 = vmatprep.subr.bf16.mxu1 %v4022_v16 }
0x14ea   : > { %7271 = vmatpush3.bf16.msra.mxu1 %v4022_v16  ;;  %v8003_v46 = vpop.eup %8002 }
0x14eb   : > { %v8005_v41 = vpop.eup %8004  ;;  %v4007_v11 = vmul.f32 %v8003_v46, %v10044_v26 }
0x14ec   : > { %v4020_v37 = vpop.permute.xlu0 %4019  ;;  %v8007_v45 = vpop.eup %8006  ;;  %v4004_v61 = vmul.f32 %v8005_v41, %v10042_v44 }
0x14ed   : > { %7272 = vmatprep.subr.bf16.mxu1 %v4020_v37  ;;  %v4006_v13 = vmul.f32 %v8007_v45, %v10038_v48  ;;  %v4295_v60 = vpop.permute.xlu1 %4294 }
0x14ee   : > { %v8009_v58 = vpop.eup %8008  ;;  %7273 = vmatpush3.bf16.msra.mxu1 %v4020_v37 }
0x14ef   : > { %v4005_v63 = vmul.f32 %v8009_v58, %v10050_v1  ;;  %7282 = vmatprep.subr.bf16.mxu1 %v7743_v47  ;;  %v4012_v20 = vpack.c.bf16 %v4007_v11, %v4006_v13 }
0x14f0   : > { %v4281_v2 = vpop.permute.xlu0 %4280 }
0x14f1   : > { %v4011_v29 = vpack.c.bf16 %v4005_v63, %v4004_v61 }
0x14f2   : > { %v8011_v28 = vpop.eup %8010 }
0x14f3   : > { %7274 = vmatprep.mubr.msk.bf16.mxu1 %vm1267_vm3, %v4011_v29  ;;  %v8013_v39 = vpop.eup %8012  ;;  %v4010_v57 = vmul.f32 %v8011_v28, %v10060_v52  ;;  %v4318_v52 = vsel %vm1178_vm1, %v4295_v60, 0 }
0x14f4   : > { %7275 = vmatmul.mubr.msk.bf16.vlgmr.msra.gmra.mxu1 %vm1267_vm3, %v4012_v20  ;;  %v4008_v44 = vmul.f32 %v8013_v39, %v10064_v31 }
0x14f5   : > { %7283 = vmatpush3.bf16.msra.mxu1 %v7743_v47  ;;  %v4014_v55 = vpack.c.bf16 %v4010_v57, %v4010_v57  ;;  %v4285_v47 = vpop.permute.xlu0 %4284 }
0x14f6   : > { %v8015_v51 = vpop.eup %8014  ;;  %7536 = vmatprep.subr.msk.bf16.mxu1 %vm1178_vm1, %v4295_v60 }
0x14f7   : > { %v4009_v26 = vmul.f32 %v8015_v51, %v10072_v56  ;;  %v4293_v56 = vpop.permute.xlu1 %4292 }
0x14f8   : > { %v4315_v0 = vsel %vm1178_vm1, %v4293_v56, 0 }
0x14f9   : > { %v4013_v48 = vpack.c.bf16 %v4009_v26, %v4008_v44  ;;  %v4666_v45 = vpop.permute.xlu0 %4665 }
0x14fa   : > { %v4689_v11 = vsel %vm1178_vm1, %v4666_v45, 0 }
0x14fb   : > { %7278 = vmatprep.mubr.msk.bf16.mxu1 %vm1267_vm3, %v4013_v48  ;;  %v4291_v16 = vpop.permute.xlu1 %4290 }
0x14fc   : > { %7279 = vmatmul.mubr.msk.bf16.gmra.mxu1 %vm1267_vm3, %v4014_v55  ;;  %v4312_v46 = vsel %vm1178_vm1, %v4291_v16, 0 }
0x14fd   : > { %v4662_v63 = vpop.permute.xlu0 %4661 }
0x14fe   : > { %v4683_v20 = vsel %vm1178_vm1, %v4662_v63, 0 }
0x14ff   : > { %v4289_v14 = vpop.permute.xlu1 %4288 }
0x1500   : > { %v4309_v37 = vsel %vm1178_vm1, %v4289_v14, 0 }
0x1501   : > { %v4652_v13 = vpop.permute.xlu0 %4651 }
0x1503   : > { %v4283_v41 = vpop.permute.xlu1 %4282 }
0x1505   : > { %v4656_v51 = vpop.permute.xlu0 %4655 }
0x1507   : > { %v4287_v58 = vpop.permute.xlu1 %4286 }
0x150b   : > { %v4664_v61 = vpop.permute.xlu1 %4663 }
0x150c   : > { %v4686_v29 = vsel %vm1178_vm1, %v4664_v61, 0 }
0x150f   : > { %v4660_v28 = vpop.permute.xlu1 %4659 }
0x1510   : > { %v4680_v39 = vsel %vm1178_vm1, %v4660_v28, 0 }
0x1513   : > { %v4654_v60 = vpop.permute.xlu1 %4653 }
0x1517   : > { %v4658_v57 = vpop.permute.xlu1 %4657 }
0x15b4   : > { %v7276_v1 = vpop.f32.mrf.mxu1 }
0x15b6   : > { %v4079_v50 = vpop.f32.mrf.mxu1 }
0x15b8   : > { %v7277_v38 = vpop.f32.mrf.mxu1 }
0x15b9   : > { %v4110_v5 = vpack.c.bf16 %v7277_v38, %v7276_v1 }
0x15ba   : > { %v4082_v42 = vpop.f32.mrf.mxu1 }
0x15bb   : > { %v4109_v40 = vpack.c.bf16 %v4082_v42, %v4079_v50 }
0x15bc   : > { %v7280_v32 = vpop.f32.mrf.mxu1 }
0x15bd   : > { %7284 = vmatprep.mubr.msk.bf16.mxu1 %vm1178_vm1, %v4109_v40  ;;  %v4112_v10 = vpack.c.bf16 %v7280_v32, %v7280_v32 }
0x15be   : > { %v4095_v31 = vpop.f32.mrf.mxu1  ;;  %7285 = vmatmul.mubr.msk.bf16.vlgmr.msra.gmra.mxu1 %vm1178_vm1, %v4110_v5 }
0x15bf   : > { %7303 = vmatpush3.bf16.xpose.msra.mxu1 %v4318_v52 }
0x15c0   : > { %7537 = vmatprep.subr.msk.bf16.mxu1 %vm1178_vm1, %v4293_v56  ;;  %v7281_v30 = vpop.f32.mrf.mxu1 }
0x15c2   : > { %v4098_v19 = vpop.f32.mrf.mxu1 }
0x15c3   : > { %v4111_v59 = vpack.c.bf16 %v4098_v19, %v4095_v31 }
0x15c5   : > { %7288 = vmatprep.mubr.msk.bf16.mxu1 %vm1178_vm1, %v4111_v59 }
0x15c6   : > { %7289 = vmatmul.mubr.msk.bf16.gmra.mxu1 %vm1178_vm1, %v4112_v10 }
0x15c7   : > { %7305 = vmatpush3.bf16.xpose.msra.mxu1 %v4315_v0  ;;  %7310 = vmatprep.mubr.msk.bf16.mxu1 %vm1178_vm1, %v4281_v2 }
0x15c8   : > { %7538 = vmatprep.subr.msk.bf16.mxu1 %vm1178_vm1, %v4291_v16 }
0x15cf   : > { %7307 = vmatpush3.bf16.xpose.msra.mxu1 %v4312_v46 }
0x15d0   : > { %7539 = vmatprep.subr.msk.bf16.mxu1 %vm1178_vm1, %v4289_v14 }
0x15d7   : > { %7309 = vmatpush3.bf16.xpose.msra.mxu1 %v4309_v37 }
0x15d8   : > { %7541 = vmatprep.subr.msk.bf16.mxu1 %vm1178_vm1, %v4666_v45 }
0x15de   : > { %7311 = vmatmul.mubr.msk.bf16.vlgmr.msra.gmra.mxu1 %vm1178_vm1, %v4283_v41 }
0x15df   : > { %7314 = vmatprep.mubr.msk.bf16.mxu1 %vm1178_vm1, %v4285_v47  ;;  %7345 = vmatpush3.bf16.xpose.msra.mxu1 %v4689_v11 }
0x15e0   : > { %7542 = vmatprep.subr.msk.bf16.mxu1 %vm1178_vm1, %v4664_v61 }
0x15e6   : > { %7315 = vmatmul.mubr.msk.bf16.gmra.mxu1 %vm1178_vm1, %v4287_v58 }
0x15e7   : > { %7347 = vmatpush3.bf16.xpose.msra.mxu1 %v4686_v29  ;;  %7352 = vmatprep.mubr.msk.bf16.mxu1 %vm1178_vm1, %v4652_v13 }
0x15e8   : > { %7543 = vmatprep.subr.msk.bf16.mxu1 %vm1178_vm1, %v4662_v63 }
0x15ef   : > { %7349 = vmatpush3.bf16.xpose.msra.mxu1 %v4683_v20 }
0x15f0   : > { %7544 = vmatprep.subr.msk.bf16.mxu1 %vm1178_vm1, %v4660_v28 }
0x15f7   : > { %7351 = vmatpush3.bf16.xpose.msra.mxu1 %v4680_v39 }
0x15fe   : > { %7353 = vmatmul.mubr.msk.bf16.vlgmr.msra.gmra.mxu1 %vm1178_vm1, %v4654_v60 }
0x15ff   : > { %7356 = vmatprep.mubr.msk.bf16.mxu1 %vm1178_vm1, %v4656_v51 }
0x1606   : > { %7357 = vmatmul.mubr.msk.bf16.gmra.mxu1 %vm1178_vm1, %v4658_v57 }
0x167e   : > { %v10156_v44 = vpop.f32.mrf.mxu1 }
0x1680   : > { %v10158_v26 = vpop.f32.mrf.mxu1 }
0x1682   : > { %v10160_v48 = vpop.f32.mrf.mxu1 }
0x1684   : > { %v10162_v55 = vpop.f32.mrf.mxu1 }
0x1686   : > { %v10164_v1 = vpop.f32.mrf.mxu1 }
0x1688   : > { %v10166_v50 = vpop.f32.mrf.mxu1 }
0x168a   : > { %v7291_v38 = vpop.f32.mrf.mxu1 }
0x168c   : > { %v10168_v42 = vpop.f32.mrf.mxu1 }
0x169e   : > { %v7312_v40 = vpop.f32.mrf.mxu1 }
0x169f   : > { %v4363_v31 = vadd.f32 %v9932_v9, %v7312_v40 }
0x16a0   : > { %v4354_v5 = vpop.f32.mrf.mxu1 }
0x16a1   : > { %v4355_v32 = vadd.f32 %v9926_v23, %v4354_v5  ;;  %v4390_v2 = vsel %vm1267_vm3, %v4363_v31, -inf }
0x16a2   : > { %v7313_v52 = vpop.f32.mrf.mxu1 }
0x16a3   : > { %v4384_v56 = vsel %vm1267_vm3, %v4355_v32, -inf  ;;  %v4366_v10 = vadd.f32 %v9945_v34, %v7313_v52 }
0x16a4   : > { %v4357_v30 = vpop.f32.mrf.mxu1  ;;  %4385 = vmax.xlane.f32.xlu0 %v4384_v56 }
0x16a5   : > { %v4358_v19 = vadd.f32 %v9939_v49, %v4357_v30  ;;  %v4393_v47 = vsel %vm1267_vm3, %v4366_v10, -inf }
0x16a6   : > { %v7316_v59 = vpop.f32.mrf.mxu1 }
0x16a7   : > { %v4387_v0 = vsel %vm1267_vm3, %v4358_v19, -inf  ;;  %v4379_v45 = vadd.f32 %v9966_v21, %v7316_v59 }
0x16a8   : > { %4388 = vmax.xlane.f32.xlu1 %v4387_v0  ;;  %4391 = vmax.xlane.f32.xlu0 %v4390_v2  ;;  %v4370_v16 = vpop.f32.mrf.mxu1 }
0x16a9   : > { %v4371_v46 = vadd.f32 %v9953_v53, %v4370_v16  ;;  %v4402_v61 = vsel %vm1267_vm3, %v4379_v45, -inf }
0x16aa   : > { %v7317_v14 = vpop.f32.mrf.mxu1 }
0x16ab   : > { %v4396_v11 = vsel %vm1267_vm3, %v4371_v46, -inf }
0x16ac   : > { %4394 = vmax.xlane.f32.xlu0 %v4393_v47  ;;  %v4373_v41 = vpop.f32.mrf.mxu1 }
0x16ad   : > { %v4374_v37 = vadd.f32 %v9960_v43, %v4373_v41 }
0x16af   : > { %v4399_v58 = vsel %vm1267_vm3, %v4374_v37, -inf }
0x16b0   : > { %4400 = vmax.xlane.f32.xlu1 %v4399_v58  ;;  %4397 = vmax.xlane.f32.xlu0 %v4396_v11 }
0x16b4   : > { %4403 = vmax.xlane.f32.xlu0 %v4402_v61 }
0x16be   : > { %v7354_v63 = vpop.f32.mrf.mxu1 }
0x16c0   : > { %v4725_v13 = vpop.f32.mrf.mxu1 }
0x16c2   : > { %v7355_v29 = vpop.f32.mrf.mxu1 }
0x16c4   : > { %v10184_v20 = vpop.f32.mrf.mxu1 }
0x16c6   : > { %v10186_v28 = vpop.f32.mrf.mxu1 }
0x16c8   : > { %v10188_v39 = vpop.f32.mrf.mxu1 }
0x16ca   : > { %v7359_v60 = vpop.f32.mrf.mxu1 }
0x172d   : > { %v4386_v51 = vpop.xlane.xlu0 %4385 }
0x172e   : > { %v4405_v57 = vsub.f32 %v4355_v32, %v4386_v51 }
0x1730   : > { %v4412_v30 = vmul.f32 1.442695, %v4405_v57 }
0x1731   : > { %v4389_v38 = vpop.xlane.xlu1 %4388  ;;  %v4392_v40 = vpop.xlane.xlu0 %4391 }
0x1732   : > { %v4407_v5 = vsub.f32 %v4363_v31, %v4392_v40  ;;  %v4406_v52 = vsub.f32 %v4358_v19, %v4389_v38 }
0x1734   : > { %v4416_v56 = vmul.f32 1.442695, %v4407_v5  ;;  %v4414_v2 = vmul.f32 1.442695, %v4406_v52 }
0x1735   : > { %v4395_v59 = vpop.xlane.xlu0 %4394 }
0x1736   : > { %v4408_v0 = vsub.f32 %v4366_v10, %v4395_v59  ;;  %8016 = vpow2.f32 %v4416_v56 }
0x1737   : > { %8018 = vpow2.f32 %v4412_v30 }
0x1738   : > { %v4418_v16 = vmul.f32 1.442695, %v4408_v0  ;;  %v10227_v0 = vadd.f32 %v9926_v23, %v4725_v13  ;;  %v10245_v23 = vadd.f32 %v9953_v53, %v10188_v39 }
0x1739   : > { %v4401_v14 = vpop.xlane.xlu1 %4400  ;;  %v4398_v47 = vpop.xlane.xlu0 %4397 }
0x173a   : > { %8020 = vpow2.f32 %v4418_v16  ;;  %v4410_v41 = vsub.f32 %v4374_v37, %v4401_v14  ;;  %v4409_v11 = vsub.f32 %v4371_v46, %v4398_v47  ;;  %v4755_v16 = vsel %vm1267_vm3, %v10227_v0, -inf }
0x173b   : > { %8022 = vpow2.f32 %v4414_v2  ;;  %v10230_v2 = vadd.f32 %v9932_v9, %v7354_v63  ;;  %v10235_v14 = vadd.f32 %v9945_v34, %v7355_v29  ;;  %v4744_v63 = vpop.f32.mrf.mxu1  ;;  %v10251_v34 = vadd.f32 %v9966_v21, %v10186_v28 }
0x173c   : > { %v4422_v58 = vmul.f32 1.442695, %v4410_v41  ;;  %v4420_v31 = vmul.f32 1.442695, %v4409_v11  ;;  %v10241_v41 = vadd.f32 %v9939_v49, %v10184_v20  ;;  %v10254_v13 = vadd.f32 %v9960_v43, %v4744_v63 }
0x173d   : > { %v4404_v32 = vpop.xlane.xlu0 %4403  ;;  %v4761_v47 = vsel %vm1267_vm3, %v10230_v2, -inf  ;;  %v4764_v9 = vsel %vm1267_vm3, %v10235_v14, -inf  ;;  %v4767_v49 = vsel %vm1267_vm3, %v10245_v23, -inf  ;;  %v4773_v53 = vsel %vm1267_vm3, %v10251_v34, -inf }
0x173e   : > { %v4411_v61 = vsub.f32 %v4379_v45, %v4404_v32  ;;  %8024 = vpow2.f32 %v4422_v58  ;;  %v4758_v29 = vsel %vm1267_vm3, %v10241_v41, -inf  ;;  %v4770_v20 = vsel %vm1267_vm3, %v10254_v13, -inf }
0x1740   : > { %v4424_v19 = vmul.f32 1.442695, %v4411_v61 }
0x1742   : > { %8026 = vpow2.f32 %v4424_v19 }
0x1743   : > { %v10190_v60 = vpop.eup %8016  ;;  %8028 = vpow2.f32 %v4420_v31 }
0x1744   : > { %v4432_v10 = vsel %vm1267_vm3, %v10190_v60, 0.0  ;;  %v10194_v51 = vpop.eup %8018 }
0x1745   : > { %4433 = vadd.xlane.f32.xlu1 %v4432_v10  ;;  %v4426_v45 = vsel %vm1267_vm3, %v10194_v51, 0.0 }
0x1747   : > { %v10196_v57 = vpop.eup %8020 }
0x1748   : > { %v4435_v46 = vsel %vm1267_vm3, %v10196_v57, 0.0  ;;  %v10200_v37 = vpop.eup %8022 }
0x1749   : > { %4436 = vadd.xlane.f32.xlu0 %v4435_v46  ;;  %4427 = vadd.xlane.f32.xlu1 %v4426_v45  ;;  %v4429_v38 = vsel %vm1267_vm3, %v10200_v37, 0.0 }
0x174b   : > { %v10206_v40 = vpop.eup %8024 }
0x174c   : > { %v4441_v52 = vsel %vm1267_vm3, %v10206_v40, 0.0 }
0x174d   : > { %4430 = vadd.xlane.f32.xlu0 %v4429_v38 }
0x174f   : > { %v10208_v5 = vpop.eup %8026 }
0x1750   : > { %v4444_v56 = vsel %vm1267_vm3, %v10208_v5, 0.0  ;;  %v10214_v30 = vpop.eup %8028 }
0x1751   : > { %4442 = vadd.xlane.f32.xlu0 %v4441_v52  ;;  %4445 = vadd.xlane.f32.xlu1 %v4444_v56  ;;  %v4438_v59 = vsel %vm1267_vm3, %v10214_v30, 0.0 }
0x1755   : > { %4439 = vadd.xlane.f32.xlu1 %v4438_v59 }
0x1766   : > { %4469 = vrot.lane.b32.xlu1 %v9889_v4, %s10877_s25 }
0x1767   : > { %4471 = vrot.lane.b32.xlu0 %v9881_v35, %s10877_s25 }
0x176a   : > { %4467 = vrot.lane.b32.xlu1 %v9898_v27, %s10877_s25 }
0x176e   : > { %4465 = vrot.lane.b32.xlu1 %v9902_v62, %s10877_s25 }
0x1786   : > { %4756 = vmax.xlane.f32.xlu0 %v4755_v16 }
0x178a   : > { %4762 = vmax.xlane.f32.xlu0 %v4761_v47 }
0x178e   : > { %4765 = vmax.xlane.f32.xlu0 %v4764_v9 }
0x1792   : > { %4768 = vmax.xlane.f32.xlu0 %v4767_v49  ;;  %4759 = vmax.xlane.f32.xlu1 %v4758_v29 }
0x1796   : > { %4774 = vmax.xlane.f32.xlu0 %v4773_v53  ;;  %4771 = vmax.xlane.f32.xlu1 %v4770_v20 }
0x17ce   : > { %v4434_v21 = vpop.xlane.xlu1 %4433 }
0x17d2   : > { %v4437_v28 = vpop.xlane.xlu0 %4436  ;;  %v4428_v43 = vpop.xlane.xlu1 %4427 }
0x17d3   : > { %8030 = vrcp.f32 %v4428_v43 }
0x17d6   : > { %v4431_v39 = vpop.xlane.xlu0 %4430 }
0x17d7   : > { %8032 = vrcp.f32 %v4431_v39 }
0x17d8   : > { %8034 = vrcp.f32 %v4437_v28 }
0x17d9   : > { %8036 = vrcp.f32 %v4434_v21 }
0x17da   : > { %v4446_v58 = vpop.xlane.xlu1 %4445  ;;  %v4443_v11 = vpop.xlane.xlu0 %4442 }
0x17db   : > { %8038 = vrcp.f32 %v4443_v11 }
0x17de   : > { %v4440_v32 = vpop.xlane.xlu1 %4439  ;;  %v4472_v61 = vpop.permute.xlu0 %4471 }
0x17df   : > { %8040 = vrcp.f32 %v4440_v32  ;;  %v4489_v31 = vsel %vm1365_vm2, %v4472_v61, 0  ;;  %7540 = vmatprep.subr.msk.bf16.mxu0 %vm1365_vm2, %v4472_v61 }
0x17e0   : > { %7319 = vmatpush3.bf16.msra.mxu0 %v4489_v31  ;;  %8042 = vrcp.f32 %v4446_v58  ;;  %v8031_v19 = vpop.eup %8030 }
0x17e1   : > { %v4454_v45 = vmul.f32 %v8031_v19, %v10194_v51 }
0x17e2   : > { %v4470_v10 = vpop.permute.xlu1 %4469 }
0x17e3   : > { %7320 = vmatprep.subr.bf16.mxu0 %v4470_v10 }
0x17e4   : > { %v8033_v46 = vpop.eup %8032  ;;  %7321 = vmatpush3.bf16.msra.mxu0 %v4470_v10 }
0x17e5   : > { %v4455_v38 = vmul.f32 %v8033_v46, %v10200_v37  ;;  %v8035_v52 = vpop.eup %8034 }
0x17e6   : > { %v4468_v56 = vpop.permute.xlu1 %4467  ;;  %v8037_v16 = vpop.eup %8036  ;;  %v4457_v47 = vmul.f32 %v8035_v52, %v10196_v57 }
0x17e7   : > { %7322 = vmatprep.subr.bf16.mxu0 %v4468_v56  ;;  %v4461_v59 = vpack.c.bf16 %v4455_v38, %v4454_v45  ;;  %v4456_v49 = vmul.f32 %v8037_v16, %v10190_v60 }
0x17e8   : > { %7323 = vmatpush3.bf16.msra.mxu0 %v4468_v56  ;;  %v8039_v9 = vpop.eup %8038 }
0x17e9   : > { %7326 = vmatprep.mubr.msk.bf16.mxu0 %vm1267_vm3, %v4461_v59  ;;  %v4462_v51 = vpack.c.bf16 %v4457_v47, %v4456_v49  ;;  %v4459_v53 = vmul.f32 %v8039_v9, %v10206_v40 }
0x17ea   : > { %v4466_v63 = vpop.permute.xlu1 %4465 }
0x17eb   : > { %7324 = vmatprep.subr.bf16.mxu0 %v4466_v63 }
0x17ec   : > { %v8041_v29 = vpop.eup %8040  ;;  %7325 = vmatpush3.bf16.msra.mxu0 %v4466_v63 }
0x17ed   : > { %v4458_v37 = vmul.f32 %v8041_v29, %v10214_v30  ;;  %v8043_v20 = vpop.eup %8042 }
0x17ee   : > { %v4460_v57 = vmul.f32 %v8043_v20, %v10208_v5 }
0x17ef   : > { %7327 = vmatmul.mubr.msk.bf16.vlgmr.msra.gmra.mxu0 %vm1267_vm3, %v4462_v51  ;;  %v4463_v21 = vpack.c.bf16 %v4459_v53, %v4458_v37  ;;  %v7744_v53 = vld [vmem:[%s10876_s4 + $0x30] sm:$0xff]  }
0x17f0   : > { %v4464_v28 = vpack.c.bf16 %v4460_v57, %v4460_v57  ;;  %7334 = vmatprep.subr.bf16.mxu0 %v7744_v53 }
0x17f1   : > { %7330 = vmatprep.mubr.msk.bf16.mxu0 %vm1267_vm3, %v4463_v21  ;;  %7335 = vmatpush3.bf16.msra.mxu0 %v7744_v53  ;;  %v10320_v21 = vpop.f32.mrf.mxu0 }
0x17f7   : > { %7331 = vmatmul.mubr.msk.bf16.gmra.mxu0 %vm1267_vm3, %v4464_v28 }
0x180f   : > { %v4757_v60 = vpop.xlane.xlu0 %4756 }
0x1810   : > { %v4776_v43 = vsub.f32 %v10227_v0, %v4757_v60 }
0x1812   : > { %v4783_v30 = vmul.f32 1.442695, %v4776_v43 }
0x1813   : > { %v4763_v39 = vpop.xlane.xlu0 %4762 }
0x1814   : > { %v4778_v58 = vsub.f32 %v10230_v2, %v4763_v39 }
0x1816   : > { %v4787_v11 = vmul.f32 1.442695, %v4778_v58 }
0x1817   : > { %v4766_v40 = vpop.xlane.xlu0 %4765 }
0x1818   : > { %8044 = vpow2.f32 %v4787_v11  ;;  %v4779_v32 = vsub.f32 %v10235_v14, %v4766_v40 }
0x1819   : > { %8046 = vpow2.f32 %v4783_v30 }
0x181a   : > { %v4789_v61 = vmul.f32 1.442695, %v4779_v32 }
0x181b   : > { %v4760_v31 = vpop.xlane.xlu1 %4759  ;;  %v4769_v19 = vpop.xlane.xlu0 %4768 }
0x181c   : > { %8048 = vpow2.f32 %v4789_v61  ;;  %v4777_v5 = vsub.f32 %v10241_v41, %v4760_v31  ;;  %v4780_v46 = vsub.f32 %v10245_v23, %v4769_v19 }
0x181e   : > { %v4785_v10 = vmul.f32 1.442695, %v4777_v5  ;;  %v4791_v14 = vmul.f32 1.442695, %v4780_v46 }
0x181f   : > { %v4772_v0 = vpop.xlane.xlu1 %4771  ;;  %v4775_v45 = vpop.xlane.xlu0 %4774 }
0x1820   : > { %8050 = vpow2.f32 %v4785_v10  ;;  %v4781_v2 = vsub.f32 %v10254_v13, %v4772_v0  ;;  %v4782_v38 = vsub.f32 %v10251_v34, %v4775_v45 }
0x1822   : > { %v4793_v52 = vmul.f32 1.442695, %v4781_v2  ;;  %v4795_v56 = vmul.f32 1.442695, %v4782_v38 }
0x1824   : > { %8052 = vpow2.f32 %v4793_v52 }
0x1825   : > { %v10284_v59 = vpop.eup %8044  ;;  %8054 = vpow2.f32 %v4795_v56 }
0x1826   : > { %v4803_v41 = vsel %vm1267_vm3, %v10284_v59, 0.0  ;;  %v10288_v16 = vpop.eup %8046  ;;  %8056 = vpow2.f32 %v4791_v14 }
0x1827   : > { %4804 = vadd.xlane.f32.xlu1 %v4803_v41  ;;  %v4797_v13 = vsel %vm1267_vm3, %v10288_v16, 0.0 }
0x1829   : > { %v10290_v23 = vpop.eup %8048 }
0x182a   : > { %v4806_v34 = vsel %vm1267_vm3, %v10290_v23, 0.0 }
0x182b   : > { %4798 = vadd.xlane.f32.xlu1 %v4797_v13  ;;  %4807 = vadd.xlane.f32.xlu0 %v4806_v34 }
0x182d   : > { %v8051_v47 = vpop.eup %8050 }
0x182e   : > { %v4800_v9 = vsel %vm1267_vm3, %v8051_v47, 0.0 }
0x182f   : > { %4801 = vadd.xlane.f32.xlu0 %v4800_v9 }
0x1831   : > { %v10297_v63 = vpop.eup %8052 }
0x1832   : > { %v10299_v49 = vpop.eup %8054  ;;  %v4812_v29 = vsel %vm1267_vm3, %v10297_v63, 0.0 }
0x1833   : > { %4813 = vadd.xlane.f32.xlu0 %v4812_v29  ;;  %v4815_v51 = vsel %vm1267_vm3, %v10299_v49, 0.0  ;;  %v10305_v37 = vpop.eup %8056 }
0x1834   : > { %4816 = vadd.xlane.f32.xlu1 %v4815_v51  ;;  %v4809_v20 = vsel %vm1267_vm3, %v10305_v37, 0.0 }
0x1838   : > { %4810 = vadd.xlane.f32.xlu1 %v4809_v20 }
0x1849   : > { %4840 = vrot.lane.b32.xlu1 %v9889_v4, %s10879_s2  ;;  %4842 = vrot.lane.b32.xlu0 %v9881_v35, %s10879_s2 }
0x184d   : > { %4838 = vrot.lane.b32.xlu1 %v9898_v27, %s10879_s2 }
0x1851   : > { %4836 = vrot.lane.b32.xlu1 %v9902_v62, %s10879_s2  ;;  %s10883_s2 = sld [smem:[#allocation45_spill]] }
0x1857   : > { %s10739_s3 = scalar_lea.hbm %s10883_s2, %s6749_s8 }
0x18af   : > { %v7328_v57 = vpop.f32.mrf.mxu0 }
0x18b0   : > { %v4805_v28 = vpop.xlane.xlu1 %4804 }
0x18b1   : > { %v4525_v60 = vpop.f32.mrf.mxu0 }
0x18b3   : > { %v7329_v43 = vpop.f32.mrf.mxu0 }
0x18b4   : > { %v4799_v39 = vpop.xlane.xlu1 %4798  ;;  %v4808_v58 = vpop.xlane.xlu0 %4807  ;;  %v4556_v4 = vpack.c.bf16 %v7329_v43, %v7328_v57 }
0x18b5   : > { %v4528_v30 = vpop.f32.mrf.mxu0  ;;  %8058 = vrcp.f32 %v4799_v39  ;;  %v4251_v39 = vadd.f32 %v10054_v17, %v10158_v26  ;;  %v4267_v17 = vadd.f32 %v10074_v22, %v10166_v50 }
0x18b6   : > { %v4555_v11 = vpack.c.bf16 %v4528_v30, %v4525_v60 }
0x18b7   : > { %v7332_v40 = vpop.f32.mrf.mxu0 }
0x18b8   : > { %7336 = vmatprep.mubr.msk.bf16.mxu0 %vm1178_vm1, %v4555_v11  ;;  %v4802_v35 = vpop.xlane.xlu0 %4801  ;;  %v4558_v5 = vpack.c.bf16 %v7332_v40, %v7332_v40  ;;  %v4254_v40 = vadd.f32 %v10062_v12, %v10162_v55 }
0x18b9   : > { %8060 = vrcp.f32 %v4802_v35  ;;  %v4541_v27 = vpop.f32.mrf.mxu0  ;;  %7337 = vmatmul.mubr.msk.bf16.vlgmr.msra.gmra.mxu0 %vm1178_vm1, %v4556_v4 }
0x18ba   : > { %8062 = vrcp.f32 %v4808_v58 }
0x18bb   : > { %v7333_v62 = vpop.f32.mrf.mxu0  ;;  %8064 = vrcp.f32 %v4805_v28 }
0x18bc   : > { %v4814_v32 = vpop.xlane.xlu0 %4813  ;;  %v4275_v62 = vadd.f32 %v10066_v15, %v10164_v1 }
0x18bd   : > { %v4817_v61 = vpop.xlane.xlu1 %4816  ;;  %v4544_v31 = vpop.f32.mrf.mxu0  ;;  %8066 = vrcp.f32 %v4814_v32 }
0x18be   : > { %v4557_v19 = vpack.c.bf16 %v4544_v31, %v4541_v27 }
0x18c0   : > { %7340 = vmatprep.mubr.msk.bf16.mxu0 %vm1178_vm1, %v4557_v19  ;;  %v4843_v10 = vpop.permute.xlu0 %4842 }
0x18c1   : > { %v4811_v46 = vpop.xlane.xlu1 %4810  ;;  %v4860_v0 = vsel %vm1365_vm2, %v4843_v10, 0  ;;  %7341 = vmatmul.mubr.msk.bf16.gmra.mxu0 %vm1178_vm1, %v4558_v5  ;;  %7545 = vmatprep.subr.msk.bf16.mxu0 %vm1365_vm2, %v4843_v10 }
0x18c2   : > { %8068 = vrcp.f32 %v4811_v46  ;;  %7361 = vmatpush3.bf16.msra.mxu0 %v4860_v0  ;;  %v8059_v45 = vpop.eup %8058 }
0x18c3   : > { %8070 = vrcp.f32 %v4817_v61  ;;  %v4825_v52 = vmul.f32 %v8059_v45, %v10288_v16 }
0x18c5   : > { %v4841_v2 = vpop.permute.xlu1 %4840 }
0x18c6   : > { %v8061_v38 = vpop.eup %8060  ;;  %7362 = vmatprep.subr.bf16.mxu0 %v4841_v2 }
0x18c7   : > { %7363 = vmatpush3.bf16.msra.mxu0 %v4841_v2  ;;  %v4826_v56 = vmul.f32 %v8061_v38, %v8051_v47  ;;  %v8063_v14 = vpop.eup %8062  ;;  %v6668_v38 = vld [vmem:[#allocation7 + $0x1] ss:$0 sm:$0xff] }
0x18c8   : > { %v8065_v34 = vpop.eup %8064  ;;  %v4828_v9 = vmul.f32 %v8063_v14, %v10290_v23 }
0x18c9   : > { %v4839_v41 = vpop.permute.xlu1 %4838  ;;  %v4832_v13 = vpack.c.bf16 %v4826_v56, %v4825_v52  ;;  %v4827_v53 = vmul.f32 %v8065_v34, %v10284_v59  ;;  %v7745_v59 = vld [vmem:[%s10876_s4 + $0x38] sm:$0xff]   ;;  %s8413_s4 = scalar_lea.vmem %s8412_s0, 1792 }
0x18ca   : > { %7364 = vmatprep.subr.bf16.mxu0 %v4839_v41  ;;  %v8067_v29 = vpop.eup %8066 }
0x18cb   : > { %7365 = vmatpush3.bf16.msra.mxu0 %v4839_v41  ;;  %7368 = vmatprep.mubr.msk.bf16.mxu0 %vm1267_vm3, %v4832_v13  ;;  %v4833_v57 = vpack.c.bf16 %v4828_v9, %v4827_v53  ;;  %v4830_v47 = vmul.f32 %v8067_v29, %v10297_v63  ;;  %v4259_v63 = vadd.f32 %v10046_v3, %v10156_v44 }
0x18cd   : > { %v4837_v51 = vpop.permute.xlu1 %4836 }
0x18ce   : > { %7366 = vmatprep.subr.bf16.mxu0 %v4837_v51 }
0x18cf   : > { %v8069_v20 = vpop.eup %8068  ;;  %7367 = vmatpush3.bf16.msra.mxu0 %v4837_v51 }
0x18d0   : > { %v4829_v16 = vmul.f32 %v8069_v20, %v10305_v37  ;;  %v8071_v28 = vpop.eup %8070  ;;  %7376 = vmatprep.subr.bf16.mxu0 %v7745_v59 }
0x18d1   : > { %v4831_v23 = vmul.f32 %v8071_v28, %v10299_v49  ;;  %v4262_v49 = vadd.f32 %v10056_v18, %v10160_v48  ;;  %v4270_v18 = vadd.f32 %v10320_v21, %v10168_v42 }
0x18d2   : > { %7369 = vmatmul.mubr.msk.bf16.vlgmr.msra.gmra.mxu0 %vm1267_vm3, %v4833_v57  ;;  %v4834_v60 = vpack.c.bf16 %v4830_v47, %v4829_v16 }
0x18d3   : > { %v4835_v43 = vpack.c.bf16 %v4831_v23, %v4831_v23  ;;  %7377 = vmatpush3.bf16.msra.mxu0 %v7745_v59 }
0x18d4   : > { %7372 = vmatprep.mubr.msk.bf16.mxu0 %vm1267_vm3, %v4834_v60 }
0x18da   : > { %7373 = vmatmul.mubr.msk.bf16.gmra.mxu0 %vm1267_vm3, %v4835_v43 }
0x1979   : > { %v7338_v37 = vpop.f32.mrf.mxu0 }
0x197a   : > { %v4646_v58 = vadd.f32 %v7338_v37, %v4259_v63 }
0x197b   : > { %v4614_v30 = vpop.f32.mrf.mxu0 }
0x197c   : > { %v4644_v11 = vadd.f32 %v4614_v30, %v4251_v39 }
0x197d   : > { %v7339_v4 = vpop.f32.mrf.mxu0 }
0x197e   : > { %v4647_v35 = vadd.f32 %v7339_v4, %v4262_v49 }
0x197f   : > { %v4617_v27 = vpop.f32.mrf.mxu0 }
0x1980   : > { %v4645_v3 = vadd.f32 %v4617_v27, %v4254_v40 }
0x1981   : > { %v7342_v44 = vpop.f32.mrf.mxu0 }
0x1982   : > { %v4650_v26 = vadd.f32 %v7342_v44, %v4275_v62 }
0x1983   : > { %v4630_v32 = vpop.f32.mrf.mxu0 }
0x1984   : > { %v4648_v61 = vadd.f32 %v4630_v32, %v4267_v17 }
0x1985   : > { %v7343_v31 = vpop.f32.mrf.mxu0 }
0x1987   : > { %v4633_v48 = vpop.f32.mrf.mxu0 }
0x1988   : > { %v4649_v19 = vadd.f32 %v4633_v48, %v4270_v18 }
0x1992   : > { %v7370_v12 = vpop.f32.mrf.mxu0 }
0x1994   : > { %v4896_v55 = vpop.f32.mrf.mxu0 }
0x1996   : > { %v7371_v5 = vpop.f32.mrf.mxu0 }
0x1997   : > { %v4927_v15 = vpack.c.bf16 %v7371_v5, %v7370_v12 }
0x1998   : > { %v4899_v10 = vpop.f32.mrf.mxu0 }
0x1999   : > { %v4926_v46 = vpack.c.bf16 %v4899_v10, %v4896_v55 }
0x199a   : > { %v7374_v1 = vpop.f32.mrf.mxu0 }
0x199b   : > { %7378 = vmatprep.mubr.msk.bf16.mxu0 %vm1178_vm1, %v4926_v46  ;;  %v4929_v2 = vpack.c.bf16 %v7374_v1, %v7374_v1 }
0x199c   : > { %v4912_v0 = vpop.f32.mrf.mxu0  ;;  %7379 = vmatmul.mubr.msk.bf16.vlgmr.msra.gmra.mxu0 %vm1178_vm1, %v4927_v15 }
0x199e   : > { %v7375_v22 = vpop.f32.mrf.mxu0 }
0x19a0   : > { %v4915_v50 = vpop.f32.mrf.mxu0 }
0x19a1   : > { %v4928_v45 = vpack.c.bf16 %v4915_v50, %v4912_v0 }
0x19a3   : > { %7382 = vmatprep.mubr.msk.bf16.mxu0 %vm1178_vm1, %v4928_v45 }
0x19a4   : > { %7383 = vmatmul.mubr.msk.bf16.gmra.mxu0 %vm1178_vm1, %v4929_v2 }
0x1a5c   : > { %v7380_v42 = vpop.f32.mrf.mxu0 }
0x1a5d   : > { %v5017_v21 = vadd.f32 %v7380_v42, %v4646_v58 }
0x1a5e   : > { %v4985_v52 = vpop.f32.mrf.mxu0 }
0x1a5f   : > { %v5015_v56 = vadd.f32 %v4985_v52, %v4644_v11  ;;  %v5032_v14 = vadd.f32 %v6668_v38, %v5017_v21 }
0x1a60   : > { %v7381_v41 = vpop.f32.mrf.mxu0 }
0x1a61   : > { %v5030_v13 = vadd.f32 %v6668_v38, %v5015_v56  ;;  %v5018_v34 = vadd.f32 %v7381_v41, %v4647_v35  ;;  %v5039_v20 = vadd.f32 %v5032_v14, %v9844_v36 }
0x1a62   : > { %v4988_v9 = vpop.f32.mrf.mxu0 }
0x1a63   : > { %v5016_v29 = vadd.f32 %v4988_v9, %v4645_v3  ;;  %v5037_v51 = vadd.f32 %v5030_v13, %v9831_v33  ;;  %v5033_v57 = vadd.f32 %v6668_v38, %v5018_v34  ;;  %v5054_v59 = vsel %vm921_vm0, %v5039_v20, 0.0  ;;  %v7746_v9 = vld [vmem:[#allocation13 + $0x18] sm:$0xff]  }
0x1a64   : > { %v7384_v53 = vpop.f32.mrf.mxu0  ;;  %7398 = vmatprep.subr.bf16.mxu0 %v7746_v9 }
0x1a65   : > { %v5031_v16 = vadd.f32 %v6668_v38, %v5016_v29  ;;  %v5048_v47 = vsel %vm921_vm0, %v5037_v51, 0.0  ;;  %v5021_v63 = vadd.f32 %v7384_v53, %v4650_v26  ;;  %v5040_v33 = vadd.f32 %v5033_v57, %v9841_v54  ;;  %v7747_v29 = vld [vmem:[%s10794_s10 + $0x18] sm:$0xff]   ;;  %7399 = vmatpush3.bf16.msra.mxu0 %v7746_v9  ;;  %v7749_v53 = vld [vmem:[%s10794_s10 + $0x10] sm:$0xff]  }
0x1a66   : > { %5049 = vadd.xlane.f32.xlu0 %v5048_v47  ;;  %v5001_v28 = vpop.f32.mrf.mxu0  ;;  %7386 = vmatprep.subr.bf16.mxu1 %v7747_v29  ;;  %v7754_v9 = vld [vmem:[%s10798_s14 + $0x58] sm:$0xff]  }
0x1a67   : > { %v5019_v60 = vadd.f32 %v5001_v28, %v4648_v61  ;;  %v5038_v23 = vadd.f32 %v5031_v16, %v9833_v25  ;;  %v5036_v30 = vadd.f32 %v6668_v38, %v5021_v63  ;;  %v5057_v11 = vsel %vm921_vm0, %v5040_v33, 0.0  ;;  %7387 = vmatpush3.bf16.msra.mxu1 %v7747_v29  ;;  %v7755_v29 = vld [vmem:[%s10798_s14 + $0x50] sm:$0xff]  }
0x1a68   : > { %v7385_v43 = vpop.f32.mrf.mxu0  ;;  %7388 = vmatprep.subr.bf16.mxu1 %v7749_v53 }
0x1a69   : > { %v5034_v37 = vadd.f32 %v6668_v38, %v5019_v60  ;;  %v5051_v39 = vsel %vm921_vm0, %v5038_v23, 0.0  ;;  %v5043_v27 = vadd.f32 %v5036_v30, %v9860_v7 }
0x1a6a   : > { %5055 = vadd.xlane.f32.xlu0 %v5054_v59  ;;  %5052 = vadd.xlane.f32.xlu1 %v5051_v39  ;;  %v5004_v36 = vpop.f32.mrf.mxu0 }
0x1a6b   : > { %v5020_v58 = vadd.f32 %v5004_v36, %v4649_v19  ;;  %v5041_v4 = vadd.f32 %v5034_v37, %v9854_v8  ;;  %v5066_v54 = vsel %vm921_vm0, %v5043_v27, 0.0  ;;  %7389 = vmatpush3.bf16.msra.mxu1 %v7749_v53  ;;  %v7757_v53 = vld [vmem:[%s10798_s14 + $0x40] sm:$0xff]  }
0x1a6d   : > { %v5035_v49 = vadd.f32 %v6668_v38, %v5020_v58  ;;  %v5060_v40 = vsel %vm921_vm0, %v5041_v4, 0.0 }
0x1a6e   : > { %5058 = vadd.xlane.f32.xlu0 %v5057_v11 }
0x1a6f   : > { %v5042_v25 = vadd.f32 %v5035_v49, %v9851_v24 }
0x1a71   : > { %v5063_v35 = vsel %vm921_vm0, %v5042_v25, 0.0 }
0x1a72   : > { %5061 = vadd.xlane.f32.xlu0 %v5060_v40  ;;  %5064 = vadd.xlane.f32.xlu1 %v5063_v35 }
0x1a76   : > { %5067 = vadd.xlane.f32.xlu0 %v5066_v54  ;;  %v6669_v54 = vld [vmem:[#allocation8 + $0x1] ss:$0 sm:$0xff] }
0x1aef   : > { %v5050_v62 = vpop.xlane.xlu0 %5049 }
0x1af0   : > { %v5069_v3 = vmul.f32 0.03125, %v5050_v62 }
0x1af2   : > { %v10373_v44 = vsub.f32 %v5037_v51, %v5069_v3  ;;  %v7748_v51 = vld [vmem:[#allocation13 + $0x10] sm:$0xff]  }
0x1af3   : > { %v5056_v17 = vpop.xlane.xlu0 %5055  ;;  %v5053_v8 = vpop.xlane.xlu1 %5052  ;;  %7400 = vmatprep.subr.bf16.mxu0 %v7748_v51 }
0x1af4   : > { %v5071_v26 = vmul.f32 0.03125, %v5056_v17  ;;  %v5070_v32 = vmul.f32 0.03125, %v5053_v8  ;;  %v5083_v24 = vmul.f32 %v10373_v44, %v10373_v44  ;;  %7401 = vmatpush3.bf16.msra.mxu0 %v7748_v51  ;;  %v7756_v51 = vld [vmem:[%s10798_s14 + $0x48] sm:$0xff]  }
0x1af6   : > { %v10377_v61 = vsub.f32 %v5039_v20, %v5071_v26  ;;  %v10379_v31 = vsub.f32 %v5038_v23, %v5070_v32  ;;  %v5090_v7 = vsel %vm921_vm0, %v5083_v24, 0.0  ;;  %v6670_v26 = vld [vmem:[#allocation10 + $0x1] ss:$0 sm:$0xff] }
0x1af7   : > { %v5059_v18 = vpop.xlane.xlu0 %5058  ;;  %5091 = vadd.xlane.f32.xlu1 %v5090_v7 }
0x1af8   : > { %v5072_v48 = vmul.f32 0.03125, %v5059_v18  ;;  %v5084_v19 = vmul.f32 %v10379_v31, %v10379_v31  ;;  %v5085_v12 = vmul.f32 %v10377_v61, %v10377_v61 }
0x1afa   : > { %v10386_v55 = vsub.f32 %v5040_v33, %v5072_v48  ;;  %v5093_v5 = vsel %vm921_vm0, %v5084_v19, 0.0  ;;  %v5096_v10 = vsel %vm921_vm0, %v5085_v12, 0.0 }
0x1afb   : > { %5094 = vadd.xlane.f32.xlu0 %v5093_v5  ;;  %v5062_v46 = vpop.xlane.xlu0 %5061  ;;  %5097 = vadd.xlane.f32.xlu1 %v5096_v10  ;;  %v5065_v15 = vpop.xlane.xlu1 %5064 }
0x1afc   : > { %v5073_v1 = vmul.f32 0.03125, %v5062_v46  ;;  %v5074_v0 = vmul.f32 0.03125, %v5065_v15  ;;  %v5086_v22 = vmul.f32 %v10386_v55, %v10386_v55 }
0x1afe   : > { %v10392_v50 = vsub.f32 %v5041_v4, %v5073_v1  ;;  %v10394_v45 = vsub.f32 %v5042_v25, %v5074_v0  ;;  %v5099_v2 = vsel %vm921_vm0, %v5086_v22, 0.0 }
0x1aff   : > { %5100 = vadd.xlane.f32.xlu0 %v5099_v2  ;;  %v5068_v42 = vpop.xlane.xlu0 %5067 }
0x1b00   : > { %v5075_v21 = vmul.f32 0.03125, %v5068_v42  ;;  %v5087_v38 = vmul.f32 %v10392_v50, %v10392_v50  ;;  %v5088_v52 = vmul.f32 %v10394_v45, %v10394_v45 }
0x1b02   : > { %v10401_v56 = vsub.f32 %v5043_v27, %v5075_v21  ;;  %v5102_v14 = vsel %vm921_vm0, %v5087_v38, 0.0  ;;  %v5105_v41 = vsel %vm921_vm0, %v5088_v52, 0.0 }
0x1b03   : > { %5103 = vadd.xlane.f32.xlu1 %v5102_v14  ;;  %5106 = vadd.xlane.f32.xlu0 %v5105_v41  ;;  %v7750_v14 = vld [vmem:[%s10798_s14 + $0x78] sm:$0xff]   ;;  %v7751_v41 = vld [vmem:[%s10798_s14 + $0x70] sm:$0xff]  }
0x1b04   : > { %v5089_v13 = vmul.f32 %v10401_v56, %v10401_v56  ;;  %7410 = vmatprep.subr.bf16.mxu1 %v7750_v14 }
0x1b06   : > { %v5108_v34 = vsel %vm921_vm0, %v5089_v13, 0.0  ;;  %v7752_v13 = vld [vmem:[%s10798_s14 + $0x68] sm:$0xff]  }
0x1b07   : > { %5109 = vadd.xlane.f32.xlu1 %v5108_v34  ;;  %v7753_v34 = vld [vmem:[%s10798_s14 + $0x60] sm:$0xff]  }
0x1b80   : > { %v5092_v20 = vpop.xlane.xlu1 %5091 }
0x1b81   : > { %v5111_v57 = vmul.f32 0.03125, %v5092_v20  ;;  %v7758_v20 = vld [vmem:[#allocation17 + $0x8] sm:$0xff]  }
0x1b82   : > { %7434 = vmatprep.subr.bf16.mxu0 %v7758_v20 }
0x1b83   : > { %v5118_v16 = vadd.f32 1e-05, %v5111_v57  ;;  %v10478_v57 = vld [vmem:[%s10804_s20 + $0x8] sm:$0xff]  }
0x1b84   : > { %v5095_v47 = vpop.xlane.xlu0 %5094  ;;  %v5098_v28 = vpop.xlane.xlu1 %5097 }
0x1b85   : > { %8072 = vrsqrt.f32 %v5118_v16  ;;  %v5112_v60 = vmul.f32 0.03125, %v5095_v47  ;;  %v5113_v23 = vmul.f32 0.03125, %v5098_v28  ;;  %v6682_v16 = vld [vmem:[#allocation14 + $0x1] ss:$0 sm:$0xff] }
0x1b87   : > { %v5119_v43 = vadd.f32 1e-05, %v5112_v60  ;;  %v5120_v59 = vadd.f32 1e-05, %v5113_v23 }
0x1b88   : > { %v5101_v63 = vpop.xlane.xlu0 %5100 }
0x1b89   : > { %8074 = vrsqrt.f32 %v5119_v43  ;;  %v5114_v37 = vmul.f32 0.03125, %v5101_v63 }
0x1b8a   : > { %8076 = vrsqrt.f32 %v5120_v59 }
0x1b8b   : > { %v5121_v39 = vadd.f32 1e-05, %v5114_v37 }
0x1b8c   : > { %v5107_v33 = vpop.xlane.xlu0 %5106  ;;  %v5104_v36 = vpop.xlane.xlu1 %5103 }
0x1b8d   : > { %8078 = vrsqrt.f32 %v5121_v39  ;;  %v5116_v58 = vmul.f32 0.03125, %v5107_v33  ;;  %v5115_v30 = vmul.f32 0.03125, %v5104_v36 }
0x1b8f   : > { %v5123_v49 = vadd.f32 1e-05, %v5116_v58  ;;  %v5122_v11 = vadd.f32 1e-05, %v5115_v30 }
0x1b90   : > { %v5110_v4 = vpop.xlane.xlu1 %5109 }
0x1b91   : > { %8080 = vrsqrt.f32 %v5123_v49  ;;  %v5117_v25 = vmul.f32 0.03125, %v5110_v4 }
0x1b92   : > { %v8073_v40 = vpop.eup %8072  ;;  %8082 = vrsqrt.f32 %v5122_v11 }
0x1b93   : > { %v5124_v35 = vadd.f32 1e-05, %v5117_v25  ;;  %v5132_v27 = vmul.f32 %v8073_v40, %v10373_v44 }
0x1b95   : > { %8084 = vrsqrt.f32 %v5124_v35  ;;  %v5145_v8 = vmul.f32 %v6669_v54, %v5132_v27 }
0x1b96   : > { %v8075_v62 = vpop.eup %8074 }
0x1b97   : > { %v8077_v3 = vpop.eup %8076  ;;  %v5133_v17 = vmul.f32 %v8075_v62, %v10379_v31  ;;  %v10418_v19 = vadd.f32 %v6670_v26, %v5145_v8 }
0x1b98   : > { %v5134_v32 = vmul.f32 %v8077_v3, %v10377_v61 }
0x1b99   : > { %v5146_v24 = vmul.f32 %v6669_v54, %v5133_v17 }
0x1b9a   : > { %v8079_v7 = vpop.eup %8078  ;;  %v5147_v18 = vmul.f32 %v6669_v54, %v5134_v32 }
0x1b9b   : > { %v5135_v48 = vmul.f32 %v8079_v7, %v10386_v55  ;;  %v10420_v12 = vadd.f32 %v6670_v26, %v5146_v24 }
0x1b9c   : > { %v10424_v31 = vadd.f32 %v6670_v26, %v5147_v18 }
0x1b9d   : > { %v5148_v44 = vmul.f32 %v6669_v54, %v5135_v48  ;;  %v5165_v5 = vpack.c.bf16 %v10420_v12, %v10418_v19 }
0x1b9e   : > { %v8081_v10 = vpop.eup %8080 }
0x1b9f   : > { %v8083_v46 = vpop.eup %8082  ;;  %v10426_v15 = vadd.f32 %v6670_v26, %v5148_v44  ;;  %7390 = vmatprep.mubr.msk.bf16.mxu1 %vm921_vm0, %v5165_v5  ;;  %7402 = vmatprep.mubr.msk.bf16.mxu0 %vm921_vm0, %v5165_v5  ;;  %v5137_v61 = vmul.f32 %v8081_v10, %v10394_v45 }
0x1ba0   : > { %v5136_v55 = vmul.f32 %v8083_v46, %v10392_v50 }
0x1ba1   : > { %v5166_v1 = vpack.c.bf16 %v10426_v15, %v10424_v31  ;;  %v5150_v0 = vmul.f32 %v6669_v54, %v5137_v61 }
0x1ba2   : > { %v8085_v22 = vpop.eup %8084  ;;  %v5149_v2 = vmul.f32 %v6669_v54, %v5136_v55 }
0x1ba3   : > { %v5138_v42 = vmul.f32 %v8085_v22, %v10401_v56  ;;  %7391 = vmatmul.mubr.msk.bf16.vlgmr.msra.gmra.mxu1 %vm921_vm0, %v5166_v1  ;;  %7403 = vmatmul.mubr.msk.bf16.vlgmr.msra.gmra.mxu0 %vm921_vm0, %v5166_v1  ;;  %v10437_v21 = vadd.f32 %v6670_v26, %v5150_v0 }
0x1ba4   : > { %v10439_v38 = vadd.f32 %v6670_v26, %v5149_v2  ;;  %7411 = vmatpush3.bf16.msra.mxu1 %v7750_v14  ;;  %7435 = vmatpush3.bf16.msra.mxu0 %v7758_v20 }
0x1ba5   : > { %v5151_v52 = vmul.f32 %v6669_v54, %v5138_v42  ;;  %7412 = vmatprep.subr.bf16.mxu1 %v7751_v41 }
0x1ba6   : > { %v5167_v50 = vpack.c.bf16 %v10437_v21, %v10439_v38 }
0x1ba7   : > { %v10443_v45 = vadd.f32 %v6670_v26, %v5151_v52 }
0x1ba8   : > { %7394 = vmatprep.mubr.msk.bf16.mxu1 %vm921_vm0, %v5167_v50  ;;  %7406 = vmatprep.mubr.msk.bf16.mxu0 %vm921_vm0, %v5167_v50 }
0x1ba9   : > { %v5168_v56 = vpack.c.bf16 %v10443_v45, %v10443_v45  ;;  %7413 = vmatpush3.bf16.msra.mxu1 %v7751_v41 }
0x1baa   : > { %7414 = vmatprep.subr.bf16.mxu1 %v7752_v13 }
0x1bab   : > { %7395 = vmatmul.mubr.msk.bf16.gmra.mxu1 %vm921_vm0, %v5168_v56  ;;  %7407 = vmatmul.mubr.msk.bf16.gmra.mxu0 %vm921_vm0, %v5168_v56 }
0x1bad   : > { %7415 = vmatpush3.bf16.msra.mxu1 %v7752_v13 }
0x1bae   : > { %7416 = vmatprep.subr.bf16.mxu1 %v7753_v34 }
0x1bb1   : > { %7417 = vmatpush3.bf16.msra.mxu1 %v7753_v34 }
0x1bb2   : > { %7418 = vmatprep.subr.bf16.mxu1 %v7754_v9 }
0x1bb5   : > { %7419 = vmatpush3.bf16.msra.mxu1 %v7754_v9 }
0x1bb6   : > { %7420 = vmatprep.subr.bf16.mxu1 %v7755_v29 }
0x1bb9   : > { %7421 = vmatpush3.bf16.msra.mxu1 %v7755_v29 }
0x1bba   : > { %7422 = vmatprep.subr.bf16.mxu1 %v7756_v51 }
0x1bbd   : > { %7423 = vmatpush3.bf16.msra.mxu1 %v7756_v51 }
0x1bbe   : > { %7424 = vmatprep.subr.bf16.mxu1 %v7757_v53 }
0x1bc1   : > { %7425 = vmatpush3.bf16.msra.mxu1 %v7757_v53 }
0x1bc2   : > { %7470 = vmatprep.subr.bf16.mxu1 %v10478_v57 }
0x1c63   : > { %v10481_v47 = vpop.f32.mrf.mxu1  ;;  %v7404_v28 = vpop.f32.mrf.mxu0 }
0x1c64   : > { %v10483_v60 = vadd.f32 %v7404_v28, %v6682_v16 }
0x1c65   : > { %v10485_v23 = vpop.f32.mrf.mxu1  ;;  %v5329_v43 = vpop.f32.mrf.mxu0 }
0x1c66   : > { %v10488_v59 = vmul.f32 0.70710677, %v10483_v60  ;;  %v10490_v63 = vadd.f32 %v6682_v16, %v5329_v43 }
0x1c67   : > { %v10492_v37 = vpop.f32.mrf.mxu1  ;;  %v7405_v39 = vpop.f32.mrf.mxu0 }
0x1c68   : > { %v5389_v33 = vand.u32 2147483647, %v10488_v59  ;;  %v10496_v36 = vmul.f32 0.70710677, %v10490_v63  ;;  %v10498_v58 = vadd.f32 %v7405_v39, %v6682_v16  ;;  %vm5375_vm11 = vcmp.ge.f32.partialorder %v10488_v59, 0.0 }
0x1c69   : > { %v10500_v30 = vpop.f32.mrf.mxu1  ;;  %v5332_v49 = vpop.f32.mrf.mxu0 }
0x1c6a   : > { %v5396_v11 = vmul.f32 0.3275911, %v5389_v33  ;;  %v5387_v4 = vand.u32 2147483647, %v10496_v36  ;;  %v10504_v25 = vmul.f32 0.70710677, %v10498_v58  ;;  %v10509_v3 = vadd.f32 %v6682_v16, %v5332_v49 }
0x1c6b   : > { %v10506_v40 = vpop.f32.mrf.mxu1  ;;  %v7408_v35 = vpop.f32.mrf.mxu0  ;;  %v5487_v5 = vsub.f32 0.0, %v5389_v33  ;;  %vm5373_vm12 = vcmp.ge.f32.partialorder %v10496_v36, 0.0 }
0x1c6c   : > { %v5403_v27 = vadd.f32 1.0, %v5396_v11  ;;  %v5394_v54 = vmul.f32 0.3275911, %v5387_v4  ;;  %v5390_v62 = vand.u32 2147483647, %v10504_v25  ;;  %v10516_v48 = vadd.f32 %v7408_v35, %v6682_v16 }
0x1c6d   : > { %v10511_v17 = vpop.f32.mrf.mxu1  ;;  %v5345_v8 = vpop.f32.mrf.mxu0  ;;  %v10514_v18 = vmul.f32 0.70710677, %v10509_v3  ;;  %v5494_v2 = vmul.f32 %v5487_v5, %v5389_v33  ;;  %v5485_v52 = vsub.f32 0.0, %v5387_v4  ;;  %vm5376_vm13 = vcmp.ge.f32.partialorder %v10504_v25, 0.0 }
0x1c6e   : > { %8086 = vrcp.f32 %v5403_v27  ;;  %v5401_v26 = vadd.f32 1.0, %v5394_v54  ;;  %v5397_v32 = vmul.f32 0.3275911, %v5390_v62  ;;  %v10520_v61 = vmul.f32 0.70710677, %v10516_v48 }
0x1c6f   : > { %v7397_v24 = vpop.f32.mrf.mxu1  ;;  %v7409_v7 = vpop.f32.mrf.mxu0  ;;  %v5388_v10 = vand.u32 2147483647, %v10514_v18  ;;  %v10522_v1 = vadd.f32 %v6682_v16, %v5345_v8  ;;  %v5488_v41 = vsub.f32 0.0, %v5390_v62  ;;  %v5503_v9 = vmul.f32 1.442695, %v5494_v2 }
0x1c70   : > { %8088 = vrcp.f32 %v5401_v26  ;;  %v5404_v44 = vadd.f32 1.0, %v5397_v32  ;;  %v5393_v0 = vand.u32 2147483647, %v10520_v61  ;;  %v5492_v53 = vmul.f32 %v5485_v52, %v5387_v4 }
0x1c71   : > { %v5348_v46 = vpop.f32.mrf.mxu0  ;;  %v5395_v55 = vmul.f32 0.3275911, %v5388_v10  ;;  %v10528_v56 = vmul.f32 0.70710677, %v10522_v1  ;;  %v5495_v43 = vmul.f32 %v5488_v41, %v5390_v62  ;;  %v5486_v39 = vsub.f32 0.0, %v5388_v10 }
0x1c72   : > { %8090 = vrcp.f32 %v5404_v44  ;;  %v10525_v22 = vadd.f32 %v6682_v16, %v5348_v46  ;;  %v5400_v50 = vmul.f32 0.3275911, %v5393_v0  ;;  %v5499_v54 = vmul.f32 1.442695, %v5492_v53 }
0x1c73   : > { %v5402_v42 = vadd.f32 1.0, %v5395_v55  ;;  %v5391_v34 = vand.u32 2147483647, %v10528_v56  ;;  %v5491_v4 = vsub.f32 0.0, %v5393_v0  ;;  %v5505_v62 = vmul.f32 1.442695, %v5495_v43 }
0x1c74   : > { %v10531_v14 = vmul.f32 0.70710677, %v10525_v22  ;;  %v5407_v13 = vadd.f32 1.0, %v5400_v50  ;;  %v5493_v7 = vmul.f32 %v5486_v39, %v5388_v10  ;;  %vm5374_vm14 = vcmp.ge.f32.partialorder %v10514_v18, 0.0 }
0x1c75   : > { %8092 = vrcp.f32 %v5402_v42  ;;  %v5398_v20 = vmul.f32 0.3275911, %v5391_v34  ;;  %v5498_v2 = vmul.f32 %v5491_v4, %v5393_v0  ;;  %v5489_v42 = vsub.f32 0.0, %v5391_v34 }
0x1c76   : > { %v5392_v29 = vand.u32 2147483647, %v10531_v14  ;;  %8094 = vrcp.f32 %v5407_v13  ;;  %v5501_v13 = vmul.f32 1.442695, %v5493_v7  ;;  %vm5379_vm15 = vcmp.ge.f32.partialorder %v10520_v61, 0.0 }
0x1c77   : > { %v5405_v33 = vadd.f32 1.0, %v5398_v20  ;;  %8096 = vpow2.f32 %v5503_v9  ;;  %v5511_v0 = vmul.f32 1.442695, %v5498_v2  ;;  %v5360_v18 = vmul.f32 0.5, %v10509_v3 }
0x1c78   : > { %v5399_v28 = vmul.f32 0.3275911, %v5392_v29  ;;  %v5490_v20 = vsub.f32 0.0, %v5392_v29  ;;  %v5386_v61 = vsel %vm5379_vm15, 1.0, %v8516_v6  ;;  %vm5377_vm1 = vcmp.ge.f32.partialorder %v10528_v56, 0.0 }
0x1c79   : > { %8098 = vrcp.f32 %v5405_v33  ;;  %v5496_v33 = vmul.f32 %v5489_v42, %v5391_v34  ;;  %vm5378_vm2 = vcmp.ge.f32.partialorder %v10531_v14, 0.0 }
0x1c7a   : > { %v5406_v35 = vadd.f32 1.0, %v5399_v28  ;;  %v5497_v4 = vmul.f32 %v5490_v20, %v5392_v29 }
0x1c7b   : > { %v8087_v51 = vpop.eup %8086 }
0x1c7c   : > { %v5424_v16 = vmul.f32 1.0614054, %v8087_v51  ;;  %8100 = vrcp.f32 %v5406_v35 }
0x1c7d   : > { %v10535_v49 = vpop.eup %8088  ;;  %8102 = vpow2.f32 %v5499_v54 }
0x1c7e   : > { %v5431_v11 = vadd.f32 -1.4531521, %v5424_v16  ;;  %v5422_v27 = vmul.f32 1.0614054, %v10535_v49  ;;  %8104 = vpow2.f32 %v5505_v62 }
0x1c7f   : > { %v10538_v8 = vpop.eup %8090  ;;  %8106 = vpow2.f32 %v5501_v13 }
0x1c80   : > { %v5438_v26 = vmul.f32 %v8087_v51, %v5431_v11  ;;  %v5429_v32 = vadd.f32 -1.4531521, %v5422_v27  ;;  %v5425_v24 = vmul.f32 1.0614054, %v10538_v8  ;;  %8108 = vpow2.f32 %v5511_v0 }
0x1c82   : > { %v5445_v44 = vadd.f32 1.4214138, %v5438_v26  ;;  %v5436_v5 = vmul.f32 %v10535_v49, %v5429_v32  ;;  %v5432_v46 = vadd.f32 -1.4531521, %v5425_v24  ;;  %v10542_v52 = vpop.eup %8092 }
0x1c83   : > { %v5423_v53 = vmul.f32 1.0614054, %v10542_v52  ;;  %v10547_v28 = vpop.eup %8094 }
0x1c84   : > { %v5452_v55 = vmul.f32 %v8087_v51, %v5445_v44  ;;  %v5443_v50 = vadd.f32 1.4214138, %v5436_v5  ;;  %v5439_v41 = vmul.f32 %v10538_v8, %v5432_v46  ;;  %v5428_v27 = vmul.f32 1.0614054, %v10547_v28  ;;  %v8097_v32 = vpop.eup %8096 }
0x1c85   : > { %v5430_v39 = vadd.f32 -1.4531521, %v5423_v53  ;;  %v5507_v46 = vmul.f32 1.442695, %v5496_v33  ;;  %v5509_v53 = vmul.f32 1.442695, %v5497_v4 }
0x1c86   : > { %v5459_v9 = vadd.f32 -0.28449672, %v5452_v55  ;;  %v5450_v10 = vmul.f32 %v10535_v49, %v5443_v50  ;;  %v5446_v16 = vadd.f32 1.4214138, %v5439_v41  ;;  %v5435_v7 = vadd.f32 -1.4531521, %v5428_v27  ;;  %v10555_v34 = vpop.eup %8098 }
0x1c87   : > { %v5437_v26 = vmul.f32 %v10542_v52, %v5430_v39  ;;  %v5426_v50 = vmul.f32 1.0614054, %v10555_v34  ;;  %8110 = vpow2.f32 %v5507_v46 }
0x1c88   : > { %v5466_v43 = vmul.f32 %v8087_v51, %v5459_v9  ;;  %v5457_v11 = vadd.f32 -0.28449672, %v5450_v10  ;;  %v5453_v35 = vmul.f32 %v10538_v8, %v5446_v16  ;;  %v5442_v29 = vmul.f32 %v10547_v28, %v5435_v7 }
0x1c89   : > { %v5444_v5 = vadd.f32 1.4214138, %v5437_v26  ;;  %v10557_v55 = vpop.eup %8100  ;;  %v5433_v16 = vadd.f32 -1.4531521, %v5426_v50  ;;  %8112 = vpow2.f32 %v5509_v53 }
0x1c8a   : > { %v5473_v54 = vadd.f32 0.2548296, %v5466_v43  ;;  %v5464_v24 = vmul.f32 %v10535_v49, %v5457_v11  ;;  %v5460_v62 = vadd.f32 -0.28449672, %v5453_v35  ;;  %v5427_v9 = vmul.f32 1.0614054, %v10557_v55  ;;  %v8103_v43 = vpop.eup %8102 }
0x1c8b   : > { %v5451_v13 = vmul.f32 %v10542_v52, %v5444_v5  ;;  %v5449_v10 = vadd.f32 1.4214138, %v5442_v29  ;;  %v5440_v27 = vmul.f32 %v10555_v34, %v5433_v16 }
0x1c8c   : > { %v5480_v44 = vmul.f32 %v8087_v51, %v5473_v54  ;;  %v5471_v2 = vadd.f32 0.2548296, %v5464_v24  ;;  %v5467_v42 = vmul.f32 %v10538_v8, %v5460_v62  ;;  %v5434_v0 = vadd.f32 -1.4531521, %v5427_v9  ;;  %v8105_v54 = vpop.eup %8104  ;;  %v10585_v9 = vld [vmem:[#allocation11 + $0x1] ss:$0 sm:$0xff] }
0x1c8d   : > { %v5458_v39 = vadd.f32 -0.28449672, %v5451_v13  ;;  %v5456_v35 = vmul.f32 %v10547_v28, %v5449_v10  ;;  %v5447_v7 = vadd.f32 1.4214138, %v5440_v27  ;;  %v8107_v36 = vpop.eup %8106  ;;  %v5361_v10 = vmul.f32 0.5, %v10483_v60 }
0x1c8e   : > { %v5515_v41 = vmul.f32 %v8097_v32, %v5480_v44  ;;  %v5478_v51 = vmul.f32 %v10535_v49, %v5471_v2  ;;  %v5474_v20 = vadd.f32 0.2548296, %v5467_v42  ;;  %v5441_v4 = vmul.f32 %v10557_v55, %v5434_v0  ;;  %v8109_v0 = vpop.eup %8108 }
0x1c8f   : > { %v5465_v49 = vmul.f32 %v10542_v52, %v5458_v39  ;;  %v5463_v62 = vadd.f32 -0.28449672, %v5456_v35  ;;  %v5382_v44 = vsel %vm5375_vm11, 1.0, %v8516_v6  ;;  %v5383_v2 = vsel %vm5376_vm13, 1.0, %v8516_v6 }
0x1c90   : > { %v5513_v33 = vmul.f32 %v8103_v43, %v5478_v51  ;;  %v5481_v11 = vmul.f32 %v10538_v8, %v5474_v20  ;;  %v5522_v26 = vsub.f32 1.0, %v5515_v41  ;;  %v5380_v8 = vsel %vm5373_vm12, 1.0, %v8516_v6 }
0x1c91   : > { %v5472_v5 = vadd.f32 0.2548296, %v5465_v49  ;;  %v5448_v46 = vadd.f32 1.4214138, %v5441_v4  ;;  %v5470_v29 = vmul.f32 %v10547_v28, %v5463_v62  ;;  %v5454_v50 = vmul.f32 %v10555_v34, %v5447_v7 }
0x1c92   : > { %v5520_v32 = vsub.f32 1.0, %v5513_v33  ;;  %v5516_v24 = vmul.f32 %v8105_v54, %v5481_v11  ;;  %v5529_v53 = vmul.f32 %v5522_v26, %v5382_v44  ;;  %v5241_v16 = vadd.f32 %v10585_v9, %v10485_v23 }
0x1c93   : > { %v5479_v59 = vmul.f32 %v10542_v52, %v5472_v5  ;;  %v5455_v13 = vmul.f32 %v10557_v55, %v5448_v46  ;;  %v5477_v20 = vadd.f32 0.2548296, %v5470_v29  ;;  %v5461_v25 = vadd.f32 -0.28449672, %v5454_v50 }
0x1c94   : > { %v5523_v42 = vsub.f32 1.0, %v5516_v24  ;;  %v5527_v41 = vmul.f32 %v5520_v32, %v5380_v8  ;;  %v5362_v33 = vmul.f32 0.5, %v10498_v58  ;;  %v5381_v54 = vsel %vm5374_vm14, 1.0, %v8516_v6  ;;  %v8111_v62 = vpop.eup %8110 }
0x1c95   : > { %v5514_v43 = vmul.f32 %v8107_v36, %v5479_v59  ;;  %v5462_v39 = vadd.f32 -0.28449672, %v5455_v13  ;;  %v5484_v11 = vmul.f32 %v10547_v28, %v5477_v20  ;;  %v5468_v35 = vmul.f32 %v10555_v34, %v5461_v25 }
0x1c96   : > { %v5530_v51 = vmul.f32 %v5523_v42, %v5383_v2  ;;  %v5534_v27 = vadd.f32 1.0, %v5527_v41  ;;  %v5536_v49 = vadd.f32 1.0, %v5529_v53  ;;  %v5359_v58 = vmul.f32 0.5, %v10490_v63  ;;  %v8113_v42 = vpop.eup %8112 }
0x1c97   : > { %v5521_v26 = vsub.f32 1.0, %v5514_v43  ;;  %v5469_v60 = vmul.f32 %v10557_v55, %v5462_v39  ;;  %v5519_v23 = vmul.f32 %v8109_v0, %v5484_v11  ;;  %v5475_v4 = vadd.f32 0.2548296, %v5468_v35 }
0x1c98   : > { %v5537_v52 = vadd.f32 1.0, %v5530_v51  ;;  %v5252_v28 = vadd.f32 %v10492_v37, %v10585_v9  ;;  %v5541_v5 = vmul.f32 %v5534_v27, %v5359_v58  ;;  %v5543_v63 = vmul.f32 %v5536_v49, %v5361_v10  ;;  %v6705_v58 = vld [vmem:[#allocation16 + $0x1] ss:$0 sm:$0xff] }
0x1c99   : > { %v5528_v32 = vmul.f32 %v5521_v26, %v5381_v54  ;;  %v5476_v24 = vadd.f32 0.2548296, %v5469_v60  ;;  %v5526_v44 = vsub.f32 1.0, %v5519_v23  ;;  %v5482_v8 = vmul.f32 %v10555_v34, %v5475_v4  ;;  %v7760_v23 = vld [vmem:[#allocation17] sm:$0xff]  }
0x1c9a   : > { %v5544_v7 = vmul.f32 %v5537_v52, %v5362_v33  ;;  %v5244_v50 = vadd.f32 %v10585_v9, %v10500_v30  ;;  %v5249_v34 = vadd.f32 %v10481_v47, %v10585_v9  ;;  %v5548_v51 = vmul.f32 %v5541_v5, %v5241_v16  ;;  %v5259_v52 = vpop.f32.mrf.mxu1  ;;  %7436 = vmatprep.subr.bf16.mxu0 %v7760_v23 }
0x1c9b   : > { %v5535_v46 = vadd.f32 1.0, %v5528_v32  ;;  %v5483_v2 = vmul.f32 %v10557_v55, %v5476_v24  ;;  %v5533_v29 = vmul.f32 %v5526_v44, %v5386_v61  ;;  %v5517_v37 = vmul.f32 %v8111_v62, %v5482_v8  ;;  %7437 = vmatpush3.bf16.msra.mxu0 %v7760_v23  ;;  %v6730_v23 = vld [vmem:[%s10805_s21] ss:$0 sm:$0xff] }
0x1c9c   : > { %v5551_v59 = vmul.f32 %v5544_v7, %v5252_v28  ;;  %v5384_v55 = vsel %vm5377_vm1, 1.0, %v8516_v6  ;;  %v5550_v56 = vmul.f32 %v5543_v63, %v5249_v34  ;;  %v5365_v25 = vmul.f32 0.5, %v10516_v48  ;;  %v7767_v34 = vld [vmem:[%s10806_s22 + $0x28] sm:$0xff]  }
0x1c9d   : > { %v5542_v41 = vmul.f32 %v5535_v46, %v5360_v18  ;;  %v5518_v3 = vmul.f32 %v8113_v42, %v5483_v2  ;;  %v5540_v13 = vadd.f32 1.0, %v5533_v29  ;;  %v5524_v36 = vsub.f32 1.0, %v5517_v37 }
0x1c9e   : > { %v5385_v30 = vsel %vm5378_vm2, 1.0, %v8516_v6  ;;  %v5556_v39 = vpack.c.bf16 %v5551_v59, %v5550_v56  ;;  %v5363_v47 = vmul.f32 0.5, %v10522_v1  ;;  %v5364_v11 = vmul.f32 0.5, %v10525_v22  ;;  %v7774_v56 = vld [vmem:[%s10802_s18 + $0x8] sm:$0xff]  }
0x1c9f   : > { %v5525_v53 = vsub.f32 1.0, %v5518_v3  ;;  %v5549_v20 = vmul.f32 %v5542_v41, %v5244_v50  ;;  %v5531_v10 = vmul.f32 %v5524_v36, %v5384_v55  ;;  %v5547_v0 = vmul.f32 %v5540_v13, %v5365_v25  ;;  %v7764_v50 = vld [vmem:[%s10802_s18 + $0x30] sm:$0xff]   ;;  %v7766_v3 = vld [vmem:[%s10802_s18 + $0x28] sm:$0xff]  }
0x1ca0   : > { %v5265_v16 = vadd.f32 %v10506_v40, %v10585_v9  ;;  %v5257_v6 = vadd.f32 %v10585_v9, %v10511_v17  ;;  %v5260_v48 = vadd.f32 %v10585_v9, %v5259_v52  ;;  %v7761_v40 = vld [vmem:[%s10804_s20] sm:$0xff]   ;;  %v7763_v17 = vld [vmem:[%s10806_s22 + $0x38] sm:$0xff]   ;;  %v7775_v25 = vld [vmem:[%s10806_s22 + $0x8] sm:$0xff]  }
0x1ca1   : > { %v5532_v43 = vmul.f32 %v5525_v53, %v5385_v30  ;;  %v5555_v14 = vpack.c.bf16 %v5549_v20, %v5548_v51  ;;  %v5538_v33 = vadd.f32 1.0, %v5531_v10  ;;  %v7769_v53 = vld [vmem:[%s10806_s22 + $0x20] sm:$0xff]   ;;  %v7772_v51 = vld [vmem:[%s10802_s18 + $0x10] sm:$0xff]  }
0x1ca2   : > { %v5554_v1 = vmul.f32 %v5547_v0, %v5265_v16  ;;  %v7773_v20 = vld [vmem:[%s10806_s22 + $0x10] sm:$0xff]   ;;  %v7776_v10 = vld [vmem:[%s10802_s18] sm:$0xff]   ;;  %v917_v16 = vld [vmem:[%s10880_s7 + $0x28] sm:$0xff] }
0x1ca3   : > { %v5539_v35 = vadd.f32 1.0, %v5532_v43  ;;  %7426 = vmatprep.mubr.bf16.mxu1 %v5555_v14  ;;  %v5545_v27 = vmul.f32 %v5538_v33, %v5363_v47  ;;  %v7777_v30 = vld [vmem:[%s10806_s22] sm:$0xff]   ;;  %v913_v43 = vld [vmem:[%s10880_s7 + $0x8] sm:$0xff]  ;;  %v914_v14 = vld [vmem:[%s10880_s7 + $0x10] sm:$0xff] }
0x1ca4   : > { %7427 = vmatmul.mubr.bf16.vlgmr.msra.gmra.mxu1 %v5556_v39  ;;  %v5558_v22 = vpack.c.bf16 %v5554_v1, %v5554_v1  ;;  %6192 = vperm.xlu1 %7713, %v913_v43   ;;  %v912_v39 = vld [vmem:[%s10880_s7] sm:$0xff]  ;;  %v6229_v0 = vsub.f32 1.0, %v914_v14  ;;  %v915_v47 = vld [vmem:[%s10880_s7 + $0x18] sm:$0xff] }
0x1ca5   : > { %v5546_v54 = vmul.f32 %v5539_v35, %v5364_v11  ;;  %7471 = vmatpush3.bf16.msra.mxu1 %v10478_v57  ;;  %v5552_v26 = vmul.f32 %v5545_v27, %v5257_v6  ;;  %v7762_v57 = vld [vmem:[%s10802_s18 + $0x38] sm:$0xff]   ;;  %6187 = vperm.xlu0 %7712, %v912_v39   ;;  %v916_v33 = vld [vmem:[%s10880_s7 + $0x20] sm:$0xff]  ;;  %v918_v11 = vld [vmem:[%s10880_s7 + $0x30] sm:$0xff]  ;;  %v6227_v27 = vsub.f32 1.0, %v912_v39  ;;  %v6228_v6 = vsub.f32 1.0, %v913_v43 }
0x1ca6   : > { %7472 = vmatprep.subr.bf16.mxu1 %v7761_v40  ;;  %7446 = vmatprep.subr.bf16.mxu0 %v7762_v57  ;;  %v6231_v52 = vsub.f32 1.0, %v916_v33  ;;  %v6233_v35 = vsub.f32 1.0, %v918_v11 }
0x1ca7   : > { %v5553_v60 = vmul.f32 %v5546_v54, %v5260_v48  ;;  %v6230_v48 = vsub.f32 1.0, %v915_v47  ;;  %v6232_v54 = vsub.f32 1.0, %v917_v16 }
0x1ca8   : > { %6197 = vperm.xlu1 %7713, %v914_v14  }
0x1ca9   : > { %v5557_v49 = vpack.c.bf16 %v5553_v60, %v5552_v26  ;;  %7473 = vmatpush3.bf16.msra.mxu1 %v7761_v40  ;;  %6246 = vperm.xlu0 %7712, %v6229_v0  }
0x1caa   : > { %7482 = vmatprep.subr.bf16.mxu1 %v7763_v17 }
0x1cab   : > { %7430 = vmatprep.mubr.bf16.mxu1 %v5557_v49 }
0x1cac   : > { %7431 = vmatmul.mubr.bf16.gmra.mxu1 %v5558_v22  ;;  %6202 = vperm.xlu1 %7713, %v915_v47   ;;  %v6714_v22 = vld [vmem:[%s10801_s17] ss:$0 sm:$0xff] }
0x1cad   : > { %6256 = vperm.xlu0 %7712, %v6231_v52  }
0x1cb0   : > { %6207 = vperm.xlu1 %7713, %v916_v33  }
0x1cb1   : > { %6266 = vperm.xlu0 %7712, %v6233_v35  }
0x1cb4   : > { %6212 = vperm.xlu1 %7713, %v917_v16  }
0x1cb8   : > { %6217 = vperm.xlu1 %7713, %v918_v11  }
0x1cbc   : > { %6236 = vperm.xlu1 %7713, %v6227_v27  }
0x1cc0   : > { %6241 = vperm.xlu1 %7713, %v6228_v6  }
0x1cc4   : > { %6251 = vperm.xlu1 %7713, %v6230_v48  }
0x1cc8   : > { %6261 = vperm.xlu1 %7713, %v6232_v54   ;;  %v6721_v54 = vld [vmem:[#allocation19] ss:$0 sm:$0xff] }
0x1d1f   : > { %v6193_v47 = vpop.permute.xlu1 %6192 }
0x1d20   : > { %v6188_v27 = vpop.permute.xlu0 %6187 }
0x1d23   : > { %v6198_v33 = vpop.permute.xlu1 %6197 }
0x1d24   : > { %v6247_v48 = vpop.permute.xlu0 %6246 }
0x1d27   : > { %v6203_v52 = vpop.permute.xlu1 %6202 }
0x1d2b   : > { %v6208_v11 = vpop.permute.xlu1 %6207 }
0x1d2f   : > { %v10715_v35 = vpop.permute.xlu1 %6212 }
0x1d33   : > { %v6218_v16 = vpop.permute.xlu1 %6217 }
0x1d37   : > { %v6237_v6 = vpop.permute.xlu1 %6236 }
0x1d64   : > { %v7428_v9 = vpop.f32.mrf.mxu1 }
0x1d65   : > { %v5675_v62 = vadd.f32 %v7428_v9, %v6705_v58 }
0x1d66   : > { %v5666_v4 = vpop.f32.mrf.mxu1 }
0x1d67   : > { %v5667_v32 = vadd.f32 %v6705_v58, %v5666_v4  ;;  %v5698_v61 = vadd.f32 %v5675_v62, %v10424_v31 }
0x1d68   : > { %v7429_v28 = vpop.f32.mrf.mxu1 }
0x1d69   : > { %v5678_v24 = vadd.f32 %v7429_v28, %v6705_v58  ;;  %v5696_v5 = vadd.f32 %v5667_v32, %v10418_v19 }
0x1d6a   : > { %v5669_v7 = vpop.f32.mrf.mxu1 }
0x1d6b   : > { %v5670_v18 = vadd.f32 %v6705_v58, %v5669_v7  ;;  %v5699_v44 = vadd.f32 %v5678_v24, %v10426_v15  ;;  %v7765_v15 = vld [vmem:[%s10806_s22 + $0x30] sm:$0xff]  }
0x1d6c   : > { %v7432_v8 = vpop.f32.mrf.mxu1 }
0x1d6d   : > { %v5697_v46 = vadd.f32 %v5670_v18, %v10420_v12  ;;  %v5704_v63 = vpack.c.bf16 %v5699_v44, %v5698_v61  ;;  %v5691_v29 = vadd.f32 %v7432_v8, %v6705_v58 }
0x1d6e   : > { %v5682_v2 = vpop.f32.mrf.mxu1 }
0x1d6f   : > { %v5703_v42 = vpack.c.bf16 %v5697_v46, %v5696_v5  ;;  %v5683_v41 = vadd.f32 %v6705_v58, %v5682_v2  ;;  %v5702_v31 = vadd.f32 %v5691_v29, %v10443_v45  ;;  %v7768_v45 = vld [vmem:[%s10802_s18 + $0x20] sm:$0xff]  }
0x1d70   : > { %v7433_v37 = vpop.f32.mrf.mxu1 }
0x1d71   : > { %7438 = vmatprep.mubr.msk.bf16.mxu0 %vm921_vm0, %v5703_v42  ;;  %7474 = vmatprep.mubr.msk.bf16.mxu1 %vm921_vm0, %v5703_v42  ;;  %v5700_v59 = vadd.f32 %v5683_v41, %v10439_v38  ;;  %v5706_v55 = vpack.c.bf16 %v5702_v31, %v5702_v31  ;;  %v7771_v38 = vld [vmem:[%s10806_s22 + $0x18] sm:$0xff]  }
0x1d72   : > { %v5685_v19 = vpop.f32.mrf.mxu1  ;;  %7439 = vmatmul.mubr.msk.bf16.vlgmr.msra.gmra.mxu0 %vm921_vm0, %v5704_v63  ;;  %7475 = vmatmul.mubr.msk.bf16.vlgmr.msra.gmra.mxu1 %vm921_vm0, %v5704_v63 }
0x1d73   : > { %v5686_v12 = vadd.f32 %v6705_v58, %v5685_v19  ;;  %7447 = vmatpush3.bf16.msra.mxu0 %v7762_v57  ;;  %7483 = vmatpush3.bf16.msra.mxu1 %v7763_v17 }
0x1d74   : > { %7448 = vmatprep.subr.bf16.mxu0 %v7764_v50  ;;  %7484 = vmatprep.subr.bf16.mxu1 %v7765_v15 }
0x1d75   : > { %v5701_v13 = vadd.f32 %v5686_v12, %v10437_v21  ;;  %v7770_v21 = vld [vmem:[%s10802_s18 + $0x18] sm:$0xff]  }
0x1d77   : > { %v5705_v36 = vpack.c.bf16 %v5701_v13, %v5700_v59  ;;  %7449 = vmatpush3.bf16.msra.mxu0 %v7764_v50  ;;  %7485 = vmatpush3.bf16.msra.mxu1 %v7765_v15 }
0x1d78   : > { %7450 = vmatprep.subr.bf16.mxu0 %v7766_v3  ;;  %7486 = vmatprep.subr.bf16.mxu1 %v7767_v34 }
0x1d79   : > { %7442 = vmatprep.mubr.msk.bf16.mxu0 %vm921_vm0, %v5705_v36  ;;  %7478 = vmatprep.mubr.msk.bf16.mxu1 %vm921_vm0, %v5705_v36 }
0x1d7a   : > { %7443 = vmatmul.mubr.msk.bf16.gmra.mxu0 %vm921_vm0, %v5706_v55  ;;  %7479 = vmatmul.mubr.msk.bf16.gmra.mxu1 %vm921_vm0, %v5706_v55 }
0x1d7b   : > { %7451 = vmatpush3.bf16.msra.mxu0 %v7766_v3  ;;  %7487 = vmatpush3.bf16.msra.mxu1 %v7767_v34 }
0x1d7c   : > { %7452 = vmatprep.subr.bf16.mxu0 %v7768_v45  ;;  %7488 = vmatprep.subr.bf16.mxu1 %v7769_v53 }
0x1d7f   : > { %7453 = vmatpush3.bf16.msra.mxu0 %v7768_v45  ;;  %7489 = vmatpush3.bf16.msra.mxu1 %v7769_v53 }
0x1d80   : > { %7454 = vmatprep.subr.bf16.mxu0 %v7770_v21  ;;  %7490 = vmatprep.subr.bf16.mxu1 %v7771_v38 }
0x1d83   : > { %7455 = vmatpush3.bf16.msra.mxu0 %v7770_v21  ;;  %7491 = vmatpush3.bf16.msra.mxu1 %v7771_v38 }
0x1d84   : > { %7456 = vmatprep.subr.bf16.mxu0 %v7772_v51  ;;  %7492 = vmatprep.subr.bf16.mxu1 %v7773_v20 }
0x1d87   : > { %7457 = vmatpush3.bf16.msra.mxu0 %v7772_v51  ;;  %7493 = vmatpush3.bf16.msra.mxu1 %v7773_v20 }
0x1d88   : > { %7458 = vmatprep.subr.bf16.mxu0 %v7774_v56  ;;  %7494 = vmatprep.subr.bf16.mxu1 %v7775_v25 }
0x1d8b   : > { %7459 = vmatpush3.bf16.msra.mxu0 %v7774_v56  ;;  %7495 = vmatpush3.bf16.msra.mxu1 %v7775_v25 }
0x1d8c   : > { %7460 = vmatprep.subr.bf16.mxu0 %v7776_v10  ;;  %7496 = vmatprep.subr.bf16.mxu1 %v7777_v30 }
0x1d8f   : > { %7461 = vmatpush3.bf16.msra.mxu0 %v7776_v10  ;;  %7497 = vmatpush3.bf16.msra.mxu1 %v7777_v30 }
0x1e32   : > { %v7440_v1 = vpop.f32.mrf.mxu0  ;;  %v7476_v26 = vpop.f32.mrf.mxu1 }
0x1e33   : > { %v5785_v28 = vadd.f32 %v7440_v1, %v6714_v22  ;;  %v6018_v32 = vadd.f32 %v7476_v26, %v6730_v23  ;;  %v6737_v1 = vld [vmem:[%s10881_s5] ss:$0 sm:$0xff]  ;;  %s8407_s5 = scalar_lea.vmem %s10733_s1, 896 }
0x1e34   : > { %v5776_v60 = vpop.f32.mrf.mxu0  ;;  %v6009_v49 = vpop.f32.mrf.mxu1  ;;  %p8408_p1 = scmp.ne.s32.totalorder %s10733_s1, %s8407_s5  ;;  %p8415_p7 = scmp.lt.s32.totalorder %s8413_s4, %s8407_s5 }
0x1e35   : > { %v5777_v17 = vadd.f32 %v6714_v22, %v5776_v60  ;;  %v6010_v9 = vadd.f32 %v6730_v23, %v6009_v49  ;;  %v5808_v29 = vmax.f32 %v5785_v28, 0.0  ;;  %v6041_v37 = vmax.f32 %v6018_v32, 0.0  ;;  %v6242_v49 = vpop.permute.xlu1 %6241 }
0x1e36   : > { %v7441_v40 = vpop.f32.mrf.mxu0  ;;  %v7477_v57 = vpop.f32.mrf.mxu1  ;;  %p8409_p13 = pnand %p8408_p1, %p8683_p5  ;;  %p8416_p12 = por %p8415_p7, %p8414_p2 }
0x1e37   : > { %v5788_v4 = vadd.f32 %v7441_v40, %v6714_v22  ;;  %v6021_v58 = vadd.f32 %v7477_v57, %v6730_v23  ;;  %v5806_v61 = vmax.f32 %v5777_v17, 0.0  ;;  %v6039_v2 = vmax.f32 %v6010_v9, 0.0 }
0x1e38   : > { %v5779_v24 = vpop.f32.mrf.mxu0  ;;  %v6012_v62 = vpop.f32.mrf.mxu1  ;;  %p8410_p4 = pneg %p8409_p13 }
0x1e39   : > { %v5780_v7 = vadd.f32 %v6714_v22, %v5779_v24  ;;  %v6013_v18 = vadd.f32 %v6730_v23, %v6012_v62  ;;  %v5809_v44 = vmax.f32 %v5788_v4, 0.0  ;;  %v6042_v8 = vmax.f32 %v6021_v58, 0.0  ;;  %v6257_v4 = vpop.permute.xlu0 %6256 }
0x1e3a   : > { %v7444_v5 = vpop.f32.mrf.mxu0  ;;  %v7480_v46 = vpop.f32.mrf.mxu1  ;;  %p8417_p10 = pnand %p8416_p12, %p8410_p4 }
0x1e3b   : > { %v5807_v42 = vmax.f32 %v5780_v7, 0.0  ;;  %v6040_v63 = vmax.f32 %v6013_v18, 0.0  ;;  %v5814_v12 = vpack.c.bf16 %v5809_v44, %v5808_v29  ;;  %v6047_v31 = vpack.c.bf16 %v6042_v8, %v6041_v37 }
0x1e3c   : > { %v5792_v50 = vpop.f32.mrf.mxu0  ;;  %v6025_v15 = vpop.f32.mrf.mxu1  ;;  %v5801_v3 = vadd.f32 %v7444_v5, %v6714_v22  ;;  %v6034_v34 = vadd.f32 %v7480_v46, %v6730_v23 }
0x1e3d   : > { %v5813_v41 = vpack.c.bf16 %v5807_v42, %v5806_v61  ;;  %v6046_v19 = vpack.c.bf16 %v6040_v63, %v6039_v2  ;;  %v5793_v36 = vadd.f32 %v6714_v22, %v5792_v50  ;;  %v6026_v55 = vadd.f32 %v6730_v23, %v6025_v15  ;;  %v6252_v61 = vpop.permute.xlu1 %6251 }
0x1e3e   : > { %v7445_v59 = vpop.f32.mrf.mxu0  ;;  %v7481_v13 = vpop.f32.mrf.mxu1  ;;  %v5812_v51 = vmax.f32 %v5801_v3, 0.0  ;;  %v6045_v20 = vmax.f32 %v6034_v34, 0.0 }
0x1e3f   : > { %7462 = vmatprep.mubr.bf16.mxu0 %v5813_v41  ;;  %7498 = vmatprep.mubr.bf16.mxu1 %v6046_v19  ;;  %v5810_v56 = vmax.f32 %v5793_v36, 0.0  ;;  %v6043_v25 = vmax.f32 %v6026_v55, 0.0  ;;  %v6267_v41 = vpop.permute.xlu0 %6266 }
0x1e40   : > { %v5795_v45 = vpop.f32.mrf.mxu0  ;;  %7463 = vmatmul.mubr.bf16.vlgmr.msra.gmra.mxu0 %v5814_v12  ;;  %v6028_v53 = vpop.f32.mrf.mxu1  ;;  %7499 = vmatmul.mubr.bf16.vlgmr.msra.gmra.mxu1 %v6047_v31  ;;  %v5816_v39 = vpack.c.bf16 %v5812_v51, %v5812_v51  ;;  %v6049_v0 = vpack.c.bf16 %v6045_v20, %v6045_v20 }
0x1e41   : > { %v5796_v21 = vadd.f32 %v6714_v22, %v5795_v45  ;;  %v6029_v38 = vadd.f32 %v6730_v23, %v6028_v53 }
0x1e43   : > { %v5811_v10 = vmax.f32 %v5796_v21, 0.0  ;;  %v6044_v30 = vmax.f32 %v6029_v38, 0.0 }
0x1e45   : > { %v5815_v43 = vpack.c.bf16 %v5811_v10, %v5810_v56  ;;  %v6048_v14 = vpack.c.bf16 %v6044_v30, %v6043_v25 }
0x1e47   : > { %7466 = vmatprep.mubr.bf16.mxu0 %v5815_v43  ;;  %7502 = vmatprep.mubr.bf16.mxu1 %v6048_v14 }
0x1e48   : > { %7467 = vmatmul.mubr.bf16.gmra.mxu0 %v5816_v39  ;;  %7503 = vmatmul.mubr.bf16.gmra.mxu1 %v6049_v0  ;;  %v6262_v39 = vpop.permute.xlu1 %6261 }
0x1f00   : > { %v7464_v26 = vpop.f32.mrf.mxu0  ;;  %v7500_v60 = vpop.f32.mrf.mxu1 }
0x1f01   : > { %v5931_v22 = vadd.f32 %v7464_v26, %v6721_v54  ;;  %v6164_v23 = vadd.f32 %v7500_v60, %v6737_v1 }
0x1f02   : > { %v5922_v40 = vpop.f32.mrf.mxu0  ;;  %v6155_v57 = vpop.f32.mrf.mxu1 }
0x1f03   : > { %v6222_v17 = vmul.f32 %v6198_v33, %v5931_v22  ;;  %v6271_v9 = vmul.f32 %v6247_v48, %v6164_v23  ;;  %v5923_v58 = vadd.f32 %v6721_v54, %v5922_v40  ;;  %v6156_v28 = vadd.f32 %v6737_v1, %v6155_v57 }
0x1f04   : > { %v7465_v32 = vpop.f32.mrf.mxu0  ;;  %v7501_v24 = vpop.f32.mrf.mxu1 }
0x1f05   : > { %v6278_v62 = vadd.f32 %v6271_v9, %v6222_v17  ;;  %v6220_v7 = vmul.f32 %v6188_v27, %v5923_v58  ;;  %v6269_v18 = vmul.f32 %v6237_v6, %v6156_v28  ;;  %v5934_v44 = vadd.f32 %v7465_v32, %v6721_v54 }
0x1f06   : > { %v6167_v8 = vadd.f32 %v7501_v24, %v6737_v1  ;;  %v5925_v5 = vpop.f32.mrf.mxu0  ;;  %v6158_v46 = vpop.f32.mrf.mxu1 }
0x1f07   : > { %6285 = vst [vmem:[%s10723_s30 + $0x10] sm:$0xff] %v6278_v62  ;;  %v6276_v2 = vadd.f32 %v6269_v18, %v6220_v7  ;;  %v6223_v42 = vmul.f32 %v6203_v52, %v5934_v44  ;;  %v5926_v63 = vadd.f32 %v6721_v54, %v5925_v5  ;;  %v6159_v29 = vadd.f32 %v6737_v1, %v6158_v46 }
0x1f08   : > { %v6272_v37 = vmul.f32 %v6252_v61, %v6167_v8  ;;  %v7468_v50 = vpop.f32.mrf.mxu0  ;;  %v7504_v15 = vpop.f32.mrf.mxu1 }
0x1f09   : > { %6283 = vst [vmem:[%s10723_s30] sm:$0xff] %v6276_v2  ;;  %v6221_v19 = vmul.f32 %v6193_v47, %v5926_v63  ;;  %v6270_v12 = vmul.f32 %v6242_v49, %v6159_v29  ;;  %v5947_v31 = vadd.f32 %v7468_v50, %v6721_v54  ;;  %v6180_v3 = vadd.f32 %v7504_v15, %v6737_v1 }
0x1f0a   : > { %v6279_v34 = vadd.f32 %v6272_v37, %v6223_v42  ;;  %v5938_v59 = vpop.f32.mrf.mxu0  ;;  %v6171_v13 = vpop.f32.mrf.mxu1 }
0x1f0b   : > { %v6277_v36 = vadd.f32 %v6270_v12, %v6221_v19  ;;  %v6226_v55 = vmul.f32 %v6218_v16, %v5947_v31  ;;  %v6275_v45 = vmul.f32 %v6267_v41, %v6180_v3  ;;  %v5939_v53 = vadd.f32 %v6721_v54, %v5938_v59 }
0x1f0c   : > { %6286 = vst [vmem:[%s10723_s30 + $0x18] sm:$0xff] %v6279_v34  ;;  %v6172_v21 = vadd.f32 %v6737_v1, %v6171_v13  ;;  %v7469_v38 = vpop.f32.mrf.mxu0  ;;  %v7505_v51 = vpop.f32.mrf.mxu1 }
0x1f0d   : > { %6284 = vst [vmem:[%s10723_s30 + $0x8] sm:$0xff] %v6277_v36  ;;  %v6282_v20 = vadd.f32 %v6275_v45, %v6226_v55  ;;  %v6224_v56 = vmul.f32 %v6208_v11, %v5939_v53 }
0x1f0e   : > { %v6273_v25 = vmul.f32 %v6257_v4, %v6172_v21  ;;  %v5941_v10 = vpop.f32.mrf.mxu0  ;;  %v6174_v30 = vpop.f32.mrf.mxu1 }
0x1f0f   : > { %6289 = vst [vmem:[%s10723_s30 + $0x30] sm:$0xff] %v6282_v20  ;;  %v5942_v43 = vadd.f32 %v6721_v54, %v5941_v10  ;;  %v6175_v14 = vadd.f32 %v6737_v1, %v6174_v30 }
0x1f10   : > { %v6280_v0 = vadd.f32 %v6273_v25, %v6224_v56 }
0x1f11   : > { %v6225_v47 = vmul.f32 %v10715_v35, %v5942_v43  ;;  %v6274_v33 = vmul.f32 %v6262_v39, %v6175_v14 }
0x1f12   : > { %6287 = vst [vmem:[%s10723_s30 + $0x20] sm:$0xff] %v6280_v0 }
0x1f13   : > { %v6281_v52 = vadd.f32 %v6274_v33, %v6225_v47 }
0x1f15   : > { %6288 = vst [vmem:[%s10723_s30 + $0x28] sm:$0xff] %v6281_v52 }
0x1f16   : > { %8420 = shalt.err (!%p8417_p10)
}
0x1f17   : > { %s8421_s27 = scalar_lea.hbm %s10739_s3, 896  ;;  %s8425_s23 = scalar_lea.hbm %s10883_s2, 1792 }
0x1f18   : > { %p8422_p9 = scmp.ne.s32.totalorder %s10739_s3, %s8421_s27  ;;  %p8426_p3 = scmp.lt.s32.totalorder %s10739_s3, %s10883_s2 }
0x1f19   : > { %p8427_p0 = scmp.lt.s32.totalorder %s8425_s23, %s8421_s27 }
0x1f1a   : > { %p8423_p8 = pnand %p8422_p9, %p8683_p5 }
0x1f1b   : > { %p8428_p6 = por %p8427_p0, %p8426_p3 }
0x1f1c   : > { %p8424_p11 = pneg %p8423_p8 }
0x1f1e   : > { %p8429_p1 = pnand %p8428_p6, %p8424_p11 }
0x1f20   : > { %8432 = shalt.err (!%p8429_p1)
}
0x1f21   : > { %s8518_s0 = smov 128   ;;  %s8519_s4 = smov 8  }
0x1f22   : > { %7591 = dma.vmem_to_hbm [thread:$0]  (%p8683_p5), %s10733_s1, 896, %s10739_s3, %s10744_s6, %s8518_s0, %s8518_s0, %s8519_s4  }
0x1f23 PF: > { %s10884_s5 = sld [smem:[#allocation30_spill]] }
0x1f24   : > { %s10885_s30 = sld [smem:[#allocation28_spill]] }
0x1f25   : > { %s10886_s8 = sld [smem:[#allocation34_spill]] }
0x1f29   : > { %p7653_p13 = scmp.ge.s32.totalorder %s10884_s5, 2 }
0x1f2a   : > { %s6319_s7 = sand.u32 1, %s10885_s30  }
0x1f2b   : > { %p10887_p4 = scmp.ne.s32.totalorder %s10886_s8, 0  ;;  %s6320_s27 = scalar_lea.sflag [#allocation4], %s6319_s7 }
0x1f2d   : > { %p7628_p2 = pnand %p7653_p13, %p10887_p4 }
0x1f2f   : > { %p7629_p7 = pneg %p7628_p2 }
0x1f31   : > { %8474 = dma.done.wait (%p7629_p7), %s6320_s27, 896  }
0x1f32   : > { %8476 = vsyncadd (%p7629_p7), %s6320_s27, 4294966400  ;;  %s10888_s28 = sld [smem:[#allocation31_spill]]  ;;  %s10891_s5 = smov %s8483_s26 }
0x1f33   : > { %s10889_s23 = sld [smem:[#allocation29_spill]] }
0x1f34   : > { %s10890_s27 = sld [smem:[#allocation32_spill]] }
0x1f38   : > { %p40_p12 = scmp.ge.s32.totalorder %s10888_s28, 4  }
0x1f39   : > { %s10892_s26 = smov %s10889_s23 }
0x1f3a   :  { %42 = sbr.rel (!%p40_p12) target bundleno = 21 (0x15), region = 215 }
0x1f3f   :  { %6325 = vsyncpa [#allocation3], 1 }
0x1f40   :  { %6327 = vsyncpa [#allocation3 + $0x1], 1 }
0x1f41   :  { %6328 = vsyncpa [#allocation6], 1 }
0x1f42   :  { %6329 = vsyncpa [#allocation9], 1 }
0x1f43   :  { %6330 = vsyncpa [#allocation12], 1 }
0x1f44   :  { %6331 = vsyncpa [#allocation15], 1 }
0x1f45   :  { %6332 = vsyncpa [#allocation18], 1 }
0x1f46   :  { %6333 = vsyncpa [#allocation4], 1 }
0x1f47   :  { %6335 = vsyncpa [#allocation4 + $0x1], 1 }

</bundles_post_ra>
